<compile_context>
chip_gen: v6e
topology: v6e:2x2x1
jax: 0.10.0
libtpu: 0.0.40
codegen_flags: <defaults>
</compile_context>

<pallas_src>
import functools

import numpy as np
import jax
import jax.numpy as jnp
from jax.experimental import pallas as pl
from jax.experimental.pallas import tpu as pltpu

# ---------------- configuration (small shapes consistent with the module) ----------
CUBE = (4, 4, 4)                                    # cube_size
IN_CHAN = 1
FLAT_DIM = CUBE[0] * CUBE[1] * CUBE[2] * IN_CHAN    # cube_flatten_dim = 64
EMBED_DIM = 48                                      # embed_dim % (6 * num_heads) == 0
NUM_HEADS = 2
DEPTH = 2                                           # encoder depth
DEC_DIM = 48                                        # decoder_embed_dim % decoder_num_heads == 0
DEC_HEADS = 2
DEC_DEPTH = 2                                       # decoder_depth
EXTRA_DEC_DEPTH = 1                                 # extra_decoder_depth
MLP_RATIO = 4.0
GIVEN_DIM = 0
LN_EPS = 1e-5

B = 2                                               # batch size
L_INFO = 6                                          # num information cubes
L_QUERY = 4                                         # num query cubes

_BLK_ORDER = ("ln1_g", "ln1_b", "qkv_w", "qkv_b", "proj_w", "proj_b",
              "ln2_g", "ln2_b", "w1x", "w1g", "b1", "w2", "b2")


# =============================== in-kernel math helpers =============================
def _layer_norm(x, g, b):
    mean = jnp.mean(x, axis=-1, keepdims=True)
    d = x - mean
    var = jnp.mean(d * d, axis=-1, keepdims=True)
    return d * jax.lax.rsqrt(var + LN_EPS) * g + b


def _erf(x):
    # Abramowitz & Stegun 7.1.26 (max abs error ~1.5e-7); exp/div only -> safe lowering.
    a1, a2, a3, a4, a5 = 0.254829592, -0.284496736, 1.421413741, -1.453152027, 1.061405429
    p = 0.3275911
    ax = jnp.abs(x)
    t = 1.0 / (1.0 + p * ax)
    poly = ((((a5 * t + a4) * t + a3) * t + a2) * t + a1) * t
    y = 1.0 - poly * jnp.exp(-ax * ax)
    return jnp.where(x >= 0.0, y, -y)


def _gelu(x):
    # exact (erf-based) GELU, matching torch.nn.GELU default
    return 0.5 * x * (1.0 + _erf(x * 0.7071067811865476))


def _guided_block(x, guide, attn_s, l, num_heads,
                  ln1_g, ln1_b, qkv_w, qkv_b, proj_w, proj_b,
                  ln2_g, ln2_b, w1x, w1g, b1, w2, b2):
    """GuidedBlock: x = x + Attn(LN1(x));  x = x + Mlp(cat(LN2(x), guide)).

    Stacked-weight refs are indexed with the static layer index `l`.
    qkv_w[l, {q,k,v}, head] is a (D, Dh) slab -> per-head matmuls, no lane slicing.
    """
    S, D = x.shape
    Dh = D // num_heads
    scale = float(Dh) ** -0.5

    xn = _layer_norm(x, ln1_g[l], ln1_b[l])
    for h in range(num_heads):
        qh = jnp.dot(xn, qkv_w[l, 0, h], preferred_element_type=jnp.float32) + qkv_b[l, 0, h]
        kh = jnp.dot(xn, qkv_w[l, 1, h], preferred_element_type=jnp.float32) + qkv_b[l, 1, h]
        vh = jnp.dot(xn, qkv_w[l, 2, h], preferred_element_type=jnp.float32) + qkv_b[l, 2, h]
        s = jax.lax.dot_general(qh, kh, (((1,), (1,)), ((), ())),
                                preferred_element_type=jnp.float32) * scale       # [S, S]
        m = jnp.max(s, axis=-1, keepdims=True)
        p = jnp.exp(s - m)
        p = p * pl.reciprocal(jnp.sum(p, axis=-1, keepdims=True), approx=True)
        attn_s[:, h * Dh:(h + 1) * Dh] = jnp.dot(p, vh, preferred_element_type=jnp.float32)
    attn = attn_s[...]                                                            # [S, D]
    x = x + jnp.dot(attn, proj_w[l], preferred_element_type=jnp.float32) + proj_b[l]

    xn2 = _layer_norm(x, ln2_g[l], ln2_b[l])
    # Mlp(cat(norm2(x), guide)) as a split matmul
    hh = (jnp.dot(xn2, w1x[l], preferred_element_type=jnp.float32)
          + jnp.dot(guide, w1g[l], preferred_element_type=jnp.float32)
          + b1[l])
    x = x + jnp.dot(_gelu(hh), w2[l], preferred_element_type=jnp.float32) + b2[l]
    return x


# =============================== fused Pallas kernels ===============================
def _encoder_kernel(
    flat_ref, pos_ref,
    pe_w, pe_b, pe_g, pe_bb,
    fe_w1x, fe_w1f, fe_b1, fe_w2, fe_b2,
    me_w1, me_b1, me_w2, me_b2,
    b_ln1_g, b_ln1_b, b_qkv_w, b_qkv_b, b_proj_w, b_proj_b,
    b_ln2_g, b_ln2_b, b_w1x, b_w1g, b_b1, b_w2, b_b2,
    norm_g, norm_b,
    out_ref,
    attn_s,
):
    flat = flat_ref[0]                                   # [L, F]  flattened cubes (one batch elem)
    pos = pos_ref[0]                                     # [L, D]

    # PatchEmbed3D: Conv3d(kernel=stride=cube) == matmul on flattened cubes, + LayerNorm
    patch = jnp.dot(flat, pe_w[...], preferred_element_type=jnp.float32) + pe_b[...]
    patch = _layer_norm(patch, pe_g[...], pe_bb[...])

    # mlp_extract_feature_vector(cat(patch, flatten_info))  (concat == split matmul)
    hh = (jnp.dot(patch, fe_w1x[...], preferred_element_type=jnp.float32)
          + jnp.dot(flat, fe_w1f[...], preferred_element_type=jnp.float32)
          + fe_b1[...])
    feature = jnp.dot(_gelu(hh), fe_w2[...], preferred_element_type=jnp.float32) + fe_b2[...]

    # mlp_embed (given_vector is None in this configuration, given_dim == 0)
    hh = jnp.dot(feature, me_w1[...], preferred_element_type=jnp.float32) + me_b1[...]
    x = jnp.dot(_gelu(hh), me_w2[...], preferred_element_type=jnp.float32) + me_b2[...]

    x = x + pos
    for l in range(DEPTH):                               # GuidedBlocks, guide = feature_vector
        x = _guided_block(x, feature, attn_s, l, NUM_HEADS,
                          b_ln1_g, b_ln1_b, b_qkv_w, b_qkv_b, b_proj_w, b_proj_b,
                          b_ln2_g, b_ln2_b, b_w1x, b_w1g, b_b1, b_w2, b_b2)

    out_ref[0] = _layer_norm(x, norm_g[...], norm_b[...])


def _decoder_kernel(
    vec_ref, flat_ref, query_ref, mask_ref,
    de_wa, de_wf, de_b,
    b_ln1_g, b_ln1_b, b_qkv_w, b_qkv_b, b_proj_w, b_proj_b,
    b_ln2_g, b_ln2_b, b_w1x, b_w1g, b_b1, b_w2, b_b2,
    pred_w, pred_b,
    out_ref,
    pack_s, attn_s,
    *, num_info, training,
):
    vec = vec_ref[0]                                     # [L, D]   vector_stack
    flat = flat_ref[0]                                   # [L, F]   flatten_info
    query = query_ref[0]                                 # [Lq, Dd] query_vectors
    mask_pack = mask_ref[0]                              # [L+Lq, F] cat(mask_info, mask_query)

    # forward_mid: decoder_embed(cat(vector_stack, flatten_info))
    info = (jnp.dot(vec, de_wa[...], preferred_element_type=jnp.float32)
            + jnp.dot(flat, de_wf[...], preferred_element_type=jnp.float32)
            + de_b[...])                                 # [L, Dd]

    # vector_pack = cat((information_vectors, query_vectors), dim=1)
    pack_s[0:num_info, :] = info
    pack_s[num_info:, :] = query
    x = pack_s[...]

    x_info_mid = None
    for t in range(DEC_DEPTH + EXTRA_DEC_DEPTH):
        x = _guided_block(x, mask_pack, attn_s, t, DEC_HEADS,
                          b_ln1_g, b_ln1_b, b_qkv_w, b_qkv_b, b_proj_w, b_proj_b,
                          b_ln2_g, b_ln2_b, b_w1x, b_w1g, b_b1, b_w2, b_b2)
        if training and t == DEC_DEPTH - 1:
            x_info_mid = x[0:num_info, :]                # vector_pack.clone()[:, :L, :]

    # NOTE: decoder_norm is created in the reference __init__ but never applied in
    #       forward_decoder -> faithfully omitted.
    pw = pred_w[...]
    pb = pred_b[...]
    if training:
        out_ref[0, 0:num_info, :] = (
            jnp.dot(x_info_mid, pw, preferred_element_type=jnp.float32) + pb)
        out_ref[0, num_info:, :] = (
            jnp.dot(x[num_info:, :], pw, preferred_element_type=jnp.float32) + pb)
    else:
        out_ref[0] = jnp.dot(x[num_info:, :], pw, preferred_element_type=jnp.float32) + pb


# =============================== pallas_call wrappers ===============================
def _const_spec(a):
    n = a.ndim
    return pl.BlockSpec(tuple(a.shape), lambda b, n=n: (0,) * n)


def _batch_spec(a):
    n = a.ndim
    return pl.BlockSpec((1,) + tuple(a.shape[1:]), lambda b, n=n: (b,) + (0,) * (n - 1))


def encoder_forward(p, flat_info, pos_embed):
    Bb, L, _ = flat_info.shape
    D = pos_embed.shape[-1]
    weights = ([p[k] for k in ("pe_w", "pe_b", "pe_g", "pe_bb",
                               "fe_w1x", "fe_w1f", "fe_b1", "fe_w2", "fe_b2",
                               "me_w1", "me_b1", "me_w2", "me_b2")]
               + [p["blk"][k] for k in _BLK_ORDER]
               + [p["norm_g"], p["norm_b"]])
    in_specs = ([_batch_spec(flat_info), _batch_spec(pos_embed)]
                + [_const_spec(w) for w in weights])
    return pl.pallas_call(
        _encoder_kernel,
        out_shape=jax.ShapeDtypeStruct((Bb, L, D), jnp.float32),
        grid=(Bb,),
        in_specs=in_specs,
        out_specs=pl.BlockSpec((1, L, D), lambda b: (b, 0, 0)),
        scratch_shapes=[pltpu.VMEM((L, D), jnp.float32)],
        compiler_params=pltpu.CompilerParams(dimension_semantics=("parallel",)),
    )(flat_info, pos_embed, *weights)


def decoder_forward(p, vector_stack, flat_info, query_vector, mask_pack, training):
    Bb, L, _ = vector_stack.shape
    Lq = query_vector.shape[1]
    St = L + Lq
    Dd = p["de_wa"].shape[-1]
    F = p["pred_w"].shape[-1]
    s_out = (L + Lq) if training else Lq
    weights = ([p["de_wa"], p["de_wf"], p["de_b"]]
               + [p["blk"][k] for k in _BLK_ORDER]
               + [p["pred_w"], p["pred_b"]])
    in_specs = ([_batch_spec(vector_stack), _batch_spec(flat_info),
                 _batch_spec(query_vector), _batch_spec(mask_pack)]
                + [_const_spec(w) for w in weights])
    kernel = functools.partial(_decoder_kernel, num_info=L, training=training)
    return pl.pallas_call(
        kernel,
        out_shape=jax.ShapeDtypeStruct((Bb, s_out, F), jnp.float32),
        grid=(Bb,),
        in_specs=in_specs,
        out_specs=pl.BlockSpec((1, s_out, F), lambda b: (b, 0, 0)),
        scratch_shapes=[pltpu.VMEM((St, Dd), jnp.float32),
                        pltpu.VMEM((St, Dd), jnp.float32)],
        compiler_params=pltpu.CompilerParams(dimension_semantics=("parallel",)),
    )(vector_stack, flat_info, query_vector, mask_pack, *weights)


# =============================== model forward ======================================
def flatten_batch(batch_tensor):
    """[B, C, X, Y, Z*L] -> [B, L, C*X*Y*Z] per-cube flatten (same order as the conv)."""
    Bb, C, X, Y, ZL = batch_tensor.shape
    Z = CUBE[2]
    L = ZL // Z
    x = batch_tensor.reshape(Bb, C, X, Y, L, Z)
    x = jnp.transpose(x, (0, 4, 1, 2, 3, 5))
    return x.reshape(Bb, L, C * X * Y * Z)


def mae_guided_forward(params, batch_tensor, pos_embed_tensor, given_vector,
                       query_vector, flatten_mask_info, flatten_mask_query,
                       training=False):
    assert given_vector is None  # given_dim == 0 configuration
    flat_info = flatten_batch(batch_tensor)                               # [B, L, F]
    vector_stack = encoder_forward(params["enc"], flat_info, pos_embed_tensor)
    mask_pack = jnp.concatenate([flatten_mask_info, flatten_mask_query], axis=1)
    return decoder_forward(params["dec"], vector_stack, flat_info,
                           query_vector, mask_pack, training)


# =============================== parameter init =====================================
def _xavier(key, shape):
    fan_in, fan_out = shape[-2], shape[-1]
    limit = float(np.sqrt(6.0 / (fan_in + fan_out)))
    return jax.random.uniform(key, shape, jnp.float32, -limit, limit)


def _init_guided_block(key, dim, guide_dim, num_heads, mlp_ratio):
    ks = jax.random.split(key, 4)
    dh = dim // num_heads
    hidden = int(dim * mlp_ratio)
    qkv = _xavier(ks[0], (dim, 3 * dim)).reshape(dim, 3, num_heads, dh)
    qkv = jnp.transpose(qkv, (1, 2, 0, 3))                # [3, H, dim, dh]  (timm column order)
    w1 = _xavier(ks[2], (dim + guide_dim, hidden))
    return dict(
        ln1_g=jnp.ones((1, dim), jnp.float32), ln1_b=jnp.zeros((1, dim), jnp.float32),
        qkv_w=qkv, qkv_b=jnp.zeros((3, num_heads, 1, dh), jnp.float32),
        proj_w=_xavier(ks[1], (dim, dim)), proj_b=jnp.zeros((1, dim), jnp.float32),
        ln2_g=jnp.ones((1, dim), jnp.float32), ln2_b=jnp.zeros((1, dim), jnp.float32),
        w1x=w1[:dim], w1g=w1[dim:], b1=jnp.zeros((1, hidden), jnp.float32),
        w2=_xavier(ks[3], (hidden, dim)), b2=jnp.zeros((1, dim), jnp.float32),
    )


def _stack_blocks(blocks):
    return {k: jnp.stack([blk[k] for blk in blocks]) for k in blocks[0]}


def init_params(key):
    assert EMBED_DIM % int(6 * NUM_HEADS) == 0 and DEC_DIM % DEC_HEADS == 0
    ks = jax.random.split(key, 10)
    D, F, Dd = EMBED_DIM, FLAT_DIM, DEC_DIM
    h_fe = int((D + F) * MLP_RATIO)
    h_me = int((D + GIVEN_DIM) * MLP_RATIO)

    fe_w1 = _xavier(ks[1], (D + F, h_fe))
    de_w = _xavier(ks[6], (D + F, Dd))
    enc_blocks = [_init_guided_block(k, D, D, NUM_HEADS, MLP_RATIO)
                  for k in jax.random.split(ks[4], DEPTH)]
    dec_blocks = [_init_guided_block(k, Dd, F, DEC_HEADS, MLP_RATIO)
                  for k in jax.random.split(ks[8], DEC_DEPTH + EXTRA_DEC_DEPTH)]

    enc = dict(
        pe_w=_xavier(ks[0], (F, D)), pe_b=jnp.zeros((1, D), jnp.float32),
        pe_g=jnp.ones((1, D), jnp.float32), pe_bb=jnp.zeros((1, D), jnp.float32),
        fe_w1x=fe_w1[:D], fe_w1f=fe_w1[D:], fe_b1=jnp.zeros((1, h_fe), jnp.float32),
        fe_w2=_xavier(ks[2], (h_fe, D)), fe_b2=jnp.zeros((1, D), jnp.float32),
        me_w1=_xavier(ks[3], (D + GIVEN_DIM, h_me)), me_b1=jnp.zeros((1, h_me), jnp.float32),
        me_w2=_xavier(ks[5], (h_me, D)), me_b2=jnp.zeros((1, D), jnp.float32),
        blk=_stack_blocks(enc_blocks),
        norm_g=jnp.ones((1, D), jnp.float32), norm_b=jnp.zeros((1, D), jnp.float32),
    )
    dec = dict(
        de_wa=de_w[:D], de_wf=de_w[D:], de_b=jnp.zeros((1, Dd), jnp.float32),
        blk=_stack_blocks(dec_blocks),
        pred_w=_xavier(ks[7], (Dd, F)), pred_b=jnp.zeros((1, F), jnp.float32),
    )
    return {"enc": enc, "dec": dec}


# =============================== main ===============================================
if __name__ == "__main__":
    key = jax.random.PRNGKey(0)
    params = init_params(jax.random.PRNGKey(1))
    k1, k2, k3, k4, k5 = jax.random.split(key, 5)

    cx, cy, cz = CUBE
    batch_tensor = jax.random.normal(k1, (B, IN_CHAN, cx, cy, cz * L_INFO), jnp.float32)
    pos_embed = jax.random.normal(k2, (B, L_INFO, EMBED_DIM), jnp.float32)
    query_vec = jax.random.normal(k3, (B, L_QUERY, DEC_DIM), jnp.float32)
    mask_info = (jax.random.uniform(k4, (B, L_INFO, FLAT_DIM)) > 0.5).astype(jnp.float32)
    mask_query = (jax.random.uniform(k5, (B, L_QUERY, FLAT_DIM)) > 0.5).astype(jnp.float32)

    fwd = jax.jit(mae_guided_forward, static_argnames=("training",))
    out = fwd(params, batch_tensor, pos_embed, None, query_vec, mask_info, mask_query,
              training=False)                     # eval mode: [B, num_query, flatten_dim]
    out = jax.block_until_ready(out)

    assert out.shape == (B, L_QUERY, FLAT_DIM), out.shape
    assert out.dtype == jnp.float32
    assert bool(jnp.all(jnp.isfinite(out)))
    print("KERNEL_OK")
</pallas_src>

<mosaic_0001>
module attributes {stable_mosaic.version = 11 : i64} {
  func.func @_encoder_kernel(%arg0: i32, %arg1: memref<1x6x64xf32, #tpu.memory_space<vmem>>, %arg2: memref<1x6x48xf32, #tpu.memory_space<vmem>>, %arg3: memref<64x48xf32, #tpu.memory_space<vmem>>, %arg4: memref<1x48xf32, #tpu.memory_space<vmem>>, %arg5: memref<1x48xf32, #tpu.memory_space<vmem>>, %arg6: memref<1x48xf32, #tpu.memory_space<vmem>>, %arg7: memref<48x448xf32, #tpu.memory_space<vmem>>, %arg8: memref<64x448xf32, #tpu.memory_space<vmem>>, %arg9: memref<1x448xf32, #tpu.memory_space<vmem>>, %arg10: memref<448x48xf32, #tpu.memory_space<vmem>>, %arg11: memref<1x48xf32, #tpu.memory_space<vmem>>, %arg12: memref<48x192xf32, #tpu.memory_space<vmem>>, %arg13: memref<1x192xf32, #tpu.memory_space<vmem>>, %arg14: memref<192x48xf32, #tpu.memory_space<vmem>>, %arg15: memref<1x48xf32, #tpu.memory_space<vmem>>, %arg16: memref<2x1x48xf32, #tpu.memory_space<vmem>>, %arg17: memref<2x1x48xf32, #tpu.memory_space<vmem>>, %arg18: memref<2x3x2x48x24xf32, #tpu.memory_space<vmem>>, %arg19: memref<2x3x2x1x24xf32, #tpu.memory_space<vmem>>, %arg20: memref<2x48x48xf32, #tpu.memory_space<vmem>>, %arg21: memref<2x1x48xf32, #tpu.memory_space<vmem>>, %arg22: memref<2x1x48xf32, #tpu.memory_space<vmem>>, %arg23: memref<2x1x48xf32, #tpu.memory_space<vmem>>, %arg24: memref<2x48x192xf32, #tpu.memory_space<vmem>>, %arg25: memref<2x48x192xf32, #tpu.memory_space<vmem>>, %arg26: memref<2x1x192xf32, #tpu.memory_space<vmem>>, %arg27: memref<2x192x48xf32, #tpu.memory_space<vmem>>, %arg28: memref<2x1x48xf32, #tpu.memory_space<vmem>>, %arg29: memref<1x48xf32, #tpu.memory_space<vmem>>, %arg30: memref<1x48xf32, #tpu.memory_space<vmem>>, %arg31: memref<1x6x48xf32, #tpu.memory_space<vmem>>, %arg32: memref<6x48xf32, #tpu.memory_space<vmem>>) attributes {dimension_semantics = [#tpu.dimension_semantics<parallel>], iteration_bounds = array<i64: 2>, scalar_prefetch = 0 : i64, scratch_operands = 1 : i64, tpu.core_type = #tpu.core_type<tc>, window_params = [{transform_indices = @transform_0, window_bounds = array<i64: 1, 6, 64>}, {transform_indices = @transform_1, window_bounds = array<i64: 1, 6, 48>}, {pipeline_mode = #tpu.pipeline_mode<synchronous>, transform_indices = @transform_2, window_bounds = array<i64: 64, 48>}, {pipeline_mode = #tpu.pipeline_mode<synchronous>, transform_indices = @transform_3, window_bounds = array<i64: 1, 48>}, {pipeline_mode = #tpu.pipeline_mode<synchronous>, transform_indices = @transform_4, window_bounds = array<i64: 1, 48>}, {pipeline_mode = #tpu.pipeline_mode<synchronous>, transform_indices = @transform_5, window_bounds = array<i64: 1, 48>}, {pipeline_mode = #tpu.pipeline_mode<synchronous>, transform_indices = @transform_6, window_bounds = array<i64: 48, 448>}, {pipeline_mode = #tpu.pipeline_mode<synchronous>, transform_indices = @transform_7, window_bounds = array<i64: 64, 448>}, {pipeline_mode = #tpu.pipeline_mode<synchronous>, transform_indices = @transform_8, window_bounds = array<i64: 1, 448>}, {pipeline_mode = #tpu.pipeline_mode<synchronous>, transform_indices = @transform_9, window_bounds = array<i64: 448, 48>}, {pipeline_mode = #tpu.pipeline_mode<synchronous>, transform_indices = @transform_10, window_bounds = array<i64: 1, 48>}, {pipeline_mode = #tpu.pipeline_mode<synchronous>, transform_indices = @transform_11, window_bounds = array<i64: 48, 192>}, {pipeline_mode = #tpu.pipeline_mode<synchronous>, transform_indices = @transform_12, window_bounds = array<i64: 1, 192>}, {pipeline_mode = #tpu.pipeline_mode<synchronous>, transform_indices = @transform_13, window_bounds = array<i64: 192, 48>}, {pipeline_mode = #tpu.pipeline_mode<synchronous>, transform_indices = @transform_14, window_bounds = array<i64: 1, 48>}, {pipeline_mode = #tpu.pipeline_mode<synchronous>, transform_indices = @transform_15, window_bounds = array<i64: 2, 1, 48>}, {pipeline_mode = #tpu.pipeline_mode<synchronous>, transform_indices = @transform_16, window_bounds = array<i64: 2, 1, 48>}, {pipeline_mode = #tpu.pipeline_mode<synchronous>, transform_indices = @transform_17, window_bounds = array<i64: 2, 3, 2, 48, 24>}, {pipeline_mode = #tpu.pipeline_mode<synchronous>, transform_indices = @transform_18, window_bounds = array<i64: 2, 3, 2, 1, 24>}, {pipeline_mode = #tpu.pipeline_mode<synchronous>, transform_indices = @transform_19, window_bounds = array<i64: 2, 48, 48>}, {pipeline_mode = #tpu.pipeline_mode<synchronous>, transform_indices = @transform_20, window_bounds = array<i64: 2, 1, 48>}, {pipeline_mode = #tpu.pipeline_mode<synchronous>, transform_indices = @transform_21, window_bounds = array<i64: 2, 1, 48>}, {pipeline_mode = #tpu.pipeline_mode<synchronous>, transform_indices = @transform_22, window_bounds = array<i64: 2, 1, 48>}, {pipeline_mode = #tpu.pipeline_mode<synchronous>, transform_indices = @transform_23, window_bounds = array<i64: 2, 48, 192>}, {pipeline_mode = #tpu.pipeline_mode<synchronous>, transform_indices = @transform_24, window_bounds = array<i64: 2, 48, 192>}, {pipeline_mode = #tpu.pipeline_mode<synchronous>, transform_indices = @transform_25, window_bounds = array<i64: 2, 1, 192>}, {pipeline_mode = #tpu.pipeline_mode<synchronous>, transform_indices = @transform_26, window_bounds = array<i64: 2, 192, 48>}, {pipeline_mode = #tpu.pipeline_mode<synchronous>, transform_indices = @transform_27, window_bounds = array<i64: 2, 1, 48>}, {pipeline_mode = #tpu.pipeline_mode<synchronous>, transform_indices = @transform_28, window_bounds = array<i64: 1, 48>}, {pipeline_mode = #tpu.pipeline_mode<synchronous>, transform_indices = @transform_29, window_bounds = array<i64: 1, 48>}, {transform_indices = @transform_30, window_bounds = array<i64: 1, 6, 48>}]} {
    %c0 = arith.constant 0 : index
    %c0_0 = arith.constant 0 : index
    %c0_1 = arith.constant 0 : index
    %0 = vector.load %arg1[%c0, %c0_0, %c0_1] : memref<1x6x64xf32, #tpu.memory_space<vmem>>, vector<1x6x64xf32>
    %1 = vector.shape_cast %0 : vector<1x6x64xf32> to vector<6x64xf32>
    %c0_2 = arith.constant 0 : index
    %c0_3 = arith.constant 0 : index
    %c0_4 = arith.constant 0 : index
    %2 = vector.load %arg2[%c0_2, %c0_3, %c0_4] : memref<1x6x48xf32, #tpu.memory_space<vmem>>, vector<1x6x48xf32>
    %3 = vector.shape_cast %2 : vector<1x6x48xf32> to vector<6x48xf32>
    %c0_5 = arith.constant 0 : index
    %c0_6 = arith.constant 0 : index
    %4 = vector.load %arg3[%c0_5, %c0_6] : memref<64x48xf32, #tpu.memory_space<vmem>>, vector<64x48xf32>
    %cst = arith.constant dense<0.000000e+00> : vector<6x48xf32>
    %5 = tpu.matmul %1, %4, %cst {dimension_numbers = #tpu.dot_dimension_numbers<[1], [0], [0], [1], [0, 0, 1, 1], [], []>} : vector<6x64xf32>, vector<64x48xf32>, vector<6x48xf32> -> vector<6x48xf32>
    %c0_7 = arith.constant 0 : index
    %c0_8 = arith.constant 0 : index
    %6 = vector.load %arg4[%c0_7, %c0_8] : memref<1x48xf32, #tpu.memory_space<vmem>>, vector<1x48xf32>
    %7 = vector.broadcast %6 : vector<1x48xf32> to vector<6x48xf32>
    %8 = arith.addf %5, %7 : vector<6x48xf32>
    %c0_9 = arith.constant 0 : index
    %c0_10 = arith.constant 0 : index
    %9 = vector.load %arg5[%c0_9, %c0_10] : memref<1x48xf32, #tpu.memory_space<vmem>>, vector<1x48xf32>
    %c0_11 = arith.constant 0 : index
    %c0_12 = arith.constant 0 : index
    %10 = vector.load %arg6[%c0_11, %c0_12] : memref<1x48xf32, #tpu.memory_space<vmem>>, vector<1x48xf32>
    %cst_13 = arith.constant dense<0.000000e+00> : vector<6xf32>
    %11 = vector.multi_reduction <add>, %8, %cst_13 [1] : vector<6x48xf32> to vector<6xf32>
    %12 = vector.shape_cast %11 : vector<6xf32> to vector<6x1xf32>
    %cst_14 = arith.constant 4.800000e+01 : f32
    %13 = vector.broadcast %cst_14 : f32 to vector<6x1xf32>
    %14 = arith.divf %12, %13 : vector<6x1xf32>
    %15 = vector.broadcast %14 : vector<6x1xf32> to vector<6x48xf32>
    %16 = arith.subf %8, %15 : vector<6x48xf32>
    %17 = arith.mulf %16, %16 : vector<6x48xf32>
    %cst_15 = arith.constant dense<0.000000e+00> : vector<6xf32>
    %18 = vector.multi_reduction <add>, %17, %cst_15 [1] : vector<6x48xf32> to vector<6xf32>
    %19 = vector.shape_cast %18 : vector<6xf32> to vector<6x1xf32>
    %cst_16 = arith.constant 4.800000e+01 : f32
    %20 = vector.broadcast %cst_16 : f32 to vector<6x1xf32>
    %21 = arith.divf %19, %20 : vector<6x1xf32>
    %cst_17 = arith.constant 9.99999974E-6 : f32
    %22 = vector.broadcast %cst_17 : f32 to vector<6x1xf32>
    %23 = arith.addf %21, %22 : vector<6x1xf32>
    %24 = math.rsqrt %23 : vector<6x1xf32>
    %25 = vector.broadcast %24 : vector<6x1xf32> to vector<6x48xf32>
    %26 = arith.mulf %16, %25 : vector<6x48xf32>
    %27 = vector.broadcast %9 : vector<1x48xf32> to vector<6x48xf32>
    %28 = arith.mulf %26, %27 : vector<6x48xf32>
    %29 = vector.broadcast %10 : vector<1x48xf32> to vector<6x48xf32>
    %30 = arith.addf %28, %29 : vector<6x48xf32>
    %c0_18 = arith.constant 0 : index
    %c0_19 = arith.constant 0 : index
    %31 = vector.load %arg7[%c0_18, %c0_19] : memref<48x448xf32, #tpu.memory_space<vmem>>, vector<48x448xf32>
    %cst_20 = arith.constant dense<0.000000e+00> : vector<6x448xf32>
    %32 = tpu.matmul %30, %31, %cst_20 {dimension_numbers = #tpu.dot_dimension_numbers<[1], [0], [0], [1], [0, 0, 1, 1], [], []>} : vector<6x48xf32>, vector<48x448xf32>, vector<6x448xf32> -> vector<6x448xf32>
    %c0_21 = arith.constant 0 : index
    %c0_22 = arith.constant 0 : index
    %33 = vector.load %arg8[%c0_21, %c0_22] : memref<64x448xf32, #tpu.memory_space<vmem>>, vector<64x448xf32>
    %cst_23 = arith.constant dense<0.000000e+00> : vector<6x448xf32>
    %34 = tpu.matmul %1, %33, %cst_23 {dimension_numbers = #tpu.dot_dimension_numbers<[1], [0], [0], [1], [0, 0, 1, 1], [], []>} : vector<6x64xf32>, vector<64x448xf32>, vector<6x448xf32> -> vector<6x448xf32>
    %35 = arith.addf %32, %34 : vector<6x448xf32>
    %c0_24 = arith.constant 0 : index
    %c0_25 = arith.constant 0 : index
    %36 = vector.load %arg9[%c0_24, %c0_25] : memref<1x448xf32, #tpu.memory_space<vmem>>, vector<1x448xf32>
    %37 = vector.broadcast %36 : vector<1x448xf32> to vector<6x448xf32>
    %38 = arith.addf %35, %37 : vector<6x448xf32>
    %cst_26 = arith.constant 5.000000e-01 : f32
    %39 = vector.broadcast %cst_26 : f32 to vector<6x448xf32>
    %40 = arith.mulf %39, %38 : vector<6x448xf32>
    %cst_27 = arith.constant 0.707106769 : f32
    %41 = vector.broadcast %cst_27 : f32 to vector<6x448xf32>
    %42 = arith.mulf %38, %41 : vector<6x448xf32>
    %43 = math.absf %42 : vector<6x448xf32>
    %cst_28 = arith.constant 0.327591091 : f32
    %44 = vector.broadcast %cst_28 : f32 to vector<6x448xf32>
    %45 = arith.mulf %44, %43 : vector<6x448xf32>
    %cst_29 = arith.constant 1.000000e+00 : f32
    %46 = vector.broadcast %cst_29 : f32 to vector<6x448xf32>
    %47 = arith.addf %46, %45 : vector<6x448xf32>
    %cst_30 = arith.constant 1.000000e+00 : f32
    %48 = vector.broadcast %cst_30 : f32 to vector<6x448xf32>
    %49 = arith.divf %48, %47 : vector<6x448xf32>
    %cst_31 = arith.constant 1.06140542 : f32
    %50 = vector.broadcast %cst_31 : f32 to vector<6x448xf32>
    %51 = arith.mulf %50, %49 : vector<6x448xf32>
    %cst_32 = arith.constant -1.45315206 : f32
    %52 = vector.broadcast %cst_32 : f32 to vector<6x448xf32>
    %53 = arith.addf %51, %52 : vector<6x448xf32>
    %54 = arith.mulf %53, %49 : vector<6x448xf32>
    %cst_33 = arith.constant 1.42141378 : f32
    %55 = vector.broadcast %cst_33 : f32 to vector<6x448xf32>
    %56 = arith.addf %54, %55 : vector<6x448xf32>
    %57 = arith.mulf %56, %49 : vector<6x448xf32>
    %cst_34 = arith.constant -0.284496725 : f32
    %58 = vector.broadcast %cst_34 : f32 to vector<6x448xf32>
    %59 = arith.addf %57, %58 : vector<6x448xf32>
    %60 = arith.mulf %59, %49 : vector<6x448xf32>
    %cst_35 = arith.constant 0.254829586 : f32
    %61 = vector.broadcast %cst_35 : f32 to vector<6x448xf32>
    %62 = arith.addf %60, %61 : vector<6x448xf32>
    %63 = arith.mulf %62, %49 : vector<6x448xf32>
    %cst_36 = arith.constant 0.000000e+00 : f32
    %64 = vector.broadcast %cst_36 : f32 to vector<6x448xf32>
    %65 = arith.subf %64, %43 : vector<6x448xf32>
    %66 = arith.mulf %65, %43 : vector<6x448xf32>
    %67 = math.exp %66 : vector<6x448xf32>
    %68 = arith.mulf %63, %67 : vector<6x448xf32>
    %cst_37 = arith.constant 1.000000e+00 : f32
    %69 = vector.broadcast %cst_37 : f32 to vector<6x448xf32>
    %70 = arith.subf %69, %68 : vector<6x448xf32>
    %cst_38 = arith.constant 0.000000e+00 : f32
    %71 = vector.broadcast %cst_38 : f32 to vector<6x448xf32>
    %72 = arith.cmpf oge, %42, %71 : vector<6x448xf32>
    %cst_39 = arith.constant 0.000000e+00 : f32
    %73 = vector.broadcast %cst_39 : f32 to vector<6x448xf32>
    %74 = arith.subf %73, %70 : vector<6x448xf32>
    %75 = arith.select %72, %70, %74 : vector<6x448xi1>, vector<6x448xf32>
    %cst_40 = arith.constant 1.000000e+00 : f32
    %76 = vector.broadcast %cst_40 : f32 to vector<6x448xf32>
    %77 = arith.addf %76, %75 : vector<6x448xf32>
    %78 = arith.mulf %40, %77 : vector<6x448xf32>
    %c0_41 = arith.constant 0 : index
    %c0_42 = arith.constant 0 : index
    %79 = vector.load %arg10[%c0_41, %c0_42] : memref<448x48xf32, #tpu.memory_space<vmem>>, vector<448x48xf32>
    %cst_43 = arith.constant dense<0.000000e+00> : vector<6x48xf32>
    %80 = tpu.matmul %78, %79, %cst_43 {dimension_numbers = #tpu.dot_dimension_numbers<[1], [0], [0], [1], [0, 0, 1, 1], [], []>} : vector<6x448xf32>, vector<448x48xf32>, vector<6x48xf32> -> vector<6x48xf32>
    %c0_44 = arith.constant 0 : index
    %c0_45 = arith.constant 0 : index
    %81 = vector.load %arg11[%c0_44, %c0_45] : memref<1x48xf32, #tpu.memory_space<vmem>>, vector<1x48xf32>
    %82 = vector.broadcast %81 : vector<1x48xf32> to vector<6x48xf32>
    %83 = arith.addf %80, %82 : vector<6x48xf32>
    %c0_46 = arith.constant 0 : index
    %c0_47 = arith.constant 0 : index
    %84 = vector.load %arg12[%c0_46, %c0_47] : memref<48x192xf32, #tpu.memory_space<vmem>>, vector<48x192xf32>
    %cst_48 = arith.constant dense<0.000000e+00> : vector<6x192xf32>
    %85 = tpu.matmul %83, %84, %cst_48 {dimension_numbers = #tpu.dot_dimension_numbers<[1], [0], [0], [1], [0, 0, 1, 1], [], []>} : vector<6x48xf32>, vector<48x192xf32>, vector<6x192xf32> -> vector<6x192xf32>
    %c0_49 = arith.constant 0 : index
    %c0_50 = arith.constant 0 : index
    %86 = vector.load %arg13[%c0_49, %c0_50] : memref<1x192xf32, #tpu.memory_space<vmem>>, vector<1x192xf32>
    %87 = vector.broadcast %86 : vector<1x192xf32> to vector<6x192xf32>
    %88 = arith.addf %85, %87 : vector<6x192xf32>
    %cst_51 = arith.constant 5.000000e-01 : f32
    %89 = vector.broadcast %cst_51 : f32 to vector<6x192xf32>
    %90 = arith.mulf %89, %88 : vector<6x192xf32>
    %cst_52 = arith.constant 0.707106769 : f32
    %91 = vector.broadcast %cst_52 : f32 to vector<6x192xf32>
    %92 = arith.mulf %88, %91 : vector<6x192xf32>
    %93 = math.absf %92 : vector<6x192xf32>
    %cst_53 = arith.constant 0.327591091 : f32
    %94 = vector.broadcast %cst_53 : f32 to vector<6x192xf32>
    %95 = arith.mulf %94, %93 : vector<6x192xf32>
    %cst_54 = arith.constant 1.000000e+00 : f32
    %96 = vector.broadcast %cst_54 : f32 to vector<6x192xf32>
    %97 = arith.addf %96, %95 : vector<6x192xf32>
    %cst_55 = arith.constant 1.000000e+00 : f32
    %98 = vector.broadcast %cst_55 : f32 to vector<6x192xf32>
    %99 = arith.divf %98, %97 : vector<6x192xf32>
    %cst_56 = arith.constant 1.06140542 : f32
    %100 = vector.broadcast %cst_56 : f32 to vector<6x192xf32>
    %101 = arith.mulf %100, %99 : vector<6x192xf32>
    %cst_57 = arith.constant -1.45315206 : f32
    %102 = vector.broadcast %cst_57 : f32 to vector<6x192xf32>
    %103 = arith.addf %101, %102 : vector<6x192xf32>
    %104 = arith.mulf %103, %99 : vector<6x192xf32>
    %cst_58 = arith.constant 1.42141378 : f32
    %105 = vector.broadcast %cst_58 : f32 to vector<6x192xf32>
    %106 = arith.addf %104, %105 : vector<6x192xf32>
    %107 = arith.mulf %106, %99 : vector<6x192xf32>
    %cst_59 = arith.constant -0.284496725 : f32
    %108 = vector.broadcast %cst_59 : f32 to vector<6x192xf32>
    %109 = arith.addf %107, %108 : vector<6x192xf32>
    %110 = arith.mulf %109, %99 : vector<6x192xf32>
    %cst_60 = arith.constant 0.254829586 : f32
    %111 = vector.broadcast %cst_60 : f32 to vector<6x192xf32>
    %112 = arith.addf %110, %111 : vector<6x192xf32>
    %113 = arith.mulf %112, %99 : vector<6x192xf32>
    %cst_61 = arith.constant 0.000000e+00 : f32
    %114 = vector.broadcast %cst_61 : f32 to vector<6x192xf32>
    %115 = arith.subf %114, %93 : vector<6x192xf32>
    %116 = arith.mulf %115, %93 : vector<6x192xf32>
    %117 = math.exp %116 : vector<6x192xf32>
    %118 = arith.mulf %113, %117 : vector<6x192xf32>
    %cst_62 = arith.constant 1.000000e+00 : f32
    %119 = vector.broadcast %cst_62 : f32 to vector<6x192xf32>
    %120 = arith.subf %119, %118 : vector<6x192xf32>
    %cst_63 = arith.constant 0.000000e+00 : f32
    %121 = vector.broadcast %cst_63 : f32 to vector<6x192xf32>
    %122 = arith.cmpf oge, %92, %121 : vector<6x192xf32>
    %cst_64 = arith.constant 0.000000e+00 : f32
    %123 = vector.broadcast %cst_64 : f32 to vector<6x192xf32>
    %124 = arith.subf %123, %120 : vector<6x192xf32>
    %125 = arith.select %122, %120, %124 : vector<6x192xi1>, vector<6x192xf32>
    %cst_65 = arith.constant 1.000000e+00 : f32
    %126 = vector.broadcast %cst_65 : f32 to vector<6x192xf32>
    %127 = arith.addf %126, %125 : vector<6x192xf32>
    %128 = arith.mulf %90, %127 : vector<6x192xf32>
    %c0_66 = arith.constant 0 : index
    %c0_67 = arith.constant 0 : index
    %129 = vector.load %arg14[%c0_66, %c0_67] : memref<192x48xf32, #tpu.memory_space<vmem>>, vector<192x48xf32>
    %cst_68 = arith.constant dense<0.000000e+00> : vector<6x48xf32>
    %130 = tpu.matmul %128, %129, %cst_68 {dimension_numbers = #tpu.dot_dimension_numbers<[1], [0], [0], [1], [0, 0, 1, 1], [], []>} : vector<6x192xf32>, vector<192x48xf32>, vector<6x48xf32> -> vector<6x48xf32>
    %c0_69 = arith.constant 0 : index
    %c0_70 = arith.constant 0 : index
    %131 = vector.load %arg15[%c0_69, %c0_70] : memref<1x48xf32, #tpu.memory_space<vmem>>, vector<1x48xf32>
    %132 = vector.broadcast %131 : vector<1x48xf32> to vector<6x48xf32>
    %133 = arith.addf %130, %132 : vector<6x48xf32>
    %134 = arith.addf %133, %3 : vector<6x48xf32>
    %c0_71 = arith.constant 0 : index
    %c0_72 = arith.constant 0 : index
    %c0_73 = arith.constant 0 : index
    %135 = vector.load %arg16[%c0_71, %c0_72, %c0_73] : memref<2x1x48xf32, #tpu.memory_space<vmem>>, vector<1x1x48xf32>
    %136 = vector.shape_cast %135 : vector<1x1x48xf32> to vector<1x48xf32>
    %c0_74 = arith.constant 0 : index
    %c0_75 = arith.constant 0 : index
    %c0_76 = arith.constant 0 : index
    %137 = vector.load %arg17[%c0_74, %c0_75, %c0_76] : memref<2x1x48xf32, #tpu.memory_space<vmem>>, vector<1x1x48xf32>
    %138 = vector.shape_cast %137 : vector<1x1x48xf32> to vector<1x48xf32>
    %cst_77 = arith.constant dense<0.000000e+00> : vector<6xf32>
    %139 = vector.multi_reduction <add>, %134, %cst_77 [1] : vector<6x48xf32> to vector<6xf32>
    %140 = vector.shape_cast %139 : vector<6xf32> to vector<6x1xf32>
    %cst_78 = arith.constant 4.800000e+01 : f32
    %141 = vector.broadcast %cst_78 : f32 to vector<6x1xf32>
    %142 = arith.divf %140, %141 : vector<6x1xf32>
    %143 = vector.broadcast %142 : vector<6x1xf32> to vector<6x48xf32>
    %144 = arith.subf %134, %143 : vector<6x48xf32>
    %145 = arith.mulf %144, %144 : vector<6x48xf32>
    %cst_79 = arith.constant dense<0.000000e+00> : vector<6xf32>
    %146 = vector.multi_reduction <add>, %145, %cst_79 [1] : vector<6x48xf32> to vector<6xf32>
    %147 = vector.shape_cast %146 : vector<6xf32> to vector<6x1xf32>
    %cst_80 = arith.constant 4.800000e+01 : f32
    %148 = vector.broadcast %cst_80 : f32 to vector<6x1xf32>
    %149 = arith.divf %147, %148 : vector<6x1xf32>
    %cst_81 = arith.constant 9.99999974E-6 : f32
    %150 = vector.broadcast %cst_81 : f32 to vector<6x1xf32>
    %151 = arith.addf %149, %150 : vector<6x1xf32>
    %152 = math.rsqrt %151 : vector<6x1xf32>
    %153 = vector.broadcast %152 : vector<6x1xf32> to vector<6x48xf32>
    %154 = arith.mulf %144, %153 : vector<6x48xf32>
    %155 = vector.broadcast %136 : vector<1x48xf32> to vector<6x48xf32>
    %156 = arith.mulf %154, %155 : vector<6x48xf32>
    %157 = vector.broadcast %138 : vector<1x48xf32> to vector<6x48xf32>
    %158 = arith.addf %156, %157 : vector<6x48xf32>
    %c0_82 = arith.constant 0 : index
    %c0_83 = arith.constant 0 : index
    %c0_84 = arith.constant 0 : index
    %c0_85 = arith.constant 0 : index
    %c0_86 = arith.constant 0 : index
    %159 = vector.load %arg18[%c0_82, %c0_83, %c0_84, %c0_85, %c0_86] : memref<2x3x2x48x24xf32, #tpu.memory_space<vmem>>, vector<1x1x1x48x24xf32>
    %160 = vector.shape_cast %159 : vector<1x1x1x48x24xf32> to vector<48x24xf32>
    %cst_87 = arith.constant dense<0.000000e+00> : vector<6x24xf32>
    %161 = tpu.matmul %158, %160, %cst_87 {dimension_numbers = #tpu.dot_dimension_numbers<[1], [0], [0], [1], [0, 0, 1, 1], [], []>} : vector<6x48xf32>, vector<48x24xf32>, vector<6x24xf32> -> vector<6x24xf32>
    %c0_88 = arith.constant 0 : index
    %c0_89 = arith.constant 0 : index
    %c0_90 = arith.constant 0 : index
    %c0_91 = arith.constant 0 : index
    %c0_92 = arith.constant 0 : index
    %162 = vector.load %arg19[%c0_88, %c0_89, %c0_90, %c0_91, %c0_92] : memref<2x3x2x1x24xf32, #tpu.memory_space<vmem>>, vector<1x1x1x1x24xf32>
    %163 = vector.shape_cast %162 : vector<1x1x1x1x24xf32> to vector<1x24xf32>
    %164 = vector.broadcast %163 : vector<1x24xf32> to vector<6x24xf32>
    %165 = arith.addf %161, %164 : vector<6x24xf32>
    %c0_93 = arith.constant 0 : index
    %c1 = arith.constant 1 : index
    %c0_94 = arith.constant 0 : index
    %c0_95 = arith.constant 0 : index
    %c0_96 = arith.constant 0 : index
    %166 = vector.load %arg18[%c0_93, %c1, %c0_94, %c0_95, %c0_96] : memref<2x3x2x48x24xf32, #tpu.memory_space<vmem>>, vector<1x1x1x48x24xf32>
    %167 = vector.shape_cast %166 : vector<1x1x1x48x24xf32> to vector<48x24xf32>
    %cst_97 = arith.constant dense<0.000000e+00> : vector<6x24xf32>
    %168 = tpu.matmul %158, %167, %cst_97 {dimension_numbers = #tpu.dot_dimension_numbers<[1], [0], [0], [1], [0, 0, 1, 1], [], []>} : vector<6x48xf32>, vector<48x24xf32>, vector<6x24xf32> -> vector<6x24xf32>
    %c0_98 = arith.constant 0 : index
    %c1_99 = arith.constant 1 : index
    %c0_100 = arith.constant 0 : index
    %c0_101 = arith.constant 0 : index
    %c0_102 = arith.constant 0 : index
    %169 = vector.load %arg19[%c0_98, %c1_99, %c0_100, %c0_101, %c0_102] : memref<2x3x2x1x24xf32, #tpu.memory_space<vmem>>, vector<1x1x1x1x24xf32>
    %170 = vector.shape_cast %169 : vector<1x1x1x1x24xf32> to vector<1x24xf32>
    %171 = vector.broadcast %170 : vector<1x24xf32> to vector<6x24xf32>
    %172 = arith.addf %168, %171 : vector<6x24xf32>
    %c0_103 = arith.constant 0 : index
    %c2 = arith.constant 2 : index
    %c0_104 = arith.constant 0 : index
    %c0_105 = arith.constant 0 : index
    %c0_106 = arith.constant 0 : index
    %173 = vector.load %arg18[%c0_103, %c2, %c0_104, %c0_105, %c0_106] : memref<2x3x2x48x24xf32, #tpu.memory_space<vmem>>, vector<1x1x1x48x24xf32>
    %174 = vector.shape_cast %173 : vector<1x1x1x48x24xf32> to vector<48x24xf32>
    %cst_107 = arith.constant dense<0.000000e+00> : vector<6x24xf32>
    %175 = tpu.matmul %158, %174, %cst_107 {dimension_numbers = #tpu.dot_dimension_numbers<[1], [0], [0], [1], [0, 0, 1, 1], [], []>} : vector<6x48xf32>, vector<48x24xf32>, vector<6x24xf32> -> vector<6x24xf32>
    %c0_108 = arith.constant 0 : index
    %c2_109 = arith.constant 2 : index
    %c0_110 = arith.constant 0 : index
    %c0_111 = arith.constant 0 : index
    %c0_112 = arith.constant 0 : index
    %176 = vector.load %arg19[%c0_108, %c2_109, %c0_110, %c0_111, %c0_112] : memref<2x3x2x1x24xf32, #tpu.memory_space<vmem>>, vector<1x1x1x1x24xf32>
    %177 = vector.shape_cast %176 : vector<1x1x1x1x24xf32> to vector<1x24xf32>
    %178 = vector.broadcast %177 : vector<1x24xf32> to vector<6x24xf32>
    %179 = arith.addf %175, %178 : vector<6x24xf32>
    %cst_113 = arith.constant dense<0.000000e+00> : vector<6x6xf32>
    %180 = tpu.matmul %165, %172, %cst_113 {dimension_numbers = #tpu.dot_dimension_numbers<[1], [1], [0], [0], [0, 0, 1, 0], [], []>} : vector<6x24xf32>, vector<6x24xf32>, vector<6x6xf32> -> vector<6x6xf32>
    %cst_114 = arith.constant 0.204124153 : f32
    %181 = vector.broadcast %cst_114 : f32 to vector<6x6xf32>
    %182 = arith.mulf %180, %181 : vector<6x6xf32>
    %cst_115 = arith.constant dense<0xFF800000> : vector<6xf32>
    %183 = vector.multi_reduction <maximumf>, %182, %cst_115 [1] : vector<6x6xf32> to vector<6xf32>
    %184 = vector.shape_cast %183 : vector<6xf32> to vector<6x1xf32>
    %185 = vector.broadcast %184 : vector<6x1xf32> to vector<6x6xf32>
    %186 = arith.subf %182, %185 : vector<6x6xf32>
    %187 = math.exp %186 : vector<6x6xf32>
    %cst_116 = arith.constant dense<0.000000e+00> : vector<6xf32>
    %188 = vector.multi_reduction <add>, %187, %cst_116 [1] : vector<6x6xf32> to vector<6xf32>
    %189 = vector.shape_cast %188 : vector<6xf32> to vector<6x1xf32>
    %190 = tpu.reciprocal %189 {approx = true} : vector<6x1xf32> -> vector<6x1xf32>
    %191 = vector.broadcast %190 : vector<6x1xf32> to vector<6x6xf32>
    %192 = arith.mulf %187, %191 : vector<6x6xf32>
    %cst_117 = arith.constant dense<0.000000e+00> : vector<6x24xf32>
    %193 = tpu.matmul %192, %179, %cst_117 {dimension_numbers = #tpu.dot_dimension_numbers<[1], [0], [0], [1], [0, 0, 1, 1], [], []>} : vector<6x6xf32>, vector<6x24xf32>, vector<6x24xf32> -> vector<6x24xf32>
    %c0_118 = arith.constant 0 : index
    %c0_119 = arith.constant 0 : index
    %194 = vector.load %arg32[%c0_118, %c0_119] : memref<6x48xf32, #tpu.memory_space<vmem>>, vector<6x24xf32>
    tpu.vector_store %arg32[%c0_118, %c0_119], %193 {strides = array<i32>} : memref<6x48xf32, #tpu.memory_space<vmem>>, vector<6x24xf32>,
    %c0_120 = arith.constant 0 : index
    %c0_121 = arith.constant 0 : index
    %c1_122 = arith.constant 1 : index
    %c0_123 = arith.constant 0 : index
    %c0_124 = arith.constant 0 : index
    %195 = vector.load %arg18[%c0_120, %c0_121, %c1_122, %c0_123, %c0_124] : memref<2x3x2x48x24xf32, #tpu.memory_space<vmem>>, vector<1x1x1x48x24xf32>
    %196 = vector.shape_cast %195 : vector<1x1x1x48x24xf32> to vector<48x24xf32>
    %cst_125 = arith.constant dense<0.000000e+00> : vector<6x24xf32>
    %197 = tpu.matmul %158, %196, %cst_125 {dimension_numbers = #tpu.dot_dimension_numbers<[1], [0], [0], [1], [0, 0, 1, 1], [], []>} : vector<6x48xf32>, vector<48x24xf32>, vector<6x24xf32> -> vector<6x24xf32>
    %c0_126 = arith.constant 0 : index
    %c0_127 = arith.constant 0 : index
    %c1_128 = arith.constant 1 : index
    %c0_129 = arith.constant 0 : index
    %c0_130 = arith.constant 0 : index
    %198 = vector.load %arg19[%c0_126, %c0_127, %c1_128, %c0_129, %c0_130] : memref<2x3x2x1x24xf32, #tpu.memory_space<vmem>>, vector<1x1x1x1x24xf32>
    %199 = vector.shape_cast %198 : vector<1x1x1x1x24xf32> to vector<1x24xf32>
    %200 = vector.broadcast %199 : vector<1x24xf32> to vector<6x24xf32>
    %201 = arith.addf %197, %200 : vector<6x24xf32>
    %c0_131 = arith.constant 0 : index
    %c1_132 = arith.constant 1 : index
    %c1_133 = arith.constant 1 : index
    %c0_134 = arith.constant 0 : index
    %c0_135 = arith.constant 0 : index
    %202 = vector.load %arg18[%c0_131, %c1_132, %c1_133, %c0_134, %c0_135] : memref<2x3x2x48x24xf32, #tpu.memory_space<vmem>>, vector<1x1x1x48x24xf32>
    %203 = vector.shape_cast %202 : vector<1x1x1x48x24xf32> to vector<48x24xf32>
    %cst_136 = arith.constant dense<0.000000e+00> : vector<6x24xf32>
    %204 = tpu.matmul %158, %203, %cst_136 {dimension_numbers = #tpu.dot_dimension_numbers<[1], [0], [0], [1], [0, 0, 1, 1], [], []>} : vector<6x48xf32>, vector<48x24xf32>, vector<6x24xf32> -> vector<6x24xf32>
    %c0_137 = arith.constant 0 : index
    %c1_138 = arith.constant 1 : index
    %c1_139 = arith.constant 1 : index
    %c0_140 = arith.constant 0 : index
    %c0_141 = arith.constant 0 : index
    %205 = vector.load %arg19[%c0_137, %c1_138, %c1_139, %c0_140, %c0_141] : memref<2x3x2x1x24xf32, #tpu.memory_space<vmem>>, vector<1x1x1x1x24xf32>
    %206 = vector.shape_cast %205 : vector<1x1x1x1x24xf32> to vector<1x24xf32>
    %207 = vector.broadcast %206 : vector<1x24xf32> to vector<6x24xf32>
    %208 = arith.addf %204, %207 : vector<6x24xf32>
    %c0_142 = arith.constant 0 : index
    %c2_143 = arith.constant 2 : index
    %c1_144 = arith.constant 1 : index
    %c0_145 = arith.constant 0 : index
    %c0_146 = arith.constant 0 : index
    %209 = vector.load %arg18[%c0_142, %c2_143, %c1_144, %c0_145, %c0_146] : memref<2x3x2x48x24xf32, #tpu.memory_space<vmem>>, vector<1x1x1x48x24xf32>
    %210 = vector.shape_cast %209 : vector<1x1x1x48x24xf32> to vector<48x24xf32>
    %cst_147 = arith.constant dense<0.000000e+00> : vector<6x24xf32>
    %211 = tpu.matmul %158, %210, %cst_147 {dimension_numbers = #tpu.dot_dimension_numbers<[1], [0], [0], [1], [0, 0, 1, 1], [], []>} : vector<6x48xf32>, vector<48x24xf32>, vector<6x24xf32> -> vector<6x24xf32>
    %c0_148 = arith.constant 0 : index
    %c2_149 = arith.constant 2 : index
    %c1_150 = arith.constant 1 : index
    %c0_151 = arith.constant 0 : index
    %c0_152 = arith.constant 0 : index
    %212 = vector.load %arg19[%c0_148, %c2_149, %c1_150, %c0_151, %c0_152] : memref<2x3x2x1x24xf32, #tpu.memory_space<vmem>>, vector<1x1x1x1x24xf32>
    %213 = vector.shape_cast %212 : vector<1x1x1x1x24xf32> to vector<1x24xf32>
    %214 = vector.broadcast %213 : vector<1x24xf32> to vector<6x24xf32>
    %215 = arith.addf %211, %214 : vector<6x24xf32>
    %cst_153 = arith.constant dense<0.000000e+00> : vector<6x6xf32>
    %216 = tpu.matmul %201, %208, %cst_153 {dimension_numbers = #tpu.dot_dimension_numbers<[1], [1], [0], [0], [0, 0, 1, 0], [], []>} : vector<6x24xf32>, vector<6x24xf32>, vector<6x6xf32> -> vector<6x6xf32>
    %cst_154 = arith.constant 0.204124153 : f32
    %217 = vector.broadcast %cst_154 : f32 to vector<6x6xf32>
    %218 = arith.mulf %216, %217 : vector<6x6xf32>
    %cst_155 = arith.constant dense<0xFF800000> : vector<6xf32>
    %219 = vector.multi_reduction <maximumf>, %218, %cst_155 [1] : vector<6x6xf32> to vector<6xf32>
    %220 = vector.shape_cast %219 : vector<6xf32> to vector<6x1xf32>
    %221 = vector.broadcast %220 : vector<6x1xf32> to vector<6x6xf32>
    %222 = arith.subf %218, %221 : vector<6x6xf32>
    %223 = math.exp %222 : vector<6x6xf32>
    %cst_156 = arith.constant dense<0.000000e+00> : vector<6xf32>
    %224 = vector.multi_reduction <add>, %223, %cst_156 [1] : vector<6x6xf32> to vector<6xf32>
    %225 = vector.shape_cast %224 : vector<6xf32> to vector<6x1xf32>
    %226 = tpu.reciprocal %225 {approx = true} : vector<6x1xf32> -> vector<6x1xf32>
    %227 = vector.broadcast %226 : vector<6x1xf32> to vector<6x6xf32>
    %228 = arith.mulf %223, %227 : vector<6x6xf32>
    %cst_157 = arith.constant dense<0.000000e+00> : vector<6x24xf32>
    %229 = tpu.matmul %228, %215, %cst_157 {dimension_numbers = #tpu.dot_dimension_numbers<[1], [0], [0], [1], [0, 0, 1, 1], [], []>} : vector<6x6xf32>, vector<6x24xf32>, vector<6x24xf32> -> vector<6x24xf32>
    %c0_158 = arith.constant 0 : index
    %c24 = arith.constant 24 : index
    %230 = vector.load %arg32[%c0_158, %c24] : memref<6x48xf32, #tpu.memory_space<vmem>>, vector<6x24xf32>
    tpu.vector_store %arg32[%c0_158, %c24], %229 {strides = array<i32>} : memref<6x48xf32, #tpu.memory_space<vmem>>, vector<6x24xf32>,
    %c0_159 = arith.constant 0 : index
    %c0_160 = arith.constant 0 : index
    %231 = vector.load %arg32[%c0_159, %c0_160] : memref<6x48xf32, #tpu.memory_space<vmem>>, vector<6x48xf32>
    %c0_161 = arith.constant 0 : index
    %c0_162 = arith.constant 0 : index
    %c0_163 = arith.constant 0 : index
    %232 = vector.load %arg20[%c0_161, %c0_162, %c0_163] : memref<2x48x48xf32, #tpu.memory_space<vmem>>, vector<1x48x48xf32>
    %233 = vector.shape_cast %232 : vector<1x48x48xf32> to vector<48x48xf32>
    %cst_164 = arith.constant dense<0.000000e+00> : vector<6x48xf32>
    %234 = tpu.matmul %231, %233, %cst_164 {dimension_numbers = #tpu.dot_dimension_numbers<[1], [0], [0], [1], [0, 0, 1, 1], [], []>} : vector<6x48xf32>, vector<48x48xf32>, vector<6x48xf32> -> vector<6x48xf32>
    %235 = arith.addf %134, %234 : vector<6x48xf32>
    %c0_165 = arith.constant 0 : index
    %c0_166 = arith.constant 0 : index
    %c0_167 = arith.constant 0 : index
    %236 = vector.load %arg21[%c0_165, %c0_166, %c0_167] : memref<2x1x48xf32, #tpu.memory_space<vmem>>, vector<1x1x48xf32>
    %237 = vector.shape_cast %236 : vector<1x1x48xf32> to vector<1x48xf32>
    %238 = vector.broadcast %237 : vector<1x48xf32> to vector<6x48xf32>
    %239 = arith.addf %235, %238 : vector<6x48xf32>
    %c0_168 = arith.constant 0 : index
    %c0_169 = arith.constant 0 : index
    %c0_170 = arith.constant 0 : index
    %240 = vector.load %arg22[%c0_168, %c0_169, %c0_170] : memref<2x1x48xf32, #tpu.memory_space<vmem>>, vector<1x1x48xf32>
    %241 = vector.shape_cast %240 : vector<1x1x48xf32> to vector<1x48xf32>
    %c0_171 = arith.constant 0 : index
    %c0_172 = arith.constant 0 : index
    %c0_173 = arith.constant 0 : index
    %242 = vector.load %arg23[%c0_171, %c0_172, %c0_173] : memref<2x1x48xf32, #tpu.memory_space<vmem>>, vector<1x1x48xf32>
    %243 = vector.shape_cast %242 : vector<1x1x48xf32> to vector<1x48xf32>
    %cst_174 = arith.constant dense<0.000000e+00> : vector<6xf32>
    %244 = vector.multi_reduction <add>, %239, %cst_174 [1] : vector<6x48xf32> to vector<6xf32>
    %245 = vector.shape_cast %244 : vector<6xf32> to vector<6x1xf32>
    %cst_175 = arith.constant 4.800000e+01 : f32
    %246 = vector.broadcast %cst_175 : f32 to vector<6x1xf32>
    %247 = arith.divf %245, %246 : vector<6x1xf32>
    %248 = vector.broadcast %247 : vector<6x1xf32> to vector<6x48xf32>
    %249 = arith.subf %239, %248 : vector<6x48xf32>
    %250 = arith.mulf %249, %249 : vector<6x48xf32>
    %cst_176 = arith.constant dense<0.000000e+00> : vector<6xf32>
    %251 = vector.multi_reduction <add>, %250, %cst_176 [1] : vector<6x48xf32> to vector<6xf32>
    %252 = vector.shape_cast %251 : vector<6xf32> to vector<6x1xf32>
    %cst_177 = arith.constant 4.800000e+01 : f32
    %253 = vector.broadcast %cst_177 : f32 to vector<6x1xf32>
    %254 = arith.divf %252, %253 : vector<6x1xf32>
    %cst_178 = arith.constant 9.99999974E-6 : f32
    %255 = vector.broadcast %cst_178 : f32 to vector<6x1xf32>
    %256 = arith.addf %254, %255 : vector<6x1xf32>
    %257 = math.rsqrt %256 : vector<6x1xf32>
    %258 = vector.broadcast %257 : vector<6x1xf32> to vector<6x48xf32>
    %259 = arith.mulf %249, %258 : vector<6x48xf32>
    %260 = vector.broadcast %241 : vector<1x48xf32> to vector<6x48xf32>
    %261 = arith.mulf %259, %260 : vector<6x48xf32>
    %262 = vector.broadcast %243 : vector<1x48xf32> to vector<6x48xf32>
    %263 = arith.addf %261, %262 : vector<6x48xf32>
    %c0_179 = arith.constant 0 : index
    %c0_180 = arith.constant 0 : index
    %c0_181 = arith.constant 0 : index
    %264 = vector.load %arg24[%c0_179, %c0_180, %c0_181] : memref<2x48x192xf32, #tpu.memory_space<vmem>>, vector<1x48x192xf32>
    %265 = vector.shape_cast %264 : vector<1x48x192xf32> to vector<48x192xf32>
    %cst_182 = arith.constant dense<0.000000e+00> : vector<6x192xf32>
    %266 = tpu.matmul %263, %265, %cst_182 {dimension_numbers = #tpu.dot_dimension_numbers<[1], [0], [0], [1], [0, 0, 1, 1], [], []>} : vector<6x48xf32>, vector<48x192xf32>, vector<6x192xf32> -> vector<6x192xf32>
    %c0_183 = arith.constant 0 : index
    %c0_184 = arith.constant 0 : index
    %c0_185 = arith.constant 0 : index
    %267 = vector.load %arg25[%c0_183, %c0_184, %c0_185] : memref<2x48x192xf32, #tpu.memory_space<vmem>>, vector<1x48x192xf32>
    %268 = vector.shape_cast %267 : vector<1x48x192xf32> to vector<48x192xf32>
    %cst_186 = arith.constant dense<0.000000e+00> : vector<6x192xf32>
    %269 = tpu.matmul %83, %268, %cst_186 {dimension_numbers = #tpu.dot_dimension_numbers<[1], [0], [0], [1], [0, 0, 1, 1], [], []>} : vector<6x48xf32>, vector<48x192xf32>, vector<6x192xf32> -> vector<6x192xf32>
    %270 = arith.addf %266, %269 : vector<6x192xf32>
    %c0_187 = arith.constant 0 : index
    %c0_188 = arith.constant 0 : index
    %c0_189 = arith.constant 0 : index
    %271 = vector.load %arg26[%c0_187, %c0_188, %c0_189] : memref<2x1x192xf32, #tpu.memory_space<vmem>>, vector<1x1x192xf32>
    %272 = vector.shape_cast %271 : vector<1x1x192xf32> to vector<1x192xf32>
    %273 = vector.broadcast %272 : vector<1x192xf32> to vector<6x192xf32>
    %274 = arith.addf %270, %273 : vector<6x192xf32>
    %cst_190 = arith.constant 5.000000e-01 : f32
    %275 = vector.broadcast %cst_190 : f32 to vector<6x192xf32>
    %276 = arith.mulf %275, %274 : vector<6x192xf32>
    %cst_191 = arith.constant 0.707106769 : f32
    %277 = vector.broadcast %cst_191 : f32 to vector<6x192xf32>
    %278 = arith.mulf %274, %277 : vector<6x192xf32>
    %279 = math.absf %278 : vector<6x192xf32>
    %cst_192 = arith.constant 0.327591091 : f32
    %280 = vector.broadcast %cst_192 : f32 to vector<6x192xf32>
    %281 = arith.mulf %280, %279 : vector<6x192xf32>
    %cst_193 = arith.constant 1.000000e+00 : f32
    %282 = vector.broadcast %cst_193 : f32 to vector<6x192xf32>
    %283 = arith.addf %282, %281 : vector<6x192xf32>
    %cst_194 = arith.constant 1.000000e+00 : f32
    %284 = vector.broadcast %cst_194 : f32 to vector<6x192xf32>
    %285 = arith.divf %284, %283 : vector<6x192xf32>
    %cst_195 = arith.constant 1.06140542 : f32
    %286 = vector.broadcast %cst_195 : f32 to vector<6x192xf32>
    %287 = arith.mulf %286, %285 : vector<6x192xf32>
    %cst_196 = arith.constant -1.45315206 : f32
    %288 = vector.broadcast %cst_196 : f32 to vector<6x192xf32>
    %289 = arith.addf %287, %288 : vector<6x192xf32>
    %290 = arith.mulf %289, %285 : vector<6x192xf32>
    %cst_197 = arith.constant 1.42141378 : f32
    %291 = vector.broadcast %cst_197 : f32 to vector<6x192xf32>
    %292 = arith.addf %290, %291 : vector<6x192xf32>
    %293 = arith.mulf %292, %285 : vector<6x192xf32>
    %cst_198 = arith.constant -0.284496725 : f32
    %294 = vector.broadcast %cst_198 : f32 to vector<6x192xf32>
    %295 = arith.addf %293, %294 : vector<6x192xf32>
    %296 = arith.mulf %295, %285 : vector<6x192xf32>
    %cst_199 = arith.constant 0.254829586 : f32
    %297 = vector.broadcast %cst_199 : f32 to vector<6x192xf32>
    %298 = arith.addf %296, %297 : vector<6x192xf32>
    %299 = arith.mulf %298, %285 : vector<6x192xf32>
    %cst_200 = arith.constant 0.000000e+00 : f32
    %300 = vector.broadcast %cst_200 : f32 to vector<6x192xf32>
    %301 = arith.subf %300, %279 : vector<6x192xf32>
    %302 = arith.mulf %301, %279 : vector<6x192xf32>
    %303 = math.exp %302 : vector<6x192xf32>
    %304 = arith.mulf %299, %303 : vector<6x192xf32>
    %cst_201 = arith.constant 1.000000e+00 : f32
    %305 = vector.broadcast %cst_201 : f32 to vector<6x192xf32>
    %306 = arith.subf %305, %304 : vector<6x192xf32>
    %cst_202 = arith.constant 0.000000e+00 : f32
    %307 = vector.broadcast %cst_202 : f32 to vector<6x192xf32>
    %308 = arith.cmpf oge, %278, %307 : vector<6x192xf32>
    %cst_203 = arith.constant 0.000000e+00 : f32
    %309 = vector.broadcast %cst_203 : f32 to vector<6x192xf32>
    %310 = arith.subf %309, %306 : vector<6x192xf32>
    %311 = arith.select %308, %306, %310 : vector<6x192xi1>, vector<6x192xf32>
    %cst_204 = arith.constant 1.000000e+00 : f32
    %312 = vector.broadcast %cst_204 : f32 to vector<6x192xf32>
    %313 = arith.addf %312, %311 : vector<6x192xf32>
    %314 = arith.mulf %276, %313 : vector<6x192xf32>
    %c0_205 = arith.constant 0 : index
    %c0_206 = arith.constant 0 : index
    %c0_207 = arith.constant 0 : index
    %315 = vector.load %arg27[%c0_205, %c0_206, %c0_207] : memref<2x192x48xf32, #tpu.memory_space<vmem>>, vector<1x192x48xf32>
    %316 = vector.shape_cast %315 : vector<1x192x48xf32> to vector<192x48xf32>
    %cst_208 = arith.constant dense<0.000000e+00> : vector<6x48xf32>
    %317 = tpu.matmul %314, %316, %cst_208 {dimension_numbers = #tpu.dot_dimension_numbers<[1], [0], [0], [1], [0, 0, 1, 1], [], []>} : vector<6x192xf32>, vector<192x48xf32>, vector<6x48xf32> -> vector<6x48xf32>
    %318 = arith.addf %239, %317 : vector<6x48xf32>
    %c0_209 = arith.constant 0 : index
    %c0_210 = arith.constant 0 : index
    %c0_211 = arith.constant 0 : index
    %319 = vector.load %arg28[%c0_209, %c0_210, %c0_211] : memref<2x1x48xf32, #tpu.memory_space<vmem>>, vector<1x1x48xf32>
    %320 = vector.shape_cast %319 : vector<1x1x48xf32> to vector<1x48xf32>
    %321 = vector.broadcast %320 : vector<1x48xf32> to vector<6x48xf32>
    %322 = arith.addf %318, %321 : vector<6x48xf32>
    %c1_212 = arith.constant 1 : index
    %c0_213 = arith.constant 0 : index
    %c0_214 = arith.constant 0 : index
    %323 = vector.load %arg16[%c1_212, %c0_213, %c0_214] : memref<2x1x48xf32, #tpu.memory_space<vmem>>, vector<1x1x48xf32>
    %324 = vector.shape_cast %323 : vector<1x1x48xf32> to vector<1x48xf32>
    %c1_215 = arith.constant 1 : index
    %c0_216 = arith.constant 0 : index
    %c0_217 = arith.constant 0 : index
    %325 = vector.load %arg17[%c1_215, %c0_216, %c0_217] : memref<2x1x48xf32, #tpu.memory_space<vmem>>, vector<1x1x48xf32>
    %326 = vector.shape_cast %325 : vector<1x1x48xf32> to vector<1x48xf32>
    %cst_218 = arith.constant dense<0.000000e+00> : vector<6xf32>
    %327 = vector.multi_reduction <add>, %322, %cst_218 [1] : vector<6x48xf32> to vector<6xf32>
    %328 = vector.shape_cast %327 : vector<6xf32> to vector<6x1xf32>
    %cst_219 = arith.constant 4.800000e+01 : f32
    %329 = vector.broadcast %cst_219 : f32 to vector<6x1xf32>
    %330 = arith.divf %328, %329 : vector<6x1xf32>
    %331 = vector.broadcast %330 : vector<6x1xf32> to vector<6x48xf32>
    %332 = arith.subf %322, %331 : vector<6x48xf32>
    %333 = arith.mulf %332, %332 : vector<6x48xf32>
    %cst_220 = arith.constant dense<0.000000e+00> : vector<6xf32>
    %334 = vector.multi_reduction <add>, %333, %cst_220 [1] : vector<6x48xf32> to vector<6xf32>
    %335 = vector.shape_cast %334 : vector<6xf32> to vector<6x1xf32>
    %cst_221 = arith.constant 4.800000e+01 : f32
    %336 = vector.broadcast %cst_221 : f32 to vector<6x1xf32>
    %337 = arith.divf %335, %336 : vector<6x1xf32>
    %cst_222 = arith.constant 9.99999974E-6 : f32
    %338 = vector.broadcast %cst_222 : f32 to vector<6x1xf32>
    %339 = arith.addf %337, %338 : vector<6x1xf32>
    %340 = math.rsqrt %339 : vector<6x1xf32>
    %341 = vector.broadcast %340 : vector<6x1xf32> to vector<6x48xf32>
    %342 = arith.mulf %332, %341 : vector<6x48xf32>
    %343 = vector.broadcast %324 : vector<1x48xf32> to vector<6x48xf32>
    %344 = arith.mulf %342, %343 : vector<6x48xf32>
    %345 = vector.broadcast %326 : vector<1x48xf32> to vector<6x48xf32>
    %346 = arith.addf %344, %345 : vector<6x48xf32>
    %c1_223 = arith.constant 1 : index
    %c0_224 = arith.constant 0 : index
    %c0_225 = arith.constant 0 : index
    %c0_226 = arith.constant 0 : index
    %c0_227 = arith.constant 0 : index
    %347 = vector.load %arg18[%c1_223, %c0_224, %c0_225, %c0_226, %c0_227] : memref<2x3x2x48x24xf32, #tpu.memory_space<vmem>>, vector<1x1x1x48x24xf32>
    %348 = vector.shape_cast %347 : vector<1x1x1x48x24xf32> to vector<48x24xf32>
    %cst_228 = arith.constant dense<0.000000e+00> : vector<6x24xf32>
    %349 = tpu.matmul %346, %348, %cst_228 {dimension_numbers = #tpu.dot_dimension_numbers<[1], [0], [0], [1], [0, 0, 1, 1], [], []>} : vector<6x48xf32>, vector<48x24xf32>, vector<6x24xf32> -> vector<6x24xf32>
    %c1_229 = arith.constant 1 : index
    %c0_230 = arith.constant 0 : index
    %c0_231 = arith.constant 0 : index
    %c0_232 = arith.constant 0 : index
    %c0_233 = arith.constant 0 : index
    %350 = vector.load %arg19[%c1_229, %c0_230, %c0_231, %c0_232, %c0_233] : memref<2x3x2x1x24xf32, #tpu.memory_space<vmem>>, vector<1x1x1x1x24xf32>
    %351 = vector.shape_cast %350 : vector<1x1x1x1x24xf32> to vector<1x24xf32>
    %352 = vector.broadcast %351 : vector<1x24xf32> to vector<6x24xf32>
    %353 = arith.addf %349, %352 : vector<6x24xf32>
    %c1_234 = arith.constant 1 : index
    %c1_235 = arith.constant 1 : index
    %c0_236 = arith.constant 0 : index
    %c0_237 = arith.constant 0 : index
    %c0_238 = arith.constant 0 : index
    %354 = vector.load %arg18[%c1_234, %c1_235, %c0_236, %c0_237, %c0_238] : memref<2x3x2x48x24xf32, #tpu.memory_space<vmem>>, vector<1x1x1x48x24xf32>
    %355 = vector.shape_cast %354 : vector<1x1x1x48x24xf32> to vector<48x24xf32>
    %cst_239 = arith.constant dense<0.000000e+00> : vector<6x24xf32>
    %356 = tpu.matmul %346, %355, %cst_239 {dimension_numbers = #tpu.dot_dimension_numbers<[1], [0], [0], [1], [0, 0, 1, 1], [], []>} : vector<6x48xf32>, vector<48x24xf32>, vector<6x24xf32> -> vector<6x24xf32>
    %c1_240 = arith.constant 1 : index
    %c1_241 = arith.constant 1 : index
    %c0_242 = arith.constant 0 : index
    %c0_243 = arith.constant 0 : index
    %c0_244 = arith.constant 0 : index
    %357 = vector.load %arg19[%c1_240, %c1_241, %c0_242, %c0_243, %c0_244] : memref<2x3x2x1x24xf32, #tpu.memory_space<vmem>>, vector<1x1x1x1x24xf32>
    %358 = vector.shape_cast %357 : vector<1x1x1x1x24xf32> to vector<1x24xf32>
    %359 = vector.broadcast %358 : vector<1x24xf32> to vector<6x24xf32>
    %360 = arith.addf %356, %359 : vector<6x24xf32>
    %c1_245 = arith.constant 1 : index
    %c2_246 = arith.constant 2 : index
    %c0_247 = arith.constant 0 : index
    %c0_248 = arith.constant 0 : index
    %c0_249 = arith.constant 0 : index
    %361 = vector.load %arg18[%c1_245, %c2_246, %c0_247, %c0_248, %c0_249] : memref<2x3x2x48x24xf32, #tpu.memory_space<vmem>>, vector<1x1x1x48x24xf32>
    %362 = vector.shape_cast %361 : vector<1x1x1x48x24xf32> to vector<48x24xf32>
    %cst_250 = arith.constant dense<0.000000e+00> : vector<6x24xf32>
    %363 = tpu.matmul %346, %362, %cst_250 {dimension_numbers = #tpu.dot_dimension_numbers<[1], [0], [0], [1], [0, 0, 1, 1], [], []>} : vector<6x48xf32>, vector<48x24xf32>, vector<6x24xf32> -> vector<6x24xf32>
    %c1_251 = arith.constant 1 : index
    %c2_252 = arith.constant 2 : index
    %c0_253 = arith.constant 0 : index
    %c0_254 = arith.constant 0 : index
    %c0_255 = arith.constant 0 : index
    %364 = vector.load %arg19[%c1_251, %c2_252, %c0_253, %c0_254, %c0_255] : memref<2x3x2x1x24xf32, #tpu.memory_space<vmem>>, vector<1x1x1x1x24xf32>
    %365 = vector.shape_cast %364 : vector<1x1x1x1x24xf32> to vector<1x24xf32>
    %366 = vector.broadcast %365 : vector<1x24xf32> to vector<6x24xf32>
    %367 = arith.addf %363, %366 : vector<6x24xf32>
    %cst_256 = arith.constant dense<0.000000e+00> : vector<6x6xf32>
    %368 = tpu.matmul %353, %360, %cst_256 {dimension_numbers = #tpu.dot_dimension_numbers<[1], [1], [0], [0], [0, 0, 1, 0], [], []>} : vector<6x24xf32>, vector<6x24xf32>, vector<6x6xf32> -> vector<6x6xf32>
    %cst_257 = arith.constant 0.204124153 : f32
    %369 = vector.broadcast %cst_257 : f32 to vector<6x6xf32>
    %370 = arith.mulf %368, %369 : vector<6x6xf32>
    %cst_258 = arith.constant dense<0xFF800000> : vector<6xf32>
    %371 = vector.multi_reduction <maximumf>, %370, %cst_258 [1] : vector<6x6xf32> to vector<6xf32>
    %372 = vector.shape_cast %371 : vector<6xf32> to vector<6x1xf32>
    %373 = vector.broadcast %372 : vector<6x1xf32> to vector<6x6xf32>
    %374 = arith.subf %370, %373 : vector<6x6xf32>
    %375 = math.exp %374 : vector<6x6xf32>
    %cst_259 = arith.constant dense<0.000000e+00> : vector<6xf32>
    %376 = vector.multi_reduction <add>, %375, %cst_259 [1] : vector<6x6xf32> to vector<6xf32>
    %377 = vector.shape_cast %376 : vector<6xf32> to vector<6x1xf32>
    %378 = tpu.reciprocal %377 {approx = true} : vector<6x1xf32> -> vector<6x1xf32>
    %379 = vector.broadcast %378 : vector<6x1xf32> to vector<6x6xf32>
    %380 = arith.mulf %375, %379 : vector<6x6xf32>
    %cst_260 = arith.constant dense<0.000000e+00> : vector<6x24xf32>
    %381 = tpu.matmul %380, %367, %cst_260 {dimension_numbers = #tpu.dot_dimension_numbers<[1], [0], [0], [1], [0, 0, 1, 1], [], []>} : vector<6x6xf32>, vector<6x24xf32>, vector<6x24xf32> -> vector<6x24xf32>
    %c0_261 = arith.constant 0 : index
    %c0_262 = arith.constant 0 : index
    %382 = vector.load %arg32[%c0_261, %c0_262] : memref<6x48xf32, #tpu.memory_space<vmem>>, vector<6x24xf32>
    tpu.vector_store %arg32[%c0_261, %c0_262], %381 {strides = array<i32>} : memref<6x48xf32, #tpu.memory_space<vmem>>, vector<6x24xf32>,
    %c1_263 = arith.constant 1 : index
    %c0_264 = arith.constant 0 : index
    %c1_265 = arith.constant 1 : index
    %c0_266 = arith.constant 0 : index
    %c0_267 = arith.constant 0 : index
    %383 = vector.load %arg18[%c1_263, %c0_264, %c1_265, %c0_266, %c0_267] : memref<2x3x2x48x24xf32, #tpu.memory_space<vmem>>, vector<1x1x1x48x24xf32>
    %384 = vector.shape_cast %383 : vector<1x1x1x48x24xf32> to vector<48x24xf32>
    %cst_268 = arith.constant dense<0.000000e+00> : vector<6x24xf32>
    %385 = tpu.matmul %346, %384, %cst_268 {dimension_numbers = #tpu.dot_dimension_numbers<[1], [0], [0], [1], [0, 0, 1, 1], [], []>} : vector<6x48xf32>, vector<48x24xf32>, vector<6x24xf32> -> vector<6x24xf32>
    %c1_269 = arith.constant 1 : index
    %c0_270 = arith.constant 0 : index
    %c1_271 = arith.constant 1 : index
    %c0_272 = arith.constant 0 : index
    %c0_273 = arith.constant 0 : index
    %386 = vector.load %arg19[%c1_269, %c0_270, %c1_271, %c0_272, %c0_273] : memref<2x3x2x1x24xf32, #tpu.memory_space<vmem>>, vector<1x1x1x1x24xf32>
    %387 = vector.shape_cast %386 : vector<1x1x1x1x24xf32> to vector<1x24xf32>
    %388 = vector.broadcast %387 : vector<1x24xf32> to vector<6x24xf32>
    %389 = arith.addf %385, %388 : vector<6x24xf32>
    %c1_274 = arith.constant 1 : index
    %c1_275 = arith.constant 1 : index
    %c1_276 = arith.constant 1 : index
    %c0_277 = arith.constant 0 : index
    %c0_278 = arith.constant 0 : index
    %390 = vector.load %arg18[%c1_274, %c1_275, %c1_276, %c0_277, %c0_278] : memref<2x3x2x48x24xf32, #tpu.memory_space<vmem>>, vector<1x1x1x48x24xf32>
    %391 = vector.shape_cast %390 : vector<1x1x1x48x24xf32> to vector<48x24xf32>
    %cst_279 = arith.constant dense<0.000000e+00> : vector<6x24xf32>
    %392 = tpu.matmul %346, %391, %cst_279 {dimension_numbers = #tpu.dot_dimension_numbers<[1], [0], [0], [1], [0, 0, 1, 1], [], []>} : vector<6x48xf32>, vector<48x24xf32>, vector<6x24xf32> -> vector<6x24xf32>
    %c1_280 = arith.constant 1 : index
    %c1_281 = arith.constant 1 : index
    %c1_282 = arith.constant 1 : index
    %c0_283 = arith.constant 0 : index
    %c0_284 = arith.constant 0 : index
    %393 = vector.load %arg19[%c1_280, %c1_281, %c1_282, %c0_283, %c0_284] : memref<2x3x2x1x24xf32, #tpu.memory_space<vmem>>, vector<1x1x1x1x24xf32>
    %394 = vector.shape_cast %393 : vector<1x1x1x1x24xf32> to vector<1x24xf32>
    %395 = vector.broadcast %394 : vector<1x24xf32> to vector<6x24xf32>
    %396 = arith.addf %392, %395 : vector<6x24xf32>
    %c1_285 = arith.constant 1 : index
    %c2_286 = arith.constant 2 : index
    %c1_287 = arith.constant 1 : index
    %c0_288 = arith.constant 0 : index
    %c0_289 = arith.constant 0 : index
    %397 = vector.load %arg18[%c1_285, %c2_286, %c1_287, %c0_288, %c0_289] : memref<2x3x2x48x24xf32, #tpu.memory_space<vmem>>, vector<1x1x1x48x24xf32>
    %398 = vector.shape_cast %397 : vector<1x1x1x48x24xf32> to vector<48x24xf32>
    %cst_290 = arith.constant dense<0.000000e+00> : vector<6x24xf32>
    %399 = tpu.matmul %346, %398, %cst_290 {dimension_numbers = #tpu.dot_dimension_numbers<[1], [0], [0], [1], [0, 0, 1, 1], [], []>} : vector<6x48xf32>, vector<48x24xf32>, vector<6x24xf32> -> vector<6x24xf32>
    %c1_291 = arith.constant 1 : index
    %c2_292 = arith.constant 2 : index
    %c1_293 = arith.constant 1 : index
    %c0_294 = arith.constant 0 : index
    %c0_295 = arith.constant 0 : index
    %400 = vector.load %arg19[%c1_291, %c2_292, %c1_293, %c0_294, %c0_295] : memref<2x3x2x1x24xf32, #tpu.memory_space<vmem>>, vector<1x1x1x1x24xf32>
    %401 = vector.shape_cast %400 : vector<1x1x1x1x24xf32> to vector<1x24xf32>
    %402 = vector.broadcast %401 : vector<1x24xf32> to vector<6x24xf32>
    %403 = arith.addf %399, %402 : vector<6x24xf32>
    %cst_296 = arith.constant dense<0.000000e+00> : vector<6x6xf32>
    %404 = tpu.matmul %389, %396, %cst_296 {dimension_numbers = #tpu.dot_dimension_numbers<[1], [1], [0], [0], [0, 0, 1, 0], [], []>} : vector<6x24xf32>, vector<6x24xf32>, vector<6x6xf32> -> vector<6x6xf32>
    %cst_297 = arith.constant 0.204124153 : f32
    %405 = vector.broadcast %cst_297 : f32 to vector<6x6xf32>
    %406 = arith.mulf %404, %405 : vector<6x6xf32>
    %cst_298 = arith.constant dense<0xFF800000> : vector<6xf32>
    %407 = vector.multi_reduction <maximumf>, %406, %cst_298 [1] : vector<6x6xf32> to vector<6xf32>
    %408 = vector.shape_cast %407 : vector<6xf32> to vector<6x1xf32>
    %409 = vector.broadcast %408 : vector<6x1xf32> to vector<6x6xf32>
    %410 = arith.subf %406, %409 : vector<6x6xf32>
    %411 = math.exp %410 : vector<6x6xf32>
    %cst_299 = arith.constant dense<0.000000e+00> : vector<6xf32>
    %412 = vector.multi_reduction <add>, %411, %cst_299 [1] : vector<6x6xf32> to vector<6xf32>
    %413 = vector.shape_cast %412 : vector<6xf32> to vector<6x1xf32>
    %414 = tpu.reciprocal %413 {approx = true} : vector<6x1xf32> -> vector<6x1xf32>
    %415 = vector.broadcast %414 : vector<6x1xf32> to vector<6x6xf32>
    %416 = arith.mulf %411, %415 : vector<6x6xf32>
    %cst_300 = arith.constant dense<0.000000e+00> : vector<6x24xf32>
    %417 = tpu.matmul %416, %403, %cst_300 {dimension_numbers = #tpu.dot_dimension_numbers<[1], [0], [0], [1], [0, 0, 1, 1], [], []>} : vector<6x6xf32>, vector<6x24xf32>, vector<6x24xf32> -> vector<6x24xf32>
    %c0_301 = arith.constant 0 : index
    %c24_302 = arith.constant 24 : index
    %418 = vector.load %arg32[%c0_301, %c24_302] : memref<6x48xf32, #tpu.memory_space<vmem>>, vector<6x24xf32>
    tpu.vector_store %arg32[%c0_301, %c24_302], %417 {strides = array<i32>} : memref<6x48xf32, #tpu.memory_space<vmem>>, vector<6x24xf32>,
    %c0_303 = arith.constant 0 : index
    %c0_304 = arith.constant 0 : index
    %419 = vector.load %arg32[%c0_303, %c0_304] : memref<6x48xf32, #tpu.memory_space<vmem>>, vector<6x48xf32>
    %c1_305 = arith.constant 1 : index
    %c0_306 = arith.constant 0 : index
    %c0_307 = arith.constant 0 : index
    %420 = vector.load %arg20[%c1_305, %c0_306, %c0_307] : memref<2x48x48xf32, #tpu.memory_space<vmem>>, vector<1x48x48xf32>
    %421 = vector.shape_cast %420 : vector<1x48x48xf32> to vector<48x48xf32>
    %cst_308 = arith.constant dense<0.000000e+00> : vector<6x48xf32>
    %422 = tpu.matmul %419, %421, %cst_308 {dimension_numbers = #tpu.dot_dimension_numbers<[1], [0], [0], [1], [0, 0, 1, 1], [], []>} : vector<6x48xf32>, vector<48x48xf32>, vector<6x48xf32> -> vector<6x48xf32>
    %423 = arith.addf %322, %422 : vector<6x48xf32>
    %c1_309 = arith.constant 1 : index
    %c0_310 = arith.constant 0 : index
    %c0_311 = arith.constant 0 : index
    %424 = vector.load %arg21[%c1_309, %c0_310, %c0_311] : memref<2x1x48xf32, #tpu.memory_space<vmem>>, vector<1x1x48xf32>
    %425 = vector.shape_cast %424 : vector<1x1x48xf32> to vector<1x48xf32>
    %426 = vector.broadcast %425 : vector<1x48xf32> to vector<6x48xf32>
    %427 = arith.addf %423, %426 : vector<6x48xf32>
    %c1_312 = arith.constant 1 : index
    %c0_313 = arith.constant 0 : index
    %c0_314 = arith.constant 0 : index
    %428 = vector.load %arg22[%c1_312, %c0_313, %c0_314] : memref<2x1x48xf32, #tpu.memory_space<vmem>>, vector<1x1x48xf32>
    %429 = vector.shape_cast %428 : vector<1x1x48xf32> to vector<1x48xf32>
    %c1_315 = arith.constant 1 : index
    %c0_316 = arith.constant 0 : index
    %c0_317 = arith.constant 0 : index
    %430 = vector.load %arg23[%c1_315, %c0_316, %c0_317] : memref<2x1x48xf32, #tpu.memory_space<vmem>>, vector<1x1x48xf32>
    %431 = vector.shape_cast %430 : vector<1x1x48xf32> to vector<1x48xf32>
    %cst_318 = arith.constant dense<0.000000e+00> : vector<6xf32>
    %432 = vector.multi_reduction <add>, %427, %cst_318 [1] : vector<6x48xf32> to vector<6xf32>
    %433 = vector.shape_cast %432 : vector<6xf32> to vector<6x1xf32>
    %cst_319 = arith.constant 4.800000e+01 : f32
    %434 = vector.broadcast %cst_319 : f32 to vector<6x1xf32>
    %435 = arith.divf %433, %434 : vector<6x1xf32>
    %436 = vector.broadcast %435 : vector<6x1xf32> to vector<6x48xf32>
    %437 = arith.subf %427, %436 : vector<6x48xf32>
    %438 = arith.mulf %437, %437 : vector<6x48xf32>
    %cst_320 = arith.constant dense<0.000000e+00> : vector<6xf32>
    %439 = vector.multi_reduction <add>, %438, %cst_320 [1] : vector<6x48xf32> to vector<6xf32>
    %440 = vector.shape_cast %439 : vector<6xf32> to vector<6x1xf32>
    %cst_321 = arith.constant 4.800000e+01 : f32
    %441 = vector.broadcast %cst_321 : f32 to vector<6x1xf32>
    %442 = arith.divf %440, %441 : vector<6x1xf32>
    %cst_322 = arith.constant 9.99999974E-6 : f32
    %443 = vector.broadcast %cst_322 : f32 to vector<6x1xf32>
    %444 = arith.addf %442, %443 : vector<6x1xf32>
    %445 = math.rsqrt %444 : vector<6x1xf32>
    %446 = vector.broadcast %445 : vector<6x1xf32> to vector<6x48xf32>
    %447 = arith.mulf %437, %446 : vector<6x48xf32>
    %448 = vector.broadcast %429 : vector<1x48xf32> to vector<6x48xf32>
    %449 = arith.mulf %447, %448 : vector<6x48xf32>
    %450 = vector.broadcast %431 : vector<1x48xf32> to vector<6x48xf32>
    %451 = arith.addf %449, %450 : vector<6x48xf32>
    %c1_323 = arith.constant 1 : index
    %c0_324 = arith.constant 0 : index
    %c0_325 = arith.constant 0 : index
    %452 = vector.load %arg24[%c1_323, %c0_324, %c0_325] : memref<2x48x192xf32, #tpu.memory_space<vmem>>, vector<1x48x192xf32>
    %453 = vector.shape_cast %452 : vector<1x48x192xf32> to vector<48x192xf32>
    %cst_326 = arith.constant dense<0.000000e+00> : vector<6x192xf32>
    %454 = tpu.matmul %451, %453, %cst_326 {dimension_numbers = #tpu.dot_dimension_numbers<[1], [0], [0], [1], [0, 0, 1, 1], [], []>} : vector<6x48xf32>, vector<48x192xf32>, vector<6x192xf32> -> vector<6x192xf32>
    %c1_327 = arith.constant 1 : index
    %c0_328 = arith.constant 0 : index
    %c0_329 = arith.constant 0 : index
    %455 = vector.load %arg25[%c1_327, %c0_328, %c0_329] : memref<2x48x192xf32, #tpu.memory_space<vmem>>, vector<1x48x192xf32>
    %456 = vector.shape_cast %455 : vector<1x48x192xf32> to vector<48x192xf32>
    %cst_330 = arith.constant dense<0.000000e+00> : vector<6x192xf32>
    %457 = tpu.matmul %83, %456, %cst_330 {dimension_numbers = #tpu.dot_dimension_numbers<[1], [0], [0], [1], [0, 0, 1, 1], [], []>} : vector<6x48xf32>, vector<48x192xf32>, vector<6x192xf32> -> vector<6x192xf32>
    %458 = arith.addf %454, %457 : vector<6x192xf32>
    %c1_331 = arith.constant 1 : index
    %c0_332 = arith.constant 0 : index
    %c0_333 = arith.constant 0 : index
    %459 = vector.load %arg26[%c1_331, %c0_332, %c0_333] : memref<2x1x192xf32, #tpu.memory_space<vmem>>, vector<1x1x192xf32>
    %460 = vector.shape_cast %459 : vector<1x1x192xf32> to vector<1x192xf32>
    %461 = vector.broadcast %460 : vector<1x192xf32> to vector<6x192xf32>
    %462 = arith.addf %458, %461 : vector<6x192xf32>
    %cst_334 = arith.constant 5.000000e-01 : f32
    %463 = vector.broadcast %cst_334 : f32 to vector<6x192xf32>
    %464 = arith.mulf %463, %462 : vector<6x192xf32>
    %cst_335 = arith.constant 0.707106769 : f32
    %465 = vector.broadcast %cst_335 : f32 to vector<6x192xf32>
    %466 = arith.mulf %462, %465 : vector<6x192xf32>
    %467 = math.absf %466 : vector<6x192xf32>
    %cst_336 = arith.constant 0.327591091 : f32
    %468 = vector.broadcast %cst_336 : f32 to vector<6x192xf32>
    %469 = arith.mulf %468, %467 : vector<6x192xf32>
    %cst_337 = arith.constant 1.000000e+00 : f32
    %470 = vector.broadcast %cst_337 : f32 to vector<6x192xf32>
    %471 = arith.addf %470, %469 : vector<6x192xf32>
    %cst_338 = arith.constant 1.000000e+00 : f32
    %472 = vector.broadcast %cst_338 : f32 to vector<6x192xf32>
    %473 = arith.divf %472, %471 : vector<6x192xf32>
    %cst_339 = arith.constant 1.06140542 : f32
    %474 = vector.broadcast %cst_339 : f32 to vector<6x192xf32>
    %475 = arith.mulf %474, %473 : vector<6x192xf32>
    %cst_340 = arith.constant -1.45315206 : f32
    %476 = vector.broadcast %cst_340 : f32 to vector<6x192xf32>
    %477 = arith.addf %475, %476 : vector<6x192xf32>
    %478 = arith.mulf %477, %473 : vector<6x192xf32>
    %cst_341 = arith.constant 1.42141378 : f32
    %479 = vector.broadcast %cst_341 : f32 to vector<6x192xf32>
    %480 = arith.addf %478, %479 : vector<6x192xf32>
    %481 = arith.mulf %480, %473 : vector<6x192xf32>
    %cst_342 = arith.constant -0.284496725 : f32
    %482 = vector.broadcast %cst_342 : f32 to vector<6x192xf32>
    %483 = arith.addf %481, %482 : vector<6x192xf32>
    %484 = arith.mulf %483, %473 : vector<6x192xf32>
    %cst_343 = arith.constant 0.254829586 : f32
    %485 = vector.broadcast %cst_343 : f32 to vector<6x192xf32>
    %486 = arith.addf %484, %485 : vector<6x192xf32>
    %487 = arith.mulf %486, %473 : vector<6x192xf32>
    %cst_344 = arith.constant 0.000000e+00 : f32
    %488 = vector.broadcast %cst_344 : f32 to vector<6x192xf32>
    %489 = arith.subf %488, %467 : vector<6x192xf32>
    %490 = arith.mulf %489, %467 : vector<6x192xf32>
    %491 = math.exp %490 : vector<6x192xf32>
    %492 = arith.mulf %487, %491 : vector<6x192xf32>
    %cst_345 = arith.constant 1.000000e+00 : f32
    %493 = vector.broadcast %cst_345 : f32 to vector<6x192xf32>
    %494 = arith.subf %493, %492 : vector<6x192xf32>
    %cst_346 = arith.constant 0.000000e+00 : f32
    %495 = vector.broadcast %cst_346 : f32 to vector<6x192xf32>
    %496 = arith.cmpf oge, %466, %495 : vector<6x192xf32>
    %cst_347 = arith.constant 0.000000e+00 : f32
    %497 = vector.broadcast %cst_347 : f32 to vector<6x192xf32>
    %498 = arith.subf %497, %494 : vector<6x192xf32>
    %499 = arith.select %496, %494, %498 : vector<6x192xi1>, vector<6x192xf32>
    %cst_348 = arith.constant 1.000000e+00 : f32
    %500 = vector.broadcast %cst_348 : f32 to vector<6x192xf32>
    %501 = arith.addf %500, %499 : vector<6x192xf32>
    %502 = arith.mulf %464, %501 : vector<6x192xf32>
    %c1_349 = arith.constant 1 : index
    %c0_350 = arith.constant 0 : index
    %c0_351 = arith.constant 0 : index
    %503 = vector.load %arg27[%c1_349, %c0_350, %c0_351] : memref<2x192x48xf32, #tpu.memory_space<vmem>>, vector<1x192x48xf32>
    %504 = vector.shape_cast %503 : vector<1x192x48xf32> to vector<192x48xf32>
    %cst_352 = arith.constant dense<0.000000e+00> : vector<6x48xf32>
    %505 = tpu.matmul %502, %504, %cst_352 {dimension_numbers = #tpu.dot_dimension_numbers<[1], [0], [0], [1], [0, 0, 1, 1], [], []>} : vector<6x192xf32>, vector<192x48xf32>, vector<6x48xf32> -> vector<6x48xf32>
    %506 = arith.addf %427, %505 : vector<6x48xf32>
    %c1_353 = arith.constant 1 : index
    %c0_354 = arith.constant 0 : index
    %c0_355 = arith.constant 0 : index
    %507 = vector.load %arg28[%c1_353, %c0_354, %c0_355] : memref<2x1x48xf32, #tpu.memory_space<vmem>>, vector<1x1x48xf32>
    %508 = vector.shape_cast %507 : vector<1x1x48xf32> to vector<1x48xf32>
    %509 = vector.broadcast %508 : vector<1x48xf32> to vector<6x48xf32>
    %510 = arith.addf %506, %509 : vector<6x48xf32>
    %c0_356 = arith.constant 0 : index
    %c0_357 = arith.constant 0 : index
    %511 = vector.load %arg29[%c0_356, %c0_357] : memref<1x48xf32, #tpu.memory_space<vmem>>, vector<1x48xf32>
    %c0_358 = arith.constant 0 : index
    %c0_359 = arith.constant 0 : index
    %512 = vector.load %arg30[%c0_358, %c0_359] : memref<1x48xf32, #tpu.memory_space<vmem>>, vector<1x48xf32>
    %cst_360 = arith.constant dense<0.000000e+00> : vector<6xf32>
    %513 = vector.multi_reduction <add>, %510, %cst_360 [1] : vector<6x48xf32> to vector<6xf32>
    %514 = vector.shape_cast %513 : vector<6xf32> to vector<6x1xf32>
    %cst_361 = arith.constant 4.800000e+01 : f32
    %515 = vector.broadcast %cst_361 : f32 to vector<6x1xf32>
    %516 = arith.divf %514, %515 : vector<6x1xf32>
    %517 = vector.broadcast %516 : vector<6x1xf32> to vector<6x48xf32>
    %518 = arith.subf %510, %517 : vector<6x48xf32>
    %519 = arith.mulf %518, %518 : vector<6x48xf32>
    %cst_362 = arith.constant dense<0.000000e+00> : vector<6xf32>
    %520 = vector.multi_reduction <add>, %519, %cst_362 [1] : vector<6x48xf32> to vector<6xf32>
    %521 = vector.shape_cast %520 : vector<6xf32> to vector<6x1xf32>
    %cst_363 = arith.constant 4.800000e+01 : f32
    %522 = vector.broadcast %cst_363 : f32 to vector<6x1xf32>
    %523 = arith.divf %521, %522 : vector<6x1xf32>
    %cst_364 = arith.constant 9.99999974E-6 : f32
    %524 = vector.broadcast %cst_364 : f32 to vector<6x1xf32>
    %525 = arith.addf %523, %524 : vector<6x1xf32>
    %526 = math.rsqrt %525 : vector<6x1xf32>
    %527 = vector.broadcast %526 : vector<6x1xf32> to vector<6x48xf32>
    %528 = arith.mulf %518, %527 : vector<6x48xf32>
    %529 = vector.broadcast %511 : vector<1x48xf32> to vector<6x48xf32>
    %530 = arith.mulf %528, %529 : vector<6x48xf32>
    %531 = vector.broadcast %512 : vector<1x48xf32> to vector<6x48xf32>
    %532 = arith.addf %530, %531 : vector<6x48xf32>
    %c0_365 = arith.constant 0 : index
    %c0_366 = arith.constant 0 : index
    %c0_367 = arith.constant 0 : index
    %533 = vector.load %arg31[%c0_365, %c0_366, %c0_367] : memref<1x6x48xf32, #tpu.memory_space<vmem>>, vector<1x6x48xf32>
    %534 = vector.shape_cast %533 : vector<1x6x48xf32> to vector<6x48xf32>
    %535 = vector.shape_cast %532 : vector<6x48xf32> to vector<1x6x48xf32>
    tpu.vector_store %arg31[%c0_365, %c0_366, %c0_367], %535 {strides = array<i32>} : memref<1x6x48xf32, #tpu.memory_space<vmem>>, vector<1x6x48xf32>,
    return
  }
  func.func @transform_0(%arg0: i32) -> (i32, i32, i32) {
    %c0_i32 = arith.constant 0 : i32
    %c0_i32_0 = arith.constant 0 : i32
    %c0_i32_1 = arith.constant 0 : i32
    return %arg0, %c0_i32, %c0_i32_0 : i32, i32, i32
  }
  func.func @transform_1(%arg0: i32) -> (i32, i32, i32) {
    %c0_i32 = arith.constant 0 : i32
    %c0_i32_0 = arith.constant 0 : i32
    %c0_i32_1 = arith.constant 0 : i32
    return %arg0, %c0_i32, %c0_i32_0 : i32, i32, i32
  }
  func.func @transform_2(%arg0: i32) -> (i32, i32) {
    %c0_i32 = arith.constant 0 : i32
    %c0_i32_0 = arith.constant 0 : i32
    %c0_i32_1 = arith.constant 0 : i32
    return %c0_i32, %c0_i32_0 : i32, i32
  }
  func.func @transform_3(%arg0: i32) -> (i32, i32) {
    %c0_i32 = arith.constant 0 : i32
    %c0_i32_0 = arith.constant 0 : i32
    %c0_i32_1 = arith.constant 0 : i32
    return %c0_i32, %c0_i32_0 : i32, i32
  }
  func.func @transform_4(%arg0: i32) -> (i32, i32) {
    %c0_i32 = arith.constant 0 : i32
    %c0_i32_0 = arith.constant 0 : i32
    %c0_i32_1 = arith.constant 0 : i32
    return %c0_i32, %c0_i32_0 : i32, i32
  }
  func.func @transform_5(%arg0: i32) -> (i32, i32) {
    %c0_i32 = arith.constant 0 : i32
    %c0_i32_0 = arith.constant 0 : i32
    %c0_i32_1 = arith.constant 0 : i32
    return %c0_i32, %c0_i32_0 : i32, i32
  }
  func.func @transform_6(%arg0: i32) -> (i32, i32) {
    %c0_i32 = arith.constant 0 : i32
    %c0_i32_0 = arith.constant 0 : i32
    %c0_i32_1 = arith.constant 0 : i32
    return %c0_i32, %c0_i32_0 : i32, i32
  }
  func.func @transform_7(%arg0: i32) -> (i32, i32) {
    %c0_i32 = arith.constant 0 : i32
    %c0_i32_0 = arith.constant 0 : i32
    %c0_i32_1 = arith.constant 0 : i32
    return %c0_i32, %c0_i32_0 : i32, i32
  }
  func.func @transform_8(%arg0: i32) -> (i32, i32) {
    %c0_i32 = arith.constant 0 : i32
    %c0_i32_0 = arith.constant 0 : i32
    %c0_i32_1 = arith.constant 0 : i32
    return %c0_i32, %c0_i32_0 : i32, i32
  }
  func.func @transform_9(%arg0: i32) -> (i32, i32) {
    %c0_i32 = arith.constant 0 : i32
    %c0_i32_0 = arith.constant 0 : i32
    %c0_i32_1 = arith.constant 0 : i32
    return %c0_i32, %c0_i32_0 : i32, i32
  }
  func.func @transform_10(%arg0: i32) -> (i32, i32) {
    %c0_i32 = arith.constant 0 : i32
    %c0_i32_0 = arith.constant 0 : i32
    %c0_i32_1 = arith.constant 0 : i32
    return %c0_i32, %c0_i32_0 : i32, i32
  }
  func.func @transform_11(%arg0: i32) -> (i32, i32) {
    %c0_i32 = arith.constant 0 : i32
    %c0_i32_0 = arith.constant 0 : i32
    %c0_i32_1 = arith.constant 0 : i32
    return %c0_i32, %c0_i32_0 : i32, i32
  }
  func.func @transform_12(%arg0: i32) -> (i32, i32) {
    %c0_i32 = arith.constant 0 : i32
    %c0_i32_0 = arith.constant 0 : i32
    %c0_i32_1 = arith.constant 0 : i32
    return %c0_i32, %c0_i32_0 : i32, i32
  }
  func.func @transform_13(%arg0: i32) -> (i32, i32) {
    %c0_i32 = arith.constant 0 : i32
    %c0_i32_0 = arith.constant 0 : i32
    %c0_i32_1 = arith.constant 0 : i32
    return %c0_i32, %c0_i32_0 : i32, i32
  }
  func.func @transform_14(%arg0: i32) -> (i32, i32) {
    %c0_i32 = arith.constant 0 : i32
    %c0_i32_0 = arith.constant 0 : i32
    %c0_i32_1 = arith.constant 0 : i32
    return %c0_i32, %c0_i32_0 : i32, i32
  }
  func.func @transform_15(%arg0: i32) -> (i32, i32, i32) {
    %c0_i32 = arith.constant 0 : i32
    %c0_i32_0 = arith.constant 0 : i32
    %c0_i32_1 = arith.constant 0 : i32
    %c0_i32_2 = arith.constant 0 : i32
    return %c0_i32, %c0_i32_0, %c0_i32_1 : i32, i32, i32
  }
  func.func @transform_16(%arg0: i32) -> (i32, i32, i32) {
    %c0_i32 = arith.constant 0 : i32
    %c0_i32_0 = arith.constant 0 : i32
    %c0_i32_1 = arith.constant 0 : i32
    %c0_i32_2 = arith.constant 0 : i32
    return %c0_i32, %c0_i32_0, %c0_i32_1 : i32, i32, i32
  }
  func.func @transform_17(%arg0: i32) -> (i32, i32, i32, i32, i32) {
    %c0_i32 = arith.constant 0 : i32
    %c0_i32_0 = arith.constant 0 : i32
    %c0_i32_1 = arith.constant 0 : i32
    %c0_i32_2 = arith.constant 0 : i32
    %c0_i32_3 = arith.constant 0 : i32
    %c0_i32_4 = arith.constant 0 : i32
    return %c0_i32, %c0_i32_0, %c0_i32_1, %c0_i32_2, %c0_i32_3 : i32, i32, i32, i32, i32
  }
  func.func @transform_18(%arg0: i32) -> (i32, i32, i32, i32, i32) {
    %c0_i32 = arith.constant 0 : i32
    %c0_i32_0 = arith.constant 0 : i32
    %c0_i32_1 = arith.constant 0 : i32
    %c0_i32_2 = arith.constant 0 : i32
    %c0_i32_3 = arith.constant 0 : i32
    %c0_i32_4 = arith.constant 0 : i32
    return %c0_i32, %c0_i32_0, %c0_i32_1, %c0_i32_2, %c0_i32_3 : i32, i32, i32, i32, i32
  }
  func.func @transform_19(%arg0: i32) -> (i32, i32, i32) {
    %c0_i32 = arith.constant 0 : i32
    %c0_i32_0 = arith.constant 0 : i32
    %c0_i32_1 = arith.constant 0 : i32
    %c0_i32_2 = arith.constant 0 : i32
    return %c0_i32, %c0_i32_0, %c0_i32_1 : i32, i32, i32
  }
  func.func @transform_20(%arg0: i32) -> (i32, i32, i32) {
    %c0_i32 = arith.constant 0 : i32
    %c0_i32_0 = arith.constant 0 : i32
    %c0_i32_1 = arith.constant 0 : i32
    %c0_i32_2 = arith.constant 0 : i32
    return %c0_i32, %c0_i32_0, %c0_i32_1 : i32, i32, i32
  }
  func.func @transform_21(%arg0: i32) -> (i32, i32, i32) {
    %c0_i32 = arith.constant 0 : i32
    %c0_i32_0 = arith.constant 0 : i32
    %c0_i32_1 = arith.constant 0 : i32
    %c0_i32_2 = arith.constant 0 : i32
    return %c0_i32, %c0_i32_0, %c0_i32_1 : i32, i32, i32
  }
  func.func @transform_22(%arg0: i32) -> (i32, i32, i32) {
    %c0_i32 = arith.constant 0 : i32
    %c0_i32_0 = arith.constant 0 : i32
    %c0_i32_1 = arith.constant 0 : i32
    %c0_i32_2 = arith.constant 0 : i32
    return %c0_i32, %c0_i32_0, %c0_i32_1 : i32, i32, i32
  }
  func.func @transform_23(%arg0: i32) -> (i32, i32, i32) {
    %c0_i32 = arith.constant 0 : i32
    %c0_i32_0 = arith.constant 0 : i32
    %c0_i32_1 = arith.constant 0 : i32
    %c0_i32_2 = arith.constant 0 : i32
    return %c0_i32, %c0_i32_0, %c0_i32_1 : i32, i32, i32
  }
  func.func @transform_24(%arg0: i32) -> (i32, i32, i32) {
    %c0_i32 = arith.constant 0 : i32
    %c0_i32_0 = arith.constant 0 : i32
    %c0_i32_1 = arith.constant 0 : i32
    %c0_i32_2 = arith.constant 0 : i32
    return %c0_i32, %c0_i32_0, %c0_i32_1 : i32, i32, i32
  }
  func.func @transform_25(%arg0: i32) -> (i32, i32, i32) {
    %c0_i32 = arith.constant 0 : i32
    %c0_i32_0 = arith.constant 0 : i32
    %c0_i32_1 = arith.constant 0 : i32
    %c0_i32_2 = arith.constant 0 : i32
    return %c0_i32, %c0_i32_0, %c0_i32_1 : i32, i32, i32
  }
  func.func @transform_26(%arg0: i32) -> (i32, i32, i32) {
    %c0_i32 = arith.constant 0 : i32
    %c0_i32_0 = arith.constant 0 : i32
    %c0_i32_1 = arith.constant 0 : i32
    %c0_i32_2 = arith.constant 0 : i32
    return %c0_i32, %c0_i32_0, %c0_i32_1 : i32, i32, i32
  }
  func.func @transform_27(%arg0: i32) -> (i32, i32, i32) {
    %c0_i32 = arith.constant 0 : i32
    %c0_i32_0 = arith.constant 0 : i32
    %c0_i32_1 = arith.constant 0 : i32
    %c0_i32_2 = arith.constant 0 : i32
    return %c0_i32, %c0_i32_0, %c0_i32_1 : i32, i32, i32
  }
  func.func @transform_28(%arg0: i32) -> (i32, i32) {
    %c0_i32 = arith.constant 0 : i32
    %c0_i32_0 = arith.constant 0 : i32
    %c0_i32_1 = arith.constant 0 : i32
    return %c0_i32, %c0_i32_0 : i32, i32
  }
  func.func @transform_29(%arg0: i32) -> (i32, i32) {
    %c0_i32 = arith.constant 0 : i32
    %c0_i32_0 = arith.constant 0 : i32
    %c0_i32_1 = arith.constant 0 : i32
    return %c0_i32, %c0_i32_0 : i32, i32
  }
  func.func @transform_30(%arg0: i32) -> (i32, i32, i32) {
    %c0_i32 = arith.constant 0 : i32
    %c0_i32_0 = arith.constant 0 : i32
    %c0_i32_1 = arith.constant 0 : i32
    return %arg0, %c0_i32, %c0_i32_0 : i32, i32, i32
  }
}

module attributes {stable_mosaic.version = 11 : i64} {
  func.func @_decoder_kernel(%arg0: i32, %arg1: memref<1x6x48xf32, #tpu.memory_space<vmem>>, %arg2: memref<1x6x64xf32, #tpu.memory_space<vmem>>, %arg3: memref<1x4x48xf32, #tpu.memory_space<vmem>>, %arg4: memref<1x10x64xf32, #tpu.memory_space<vmem>>, %arg5: memref<48x48xf32, #tpu.memory_space<vmem>>, %arg6: memref<64x48xf32, #tpu.memory_space<vmem>>, %arg7: memref<1x48xf32, #tpu.memory_space<vmem>>, %arg8: memref<3x1x48xf32, #tpu.memory_space<vmem>>, %arg9: memref<3x1x48xf32, #tpu.memory_space<vmem>>, %arg10: memref<3x3x2x48x24xf32, #tpu.memory_space<vmem>>, %arg11: memref<3x3x2x1x24xf32, #tpu.memory_space<vmem>>, %arg12: memref<3x48x48xf32, #tpu.memory_space<vmem>>, %arg13: memref<3x1x48xf32, #tpu.memory_space<vmem>>, %arg14: memref<3x1x48xf32, #tpu.memory_space<vmem>>, %arg15: memref<3x1x48xf32, #tpu.memory_space<vmem>>, %arg16: memref<3x48x192xf32, #tpu.memory_space<vmem>>, %arg17: memref<3x64x192xf32, #tpu.memory_space<vmem>>, %arg18: memref<3x1x192xf32, #tpu.memory_space<vmem>>, %arg19: memref<3x192x48xf32, #tpu.memory_space<vmem>>, %arg20: memref<3x1x48xf32, #tpu.memory_space<vmem>>, %arg21: memref<48x64xf32, #tpu.memory_space<vmem>>, %arg22: memref<1x64xf32, #tpu.memory_space<vmem>>, %arg23: memref<1x4x64xf32, #tpu.memory_space<vmem>>, %arg24: memref<10x48xf32, #tpu.memory_space<vmem>>, %arg25: memref<10x48xf32, #tpu.memory_space<vmem>>) attributes {dimension_semantics = [#tpu.dimension_semantics<parallel>], iteration_bounds = array<i64: 2>, scalar_prefetch = 0 : i64, scratch_operands = 2 : i64, tpu.core_type = #tpu.core_type<tc>, window_params = [{transform_indices = @transform_0, window_bounds = array<i64: 1, 6, 48>}, {transform_indices = @transform_1, window_bounds = array<i64: 1, 6, 64>}, {transform_indices = @transform_2, window_bounds = array<i64: 1, 4, 48>}, {transform_indices = @transform_3, window_bounds = array<i64: 1, 10, 64>}, {pipeline_mode = #tpu.pipeline_mode<synchronous>, transform_indices = @transform_4, window_bounds = array<i64: 48, 48>}, {pipeline_mode = #tpu.pipeline_mode<synchronous>, transform_indices = @transform_5, window_bounds = array<i64: 64, 48>}, {pipeline_mode = #tpu.pipeline_mode<synchronous>, transform_indices = @transform_6, window_bounds = array<i64: 1, 48>}, {pipeline_mode = #tpu.pipeline_mode<synchronous>, transform_indices = @transform_7, window_bounds = array<i64: 3, 1, 48>}, {pipeline_mode = #tpu.pipeline_mode<synchronous>, transform_indices = @transform_8, window_bounds = array<i64: 3, 1, 48>}, {pipeline_mode = #tpu.pipeline_mode<synchronous>, transform_indices = @transform_9, window_bounds = array<i64: 3, 3, 2, 48, 24>}, {pipeline_mode = #tpu.pipeline_mode<synchronous>, transform_indices = @transform_10, window_bounds = array<i64: 3, 3, 2, 1, 24>}, {pipeline_mode = #tpu.pipeline_mode<synchronous>, transform_indices = @transform_11, window_bounds = array<i64: 3, 48, 48>}, {pipeline_mode = #tpu.pipeline_mode<synchronous>, transform_indices = @transform_12, window_bounds = array<i64: 3, 1, 48>}, {pipeline_mode = #tpu.pipeline_mode<synchronous>, transform_indices = @transform_13, window_bounds = array<i64: 3, 1, 48>}, {pipeline_mode = #tpu.pipeline_mode<synchronous>, transform_indices = @transform_14, window_bounds = array<i64: 3, 1, 48>}, {pipeline_mode = #tpu.pipeline_mode<synchronous>, transform_indices = @transform_15, window_bounds = array<i64: 3, 48, 192>}, {pipeline_mode = #tpu.pipeline_mode<synchronous>, transform_indices = @transform_16, window_bounds = array<i64: 3, 64, 192>}, {pipeline_mode = #tpu.pipeline_mode<synchronous>, transform_indices = @transform_17, window_bounds = array<i64: 3, 1, 192>}, {pipeline_mode = #tpu.pipeline_mode<synchronous>, transform_indices = @transform_18, window_bounds = array<i64: 3, 192, 48>}, {pipeline_mode = #tpu.pipeline_mode<synchronous>, transform_indices = @transform_19, window_bounds = array<i64: 3, 1, 48>}, {pipeline_mode = #tpu.pipeline_mode<synchronous>, transform_indices = @transform_20, window_bounds = array<i64: 48, 64>}, {pipeline_mode = #tpu.pipeline_mode<synchronous>, transform_indices = @transform_21, window_bounds = array<i64: 1, 64>}, {transform_indices = @transform_22, window_bounds = array<i64: 1, 4, 64>}]} {
    %c0 = arith.constant 0 : index
    %c0_0 = arith.constant 0 : index
    %c0_1 = arith.constant 0 : index
    %0 = vector.load %arg1[%c0, %c0_0, %c0_1] : memref<1x6x48xf32, #tpu.memory_space<vmem>>, vector<1x6x48xf32>
    %1 = vector.shape_cast %0 : vector<1x6x48xf32> to vector<6x48xf32>
    %c0_2 = arith.constant 0 : index
    %c0_3 = arith.constant 0 : index
    %c0_4 = arith.constant 0 : index
    %2 = vector.load %arg2[%c0_2, %c0_3, %c0_4] : memref<1x6x64xf32, #tpu.memory_space<vmem>>, vector<1x6x64xf32>
    %3 = vector.shape_cast %2 : vector<1x6x64xf32> to vector<6x64xf32>
    %c0_5 = arith.constant 0 : index
    %c0_6 = arith.constant 0 : index
    %c0_7 = arith.constant 0 : index
    %4 = vector.load %arg3[%c0_5, %c0_6, %c0_7] : memref<1x4x48xf32, #tpu.memory_space<vmem>>, vector<1x4x48xf32>
    %5 = vector.shape_cast %4 : vector<1x4x48xf32> to vector<4x48xf32>
    %c0_8 = arith.constant 0 : index
    %c0_9 = arith.constant 0 : index
    %c0_10 = arith.constant 0 : index
    %6 = vector.load %arg4[%c0_8, %c0_9, %c0_10] : memref<1x10x64xf32, #tpu.memory_space<vmem>>, vector<1x10x64xf32>
    %7 = vector.shape_cast %6 : vector<1x10x64xf32> to vector<10x64xf32>
    %c0_11 = arith.constant 0 : index
    %c0_12 = arith.constant 0 : index
    %8 = vector.load %arg5[%c0_11, %c0_12] : memref<48x48xf32, #tpu.memory_space<vmem>>, vector<48x48xf32>
    %cst = arith.constant dense<0.000000e+00> : vector<6x48xf32>
    %9 = tpu.matmul %1, %8, %cst {dimension_numbers = #tpu.dot_dimension_numbers<[1], [0], [0], [1], [0, 0, 1, 1], [], []>} : vector<6x48xf32>, vector<48x48xf32>, vector<6x48xf32> -> vector<6x48xf32>
    %c0_13 = arith.constant 0 : index
    %c0_14 = arith.constant 0 : index
    %10 = vector.load %arg6[%c0_13, %c0_14] : memref<64x48xf32, #tpu.memory_space<vmem>>, vector<64x48xf32>
    %cst_15 = arith.constant dense<0.000000e+00> : vector<6x48xf32>
    %11 = tpu.matmul %3, %10, %cst_15 {dimension_numbers = #tpu.dot_dimension_numbers<[1], [0], [0], [1], [0, 0, 1, 1], [], []>} : vector<6x64xf32>, vector<64x48xf32>, vector<6x48xf32> -> vector<6x48xf32>
    %12 = arith.addf %9, %11 : vector<6x48xf32>
    %c0_16 = arith.constant 0 : index
    %c0_17 = arith.constant 0 : index
    %13 = vector.load %arg7[%c0_16, %c0_17] : memref<1x48xf32, #tpu.memory_space<vmem>>, vector<1x48xf32>
    %14 = vector.broadcast %13 : vector<1x48xf32> to vector<6x48xf32>
    %15 = arith.addf %12, %14 : vector<6x48xf32>
    %c0_18 = arith.constant 0 : index
    %c0_19 = arith.constant 0 : index
    %16 = vector.load %arg24[%c0_18, %c0_19] : memref<10x48xf32, #tpu.memory_space<vmem>>, vector<6x48xf32>
    tpu.vector_store %arg24[%c0_18, %c0_19], %15 {strides = array<i32>} : memref<10x48xf32, #tpu.memory_space<vmem>>, vector<6x48xf32>,
    %c6 = arith.constant 6 : index
    %c0_20 = arith.constant 0 : index
    %17 = vector.load %arg24[%c6, %c0_20] : memref<10x48xf32, #tpu.memory_space<vmem>>, vector<4x48xf32>
    tpu.vector_store %arg24[%c6, %c0_20], %5 {strides = array<i32>} : memref<10x48xf32, #tpu.memory_space<vmem>>, vector<4x48xf32>,
    %c0_21 = arith.constant 0 : index
    %c0_22 = arith.constant 0 : index
    %18 = vector.load %arg24[%c0_21, %c0_22] : memref<10x48xf32, #tpu.memory_space<vmem>>, vector<10x48xf32>
    %c0_23 = arith.constant 0 : index
    %c0_24 = arith.constant 0 : index
    %c0_25 = arith.constant 0 : index
    %19 = vector.load %arg8[%c0_23, %c0_24, %c0_25] : memref<3x1x48xf32, #tpu.memory_space<vmem>>, vector<1x1x48xf32>
    %20 = vector.shape_cast %19 : vector<1x1x48xf32> to vector<1x48xf32>
    %c0_26 = arith.constant 0 : index
    %c0_27 = arith.constant 0 : index
    %c0_28 = arith.constant 0 : index
    %21 = vector.load %arg9[%c0_26, %c0_27, %c0_28] : memref<3x1x48xf32, #tpu.memory_space<vmem>>, vector<1x1x48xf32>
    %22 = vector.shape_cast %21 : vector<1x1x48xf32> to vector<1x48xf32>
    %cst_29 = arith.constant dense<0.000000e+00> : vector<10xf32>
    %23 = vector.multi_reduction <add>, %18, %cst_29 [1] : vector<10x48xf32> to vector<10xf32>
    %24 = vector.shape_cast %23 : vector<10xf32> to vector<10x1xf32>
    %cst_30 = arith.constant 4.800000e+01 : f32
    %25 = vector.broadcast %cst_30 : f32 to vector<10x1xf32>
    %26 = arith.divf %24, %25 : vector<10x1xf32>
    %27 = vector.broadcast %26 : vector<10x1xf32> to vector<10x48xf32>
    %28 = arith.subf %18, %27 : vector<10x48xf32>
    %29 = arith.mulf %28, %28 : vector<10x48xf32>
    %cst_31 = arith.constant dense<0.000000e+00> : vector<10xf32>
    %30 = vector.multi_reduction <add>, %29, %cst_31 [1] : vector<10x48xf32> to vector<10xf32>
    %31 = vector.shape_cast %30 : vector<10xf32> to vector<10x1xf32>
    %cst_32 = arith.constant 4.800000e+01 : f32
    %32 = vector.broadcast %cst_32 : f32 to vector<10x1xf32>
    %33 = arith.divf %31, %32 : vector<10x1xf32>
    %cst_33 = arith.constant 9.99999974E-6 : f32
    %34 = vector.broadcast %cst_33 : f32 to vector<10x1xf32>
    %35 = arith.addf %33, %34 : vector<10x1xf32>
    %36 = math.rsqrt %35 : vector<10x1xf32>
    %37 = vector.broadcast %36 : vector<10x1xf32> to vector<10x48xf32>
    %38 = arith.mulf %28, %37 : vector<10x48xf32>
    %39 = vector.broadcast %20 : vector<1x48xf32> to vector<10x48xf32>
    %40 = arith.mulf %38, %39 : vector<10x48xf32>
    %41 = vector.broadcast %22 : vector<1x48xf32> to vector<10x48xf32>
    %42 = arith.addf %40, %41 : vector<10x48xf32>
    %c0_34 = arith.constant 0 : index
    %c0_35 = arith.constant 0 : index
    %c0_36 = arith.constant 0 : index
    %c0_37 = arith.constant 0 : index
    %c0_38 = arith.constant 0 : index
    %43 = vector.load %arg10[%c0_34, %c0_35, %c0_36, %c0_37, %c0_38] : memref<3x3x2x48x24xf32, #tpu.memory_space<vmem>>, vector<1x1x1x48x24xf32>
    %44 = vector.shape_cast %43 : vector<1x1x1x48x24xf32> to vector<48x24xf32>
    %cst_39 = arith.constant dense<0.000000e+00> : vector<10x24xf32>
    %45 = tpu.matmul %42, %44, %cst_39 {dimension_numbers = #tpu.dot_dimension_numbers<[1], [0], [0], [1], [0, 0, 1, 1], [], []>} : vector<10x48xf32>, vector<48x24xf32>, vector<10x24xf32> -> vector<10x24xf32>
    %c0_40 = arith.constant 0 : index
    %c0_41 = arith.constant 0 : index
    %c0_42 = arith.constant 0 : index
    %c0_43 = arith.constant 0 : index
    %c0_44 = arith.constant 0 : index
    %46 = vector.load %arg11[%c0_40, %c0_41, %c0_42, %c0_43, %c0_44] : memref<3x3x2x1x24xf32, #tpu.memory_space<vmem>>, vector<1x1x1x1x24xf32>
    %47 = vector.shape_cast %46 : vector<1x1x1x1x24xf32> to vector<1x24xf32>
    %48 = vector.broadcast %47 : vector<1x24xf32> to vector<10x24xf32>
    %49 = arith.addf %45, %48 : vector<10x24xf32>
    %c0_45 = arith.constant 0 : index
    %c1 = arith.constant 1 : index
    %c0_46 = arith.constant 0 : index
    %c0_47 = arith.constant 0 : index
    %c0_48 = arith.constant 0 : index
    %50 = vector.load %arg10[%c0_45, %c1, %c0_46, %c0_47, %c0_48] : memref<3x3x2x48x24xf32, #tpu.memory_space<vmem>>, vector<1x1x1x48x24xf32>
    %51 = vector.shape_cast %50 : vector<1x1x1x48x24xf32> to vector<48x24xf32>
    %cst_49 = arith.constant dense<0.000000e+00> : vector<10x24xf32>
    %52 = tpu.matmul %42, %51, %cst_49 {dimension_numbers = #tpu.dot_dimension_numbers<[1], [0], [0], [1], [0, 0, 1, 1], [], []>} : vector<10x48xf32>, vector<48x24xf32>, vector<10x24xf32> -> vector<10x24xf32>
    %c0_50 = arith.constant 0 : index
    %c1_51 = arith.constant 1 : index
    %c0_52 = arith.constant 0 : index
    %c0_53 = arith.constant 0 : index
    %c0_54 = arith.constant 0 : index
    %53 = vector.load %arg11[%c0_50, %c1_51, %c0_52, %c0_53, %c0_54] : memref<3x3x2x1x24xf32, #tpu.memory_space<vmem>>, vector<1x1x1x1x24xf32>
    %54 = vector.shape_cast %53 : vector<1x1x1x1x24xf32> to vector<1x24xf32>
    %55 = vector.broadcast %54 : vector<1x24xf32> to vector<10x24xf32>
    %56 = arith.addf %52, %55 : vector<10x24xf32>
    %c0_55 = arith.constant 0 : index
    %c2 = arith.constant 2 : index
    %c0_56 = arith.constant 0 : index
    %c0_57 = arith.constant 0 : index
    %c0_58 = arith.constant 0 : index
    %57 = vector.load %arg10[%c0_55, %c2, %c0_56, %c0_57, %c0_58] : memref<3x3x2x48x24xf32, #tpu.memory_space<vmem>>, vector<1x1x1x48x24xf32>
    %58 = vector.shape_cast %57 : vector<1x1x1x48x24xf32> to vector<48x24xf32>
    %cst_59 = arith.constant dense<0.000000e+00> : vector<10x24xf32>
    %59 = tpu.matmul %42, %58, %cst_59 {dimension_numbers = #tpu.dot_dimension_numbers<[1], [0], [0], [1], [0, 0, 1, 1], [], []>} : vector<10x48xf32>, vector<48x24xf32>, vector<10x24xf32> -> vector<10x24xf32>
    %c0_60 = arith.constant 0 : index
    %c2_61 = arith.constant 2 : index
    %c0_62 = arith.constant 0 : index
    %c0_63 = arith.constant 0 : index
    %c0_64 = arith.constant 0 : index
    %60 = vector.load %arg11[%c0_60, %c2_61, %c0_62, %c0_63, %c0_64] : memref<3x3x2x1x24xf32, #tpu.memory_space<vmem>>, vector<1x1x1x1x24xf32>
    %61 = vector.shape_cast %60 : vector<1x1x1x1x24xf32> to vector<1x24xf32>
    %62 = vector.broadcast %61 : vector<1x24xf32> to vector<10x24xf32>
    %63 = arith.addf %59, %62 : vector<10x24xf32>
    %cst_65 = arith.constant dense<0.000000e+00> : vector<10x10xf32>
    %64 = tpu.matmul %49, %56, %cst_65 {dimension_numbers = #tpu.dot_dimension_numbers<[1], [1], [0], [0], [0, 0, 1, 0], [], []>} : vector<10x24xf32>, vector<10x24xf32>, vector<10x10xf32> -> vector<10x10xf32>
    %cst_66 = arith.constant 0.204124153 : f32
    %65 = vector.broadcast %cst_66 : f32 to vector<10x10xf32>
    %66 = arith.mulf %64, %65 : vector<10x10xf32>
    %cst_67 = arith.constant dense<0xFF800000> : vector<10xf32>
    %67 = vector.multi_reduction <maximumf>, %66, %cst_67 [1] : vector<10x10xf32> to vector<10xf32>
    %68 = vector.shape_cast %67 : vector<10xf32> to vector<10x1xf32>
    %69 = vector.broadcast %68 : vector<10x1xf32> to vector<10x10xf32>
    %70 = arith.subf %66, %69 : vector<10x10xf32>
    %71 = math.exp %70 : vector<10x10xf32>
    %cst_68 = arith.constant dense<0.000000e+00> : vector<10xf32>
    %72 = vector.multi_reduction <add>, %71, %cst_68 [1] : vector<10x10xf32> to vector<10xf32>
    %73 = vector.shape_cast %72 : vector<10xf32> to vector<10x1xf32>
    %74 = tpu.reciprocal %73 {approx = true} : vector<10x1xf32> -> vector<10x1xf32>
    %75 = vector.broadcast %74 : vector<10x1xf32> to vector<10x10xf32>
    %76 = arith.mulf %71, %75 : vector<10x10xf32>
    %cst_69 = arith.constant dense<0.000000e+00> : vector<10x24xf32>
    %77 = tpu.matmul %76, %63, %cst_69 {dimension_numbers = #tpu.dot_dimension_numbers<[1], [0], [0], [1], [0, 0, 1, 1], [], []>} : vector<10x10xf32>, vector<10x24xf32>, vector<10x24xf32> -> vector<10x24xf32>
    %c0_70 = arith.constant 0 : index
    %c0_71 = arith.constant 0 : index
    %78 = vector.load %arg25[%c0_70, %c0_71] : memref<10x48xf32, #tpu.memory_space<vmem>>, vector<10x24xf32>
    tpu.vector_store %arg25[%c0_70, %c0_71], %77 {strides = array<i32>} : memref<10x48xf32, #tpu.memory_space<vmem>>, vector<10x24xf32>,
    %c0_72 = arith.constant 0 : index
    %c0_73 = arith.constant 0 : index
    %c1_74 = arith.constant 1 : index
    %c0_75 = arith.constant 0 : index
    %c0_76 = arith.constant 0 : index
    %79 = vector.load %arg10[%c0_72, %c0_73, %c1_74, %c0_75, %c0_76] : memref<3x3x2x48x24xf32, #tpu.memory_space<vmem>>, vector<1x1x1x48x24xf32>
    %80 = vector.shape_cast %79 : vector<1x1x1x48x24xf32> to vector<48x24xf32>
    %cst_77 = arith.constant dense<0.000000e+00> : vector<10x24xf32>
    %81 = tpu.matmul %42, %80, %cst_77 {dimension_numbers = #tpu.dot_dimension_numbers<[1], [0], [0], [1], [0, 0, 1, 1], [], []>} : vector<10x48xf32>, vector<48x24xf32>, vector<10x24xf32> -> vector<10x24xf32>
    %c0_78 = arith.constant 0 : index
    %c0_79 = arith.constant 0 : index
    %c1_80 = arith.constant 1 : index
    %c0_81 = arith.constant 0 : index
    %c0_82 = arith.constant 0 : index
    %82 = vector.load %arg11[%c0_78, %c0_79, %c1_80, %c0_81, %c0_82] : memref<3x3x2x1x24xf32, #tpu.memory_space<vmem>>, vector<1x1x1x1x24xf32>
    %83 = vector.shape_cast %82 : vector<1x1x1x1x24xf32> to vector<1x24xf32>
    %84 = vector.broadcast %83 : vector<1x24xf32> to vector<10x24xf32>
    %85 = arith.addf %81, %84 : vector<10x24xf32>
    %c0_83 = arith.constant 0 : index
    %c1_84 = arith.constant 1 : index
    %c1_85 = arith.constant 1 : index
    %c0_86 = arith.constant 0 : index
    %c0_87 = arith.constant 0 : index
    %86 = vector.load %arg10[%c0_83, %c1_84, %c1_85, %c0_86, %c0_87] : memref<3x3x2x48x24xf32, #tpu.memory_space<vmem>>, vector<1x1x1x48x24xf32>
    %87 = vector.shape_cast %86 : vector<1x1x1x48x24xf32> to vector<48x24xf32>
    %cst_88 = arith.constant dense<0.000000e+00> : vector<10x24xf32>
    %88 = tpu.matmul %42, %87, %cst_88 {dimension_numbers = #tpu.dot_dimension_numbers<[1], [0], [0], [1], [0, 0, 1, 1], [], []>} : vector<10x48xf32>, vector<48x24xf32>, vector<10x24xf32> -> vector<10x24xf32>
    %c0_89 = arith.constant 0 : index
    %c1_90 = arith.constant 1 : index
    %c1_91 = arith.constant 1 : index
    %c0_92 = arith.constant 0 : index
    %c0_93 = arith.constant 0 : index
    %89 = vector.load %arg11[%c0_89, %c1_90, %c1_91, %c0_92, %c0_93] : memref<3x3x2x1x24xf32, #tpu.memory_space<vmem>>, vector<1x1x1x1x24xf32>
    %90 = vector.shape_cast %89 : vector<1x1x1x1x24xf32> to vector<1x24xf32>
    %91 = vector.broadcast %90 : vector<1x24xf32> to vector<10x24xf32>
    %92 = arith.addf %88, %91 : vector<10x24xf32>
    %c0_94 = arith.constant 0 : index
    %c2_95 = arith.constant 2 : index
    %c1_96 = arith.constant 1 : index
    %c0_97 = arith.constant 0 : index
    %c0_98 = arith.constant 0 : index
    %93 = vector.load %arg10[%c0_94, %c2_95, %c1_96, %c0_97, %c0_98] : memref<3x3x2x48x24xf32, #tpu.memory_space<vmem>>, vector<1x1x1x48x24xf32>
    %94 = vector.shape_cast %93 : vector<1x1x1x48x24xf32> to vector<48x24xf32>
    %cst_99 = arith.constant dense<0.000000e+00> : vector<10x24xf32>
    %95 = tpu.matmul %42, %94, %cst_99 {dimension_numbers = #tpu.dot_dimension_numbers<[1], [0], [0], [1], [0, 0, 1, 1], [], []>} : vector<10x48xf32>, vector<48x24xf32>, vector<10x24xf32> -> vector<10x24xf32>
    %c0_100 = arith.constant 0 : index
    %c2_101 = arith.constant 2 : index
    %c1_102 = arith.constant 1 : index
    %c0_103 = arith.constant 0 : index
    %c0_104 = arith.constant 0 : index
    %96 = vector.load %arg11[%c0_100, %c2_101, %c1_102, %c0_103, %c0_104] : memref<3x3x2x1x24xf32, #tpu.memory_space<vmem>>, vector<1x1x1x1x24xf32>
    %97 = vector.shape_cast %96 : vector<1x1x1x1x24xf32> to vector<1x24xf32>
    %98 = vector.broadcast %97 : vector<1x24xf32> to vector<10x24xf32>
    %99 = arith.addf %95, %98 : vector<10x24xf32>
    %cst_105 = arith.constant dense<0.000000e+00> : vector<10x10xf32>
    %100 = tpu.matmul %85, %92, %cst_105 {dimension_numbers = #tpu.dot_dimension_numbers<[1], [1], [0], [0], [0, 0, 1, 0], [], []>} : vector<10x24xf32>, vector<10x24xf32>, vector<10x10xf32> -> vector<10x10xf32>
    %cst_106 = arith.constant 0.204124153 : f32
    %101 = vector.broadcast %cst_106 : f32 to vector<10x10xf32>
    %102 = arith.mulf %100, %101 : vector<10x10xf32>
    %cst_107 = arith.constant dense<0xFF800000> : vector<10xf32>
    %103 = vector.multi_reduction <maximumf>, %102, %cst_107 [1] : vector<10x10xf32> to vector<10xf32>
    %104 = vector.shape_cast %103 : vector<10xf32> to vector<10x1xf32>
    %105 = vector.broadcast %104 : vector<10x1xf32> to vector<10x10xf32>
    %106 = arith.subf %102, %105 : vector<10x10xf32>
    %107 = math.exp %106 : vector<10x10xf32>
    %cst_108 = arith.constant dense<0.000000e+00> : vector<10xf32>
    %108 = vector.multi_reduction <add>, %107, %cst_108 [1] : vector<10x10xf32> to vector<10xf32>
    %109 = vector.shape_cast %108 : vector<10xf32> to vector<10x1xf32>
    %110 = tpu.reciprocal %109 {approx = true} : vector<10x1xf32> -> vector<10x1xf32>
    %111 = vector.broadcast %110 : vector<10x1xf32> to vector<10x10xf32>
    %112 = arith.mulf %107, %111 : vector<10x10xf32>
    %cst_109 = arith.constant dense<0.000000e+00> : vector<10x24xf32>
    %113 = tpu.matmul %112, %99, %cst_109 {dimension_numbers = #tpu.dot_dimension_numbers<[1], [0], [0], [1], [0, 0, 1, 1], [], []>} : vector<10x10xf32>, vector<10x24xf32>, vector<10x24xf32> -> vector<10x24xf32>
    %c0_110 = arith.constant 0 : index
    %c24 = arith.constant 24 : index
    %114 = vector.load %arg25[%c0_110, %c24] : memref<10x48xf32, #tpu.memory_space<vmem>>, vector<10x24xf32>
    tpu.vector_store %arg25[%c0_110, %c24], %113 {strides = array<i32>} : memref<10x48xf32, #tpu.memory_space<vmem>>, vector<10x24xf32>,
    %c0_111 = arith.constant 0 : index
    %c0_112 = arith.constant 0 : index
    %115 = vector.load %arg25[%c0_111, %c0_112] : memref<10x48xf32, #tpu.memory_space<vmem>>, vector<10x48xf32>
    %c0_113 = arith.constant 0 : index
    %c0_114 = arith.constant 0 : index
    %c0_115 = arith.constant 0 : index
    %116 = vector.load %arg12[%c0_113, %c0_114, %c0_115] : memref<3x48x48xf32, #tpu.memory_space<vmem>>, vector<1x48x48xf32>
    %117 = vector.shape_cast %116 : vector<1x48x48xf32> to vector<48x48xf32>
    %cst_116 = arith.constant dense<0.000000e+00> : vector<10x48xf32>
    %118 = tpu.matmul %115, %117, %cst_116 {dimension_numbers = #tpu.dot_dimension_numbers<[1], [0], [0], [1], [0, 0, 1, 1], [], []>} : vector<10x48xf32>, vector<48x48xf32>, vector<10x48xf32> -> vector<10x48xf32>
    %119 = arith.addf %18, %118 : vector<10x48xf32>
    %c0_117 = arith.constant 0 : index
    %c0_118 = arith.constant 0 : index
    %c0_119 = arith.constant 0 : index
    %120 = vector.load %arg13[%c0_117, %c0_118, %c0_119] : memref<3x1x48xf32, #tpu.memory_space<vmem>>, vector<1x1x48xf32>
    %121 = vector.shape_cast %120 : vector<1x1x48xf32> to vector<1x48xf32>
    %122 = vector.broadcast %121 : vector<1x48xf32> to vector<10x48xf32>
    %123 = arith.addf %119, %122 : vector<10x48xf32>
    %c0_120 = arith.constant 0 : index
    %c0_121 = arith.constant 0 : index
    %c0_122 = arith.constant 0 : index
    %124 = vector.load %arg14[%c0_120, %c0_121, %c0_122] : memref<3x1x48xf32, #tpu.memory_space<vmem>>, vector<1x1x48xf32>
    %125 = vector.shape_cast %124 : vector<1x1x48xf32> to vector<1x48xf32>
    %c0_123 = arith.constant 0 : index
    %c0_124 = arith.constant 0 : index
    %c0_125 = arith.constant 0 : index
    %126 = vector.load %arg15[%c0_123, %c0_124, %c0_125] : memref<3x1x48xf32, #tpu.memory_space<vmem>>, vector<1x1x48xf32>
    %127 = vector.shape_cast %126 : vector<1x1x48xf32> to vector<1x48xf32>
    %cst_126 = arith.constant dense<0.000000e+00> : vector<10xf32>
    %128 = vector.multi_reduction <add>, %123, %cst_126 [1] : vector<10x48xf32> to vector<10xf32>
    %129 = vector.shape_cast %128 : vector<10xf32> to vector<10x1xf32>
    %cst_127 = arith.constant 4.800000e+01 : f32
    %130 = vector.broadcast %cst_127 : f32 to vector<10x1xf32>
    %131 = arith.divf %129, %130 : vector<10x1xf32>
    %132 = vector.broadcast %131 : vector<10x1xf32> to vector<10x48xf32>
    %133 = arith.subf %123, %132 : vector<10x48xf32>
    %134 = arith.mulf %133, %133 : vector<10x48xf32>
    %cst_128 = arith.constant dense<0.000000e+00> : vector<10xf32>
    %135 = vector.multi_reduction <add>, %134, %cst_128 [1] : vector<10x48xf32> to vector<10xf32>
    %136 = vector.shape_cast %135 : vector<10xf32> to vector<10x1xf32>
    %cst_129 = arith.constant 4.800000e+01 : f32
    %137 = vector.broadcast %cst_129 : f32 to vector<10x1xf32>
    %138 = arith.divf %136, %137 : vector<10x1xf32>
    %cst_130 = arith.constant 9.99999974E-6 : f32
    %139 = vector.broadcast %cst_130 : f32 to vector<10x1xf32>
    %140 = arith.addf %138, %139 : vector<10x1xf32>
    %141 = math.rsqrt %140 : vector<10x1xf32>
    %142 = vector.broadcast %141 : vector<10x1xf32> to vector<10x48xf32>
    %143 = arith.mulf %133, %142 : vector<10x48xf32>
    %144 = vector.broadcast %125 : vector<1x48xf32> to vector<10x48xf32>
    %145 = arith.mulf %143, %144 : vector<10x48xf32>
    %146 = vector.broadcast %127 : vector<1x48xf32> to vector<10x48xf32>
    %147 = arith.addf %145, %146 : vector<10x48xf32>
    %c0_131 = arith.constant 0 : index
    %c0_132 = arith.constant 0 : index
    %c0_133 = arith.constant 0 : index
    %148 = vector.load %arg16[%c0_131, %c0_132, %c0_133] : memref<3x48x192xf32, #tpu.memory_space<vmem>>, vector<1x48x192xf32>
    %149 = vector.shape_cast %148 : vector<1x48x192xf32> to vector<48x192xf32>
    %cst_134 = arith.constant dense<0.000000e+00> : vector<10x192xf32>
    %150 = tpu.matmul %147, %149, %cst_134 {dimension_numbers = #tpu.dot_dimension_numbers<[1], [0], [0], [1], [0, 0, 1, 1], [], []>} : vector<10x48xf32>, vector<48x192xf32>, vector<10x192xf32> -> vector<10x192xf32>
    %c0_135 = arith.constant 0 : index
    %c0_136 = arith.constant 0 : index
    %c0_137 = arith.constant 0 : index
    %151 = vector.load %arg17[%c0_135, %c0_136, %c0_137] : memref<3x64x192xf32, #tpu.memory_space<vmem>>, vector<1x64x192xf32>
    %152 = vector.shape_cast %151 : vector<1x64x192xf32> to vector<64x192xf32>
    %cst_138 = arith.constant dense<0.000000e+00> : vector<10x192xf32>
    %153 = tpu.matmul %7, %152, %cst_138 {dimension_numbers = #tpu.dot_dimension_numbers<[1], [0], [0], [1], [0, 0, 1, 1], [], []>} : vector<10x64xf32>, vector<64x192xf32>, vector<10x192xf32> -> vector<10x192xf32>
    %154 = arith.addf %150, %153 : vector<10x192xf32>
    %c0_139 = arith.constant 0 : index
    %c0_140 = arith.constant 0 : index
    %c0_141 = arith.constant 0 : index
    %155 = vector.load %arg18[%c0_139, %c0_140, %c0_141] : memref<3x1x192xf32, #tpu.memory_space<vmem>>, vector<1x1x192xf32>
    %156 = vector.shape_cast %155 : vector<1x1x192xf32> to vector<1x192xf32>
    %157 = vector.broadcast %156 : vector<1x192xf32> to vector<10x192xf32>
    %158 = arith.addf %154, %157 : vector<10x192xf32>
    %cst_142 = arith.constant 5.000000e-01 : f32
    %159 = vector.broadcast %cst_142 : f32 to vector<10x192xf32>
    %160 = arith.mulf %159, %158 : vector<10x192xf32>
    %cst_143 = arith.constant 0.707106769 : f32
    %161 = vector.broadcast %cst_143 : f32 to vector<10x192xf32>
    %162 = arith.mulf %158, %161 : vector<10x192xf32>
    %163 = math.absf %162 : vector<10x192xf32>
    %cst_144 = arith.constant 0.327591091 : f32
    %164 = vector.broadcast %cst_144 : f32 to vector<10x192xf32>
    %165 = arith.mulf %164, %163 : vector<10x192xf32>
    %cst_145 = arith.constant 1.000000e+00 : f32
    %166 = vector.broadcast %cst_145 : f32 to vector<10x192xf32>
    %167 = arith.addf %166, %165 : vector<10x192xf32>
    %cst_146 = arith.constant 1.000000e+00 : f32
    %168 = vector.broadcast %cst_146 : f32 to vector<10x192xf32>
    %169 = arith.divf %168, %167 : vector<10x192xf32>
    %cst_147 = arith.constant 1.06140542 : f32
    %170 = vector.broadcast %cst_147 : f32 to vector<10x192xf32>
    %171 = arith.mulf %170, %169 : vector<10x192xf32>
    %cst_148 = arith.constant -1.45315206 : f32
    %172 = vector.broadcast %cst_148 : f32 to vector<10x192xf32>
    %173 = arith.addf %171, %172 : vector<10x192xf32>
    %174 = arith.mulf %173, %169 : vector<10x192xf32>
    %cst_149 = arith.constant 1.42141378 : f32
    %175 = vector.broadcast %cst_149 : f32 to vector<10x192xf32>
    %176 = arith.addf %174, %175 : vector<10x192xf32>
    %177 = arith.mulf %176, %169 : vector<10x192xf32>
    %cst_150 = arith.constant -0.284496725 : f32
    %178 = vector.broadcast %cst_150 : f32 to vector<10x192xf32>
    %179 = arith.addf %177, %178 : vector<10x192xf32>
    %180 = arith.mulf %179, %169 : vector<10x192xf32>
    %cst_151 = arith.constant 0.254829586 : f32
    %181 = vector.broadcast %cst_151 : f32 to vector<10x192xf32>
    %182 = arith.addf %180, %181 : vector<10x192xf32>
    %183 = arith.mulf %182, %169 : vector<10x192xf32>
    %cst_152 = arith.constant 0.000000e+00 : f32
    %184 = vector.broadcast %cst_152 : f32 to vector<10x192xf32>
    %185 = arith.subf %184, %163 : vector<10x192xf32>
    %186 = arith.mulf %185, %163 : vector<10x192xf32>
    %187 = math.exp %186 : vector<10x192xf32>
    %188 = arith.mulf %183, %187 : vector<10x192xf32>
    %cst_153 = arith.constant 1.000000e+00 : f32
    %189 = vector.broadcast %cst_153 : f32 to vector<10x192xf32>
    %190 = arith.subf %189, %188 : vector<10x192xf32>
    %cst_154 = arith.constant 0.000000e+00 : f32
    %191 = vector.broadcast %cst_154 : f32 to vector<10x192xf32>
    %192 = arith.cmpf oge, %162, %191 : vector<10x192xf32>
    %cst_155 = arith.constant 0.000000e+00 : f32
    %193 = vector.broadcast %cst_155 : f32 to vector<10x192xf32>
    %194 = arith.subf %193, %190 : vector<10x192xf32>
    %195 = arith.select %192, %190, %194 : vector<10x192xi1>, vector<10x192xf32>
    %cst_156 = arith.constant 1.000000e+00 : f32
    %196 = vector.broadcast %cst_156 : f32 to vector<10x192xf32>
    %197 = arith.addf %196, %195 : vector<10x192xf32>
    %198 = arith.mulf %160, %197 : vector<10x192xf32>
    %c0_157 = arith.constant 0 : index
    %c0_158 = arith.constant 0 : index
    %c0_159 = arith.constant 0 : index
    %199 = vector.load %arg19[%c0_157, %c0_158, %c0_159] : memref<3x192x48xf32, #tpu.memory_space<vmem>>, vector<1x192x48xf32>
    %200 = vector.shape_cast %199 : vector<1x192x48xf32> to vector<192x48xf32>
    %cst_160 = arith.constant dense<0.000000e+00> : vector<10x48xf32>
    %201 = tpu.matmul %198, %200, %cst_160 {dimension_numbers = #tpu.dot_dimension_numbers<[1], [0], [0], [1], [0, 0, 1, 1], [], []>} : vector<10x192xf32>, vector<192x48xf32>, vector<10x48xf32> -> vector<10x48xf32>
    %202 = arith.addf %123, %201 : vector<10x48xf32>
    %c0_161 = arith.constant 0 : index
    %c0_162 = arith.constant 0 : index
    %c0_163 = arith.constant 0 : index
    %203 = vector.load %arg20[%c0_161, %c0_162, %c0_163] : memref<3x1x48xf32, #tpu.memory_space<vmem>>, vector<1x1x48xf32>
    %204 = vector.shape_cast %203 : vector<1x1x48xf32> to vector<1x48xf32>
    %205 = vector.broadcast %204 : vector<1x48xf32> to vector<10x48xf32>
    %206 = arith.addf %202, %205 : vector<10x48xf32>
    %c1_164 = arith.constant 1 : index
    %c0_165 = arith.constant 0 : index
    %c0_166 = arith.constant 0 : index
    %207 = vector.load %arg8[%c1_164, %c0_165, %c0_166] : memref<3x1x48xf32, #tpu.memory_space<vmem>>, vector<1x1x48xf32>
    %208 = vector.shape_cast %207 : vector<1x1x48xf32> to vector<1x48xf32>
    %c1_167 = arith.constant 1 : index
    %c0_168 = arith.constant 0 : index
    %c0_169 = arith.constant 0 : index
    %209 = vector.load %arg9[%c1_167, %c0_168, %c0_169] : memref<3x1x48xf32, #tpu.memory_space<vmem>>, vector<1x1x48xf32>
    %210 = vector.shape_cast %209 : vector<1x1x48xf32> to vector<1x48xf32>
    %cst_170 = arith.constant dense<0.000000e+00> : vector<10xf32>
    %211 = vector.multi_reduction <add>, %206, %cst_170 [1] : vector<10x48xf32> to vector<10xf32>
    %212 = vector.shape_cast %211 : vector<10xf32> to vector<10x1xf32>
    %cst_171 = arith.constant 4.800000e+01 : f32
    %213 = vector.broadcast %cst_171 : f32 to vector<10x1xf32>
    %214 = arith.divf %212, %213 : vector<10x1xf32>
    %215 = vector.broadcast %214 : vector<10x1xf32> to vector<10x48xf32>
    %216 = arith.subf %206, %215 : vector<10x48xf32>
    %217 = arith.mulf %216, %216 : vector<10x48xf32>
    %cst_172 = arith.constant dense<0.000000e+00> : vector<10xf32>
    %218 = vector.multi_reduction <add>, %217, %cst_172 [1] : vector<10x48xf32> to vector<10xf32>
    %219 = vector.shape_cast %218 : vector<10xf32> to vector<10x1xf32>
    %cst_173 = arith.constant 4.800000e+01 : f32
    %220 = vector.broadcast %cst_173 : f32 to vector<10x1xf32>
    %221 = arith.divf %219, %220 : vector<10x1xf32>
    %cst_174 = arith.constant 9.99999974E-6 : f32
    %222 = vector.broadcast %cst_174 : f32 to vector<10x1xf32>
    %223 = arith.addf %221, %222 : vector<10x1xf32>
    %224 = math.rsqrt %223 : vector<10x1xf32>
    %225 = vector.broadcast %224 : vector<10x1xf32> to vector<10x48xf32>
    %226 = arith.mulf %216, %225 : vector<10x48xf32>
    %227 = vector.broadcast %208 : vector<1x48xf32> to vector<10x48xf32>
    %228 = arith.mulf %226, %227 : vector<10x48xf32>
    %229 = vector.broadcast %210 : vector<1x48xf32> to vector<10x48xf32>
    %230 = arith.addf %228, %229 : vector<10x48xf32>
    %c1_175 = arith.constant 1 : index
    %c0_176 = arith.constant 0 : index
    %c0_177 = arith.constant 0 : index
    %c0_178 = arith.constant 0 : index
    %c0_179 = arith.constant 0 : index
    %231 = vector.load %arg10[%c1_175, %c0_176, %c0_177, %c0_178, %c0_179] : memref<3x3x2x48x24xf32, #tpu.memory_space<vmem>>, vector<1x1x1x48x24xf32>
    %232 = vector.shape_cast %231 : vector<1x1x1x48x24xf32> to vector<48x24xf32>
    %cst_180 = arith.constant dense<0.000000e+00> : vector<10x24xf32>
    %233 = tpu.matmul %230, %232, %cst_180 {dimension_numbers = #tpu.dot_dimension_numbers<[1], [0], [0], [1], [0, 0, 1, 1], [], []>} : vector<10x48xf32>, vector<48x24xf32>, vector<10x24xf32> -> vector<10x24xf32>
    %c1_181 = arith.constant 1 : index
    %c0_182 = arith.constant 0 : index
    %c0_183 = arith.constant 0 : index
    %c0_184 = arith.constant 0 : index
    %c0_185 = arith.constant 0 : index
    %234 = vector.load %arg11[%c1_181, %c0_182, %c0_183, %c0_184, %c0_185] : memref<3x3x2x1x24xf32, #tpu.memory_space<vmem>>, vector<1x1x1x1x24xf32>
    %235 = vector.shape_cast %234 : vector<1x1x1x1x24xf32> to vector<1x24xf32>
    %236 = vector.broadcast %235 : vector<1x24xf32> to vector<10x24xf32>
    %237 = arith.addf %233, %236 : vector<10x24xf32>
    %c1_186 = arith.constant 1 : index
    %c1_187 = arith.constant 1 : index
    %c0_188 = arith.constant 0 : index
    %c0_189 = arith.constant 0 : index
    %c0_190 = arith.constant 0 : index
    %238 = vector.load %arg10[%c1_186, %c1_187, %c0_188, %c0_189, %c0_190] : memref<3x3x2x48x24xf32, #tpu.memory_space<vmem>>, vector<1x1x1x48x24xf32>
    %239 = vector.shape_cast %238 : vector<1x1x1x48x24xf32> to vector<48x24xf32>
    %cst_191 = arith.constant dense<0.000000e+00> : vector<10x24xf32>
    %240 = tpu.matmul %230, %239, %cst_191 {dimension_numbers = #tpu.dot_dimension_numbers<[1], [0], [0], [1], [0, 0, 1, 1], [], []>} : vector<10x48xf32>, vector<48x24xf32>, vector<10x24xf32> -> vector<10x24xf32>
    %c1_192 = arith.constant 1 : index
    %c1_193 = arith.constant 1 : index
    %c0_194 = arith.constant 0 : index
    %c0_195 = arith.constant 0 : index
    %c0_196 = arith.constant 0 : index
    %241 = vector.load %arg11[%c1_192, %c1_193, %c0_194, %c0_195, %c0_196] : memref<3x3x2x1x24xf32, #tpu.memory_space<vmem>>, vector<1x1x1x1x24xf32>
    %242 = vector.shape_cast %241 : vector<1x1x1x1x24xf32> to vector<1x24xf32>
    %243 = vector.broadcast %242 : vector<1x24xf32> to vector<10x24xf32>
    %244 = arith.addf %240, %243 : vector<10x24xf32>
    %c1_197 = arith.constant 1 : index
    %c2_198 = arith.constant 2 : index
    %c0_199 = arith.constant 0 : index
    %c0_200 = arith.constant 0 : index
    %c0_201 = arith.constant 0 : index
    %245 = vector.load %arg10[%c1_197, %c2_198, %c0_199, %c0_200, %c0_201] : memref<3x3x2x48x24xf32, #tpu.memory_space<vmem>>, vector<1x1x1x48x24xf32>
    %246 = vector.shape_cast %245 : vector<1x1x1x48x24xf32> to vector<48x24xf32>
    %cst_202 = arith.constant dense<0.000000e+00> : vector<10x24xf32>
    %247 = tpu.matmul %230, %246, %cst_202 {dimension_numbers = #tpu.dot_dimension_numbers<[1], [0], [0], [1], [0, 0, 1, 1], [], []>} : vector<10x48xf32>, vector<48x24xf32>, vector<10x24xf32> -> vector<10x24xf32>
    %c1_203 = arith.constant 1 : index
    %c2_204 = arith.constant 2 : index
    %c0_205 = arith.constant 0 : index
    %c0_206 = arith.constant 0 : index
    %c0_207 = arith.constant 0 : index
    %248 = vector.load %arg11[%c1_203, %c2_204, %c0_205, %c0_206, %c0_207] : memref<3x3x2x1x24xf32, #tpu.memory_space<vmem>>, vector<1x1x1x1x24xf32>
    %249 = vector.shape_cast %248 : vector<1x1x1x1x24xf32> to vector<1x24xf32>
    %250 = vector.broadcast %249 : vector<1x24xf32> to vector<10x24xf32>
    %251 = arith.addf %247, %250 : vector<10x24xf32>
    %cst_208 = arith.constant dense<0.000000e+00> : vector<10x10xf32>
    %252 = tpu.matmul %237, %244, %cst_208 {dimension_numbers = #tpu.dot_dimension_numbers<[1], [1], [0], [0], [0, 0, 1, 0], [], []>} : vector<10x24xf32>, vector<10x24xf32>, vector<10x10xf32> -> vector<10x10xf32>
    %cst_209 = arith.constant 0.204124153 : f32
    %253 = vector.broadcast %cst_209 : f32 to vector<10x10xf32>
    %254 = arith.mulf %252, %253 : vector<10x10xf32>
    %cst_210 = arith.constant dense<0xFF800000> : vector<10xf32>
    %255 = vector.multi_reduction <maximumf>, %254, %cst_210 [1] : vector<10x10xf32> to vector<10xf32>
    %256 = vector.shape_cast %255 : vector<10xf32> to vector<10x1xf32>
    %257 = vector.broadcast %256 : vector<10x1xf32> to vector<10x10xf32>
    %258 = arith.subf %254, %257 : vector<10x10xf32>
    %259 = math.exp %258 : vector<10x10xf32>
    %cst_211 = arith.constant dense<0.000000e+00> : vector<10xf32>
    %260 = vector.multi_reduction <add>, %259, %cst_211 [1] : vector<10x10xf32> to vector<10xf32>
    %261 = vector.shape_cast %260 : vector<10xf32> to vector<10x1xf32>
    %262 = tpu.reciprocal %261 {approx = true} : vector<10x1xf32> -> vector<10x1xf32>
    %263 = vector.broadcast %262 : vector<10x1xf32> to vector<10x10xf32>
    %264 = arith.mulf %259, %263 : vector<10x10xf32>
    %cst_212 = arith.constant dense<0.000000e+00> : vector<10x24xf32>
    %265 = tpu.matmul %264, %251, %cst_212 {dimension_numbers = #tpu.dot_dimension_numbers<[1], [0], [0], [1], [0, 0, 1, 1], [], []>} : vector<10x10xf32>, vector<10x24xf32>, vector<10x24xf32> -> vector<10x24xf32>
    %c0_213 = arith.constant 0 : index
    %c0_214 = arith.constant 0 : index
    %266 = vector.load %arg25[%c0_213, %c0_214] : memref<10x48xf32, #tpu.memory_space<vmem>>, vector<10x24xf32>
    tpu.vector_store %arg25[%c0_213, %c0_214], %265 {strides = array<i32>} : memref<10x48xf32, #tpu.memory_space<vmem>>, vector<10x24xf32>,
    %c1_215 = arith.constant 1 : index
    %c0_216 = arith.constant 0 : index
    %c1_217 = arith.constant 1 : index
    %c0_218 = arith.constant 0 : index
    %c0_219 = arith.constant 0 : index
    %267 = vector.load %arg10[%c1_215, %c0_216, %c1_217, %c0_218, %c0_219] : memref<3x3x2x48x24xf32, #tpu.memory_space<vmem>>, vector<1x1x1x48x24xf32>
    %268 = vector.shape_cast %267 : vector<1x1x1x48x24xf32> to vector<48x24xf32>
    %cst_220 = arith.constant dense<0.000000e+00> : vector<10x24xf32>
    %269 = tpu.matmul %230, %268, %cst_220 {dimension_numbers = #tpu.dot_dimension_numbers<[1], [0], [0], [1], [0, 0, 1, 1], [], []>} : vector<10x48xf32>, vector<48x24xf32>, vector<10x24xf32> -> vector<10x24xf32>
    %c1_221 = arith.constant 1 : index
    %c0_222 = arith.constant 0 : index
    %c1_223 = arith.constant 1 : index
    %c0_224 = arith.constant 0 : index
    %c0_225 = arith.constant 0 : index
    %270 = vector.load %arg11[%c1_221, %c0_222, %c1_223, %c0_224, %c0_225] : memref<3x3x2x1x24xf32, #tpu.memory_space<vmem>>, vector<1x1x1x1x24xf32>
    %271 = vector.shape_cast %270 : vector<1x1x1x1x24xf32> to vector<1x24xf32>
    %272 = vector.broadcast %271 : vector<1x24xf32> to vector<10x24xf32>
    %273 = arith.addf %269, %272 : vector<10x24xf32>
    %c1_226 = arith.constant 1 : index
    %c1_227 = arith.constant 1 : index
    %c1_228 = arith.constant 1 : index
    %c0_229 = arith.constant 0 : index
    %c0_230 = arith.constant 0 : index
    %274 = vector.load %arg10[%c1_226, %c1_227, %c1_228, %c0_229, %c0_230] : memref<3x3x2x48x24xf32, #tpu.memory_space<vmem>>, vector<1x1x1x48x24xf32>
    %275 = vector.shape_cast %274 : vector<1x1x1x48x24xf32> to vector<48x24xf32>
    %cst_231 = arith.constant dense<0.000000e+00> : vector<10x24xf32>
    %276 = tpu.matmul %230, %275, %cst_231 {dimension_numbers = #tpu.dot_dimension_numbers<[1], [0], [0], [1], [0, 0, 1, 1], [], []>} : vector<10x48xf32>, vector<48x24xf32>, vector<10x24xf32> -> vector<10x24xf32>
    %c1_232 = arith.constant 1 : index
    %c1_233 = arith.constant 1 : index
    %c1_234 = arith.constant 1 : index
    %c0_235 = arith.constant 0 : index
    %c0_236 = arith.constant 0 : index
    %277 = vector.load %arg11[%c1_232, %c1_233, %c1_234, %c0_235, %c0_236] : memref<3x3x2x1x24xf32, #tpu.memory_space<vmem>>, vector<1x1x1x1x24xf32>
    %278 = vector.shape_cast %277 : vector<1x1x1x1x24xf32> to vector<1x24xf32>
    %279 = vector.broadcast %278 : vector<1x24xf32> to vector<10x24xf32>
    %280 = arith.addf %276, %279 : vector<10x24xf32>
    %c1_237 = arith.constant 1 : index
    %c2_238 = arith.constant 2 : index
    %c1_239 = arith.constant 1 : index
    %c0_240 = arith.constant 0 : index
    %c0_241 = arith.constant 0 : index
    %281 = vector.load %arg10[%c1_237, %c2_238, %c1_239, %c0_240, %c0_241] : memref<3x3x2x48x24xf32, #tpu.memory_space<vmem>>, vector<1x1x1x48x24xf32>
    %282 = vector.shape_cast %281 : vector<1x1x1x48x24xf32> to vector<48x24xf32>
    %cst_242 = arith.constant dense<0.000000e+00> : vector<10x24xf32>
    %283 = tpu.matmul %230, %282, %cst_242 {dimension_numbers = #tpu.dot_dimension_numbers<[1], [0], [0], [1], [0, 0, 1, 1], [], []>} : vector<10x48xf32>, vector<48x24xf32>, vector<10x24xf32> -> vector<10x24xf32>
    %c1_243 = arith.constant 1 : index
    %c2_244 = arith.constant 2 : index
    %c1_245 = arith.constant 1 : index
    %c0_246 = arith.constant 0 : index
    %c0_247 = arith.constant 0 : index
    %284 = vector.load %arg11[%c1_243, %c2_244, %c1_245, %c0_246, %c0_247] : memref<3x3x2x1x24xf32, #tpu.memory_space<vmem>>, vector<1x1x1x1x24xf32>
    %285 = vector.shape_cast %284 : vector<1x1x1x1x24xf32> to vector<1x24xf32>
    %286 = vector.broadcast %285 : vector<1x24xf32> to vector<10x24xf32>
    %287 = arith.addf %283, %286 : vector<10x24xf32>
    %cst_248 = arith.constant dense<0.000000e+00> : vector<10x10xf32>
    %288 = tpu.matmul %273, %280, %cst_248 {dimension_numbers = #tpu.dot_dimension_numbers<[1], [1], [0], [0], [0, 0, 1, 0], [], []>} : vector<10x24xf32>, vector<10x24xf32>, vector<10x10xf32> -> vector<10x10xf32>
    %cst_249 = arith.constant 0.204124153 : f32
    %289 = vector.broadcast %cst_249 : f32 to vector<10x10xf32>
    %290 = arith.mulf %288, %289 : vector<10x10xf32>
    %cst_250 = arith.constant dense<0xFF800000> : vector<10xf32>
    %291 = vector.multi_reduction <maximumf>, %290, %cst_250 [1] : vector<10x10xf32> to vector<10xf32>
    %292 = vector.shape_cast %291 : vector<10xf32> to vector<10x1xf32>
    %293 = vector.broadcast %292 : vector<10x1xf32> to vector<10x10xf32>
    %294 = arith.subf %290, %293 : vector<10x10xf32>
    %295 = math.exp %294 : vector<10x10xf32>
    %cst_251 = arith.constant dense<0.000000e+00> : vector<10xf32>
    %296 = vector.multi_reduction <add>, %295, %cst_251 [1] : vector<10x10xf32> to vector<10xf32>
    %297 = vector.shape_cast %296 : vector<10xf32> to vector<10x1xf32>
    %298 = tpu.reciprocal %297 {approx = true} : vector<10x1xf32> -> vector<10x1xf32>
    %299 = vector.broadcast %298 : vector<10x1xf32> to vector<10x10xf32>
    %300 = arith.mulf %295, %299 : vector<10x10xf32>
    %cst_252 = arith.constant dense<0.000000e+00> : vector<10x24xf32>
    %301 = tpu.matmul %300, %287, %cst_252 {dimension_numbers = #tpu.dot_dimension_numbers<[1], [0], [0], [1], [0, 0, 1, 1], [], []>} : vector<10x10xf32>, vector<10x24xf32>, vector<10x24xf32> -> vector<10x24xf32>
    %c0_253 = arith.constant 0 : index
    %c24_254 = arith.constant 24 : index
    %302 = vector.load %arg25[%c0_253, %c24_254] : memref<10x48xf32, #tpu.memory_space<vmem>>, vector<10x24xf32>
    tpu.vector_store %arg25[%c0_253, %c24_254], %301 {strides = array<i32>} : memref<10x48xf32, #tpu.memory_space<vmem>>, vector<10x24xf32>,
    %c0_255 = arith.constant 0 : index
    %c0_256 = arith.constant 0 : index
    %303 = vector.load %arg25[%c0_255, %c0_256] : memref<10x48xf32, #tpu.memory_space<vmem>>, vector<10x48xf32>
    %c1_257 = arith.constant 1 : index
    %c0_258 = arith.constant 0 : index
    %c0_259 = arith.constant 0 : index
    %304 = vector.load %arg12[%c1_257, %c0_258, %c0_259] : memref<3x48x48xf32, #tpu.memory_space<vmem>>, vector<1x48x48xf32>
    %305 = vector.shape_cast %304 : vector<1x48x48xf32> to vector<48x48xf32>
    %cst_260 = arith.constant dense<0.000000e+00> : vector<10x48xf32>
    %306 = tpu.matmul %303, %305, %cst_260 {dimension_numbers = #tpu.dot_dimension_numbers<[1], [0], [0], [1], [0, 0, 1, 1], [], []>} : vector<10x48xf32>, vector<48x48xf32>, vector<10x48xf32> -> vector<10x48xf32>
    %307 = arith.addf %206, %306 : vector<10x48xf32>
    %c1_261 = arith.constant 1 : index
    %c0_262 = arith.constant 0 : index
    %c0_263 = arith.constant 0 : index
    %308 = vector.load %arg13[%c1_261, %c0_262, %c0_263] : memref<3x1x48xf32, #tpu.memory_space<vmem>>, vector<1x1x48xf32>
    %309 = vector.shape_cast %308 : vector<1x1x48xf32> to vector<1x48xf32>
    %310 = vector.broadcast %309 : vector<1x48xf32> to vector<10x48xf32>
    %311 = arith.addf %307, %310 : vector<10x48xf32>
    %c1_264 = arith.constant 1 : index
    %c0_265 = arith.constant 0 : index
    %c0_266 = arith.constant 0 : index
    %312 = vector.load %arg14[%c1_264, %c0_265, %c0_266] : memref<3x1x48xf32, #tpu.memory_space<vmem>>, vector<1x1x48xf32>
    %313 = vector.shape_cast %312 : vector<1x1x48xf32> to vector<1x48xf32>
    %c1_267 = arith.constant 1 : index
    %c0_268 = arith.constant 0 : index
    %c0_269 = arith.constant 0 : index
    %314 = vector.load %arg15[%c1_267, %c0_268, %c0_269] : memref<3x1x48xf32, #tpu.memory_space<vmem>>, vector<1x1x48xf32>
    %315 = vector.shape_cast %314 : vector<1x1x48xf32> to vector<1x48xf32>
    %cst_270 = arith.constant dense<0.000000e+00> : vector<10xf32>
    %316 = vector.multi_reduction <add>, %311, %cst_270 [1] : vector<10x48xf32> to vector<10xf32>
    %317 = vector.shape_cast %316 : vector<10xf32> to vector<10x1xf32>
    %cst_271 = arith.constant 4.800000e+01 : f32
    %318 = vector.broadcast %cst_271 : f32 to vector<10x1xf32>
    %319 = arith.divf %317, %318 : vector<10x1xf32>
    %320 = vector.broadcast %319 : vector<10x1xf32> to vector<10x48xf32>
    %321 = arith.subf %311, %320 : vector<10x48xf32>
    %322 = arith.mulf %321, %321 : vector<10x48xf32>
    %cst_272 = arith.constant dense<0.000000e+00> : vector<10xf32>
    %323 = vector.multi_reduction <add>, %322, %cst_272 [1] : vector<10x48xf32> to vector<10xf32>
    %324 = vector.shape_cast %323 : vector<10xf32> to vector<10x1xf32>
    %cst_273 = arith.constant 4.800000e+01 : f32
    %325 = vector.broadcast %cst_273 : f32 to vector<10x1xf32>
    %326 = arith.divf %324, %325 : vector<10x1xf32>
    %cst_274 = arith.constant 9.99999974E-6 : f32
    %327 = vector.broadcast %cst_274 : f32 to vector<10x1xf32>
    %328 = arith.addf %326, %327 : vector<10x1xf32>
    %329 = math.rsqrt %328 : vector<10x1xf32>
    %330 = vector.broadcast %329 : vector<10x1xf32> to vector<10x48xf32>
    %331 = arith.mulf %321, %330 : vector<10x48xf32>
    %332 = vector.broadcast %313 : vector<1x48xf32> to vector<10x48xf32>
    %333 = arith.mulf %331, %332 : vector<10x48xf32>
    %334 = vector.broadcast %315 : vector<1x48xf32> to vector<10x48xf32>
    %335 = arith.addf %333, %334 : vector<10x48xf32>
    %c1_275 = arith.constant 1 : index
    %c0_276 = arith.constant 0 : index
    %c0_277 = arith.constant 0 : index
    %336 = vector.load %arg16[%c1_275, %c0_276, %c0_277] : memref<3x48x192xf32, #tpu.memory_space<vmem>>, vector<1x48x192xf32>
    %337 = vector.shape_cast %336 : vector<1x48x192xf32> to vector<48x192xf32>
    %cst_278 = arith.constant dense<0.000000e+00> : vector<10x192xf32>
    %338 = tpu.matmul %335, %337, %cst_278 {dimension_numbers = #tpu.dot_dimension_numbers<[1], [0], [0], [1], [0, 0, 1, 1], [], []>} : vector<10x48xf32>, vector<48x192xf32>, vector<10x192xf32> -> vector<10x192xf32>
    %c1_279 = arith.constant 1 : index
    %c0_280 = arith.constant 0 : index
    %c0_281 = arith.constant 0 : index
    %339 = vector.load %arg17[%c1_279, %c0_280, %c0_281] : memref<3x64x192xf32, #tpu.memory_space<vmem>>, vector<1x64x192xf32>
    %340 = vector.shape_cast %339 : vector<1x64x192xf32> to vector<64x192xf32>
    %cst_282 = arith.constant dense<0.000000e+00> : vector<10x192xf32>
    %341 = tpu.matmul %7, %340, %cst_282 {dimension_numbers = #tpu.dot_dimension_numbers<[1], [0], [0], [1], [0, 0, 1, 1], [], []>} : vector<10x64xf32>, vector<64x192xf32>, vector<10x192xf32> -> vector<10x192xf32>
    %342 = arith.addf %338, %341 : vector<10x192xf32>
    %c1_283 = arith.constant 1 : index
    %c0_284 = arith.constant 0 : index
    %c0_285 = arith.constant 0 : index
    %343 = vector.load %arg18[%c1_283, %c0_284, %c0_285] : memref<3x1x192xf32, #tpu.memory_space<vmem>>, vector<1x1x192xf32>
    %344 = vector.shape_cast %343 : vector<1x1x192xf32> to vector<1x192xf32>
    %345 = vector.broadcast %344 : vector<1x192xf32> to vector<10x192xf32>
    %346 = arith.addf %342, %345 : vector<10x192xf32>
    %cst_286 = arith.constant 5.000000e-01 : f32
    %347 = vector.broadcast %cst_286 : f32 to vector<10x192xf32>
    %348 = arith.mulf %347, %346 : vector<10x192xf32>
    %cst_287 = arith.constant 0.707106769 : f32
    %349 = vector.broadcast %cst_287 : f32 to vector<10x192xf32>
    %350 = arith.mulf %346, %349 : vector<10x192xf32>
    %351 = math.absf %350 : vector<10x192xf32>
    %cst_288 = arith.constant 0.327591091 : f32
    %352 = vector.broadcast %cst_288 : f32 to vector<10x192xf32>
    %353 = arith.mulf %352, %351 : vector<10x192xf32>
    %cst_289 = arith.constant 1.000000e+00 : f32
    %354 = vector.broadcast %cst_289 : f32 to vector<10x192xf32>
    %355 = arith.addf %354, %353 : vector<10x192xf32>
    %cst_290 = arith.constant 1.000000e+00 : f32
    %356 = vector.broadcast %cst_290 : f32 to vector<10x192xf32>
    %357 = arith.divf %356, %355 : vector<10x192xf32>
    %cst_291 = arith.constant 1.06140542 : f32
    %358 = vector.broadcast %cst_291 : f32 to vector<10x192xf32>
    %359 = arith.mulf %358, %357 : vector<10x192xf32>
    %cst_292 = arith.constant -1.45315206 : f32
    %360 = vector.broadcast %cst_292 : f32 to vector<10x192xf32>
    %361 = arith.addf %359, %360 : vector<10x192xf32>
    %362 = arith.mulf %361, %357 : vector<10x192xf32>
    %cst_293 = arith.constant 1.42141378 : f32
    %363 = vector.broadcast %cst_293 : f32 to vector<10x192xf32>
    %364 = arith.addf %362, %363 : vector<10x192xf32>
    %365 = arith.mulf %364, %357 : vector<10x192xf32>
    %cst_294 = arith.constant -0.284496725 : f32
    %366 = vector.broadcast %cst_294 : f32 to vector<10x192xf32>
    %367 = arith.addf %365, %366 : vector<10x192xf32>
    %368 = arith.mulf %367, %357 : vector<10x192xf32>
    %cst_295 = arith.constant 0.254829586 : f32
    %369 = vector.broadcast %cst_295 : f32 to vector<10x192xf32>
    %370 = arith.addf %368, %369 : vector<10x192xf32>
    %371 = arith.mulf %370, %357 : vector<10x192xf32>
    %cst_296 = arith.constant 0.000000e+00 : f32
    %372 = vector.broadcast %cst_296 : f32 to vector<10x192xf32>
    %373 = arith.subf %372, %351 : vector<10x192xf32>
    %374 = arith.mulf %373, %351 : vector<10x192xf32>
    %375 = math.exp %374 : vector<10x192xf32>
    %376 = arith.mulf %371, %375 : vector<10x192xf32>
    %cst_297 = arith.constant 1.000000e+00 : f32
    %377 = vector.broadcast %cst_297 : f32 to vector<10x192xf32>
    %378 = arith.subf %377, %376 : vector<10x192xf32>
    %cst_298 = arith.constant 0.000000e+00 : f32
    %379 = vector.broadcast %cst_298 : f32 to vector<10x192xf32>
    %380 = arith.cmpf oge, %350, %379 : vector<10x192xf32>
    %cst_299 = arith.constant 0.000000e+00 : f32
    %381 = vector.broadcast %cst_299 : f32 to vector<10x192xf32>
    %382 = arith.subf %381, %378 : vector<10x192xf32>
    %383 = arith.select %380, %378, %382 : vector<10x192xi1>, vector<10x192xf32>
    %cst_300 = arith.constant 1.000000e+00 : f32
    %384 = vector.broadcast %cst_300 : f32 to vector<10x192xf32>
    %385 = arith.addf %384, %383 : vector<10x192xf32>
    %386 = arith.mulf %348, %385 : vector<10x192xf32>
    %c1_301 = arith.constant 1 : index
    %c0_302 = arith.constant 0 : index
    %c0_303 = arith.constant 0 : index
    %387 = vector.load %arg19[%c1_301, %c0_302, %c0_303] : memref<3x192x48xf32, #tpu.memory_space<vmem>>, vector<1x192x48xf32>
    %388 = vector.shape_cast %387 : vector<1x192x48xf32> to vector<192x48xf32>
    %cst_304 = arith.constant dense<0.000000e+00> : vector<10x48xf32>
    %389 = tpu.matmul %386, %388, %cst_304 {dimension_numbers = #tpu.dot_dimension_numbers<[1], [0], [0], [1], [0, 0, 1, 1], [], []>} : vector<10x192xf32>, vector<192x48xf32>, vector<10x48xf32> -> vector<10x48xf32>
    %390 = arith.addf %311, %389 : vector<10x48xf32>
    %c1_305 = arith.constant 1 : index
    %c0_306 = arith.constant 0 : index
    %c0_307 = arith.constant 0 : index
    %391 = vector.load %arg20[%c1_305, %c0_306, %c0_307] : memref<3x1x48xf32, #tpu.memory_space<vmem>>, vector<1x1x48xf32>
    %392 = vector.shape_cast %391 : vector<1x1x48xf32> to vector<1x48xf32>
    %393 = vector.broadcast %392 : vector<1x48xf32> to vector<10x48xf32>
    %394 = arith.addf %390, %393 : vector<10x48xf32>
    %c2_308 = arith.constant 2 : index
    %c0_309 = arith.constant 0 : index
    %c0_310 = arith.constant 0 : index
    %395 = vector.load %arg8[%c2_308, %c0_309, %c0_310] : memref<3x1x48xf32, #tpu.memory_space<vmem>>, vector<1x1x48xf32>
    %396 = vector.shape_cast %395 : vector<1x1x48xf32> to vector<1x48xf32>
    %c2_311 = arith.constant 2 : index
    %c0_312 = arith.constant 0 : index
    %c0_313 = arith.constant 0 : index
    %397 = vector.load %arg9[%c2_311, %c0_312, %c0_313] : memref<3x1x48xf32, #tpu.memory_space<vmem>>, vector<1x1x48xf32>
    %398 = vector.shape_cast %397 : vector<1x1x48xf32> to vector<1x48xf32>
    %cst_314 = arith.constant dense<0.000000e+00> : vector<10xf32>
    %399 = vector.multi_reduction <add>, %394, %cst_314 [1] : vector<10x48xf32> to vector<10xf32>
    %400 = vector.shape_cast %399 : vector<10xf32> to vector<10x1xf32>
    %cst_315 = arith.constant 4.800000e+01 : f32
    %401 = vector.broadcast %cst_315 : f32 to vector<10x1xf32>
    %402 = arith.divf %400, %401 : vector<10x1xf32>
    %403 = vector.broadcast %402 : vector<10x1xf32> to vector<10x48xf32>
    %404 = arith.subf %394, %403 : vector<10x48xf32>
    %405 = arith.mulf %404, %404 : vector<10x48xf32>
    %cst_316 = arith.constant dense<0.000000e+00> : vector<10xf32>
    %406 = vector.multi_reduction <add>, %405, %cst_316 [1] : vector<10x48xf32> to vector<10xf32>
    %407 = vector.shape_cast %406 : vector<10xf32> to vector<10x1xf32>
    %cst_317 = arith.constant 4.800000e+01 : f32
    %408 = vector.broadcast %cst_317 : f32 to vector<10x1xf32>
    %409 = arith.divf %407, %408 : vector<10x1xf32>
    %cst_318 = arith.constant 9.99999974E-6 : f32
    %410 = vector.broadcast %cst_318 : f32 to vector<10x1xf32>
    %411 = arith.addf %409, %410 : vector<10x1xf32>
    %412 = math.rsqrt %411 : vector<10x1xf32>
    %413 = vector.broadcast %412 : vector<10x1xf32> to vector<10x48xf32>
    %414 = arith.mulf %404, %413 : vector<10x48xf32>
    %415 = vector.broadcast %396 : vector<1x48xf32> to vector<10x48xf32>
    %416 = arith.mulf %414, %415 : vector<10x48xf32>
    %417 = vector.broadcast %398 : vector<1x48xf32> to vector<10x48xf32>
    %418 = arith.addf %416, %417 : vector<10x48xf32>
    %c2_319 = arith.constant 2 : index
    %c0_320 = arith.constant 0 : index
    %c0_321 = arith.constant 0 : index
    %c0_322 = arith.constant 0 : index
    %c0_323 = arith.constant 0 : index
    %419 = vector.load %arg10[%c2_319, %c0_320, %c0_321, %c0_322, %c0_323] : memref<3x3x2x48x24xf32, #tpu.memory_space<vmem>>, vector<1x1x1x48x24xf32>
    %420 = vector.shape_cast %419 : vector<1x1x1x48x24xf32> to vector<48x24xf32>
    %cst_324 = arith.constant dense<0.000000e+00> : vector<10x24xf32>
    %421 = tpu.matmul %418, %420, %cst_324 {dimension_numbers = #tpu.dot_dimension_numbers<[1], [0], [0], [1], [0, 0, 1, 1], [], []>} : vector<10x48xf32>, vector<48x24xf32>, vector<10x24xf32> -> vector<10x24xf32>
    %c2_325 = arith.constant 2 : index
    %c0_326 = arith.constant 0 : index
    %c0_327 = arith.constant 0 : index
    %c0_328 = arith.constant 0 : index
    %c0_329 = arith.constant 0 : index
    %422 = vector.load %arg11[%c2_325, %c0_326, %c0_327, %c0_328, %c0_329] : memref<3x3x2x1x24xf32, #tpu.memory_space<vmem>>, vector<1x1x1x1x24xf32>
    %423 = vector.shape_cast %422 : vector<1x1x1x1x24xf32> to vector<1x24xf32>
    %424 = vector.broadcast %423 : vector<1x24xf32> to vector<10x24xf32>
    %425 = arith.addf %421, %424 : vector<10x24xf32>
    %c2_330 = arith.constant 2 : index
    %c1_331 = arith.constant 1 : index
    %c0_332 = arith.constant 0 : index
    %c0_333 = arith.constant 0 : index
    %c0_334 = arith.constant 0 : index
    %426 = vector.load %arg10[%c2_330, %c1_331, %c0_332, %c0_333, %c0_334] : memref<3x3x2x48x24xf32, #tpu.memory_space<vmem>>, vector<1x1x1x48x24xf32>
    %427 = vector.shape_cast %426 : vector<1x1x1x48x24xf32> to vector<48x24xf32>
    %cst_335 = arith.constant dense<0.000000e+00> : vector<10x24xf32>
    %428 = tpu.matmul %418, %427, %cst_335 {dimension_numbers = #tpu.dot_dimension_numbers<[1], [0], [0], [1], [0, 0, 1, 1], [], []>} : vector<10x48xf32>, vector<48x24xf32>, vector<10x24xf32> -> vector<10x24xf32>
    %c2_336 = arith.constant 2 : index
    %c1_337 = arith.constant 1 : index
    %c0_338 = arith.constant 0 : index
    %c0_339 = arith.constant 0 : index
    %c0_340 = arith.constant 0 : index
    %429 = vector.load %arg11[%c2_336, %c1_337, %c0_338, %c0_339, %c0_340] : memref<3x3x2x1x24xf32, #tpu.memory_space<vmem>>, vector<1x1x1x1x24xf32>
    %430 = vector.shape_cast %429 : vector<1x1x1x1x24xf32> to vector<1x24xf32>
    %431 = vector.broadcast %430 : vector<1x24xf32> to vector<10x24xf32>
    %432 = arith.addf %428, %431 : vector<10x24xf32>
    %c2_341 = arith.constant 2 : index
    %c2_342 = arith.constant 2 : index
    %c0_343 = arith.constant 0 : index
    %c0_344 = arith.constant 0 : index
    %c0_345 = arith.constant 0 : index
    %433 = vector.load %arg10[%c2_341, %c2_342, %c0_343, %c0_344, %c0_345] : memref<3x3x2x48x24xf32, #tpu.memory_space<vmem>>, vector<1x1x1x48x24xf32>
    %434 = vector.shape_cast %433 : vector<1x1x1x48x24xf32> to vector<48x24xf32>
    %cst_346 = arith.constant dense<0.000000e+00> : vector<10x24xf32>
    %435 = tpu.matmul %418, %434, %cst_346 {dimension_numbers = #tpu.dot_dimension_numbers<[1], [0], [0], [1], [0, 0, 1, 1], [], []>} : vector<10x48xf32>, vector<48x24xf32>, vector<10x24xf32> -> vector<10x24xf32>
    %c2_347 = arith.constant 2 : index
    %c2_348 = arith.constant 2 : index
    %c0_349 = arith.constant 0 : index
    %c0_350 = arith.constant 0 : index
    %c0_351 = arith.constant 0 : index
    %436 = vector.load %arg11[%c2_347, %c2_348, %c0_349, %c0_350, %c0_351] : memref<3x3x2x1x24xf32, #tpu.memory_space<vmem>>, vector<1x1x1x1x24xf32>
    %437 = vector.shape_cast %436 : vector<1x1x1x1x24xf32> to vector<1x24xf32>
    %438 = vector.broadcast %437 : vector<1x24xf32> to vector<10x24xf32>
    %439 = arith.addf %435, %438 : vector<10x24xf32>
    %cst_352 = arith.constant dense<0.000000e+00> : vector<10x10xf32>
    %440 = tpu.matmul %425, %432, %cst_352 {dimension_numbers = #tpu.dot_dimension_numbers<[1], [1], [0], [0], [0, 0, 1, 0], [], []>} : vector<10x24xf32>, vector<10x24xf32>, vector<10x10xf32> -> vector<10x10xf32>
    %cst_353 = arith.constant 0.204124153 : f32
    %441 = vector.broadcast %cst_353 : f32 to vector<10x10xf32>
    %442 = arith.mulf %440, %441 : vector<10x10xf32>
    %cst_354 = arith.constant dense<0xFF800000> : vector<10xf32>
    %443 = vector.multi_reduction <maximumf>, %442, %cst_354 [1] : vector<10x10xf32> to vector<10xf32>
    %444 = vector.shape_cast %443 : vector<10xf32> to vector<10x1xf32>
    %445 = vector.broadcast %444 : vector<10x1xf32> to vector<10x10xf32>
    %446 = arith.subf %442, %445 : vector<10x10xf32>
    %447 = math.exp %446 : vector<10x10xf32>
    %cst_355 = arith.constant dense<0.000000e+00> : vector<10xf32>
    %448 = vector.multi_reduction <add>, %447, %cst_355 [1] : vector<10x10xf32> to vector<10xf32>
    %449 = vector.shape_cast %448 : vector<10xf32> to vector<10x1xf32>
    %450 = tpu.reciprocal %449 {approx = true} : vector<10x1xf32> -> vector<10x1xf32>
    %451 = vector.broadcast %450 : vector<10x1xf32> to vector<10x10xf32>
    %452 = arith.mulf %447, %451 : vector<10x10xf32>
    %cst_356 = arith.constant dense<0.000000e+00> : vector<10x24xf32>
    %453 = tpu.matmul %452, %439, %cst_356 {dimension_numbers = #tpu.dot_dimension_numbers<[1], [0], [0], [1], [0, 0, 1, 1], [], []>} : vector<10x10xf32>, vector<10x24xf32>, vector<10x24xf32> -> vector<10x24xf32>
    %c0_357 = arith.constant 0 : index
    %c0_358 = arith.constant 0 : index
    %454 = vector.load %arg25[%c0_357, %c0_358] : memref<10x48xf32, #tpu.memory_space<vmem>>, vector<10x24xf32>
    tpu.vector_store %arg25[%c0_357, %c0_358], %453 {strides = array<i32>} : memref<10x48xf32, #tpu.memory_space<vmem>>, vector<10x24xf32>,
    %c2_359 = arith.constant 2 : index
    %c0_360 = arith.constant 0 : index
    %c1_361 = arith.constant 1 : index
    %c0_362 = arith.constant 0 : index
    %c0_363 = arith.constant 0 : index
    %455 = vector.load %arg10[%c2_359, %c0_360, %c1_361, %c0_362, %c0_363] : memref<3x3x2x48x24xf32, #tpu.memory_space<vmem>>, vector<1x1x1x48x24xf32>
    %456 = vector.shape_cast %455 : vector<1x1x1x48x24xf32> to vector<48x24xf32>
    %cst_364 = arith.constant dense<0.000000e+00> : vector<10x24xf32>
    %457 = tpu.matmul %418, %456, %cst_364 {dimension_numbers = #tpu.dot_dimension_numbers<[1], [0], [0], [1], [0, 0, 1, 1], [], []>} : vector<10x48xf32>, vector<48x24xf32>, vector<10x24xf32> -> vector<10x24xf32>
    %c2_365 = arith.constant 2 : index
    %c0_366 = arith.constant 0 : index
    %c1_367 = arith.constant 1 : index
    %c0_368 = arith.constant 0 : index
    %c0_369 = arith.constant 0 : index
    %458 = vector.load %arg11[%c2_365, %c0_366, %c1_367, %c0_368, %c0_369] : memref<3x3x2x1x24xf32, #tpu.memory_space<vmem>>, vector<1x1x1x1x24xf32>
    %459 = vector.shape_cast %458 : vector<1x1x1x1x24xf32> to vector<1x24xf32>
    %460 = vector.broadcast %459 : vector<1x24xf32> to vector<10x24xf32>
    %461 = arith.addf %457, %460 : vector<10x24xf32>
    %c2_370 = arith.constant 2 : index
    %c1_371 = arith.constant 1 : index
    %c1_372 = arith.constant 1 : index
    %c0_373 = arith.constant 0 : index
    %c0_374 = arith.constant 0 : index
    %462 = vector.load %arg10[%c2_370, %c1_371, %c1_372, %c0_373, %c0_374] : memref<3x3x2x48x24xf32, #tpu.memory_space<vmem>>, vector<1x1x1x48x24xf32>
    %463 = vector.shape_cast %462 : vector<1x1x1x48x24xf32> to vector<48x24xf32>
    %cst_375 = arith.constant dense<0.000000e+00> : vector<10x24xf32>
    %464 = tpu.matmul %418, %463, %cst_375 {dimension_numbers = #tpu.dot_dimension_numbers<[1], [0], [0], [1], [0, 0, 1, 1], [], []>} : vector<10x48xf32>, vector<48x24xf32>, vector<10x24xf32> -> vector<10x24xf32>
    %c2_376 = arith.constant 2 : index
    %c1_377 = arith.constant 1 : index
    %c1_378 = arith.constant 1 : index
    %c0_379 = arith.constant 0 : index
    %c0_380 = arith.constant 0 : index
    %465 = vector.load %arg11[%c2_376, %c1_377, %c1_378, %c0_379, %c0_380] : memref<3x3x2x1x24xf32, #tpu.memory_space<vmem>>, vector<1x1x1x1x24xf32>
    %466 = vector.shape_cast %465 : vector<1x1x1x1x24xf32> to vector<1x24xf32>
    %467 = vector.broadcast %466 : vector<1x24xf32> to vector<10x24xf32>
    %468 = arith.addf %464, %467 : vector<10x24xf32>
    %c2_381 = arith.constant 2 : index
    %c2_382 = arith.constant 2 : index
    %c1_383 = arith.constant 1 : index
    %c0_384 = arith.constant 0 : index
    %c0_385 = arith.constant 0 : index
    %469 = vector.load %arg10[%c2_381, %c2_382, %c1_383, %c0_384, %c0_385] : memref<3x3x2x48x24xf32, #tpu.memory_space<vmem>>, vector<1x1x1x48x24xf32>
    %470 = vector.shape_cast %469 : vector<1x1x1x48x24xf32> to vector<48x24xf32>
    %cst_386 = arith.constant dense<0.000000e+00> : vector<10x24xf32>
    %471 = tpu.matmul %418, %470, %cst_386 {dimension_numbers = #tpu.dot_dimension_numbers<[1], [0], [0], [1], [0, 0, 1, 1], [], []>} : vector<10x48xf32>, vector<48x24xf32>, vector<10x24xf32> -> vector<10x24xf32>
    %c2_387 = arith.constant 2 : index
    %c2_388 = arith.constant 2 : index
    %c1_389 = arith.constant 1 : index
    %c0_390 = arith.constant 0 : index
    %c0_391 = arith.constant 0 : index
    %472 = vector.load %arg11[%c2_387, %c2_388, %c1_389, %c0_390, %c0_391] : memref<3x3x2x1x24xf32, #tpu.memory_space<vmem>>, vector<1x1x1x1x24xf32>
    %473 = vector.shape_cast %472 : vector<1x1x1x1x24xf32> to vector<1x24xf32>
    %474 = vector.broadcast %473 : vector<1x24xf32> to vector<10x24xf32>
    %475 = arith.addf %471, %474 : vector<10x24xf32>
    %cst_392 = arith.constant dense<0.000000e+00> : vector<10x10xf32>
    %476 = tpu.matmul %461, %468, %cst_392 {dimension_numbers = #tpu.dot_dimension_numbers<[1], [1], [0], [0], [0, 0, 1, 0], [], []>} : vector<10x24xf32>, vector<10x24xf32>, vector<10x10xf32> -> vector<10x10xf32>
    %cst_393 = arith.constant 0.204124153 : f32
    %477 = vector.broadcast %cst_393 : f32 to vector<10x10xf32>
    %478 = arith.mulf %476, %477 : vector<10x10xf32>
    %cst_394 = arith.constant dense<0xFF800000> : vector<10xf32>
    %479 = vector.multi_reduction <maximumf>, %478, %cst_394 [1] : vector<10x10xf32> to vector<10xf32>
    %480 = vector.shape_cast %479 : vector<10xf32> to vector<10x1xf32>
    %481 = vector.broadcast %480 : vector<10x1xf32> to vector<10x10xf32>
    %482 = arith.subf %478, %481 : vector<10x10xf32>
    %483 = math.exp %482 : vector<10x10xf32>
    %cst_395 = arith.constant dense<0.000000e+00> : vector<10xf32>
    %484 = vector.multi_reduction <add>, %483, %cst_395 [1] : vector<10x10xf32> to vector<10xf32>
    %485 = vector.shape_cast %484 : vector<10xf32> to vector<10x1xf32>
    %486 = tpu.reciprocal %485 {approx = true} : vector<10x1xf32> -> vector<10x1xf32>
    %487 = vector.broadcast %486 : vector<10x1xf32> to vector<10x10xf32>
    %488 = arith.mulf %483, %487 : vector<10x10xf32>
    %cst_396 = arith.constant dense<0.000000e+00> : vector<10x24xf32>
    %489 = tpu.matmul %488, %475, %cst_396 {dimension_numbers = #tpu.dot_dimension_numbers<[1], [0], [0], [1], [0, 0, 1, 1], [], []>} : vector<10x10xf32>, vector<10x24xf32>, vector<10x24xf32> -> vector<10x24xf32>
    %c0_397 = arith.constant 0 : index
    %c24_398 = arith.constant 24 : index
    %490 = vector.load %arg25[%c0_397, %c24_398] : memref<10x48xf32, #tpu.memory_space<vmem>>, vector<10x24xf32>
    tpu.vector_store %arg25[%c0_397, %c24_398], %489 {strides = array<i32>} : memref<10x48xf32, #tpu.memory_space<vmem>>, vector<10x24xf32>,
    %c0_399 = arith.constant 0 : index
    %c0_400 = arith.constant 0 : index
    %491 = vector.load %arg25[%c0_399, %c0_400] : memref<10x48xf32, #tpu.memory_space<vmem>>, vector<10x48xf32>
    %c2_401 = arith.constant 2 : index
    %c0_402 = arith.constant 0 : index
    %c0_403 = arith.constant 0 : index
    %492 = vector.load %arg12[%c2_401, %c0_402, %c0_403] : memref<3x48x48xf32, #tpu.memory_space<vmem>>, vector<1x48x48xf32>
    %493 = vector.shape_cast %492 : vector<1x48x48xf32> to vector<48x48xf32>
    %cst_404 = arith.constant dense<0.000000e+00> : vector<10x48xf32>
    %494 = tpu.matmul %491, %493, %cst_404 {dimension_numbers = #tpu.dot_dimension_numbers<[1], [0], [0], [1], [0, 0, 1, 1], [], []>} : vector<10x48xf32>, vector<48x48xf32>, vector<10x48xf32> -> vector<10x48xf32>
    %495 = arith.addf %394, %494 : vector<10x48xf32>
    %c2_405 = arith.constant 2 : index
    %c0_406 = arith.constant 0 : index
    %c0_407 = arith.constant 0 : index
    %496 = vector.load %arg13[%c2_405, %c0_406, %c0_407] : memref<3x1x48xf32, #tpu.memory_space<vmem>>, vector<1x1x48xf32>
    %497 = vector.shape_cast %496 : vector<1x1x48xf32> to vector<1x48xf32>
    %498 = vector.broadcast %497 : vector<1x48xf32> to vector<10x48xf32>
    %499 = arith.addf %495, %498 : vector<10x48xf32>
    %c2_408 = arith.constant 2 : index
    %c0_409 = arith.constant 0 : index
    %c0_410 = arith.constant 0 : index
    %500 = vector.load %arg14[%c2_408, %c0_409, %c0_410] : memref<3x1x48xf32, #tpu.memory_space<vmem>>, vector<1x1x48xf32>
    %501 = vector.shape_cast %500 : vector<1x1x48xf32> to vector<1x48xf32>
    %c2_411 = arith.constant 2 : index
    %c0_412 = arith.constant 0 : index
    %c0_413 = arith.constant 0 : index
    %502 = vector.load %arg15[%c2_411, %c0_412, %c0_413] : memref<3x1x48xf32, #tpu.memory_space<vmem>>, vector<1x1x48xf32>
    %503 = vector.shape_cast %502 : vector<1x1x48xf32> to vector<1x48xf32>
    %cst_414 = arith.constant dense<0.000000e+00> : vector<10xf32>
    %504 = vector.multi_reduction <add>, %499, %cst_414 [1] : vector<10x48xf32> to vector<10xf32>
    %505 = vector.shape_cast %504 : vector<10xf32> to vector<10x1xf32>
    %cst_415 = arith.constant 4.800000e+01 : f32
    %506 = vector.broadcast %cst_415 : f32 to vector<10x1xf32>
    %507 = arith.divf %505, %506 : vector<10x1xf32>
    %508 = vector.broadcast %507 : vector<10x1xf32> to vector<10x48xf32>
    %509 = arith.subf %499, %508 : vector<10x48xf32>
    %510 = arith.mulf %509, %509 : vector<10x48xf32>
    %cst_416 = arith.constant dense<0.000000e+00> : vector<10xf32>
    %511 = vector.multi_reduction <add>, %510, %cst_416 [1] : vector<10x48xf32> to vector<10xf32>
    %512 = vector.shape_cast %511 : vector<10xf32> to vector<10x1xf32>
    %cst_417 = arith.constant 4.800000e+01 : f32
    %513 = vector.broadcast %cst_417 : f32 to vector<10x1xf32>
    %514 = arith.divf %512, %513 : vector<10x1xf32>
    %cst_418 = arith.constant 9.99999974E-6 : f32
    %515 = vector.broadcast %cst_418 : f32 to vector<10x1xf32>
    %516 = arith.addf %514, %515 : vector<10x1xf32>
    %517 = math.rsqrt %516 : vector<10x1xf32>
    %518 = vector.broadcast %517 : vector<10x1xf32> to vector<10x48xf32>
    %519 = arith.mulf %509, %518 : vector<10x48xf32>
    %520 = vector.broadcast %501 : vector<1x48xf32> to vector<10x48xf32>
    %521 = arith.mulf %519, %520 : vector<10x48xf32>
    %522 = vector.broadcast %503 : vector<1x48xf32> to vector<10x48xf32>
    %523 = arith.addf %521, %522 : vector<10x48xf32>
    %c2_419 = arith.constant 2 : index
    %c0_420 = arith.constant 0 : index
    %c0_421 = arith.constant 0 : index
    %524 = vector.load %arg16[%c2_419, %c0_420, %c0_421] : memref<3x48x192xf32, #tpu.memory_space<vmem>>, vector<1x48x192xf32>
    %525 = vector.shape_cast %524 : vector<1x48x192xf32> to vector<48x192xf32>
    %cst_422 = arith.constant dense<0.000000e+00> : vector<10x192xf32>
    %526 = tpu.matmul %523, %525, %cst_422 {dimension_numbers = #tpu.dot_dimension_numbers<[1], [0], [0], [1], [0, 0, 1, 1], [], []>} : vector<10x48xf32>, vector<48x192xf32>, vector<10x192xf32> -> vector<10x192xf32>
    %c2_423 = arith.constant 2 : index
    %c0_424 = arith.constant 0 : index
    %c0_425 = arith.constant 0 : index
    %527 = vector.load %arg17[%c2_423, %c0_424, %c0_425] : memref<3x64x192xf32, #tpu.memory_space<vmem>>, vector<1x64x192xf32>
    %528 = vector.shape_cast %527 : vector<1x64x192xf32> to vector<64x192xf32>
    %cst_426 = arith.constant dense<0.000000e+00> : vector<10x192xf32>
    %529 = tpu.matmul %7, %528, %cst_426 {dimension_numbers = #tpu.dot_dimension_numbers<[1], [0], [0], [1], [0, 0, 1, 1], [], []>} : vector<10x64xf32>, vector<64x192xf32>, vector<10x192xf32> -> vector<10x192xf32>
    %530 = arith.addf %526, %529 : vector<10x192xf32>
    %c2_427 = arith.constant 2 : index
    %c0_428 = arith.constant 0 : index
    %c0_429 = arith.constant 0 : index
    %531 = vector.load %arg18[%c2_427, %c0_428, %c0_429] : memref<3x1x192xf32, #tpu.memory_space<vmem>>, vector<1x1x192xf32>
    %532 = vector.shape_cast %531 : vector<1x1x192xf32> to vector<1x192xf32>
    %533 = vector.broadcast %532 : vector<1x192xf32> to vector<10x192xf32>
    %534 = arith.addf %530, %533 : vector<10x192xf32>
    %cst_430 = arith.constant 5.000000e-01 : f32
    %535 = vector.broadcast %cst_430 : f32 to vector<10x192xf32>
    %536 = arith.mulf %535, %534 : vector<10x192xf32>
    %cst_431 = arith.constant 0.707106769 : f32
    %537 = vector.broadcast %cst_431 : f32 to vector<10x192xf32>
    %538 = arith.mulf %534, %537 : vector<10x192xf32>
    %539 = math.absf %538 : vector<10x192xf32>
    %cst_432 = arith.constant 0.327591091 : f32
    %540 = vector.broadcast %cst_432 : f32 to vector<10x192xf32>
    %541 = arith.mulf %540, %539 : vector<10x192xf32>
    %cst_433 = arith.constant 1.000000e+00 : f32
    %542 = vector.broadcast %cst_433 : f32 to vector<10x192xf32>
    %543 = arith.addf %542, %541 : vector<10x192xf32>
    %cst_434 = arith.constant 1.000000e+00 : f32
    %544 = vector.broadcast %cst_434 : f32 to vector<10x192xf32>
    %545 = arith.divf %544, %543 : vector<10x192xf32>
    %cst_435 = arith.constant 1.06140542 : f32
    %546 = vector.broadcast %cst_435 : f32 to vector<10x192xf32>
    %547 = arith.mulf %546, %545 : vector<10x192xf32>
    %cst_436 = arith.constant -1.45315206 : f32
    %548 = vector.broadcast %cst_436 : f32 to vector<10x192xf32>
    %549 = arith.addf %547, %548 : vector<10x192xf32>
    %550 = arith.mulf %549, %545 : vector<10x192xf32>
    %cst_437 = arith.constant 1.42141378 : f32
    %551 = vector.broadcast %cst_437 : f32 to vector<10x192xf32>
    %552 = arith.addf %550, %551 : vector<10x192xf32>
    %553 = arith.mulf %552, %545 : vector<10x192xf32>
    %cst_438 = arith.constant -0.284496725 : f32
    %554 = vector.broadcast %cst_438 : f32 to vector<10x192xf32>
    %555 = arith.addf %553, %554 : vector<10x192xf32>
    %556 = arith.mulf %555, %545 : vector<10x192xf32>
    %cst_439 = arith.constant 0.254829586 : f32
    %557 = vector.broadcast %cst_439 : f32 to vector<10x192xf32>
    %558 = arith.addf %556, %557 : vector<10x192xf32>
    %559 = arith.mulf %558, %545 : vector<10x192xf32>
    %cst_440 = arith.constant 0.000000e+00 : f32
    %560 = vector.broadcast %cst_440 : f32 to vector<10x192xf32>
    %561 = arith.subf %560, %539 : vector<10x192xf32>
    %562 = arith.mulf %561, %539 : vector<10x192xf32>
    %563 = math.exp %562 : vector<10x192xf32>
    %564 = arith.mulf %559, %563 : vector<10x192xf32>
    %cst_441 = arith.constant 1.000000e+00 : f32
    %565 = vector.broadcast %cst_441 : f32 to vector<10x192xf32>
    %566 = arith.subf %565, %564 : vector<10x192xf32>
    %cst_442 = arith.constant 0.000000e+00 : f32
    %567 = vector.broadcast %cst_442 : f32 to vector<10x192xf32>
    %568 = arith.cmpf oge, %538, %567 : vector<10x192xf32>
    %cst_443 = arith.constant 0.000000e+00 : f32
    %569 = vector.broadcast %cst_443 : f32 to vector<10x192xf32>
    %570 = arith.subf %569, %566 : vector<10x192xf32>
    %571 = arith.select %568, %566, %570 : vector<10x192xi1>, vector<10x192xf32>
    %cst_444 = arith.constant 1.000000e+00 : f32
    %572 = vector.broadcast %cst_444 : f32 to vector<10x192xf32>
    %573 = arith.addf %572, %571 : vector<10x192xf32>
    %574 = arith.mulf %536, %573 : vector<10x192xf32>
    %c2_445 = arith.constant 2 : index
    %c0_446 = arith.constant 0 : index
    %c0_447 = arith.constant 0 : index
    %575 = vector.load %arg19[%c2_445, %c0_446, %c0_447] : memref<3x192x48xf32, #tpu.memory_space<vmem>>, vector<1x192x48xf32>
    %576 = vector.shape_cast %575 : vector<1x192x48xf32> to vector<192x48xf32>
    %cst_448 = arith.constant dense<0.000000e+00> : vector<10x48xf32>
    %577 = tpu.matmul %574, %576, %cst_448 {dimension_numbers = #tpu.dot_dimension_numbers<[1], [0], [0], [1], [0, 0, 1, 1], [], []>} : vector<10x192xf32>, vector<192x48xf32>, vector<10x48xf32> -> vector<10x48xf32>
    %578 = arith.addf %499, %577 : vector<10x48xf32>
    %c2_449 = arith.constant 2 : index
    %c0_450 = arith.constant 0 : index
    %c0_451 = arith.constant 0 : index
    %579 = vector.load %arg20[%c2_449, %c0_450, %c0_451] : memref<3x1x48xf32, #tpu.memory_space<vmem>>, vector<1x1x48xf32>
    %580 = vector.shape_cast %579 : vector<1x1x48xf32> to vector<1x48xf32>
    %581 = vector.broadcast %580 : vector<1x48xf32> to vector<10x48xf32>
    %582 = arith.addf %578, %581 : vector<10x48xf32>
    %c0_452 = arith.constant 0 : index
    %c0_453 = arith.constant 0 : index
    %583 = vector.load %arg21[%c0_452, %c0_453] : memref<48x64xf32, #tpu.memory_space<vmem>>, vector<48x64xf32>
    %c0_454 = arith.constant 0 : index
    %c0_455 = arith.constant 0 : index
    %584 = vector.load %arg22[%c0_454, %c0_455] : memref<1x64xf32, #tpu.memory_space<vmem>>, vector<1x64xf32>
    %585 = vector.extract_strided_slice %582 {offsets = [6, 0], sizes = [4, 48], strides = [1, 1]} : vector<10x48xf32> to vector<4x48xf32>
    %cst_456 = arith.constant dense<0.000000e+00> : vector<4x64xf32>
    %586 = tpu.matmul %585, %583, %cst_456 {dimension_numbers = #tpu.dot_dimension_numbers<[1], [0], [0], [1], [0, 0, 1, 1], [], []>} : vector<4x48xf32>, vector<48x64xf32>, vector<4x64xf32> -> vector<4x64xf32>
    %587 = vector.broadcast %584 : vector<1x64xf32> to vector<4x64xf32>
    %588 = arith.addf %586, %587 : vector<4x64xf32>
    %c0_457 = arith.constant 0 : index
    %c0_458 = arith.constant 0 : index
    %c0_459 = arith.constant 0 : index
    %589 = vector.load %arg23[%c0_457, %c0_458, %c0_459] : memref<1x4x64xf32, #tpu.memory_space<vmem>>, vector<1x4x64xf32>
    %590 = vector.shape_cast %589 : vector<1x4x64xf32> to vector<4x64xf32>
    %591 = vector.shape_cast %588 : vector<4x64xf32> to vector<1x4x64xf32>
    tpu.vector_store %arg23[%c0_457, %c0_458, %c0_459], %591 {strides = array<i32>} : memref<1x4x64xf32, #tpu.memory_space<vmem>>, vector<1x4x64xf32>,
    return
  }
  func.func @transform_0(%arg0: i32) -> (i32, i32, i32) {
    %c0_i32 = arith.constant 0 : i32
    %c0_i32_0 = arith.constant 0 : i32
    %c0_i32_1 = arith.constant 0 : i32
    return %arg0, %c0_i32, %c0_i32_0 : i32, i32, i32
  }
  func.func @transform_1(%arg0: i32) -> (i32, i32, i32) {
    %c0_i32 = arith.constant 0 : i32
    %c0_i32_0 = arith.constant 0 : i32
    %c0_i32_1 = arith.constant 0 : i32
    return %arg0, %c0_i32, %c0_i32_0 : i32, i32, i32
  }
  func.func @transform_2(%arg0: i32) -> (i32, i32, i32) {
    %c0_i32 = arith.constant 0 : i32
    %c0_i32_0 = arith.constant 0 : i32
    %c0_i32_1 = arith.constant 0 : i32
    return %arg0, %c0_i32, %c0_i32_0 : i32, i32, i32
  }
  func.func @transform_3(%arg0: i32) -> (i32, i32, i32) {
    %c0_i32 = arith.constant 0 : i32
    %c0_i32_0 = arith.constant 0 : i32
    %c0_i32_1 = arith.constant 0 : i32
    return %arg0, %c0_i32, %c0_i32_0 : i32, i32, i32
  }
  func.func @transform_4(%arg0: i32) -> (i32, i32) {
    %c0_i32 = arith.constant 0 : i32
    %c0_i32_0 = arith.constant 0 : i32
    %c0_i32_1 = arith.constant 0 : i32
    return %c0_i32, %c0_i32_0 : i32, i32
  }
  func.func @transform_5(%arg0: i32) -> (i32, i32) {
    %c0_i32 = arith.constant 0 : i32
    %c0_i32_0 = arith.constant 0 : i32
    %c0_i32_1 = arith.constant 0 : i32
    return %c0_i32, %c0_i32_0 : i32, i32
  }
  func.func @transform_6(%arg0: i32) -> (i32, i32) {
    %c0_i32 = arith.constant 0 : i32
    %c0_i32_0 = arith.constant 0 : i32
    %c0_i32_1 = arith.constant 0 : i32
    return %c0_i32, %c0_i32_0 : i32, i32
  }
  func.func @transform_7(%arg0: i32) -> (i32, i32, i32) {
    %c0_i32 = arith.constant 0 : i32
    %c0_i32_0 = arith.constant 0 : i32
    %c0_i32_1 = arith.constant 0 : i32
    %c0_i32_2 = arith.constant 0 : i32
    return %c0_i32, %c0_i32_0, %c0_i32_1 : i32, i32, i32
  }
  func.func @transform_8(%arg0: i32) -> (i32, i32, i32) {
    %c0_i32 = arith.constant 0 : i32
    %c0_i32_0 = arith.constant 0 : i32
    %c0_i32_1 = arith.constant 0 : i32
    %c0_i32_2 = arith.constant 0 : i32
    return %c0_i32, %c0_i32_0, %c0_i32_1 : i32, i32, i32
  }
  func.func @transform_9(%arg0: i32) -> (i32, i32, i32, i32, i32) {
    %c0_i32 = arith.constant 0 : i32
    %c0_i32_0 = arith.constant 0 : i32
    %c0_i32_1 = arith.constant 0 : i32
    %c0_i32_2 = arith.constant 0 : i32
    %c0_i32_3 = arith.constant 0 : i32
    %c0_i32_4 = arith.constant 0 : i32
    return %c0_i32, %c0_i32_0, %c0_i32_1, %c0_i32_2, %c0_i32_3 : i32, i32, i32, i32, i32
  }
  func.func @transform_10(%arg0: i32) -> (i32, i32, i32, i32, i32) {
    %c0_i32 = arith.constant 0 : i32
    %c0_i32_0 = arith.constant 0 : i32
    %c0_i32_1 = arith.constant 0 : i32
    %c0_i32_2 = arith.constant 0 : i32
    %c0_i32_3 = arith.constant 0 : i32
    %c0_i32_4 = arith.constant 0 : i32
    return %c0_i32, %c0_i32_0, %c0_i32_1, %c0_i32_2, %c0_i32_3 : i32, i32, i32, i32, i32
  }
  func.func @transform_11(%arg0: i32) -> (i32, i32, i32) {
    %c0_i32 = arith.constant 0 : i32
    %c0_i32_0 = arith.constant 0 : i32
    %c0_i32_1 = arith.constant 0 : i32
    %c0_i32_2 = arith.constant 0 : i32
    return %c0_i32, %c0_i32_0, %c0_i32_1 : i32, i32, i32
  }
  func.func @transform_12(%arg0: i32) -> (i32, i32, i32) {
    %c0_i32 = arith.constant 0 : i32
    %c0_i32_0 = arith.constant 0 : i32
    %c0_i32_1 = arith.constant 0 : i32
    %c0_i32_2 = arith.constant 0 : i32
    return %c0_i32, %c0_i32_0, %c0_i32_1 : i32, i32, i32
  }
  func.func @transform_13(%arg0: i32) -> (i32, i32, i32) {
    %c0_i32 = arith.constant 0 : i32
    %c0_i32_0 = arith.constant 0 : i32
    %c0_i32_1 = arith.constant 0 : i32
    %c0_i32_2 = arith.constant 0 : i32
    return %c0_i32, %c0_i32_0, %c0_i32_1 : i32, i32, i32
  }
  func.func @transform_14(%arg0: i32) -> (i32, i32, i32) {
    %c0_i32 = arith.constant 0 : i32
    %c0_i32_0 = arith.constant 0 : i32
    %c0_i32_1 = arith.constant 0 : i32
    %c0_i32_2 = arith.constant 0 : i32
    return %c0_i32, %c0_i32_0, %c0_i32_1 : i32, i32, i32
  }
  func.func @transform_15(%arg0: i32) -> (i32, i32, i32) {
    %c0_i32 = arith.constant 0 : i32
    %c0_i32_0 = arith.constant 0 : i32
    %c0_i32_1 = arith.constant 0 : i32
    %c0_i32_2 = arith.constant 0 : i32
    return %c0_i32, %c0_i32_0, %c0_i32_1 : i32, i32, i32
  }
  func.func @transform_16(%arg0: i32) -> (i32, i32, i32) {
    %c0_i32 = arith.constant 0 : i32
    %c0_i32_0 = arith.constant 0 : i32
    %c0_i32_1 = arith.constant 0 : i32
    %c0_i32_2 = arith.constant 0 : i32
    return %c0_i32, %c0_i32_0, %c0_i32_1 : i32, i32, i32
  }
  func.func @transform_17(%arg0: i32) -> (i32, i32, i32) {
    %c0_i32 = arith.constant 0 : i32
    %c0_i32_0 = arith.constant 0 : i32
    %c0_i32_1 = arith.constant 0 : i32
    %c0_i32_2 = arith.constant 0 : i32
    return %c0_i32, %c0_i32_0, %c0_i32_1 : i32, i32, i32
  }
  func.func @transform_18(%arg0: i32) -> (i32, i32, i32) {
    %c0_i32 = arith.constant 0 : i32
    %c0_i32_0 = arith.constant 0 : i32
    %c0_i32_1 = arith.constant 0 : i32
    %c0_i32_2 = arith.constant 0 : i32
    return %c0_i32, %c0_i32_0, %c0_i32_1 : i32, i32, i32
  }
  func.func @transform_19(%arg0: i32) -> (i32, i32, i32) {
    %c0_i32 = arith.constant 0 : i32
    %c0_i32_0 = arith.constant 0 : i32
    %c0_i32_1 = arith.constant 0 : i32
    %c0_i32_2 = arith.constant 0 : i32
    return %c0_i32, %c0_i32_0, %c0_i32_1 : i32, i32, i32
  }
  func.func @transform_20(%arg0: i32) -> (i32, i32) {
    %c0_i32 = arith.constant 0 : i32
    %c0_i32_0 = arith.constant 0 : i32
    %c0_i32_1 = arith.constant 0 : i32
    return %c0_i32, %c0_i32_0 : i32, i32
  }
  func.func @transform_21(%arg0: i32) -> (i32, i32) {
    %c0_i32 = arith.constant 0 : i32
    %c0_i32_0 = arith.constant 0 : i32
    %c0_i32_1 = arith.constant 0 : i32
    return %c0_i32, %c0_i32_0 : i32, i32
  }
  func.func @transform_22(%arg0: i32) -> (i32, i32, i32) {
    %c0_i32 = arith.constant 0 : i32
    %c0_i32_0 = arith.constant 0 : i32
    %c0_i32_1 = arith.constant 0 : i32
    return %arg0, %c0_i32, %c0_i32_0 : i32, i32, i32
  }
}

</mosaic_0001>

<bundles_post_ra>
// kernel: mae_guided_forward.2
= control target key start
LH: loop header
LB: loop body
LE: loop exit
PB: predicated region body
PF: predicated region fallthrough
CT: control target
= control target key end

     0   :  { %s5587_s6 = smov 1   ;;  %s5588_s10 = smov 2   ;;  %s6587_s0 = inlined_call_operand.smem [shape: u32[31], index: -1, kind: input, shape index: {}] }
   0x1   :  { %s5628_s5 = sld [smem:[%s6587_s0]]   ;;  %s5589_s14 = smov 3  }
   0x2   :  { %s5633_s9 = sld [smem:[%s6587_s0 + %s5587_s6]]   ;;  %s5590_s18 = smov 4  }
   0x3   :  { %s5638_s13 = sld [smem:[%s6587_s0 + %s5588_s10]]   ;;  %s5591_s22 = smov 5  }
   0x4   :  { %s5643_s17 = sld [smem:[%s6587_s0 + %s5589_s14]]   ;;  %s5592_s26 = smov 6  }
   0x5   :  { %s5648_s21 = sld [smem:[%s6587_s0 + %s5590_s18]]   ;;  %s5593_s30 = smov 7  }
   0x6   :  { %s5653_s25 = sld [smem:[%s6587_s0 + %s5591_s22]]   ;;  %s5594_s4 = smov 8  }
   0x7   :  { %s5658_s29 = sld [smem:[%s6587_s0 + %s5592_s26]]   ;;  %s5595_s10 = smov 9  }
   0x8   :  { %s5663_s3 = sld [smem:[%s6587_s0 + %s5593_s30]]   ;;  %s5596_s15 = smov 10  }
   0x9   :  { %s5668_s8 = sld [smem:[%s6587_s0 + %s5594_s4]]   ;;  %s5597_s20 = smov 11  }
   0xa   :  { %s5673_s14 = sld [smem:[%s6587_s0 + %s5595_s10]]   ;;  %s5598_s26 = smov 12  }
   0xb   :  { %s5678_s19 = sld [smem:[%s6587_s0 + %s5596_s15]]   ;;  %s5599_s1 = smov 13  }
   0xc   :  { %s5683_s24 = sld [smem:[%s6587_s0 + %s5597_s20]]   ;;  %s5600_s7 = smov 14  }
   0xd   :  { %s5688_s30 = sld [smem:[%s6587_s0 + %s5598_s26]]   ;;  %s5601_s15 = smov 15  }
   0xe   :  { %6603 = sst [smem:[#allocation3_spill]] %s5663_s3  ;;  %s5602_s22 = smov 16  }
   0xf   :  { %s5693_s6 = sld [smem:[%s6587_s0 + %s5599_s1]]   ;;  %s5603_s28 = smov 17  }
  0x10   :  { %s5698_s12 = sld [smem:[%s6587_s0 + %s5600_s7]]   ;;  %s5604_s7 = smov 18  }
  0x11   :  { %s5703_s20 = sld [smem:[%s6587_s0 + %s5601_s15]]   ;;  %s5605_s15 = smov 19  }
  0x12   :  { %s5708_s27 = sld [smem:[%s6587_s0 + %s5602_s22]]   ;;  %s5606_s22 = smov 20  }
  0x13   :  { %s5713_s4 = sld [smem:[%s6587_s0 + %s5603_s28]]   ;;  %s5607_s28 = smov 21  }
  0x16   :  { %6604 = sst [smem:[#allocation4_spill]] %s5698_s12 }
  0x17   :  { %6605 = sst [smem:[#allocation5_spill]] %s5703_s20 }
  0x18   :  { %6606 = sst [smem:[#allocation6_spill]] %s5708_s27 }
  0x19   :  { %6607 = sst [smem:[#allocation7_spill]] %s5713_s4 }
  0x1a   :  { %s5718_s12 = sld [smem:[%s6587_s0 + %s5604_s7]]   ;;  %s5608_s7 = smov 22  }
  0x1b   :  { %s5723_s20 = sld [smem:[%s6587_s0 + %s5605_s15]]   ;;  %s5609_s15 = smov 23  }
  0x1c   :  { %s5728_s27 = sld [smem:[%s6587_s0 + %s5606_s22]]   ;;  %s5610_s22 = smov 24  }
  0x1d   :  { %s5733_s4 = sld [smem:[%s6587_s0 + %s5607_s28]]   ;;  %s5611_s28 = smov 25  }
  0x20   :  { %6608 = sst [smem:[#allocation8_spill]] %s5718_s12 }
  0x21   :  { %6609 = sst [smem:[#allocation9_spill]] %s5723_s20 }
  0x22   :  { %6610 = sst [smem:[#allocation10_spill]] %s5728_s27 }
  0x23   :  { %6611 = sst [smem:[#allocation11_spill]] %s5733_s4 }
  0x24   :  { %s5738_s12 = sld [smem:[%s6587_s0 + %s5608_s7]]   ;;  %s5612_s7 = smov 26  }
  0x25   :  { %s5743_s20 = sld [smem:[%s6587_s0 + %s5609_s15]]   ;;  %s5613_s15 = smov 27  }
  0x26   :  { %s5748_s27 = sld [smem:[%s6587_s0 + %s5610_s22]]   ;;  %s5614_s22 = smov 28  }
  0x27   :  { %s5753_s4 = sld [smem:[%s6587_s0 + %s5611_s28]]   ;;  %s5615_s28 = smov 29  }
  0x2a   :  { %6612 = sst [smem:[#allocation12_spill]] %s5738_s12 }
  0x2b   :  { %6613 = sst [smem:[#allocation13_spill]] %s5743_s20 }
  0x2c   :  { %6614 = sst [smem:[#allocation14_spill]] %s5748_s27 }
  0x2d   :  { %6615 = sst [smem:[#allocation15_spill]] %s5753_s4 }
  0x2e   :  { %s5758_s12 = sld [smem:[%s6587_s0 + %s5612_s7]]   ;;  %s5616_s7 = smov 30  }
  0x2f   :  { %s5763_s20 = sld [smem:[%s6587_s0 + %s5613_s15]]   ;;  %s5780_s15 = smov 0  }
  0x30   :  { %s5768_s27 = sld [smem:[%s6587_s0 + %s5614_s22]]  }
  0x31   :  { %s5773_s4 = sld [smem:[%s6587_s0 + %s5615_s28]]  }
  0x34   :  { %6616 = sst [smem:[#allocation16_spill]] %s5758_s12 }
  0x35   :  { %s5778_s12 = sld [smem:[%s6587_s0 + %s5616_s7]]  }
  0x36 LB: > { %s6617_s3 = sld [smem:[#allocation3_spill]]  ;;  %s4820_s16 = sadd.s32 4294967295, %s5585_s15   ;;  %s5585_s15 = sphi %s5780_s15, %s71_s15  }
  0x37   : > { %p4824_p0 = scmp.ge.s32.totalorder %s5585_s15, 1  ;;  %p851_p1 = scmp.lt.s32.totalorder %s5585_s15, 3 }
  0x39   : > { %p852_p2 = pnand %p4824_p0, %p851_p1 }
  0x3a   : > { %p931_p3 = scmp.lt.s32.totalorder (!%p852_p2), %s4820_s16, 1  ;;  %s6618_s22 = sld [smem:[#allocation4_spill]] (!%p852_p2) }
  0x3b   : > { %855 = sbr.rel (%p852_p2) target bundleno = 7819 (0x1e8b), region = 140  ;;  %s6619_s23 = sld [smem:[#allocation7_spill]] (!%p852_p2) }
  0x3c   : > { %s6620_s28 = sld [smem:[#allocation5_spill]] (!%p852_p2) }
  0x3d   : > { %s6621_s1 = sld [smem:[#allocation6_spill]] (!%p852_p2) }
  0x3e   : > { %s6622_s2 = sld [smem:[#allocation8_spill]] (!%p852_p2) }
  0x3f   : > { %s6623_s7 = sld [smem:[#allocation14_spill]] (!%p852_p2) }
  0x40   : > { %v952_v0 = vld [vmem:[%s5638_s13 + $0x38] sm:$0xff]  ;;  %v5617_v1 = vmov 0.0   ;;  %v951_v2 = vld [vmem:[%s5638_s13 + $0x30] sm:$0xff]  ;;  %vm5618_vm0 = vmmov 0   ;;  %v950_v3 = vld [vmem:[%s5638_s13 + $0x28] sm:$0xff]  ;;  %s6633_s16 = smov (!%p931_p3, %s4820_s16), 1 }
  0x41   : > { %5201 = vmatprep.subr.mxu0 %v5617_v1  ;;  %5217 = vmatprep.mubr.msk.f32.mxu0 %vm5618_vm0, %v5617_v1  ;;  %v949_v4 = vld [vmem:[%s5638_s13 + $0x20] sm:$0xff]  ;;  %v948_v5 = vld [vmem:[%s5638_s13 + $0x18] sm:$0xff]  ;;  %s5800_s0 = sshll.u32 %s6633_s16, 3  ;;  %v947_v6 = vld [vmem:[%s5638_s13 + $0x10] sm:$0xff]  ;;  %vm960_vm1 = vcmask 523264   ;;  %vm1036_vm2 = vcmask 390144  }
  0x42   : > { %5202 = vmatpush3.msra.mxu0 %v952_v0  ;;  %1331 = vmatprep.mubr.f32.mxu1 %v5617_v1  ;;  %v946_v7 = vld [vmem:[%s5638_s13 + $0x8] sm:$0xff]  ;;  %s934_s18 = scalar_lea.vmem %s5628_s5, %s5800_s0  ;;  %v945_v8 = vld [vmem:[%s5638_s13] sm:$0xff]  ;;  %v1120_v46 = vld [vmem:[%s6617_s3 + $0xf8] sm:$0xff]  ;;  %vm1263_vm3 = vcmask 392192   ;;  %s938_s26 = scalar_lea.vmem %s5633_s9, %s5800_s0  ;;  %vm2291_vm10 = vcmask 195584   ;;  %vm2385_vm11 = vcmask 1045504  }
  0x43   : > { %5203 = vmatprep.subr.mxu0 %v5617_v1  ;;  %v5810_v9 = vld [vmem:[%s934_s18] sm:$0x3f]  ;;  %v1118_v20 = vld [vmem:[%s6617_s3 + $0xe8] sm:$0xff]  ;;  %v1119_v47 = vld [vmem:[%s6617_s3 + $0xf0] sm:$0xff]  ;;  %vm2369_vm12 = vcmask 46080   ;;  %vm2381_vm13 = vcmask 48128  }
  0x44   : > { %5204 = vmatpush3.msra.mxu0 %v951_v2  ;;  %v4828_v10 = vld [vmem:[%s5643_s17] ss:$0 sm:$0xff]  ;;  %v1114_v22 = vld [vmem:[%s6617_s3 + $0xc8] sm:$0xff]  ;;  %v1116_v49 = vld [vmem:[%s6617_s3 + $0xd8] sm:$0xff]  ;;  %vm2459_vm14 = vcmask 193536   ;;  %s6624_s10 = sld [smem:[#allocation9_spill]] }
  0x45   : > { %5205 = vmatprep.subr.mxu0 %v5617_v1  ;;  %v1117_v21 = vld [vmem:[%s6617_s3 + $0xe0] sm:$0xff]  ;;  %v1110_v24 = vld [vmem:[%s6617_s3 + $0xa8] sm:$0xff]  ;;  %v1115_v51 = vld [vmem:[%s6617_s3 + $0xd0] sm:$0xff]  ;;  %s6625_s11 = sld [smem:[#allocation10_spill]]  ;;  %s6600_s16 = smov 24   ;;  %vm2884_vm15 = vcmask 390336  }
  0x46   : > { %5206 = vmatpush3.msra.mxu0 %v950_v3  ;;  %v1113_v23 = vld [vmem:[%s6617_s3 + $0xc0] sm:$0xff]  ;;  %v1106_v26 = vld [vmem:[%s6617_s3 + $0x88] sm:$0xff]  ;;  %v1088_v52 = vld [vmem:[%s5658_s29 + $0xb8] sm:$0xff]  ;;  %s6626_s18 = sld [smem:[#allocation13_spill]] }
  0x47   : > { %5207 = vmatprep.subr.mxu0 %v5617_v1  ;;  %v1109_v25 = vld [vmem:[%s6617_s3 + $0xa0] sm:$0xff]  ;;  %v1102_v28 = vld [vmem:[%s6617_s3 + $0x68] sm:$0xff]  ;;  %v1112_v53 = vld [vmem:[%s6617_s3 + $0xb8] sm:$0xff] }
  0x48   : > { %5208 = vmatpush3.msra.mxu0 %v949_v4  ;;  %v1105_v27 = vld [vmem:[%s6617_s3 + $0x80] sm:$0xff]  ;;  %v1086_v29 = vld [vmem:[%s5658_s29 + $0xa8] sm:$0xff]  ;;  %v1111_v54 = vld [vmem:[%s6617_s3 + $0xb0] sm:$0xff] }
  0x49   : > { %5209 = vmatprep.subr.mxu0 %v5617_v1  ;;  %v1101_v30 = vld [vmem:[%s6617_s3 + $0x60] sm:$0xff]  ;;  %1287 = vmatprep.subr.mxu1 %v1086_v29  ;;  %v1082_v32 = vld [vmem:[%s5658_s29 + $0x88] sm:$0xff]  ;;  %v1108_v55 = vld [vmem:[%s6617_s3 + $0x98] sm:$0xff] }
  0x4a   : > { %5210 = vmatpush3.msra.mxu0 %v948_v5  ;;  %v1085_v31 = vld [vmem:[%s5658_s29 + $0xa0] sm:$0xff]  ;;  %v1098_v33 = vld [vmem:[%s6617_s3 + $0x48] sm:$0xff]  ;;  %v1107_v56 = vld [vmem:[%s6617_s3 + $0x90] sm:$0xff] }
  0x4b   : > { %5211 = vmatprep.subr.mxu0 %v5617_v1  ;;  %1288 = vmatpush1.msra.mxu1 %v1085_v31  ;;  %v1081_v34 = vld [vmem:[%s5658_s29 + $0x80] sm:$0xff]  ;;  %v1078_v36 = vld [vmem:[%s5658_s29 + $0x68] sm:$0xff]  ;;  %v1104_v57 = vld [vmem:[%s6617_s3 + $0x78] sm:$0xff] }
  0x4c   : > { %5212 = vmatpush3.msra.mxu0 %v947_v6  ;;  %v1097_v35 = vld [vmem:[%s6617_s3 + $0x40] sm:$0xff]  ;;  %1289 = vmatprep.subr.mxu1 %v1082_v32  ;;  %v1094_v38 = vld [vmem:[%s6617_s3 + $0x28] sm:$0xff]  ;;  %v1103_v58 = vld [vmem:[%s6617_s3 + $0x70] sm:$0xff] }
  0x4d   : > { %5213 = vmatprep.subr.mxu0 %v5617_v1  ;;  %v1077_v37 = vld [vmem:[%s5658_s29 + $0x60] sm:$0xff]  ;;  %1290 = vmatpush1.msra.mxu1 %v1081_v34  ;;  %v1074_v39 = vld [vmem:[%s5658_s29 + $0x48] sm:$0xff]  ;;  %v1100_v59 = vld [vmem:[%s6617_s3 + $0x58] sm:$0xff] }
  0x4e   : > { %5214 = vmatpush3.msra.mxu0 %v946_v7  ;;  %v1093_v40 = vld [vmem:[%s6617_s3 + $0x20] sm:$0xff]  ;;  %1291 = vmatprep.subr.mxu1 %v1078_v36  ;;  %v1090_v42 = vld [vmem:[%s6617_s3 + $0x8] sm:$0xff]  ;;  %v1099_v60 = vld [vmem:[%s6617_s3 + $0x50] sm:$0xff] }
  0x4f   : > { %5215 = vmatprep.subr.mxu0 %v5617_v1  ;;  %v1073_v41 = vld [vmem:[%s5658_s29 + $0x40] sm:$0xff]  ;;  %1292 = vmatpush1.msra.mxu1 %v1077_v37  ;;  %v1070_v43 = vld [vmem:[%s5658_s29 + $0x28] sm:$0xff]  ;;  %v1096_v61 = vld [vmem:[%s6617_s3 + $0x38] sm:$0xff] }
  0x50   : > { %5216 = vmatpush3.msra.mxu0 %v945_v8  ;;  %v1089_v44 = vld [vmem:[%s6617_s3] sm:$0xff]  ;;  %1293 = vmatprep.subr.mxu1 %v1074_v39  ;;  %v1066_v48 = vld [vmem:[%s5658_s29 + $0x8] sm:$0xff]  ;;  %v1095_v62 = vld [vmem:[%s6617_s3 + $0x30] sm:$0xff] }
  0x51   : > { %5218 = vmatmul.mubr.msk.f32.vlgmr.msra.gmra.mxu0 %vm960_vm1, %v5810_v9  ;;  %1137 = vmatprep.subr.mxu0 %v1118_v20  ;;  %v1069_v45 = vld [vmem:[%s5658_s29 + $0x20] sm:$0xff]  ;;  %v1092_v63 = vld [vmem:[%s6617_s3 + $0x18] sm:$0xff]  ;;  %v1091_v0 = vld [vmem:[%s6617_s3 + $0x10] sm:$0xff]  ;;  %s6630_s3 = sld [smem:[#allocation15_spill]] }
  0x52   : > { %1185 = vmatprep.mubr.f32.mxu0 %v5617_v1  ;;  %1138 = vmatpush1.msra.mxu0 %v1117_v21  ;;  %v1065_v50 = vld [vmem:[%s5658_s29] sm:$0xff]  ;;  %v1068_v20 = vld [vmem:[%s5658_s29 + $0x18] sm:$0xff]  ;;  %v1067_v21 = vld [vmem:[%s5658_s29 + $0x10] sm:$0xff] }
  0x53   : > { %1139 = vmatprep.subr.mxu0 %v1114_v22  ;;  %1294 = vmatpush1.msra.mxu1 %v1073_v41  ;;  %v4830_v6 = vld [vmem:[%s5648_s21] ss:$0 sm:$0xff]  ;;  %v1590_v22 = vld [vmem:[%s5673_s14 + $0x178] sm:$0xff]  ;;  %v1557_v29 = vld [vmem:[%s5673_s14 + $0x70] sm:$0xff] }
  0x54   : > { %1140 = vmatpush1.msra.mxu0 %v1113_v23  ;;  %1295 = vmatprep.subr.mxu1 %v1070_v43  ;;  %v4831_v8 = vld [vmem:[%s5653_s25] ss:$0 sm:$0xff]  ;;  %v1589_v23 = vld [vmem:[%s5673_s14 + $0x170] sm:$0xff]  ;;  %v1586_v31 = vld [vmem:[%s5673_s14 + $0x158] sm:$0xff] }
  0x55   : > { %1141 = vmatprep.subr.mxu0 %v1110_v24  ;;  %1296 = vmatpush1.msra.mxu1 %v1069_v45  ;;  %v1574_v24 = vld [vmem:[%s5673_s14 + $0xf8] sm:$0xff]  ;;  %v1556_v32 = vld [vmem:[%s5673_s14 + $0x68] sm:$0xff]  ;;  %v1585_v34 = vld [vmem:[%s5673_s14 + $0x150] sm:$0xff] }
  0x56   : > { %1142 = vmatpush1.msra.mxu0 %v1109_v25  ;;  %1297 = vmatprep.subr.mxu1 %v1066_v48  ;;  %v1588_v25 = vld [vmem:[%s5673_s14 + $0x168] sm:$0xff]  ;;  %v1570_v36 = vld [vmem:[%s5673_s14 + $0xd8] sm:$0xff]  ;;  %v1569_v39 = vld [vmem:[%s5673_s14 + $0xd0] sm:$0xff] }
  0x57   : > { %1143 = vmatprep.subr.mxu0 %v1106_v26  ;;  %1298 = vmatpush1.msra.mxu1 %v1065_v50  ;;  %v1558_v26 = vld [vmem:[%s5673_s14 + $0x78] sm:$0xff]  ;;  %v1584_v37 = vld [vmem:[%s5673_s14 + $0x148] sm:$0xff]  ;;  %v1553_v41 = vld [vmem:[%s5673_s14 + $0x50] sm:$0xff] }
  0x58   : > { %1144 = vmatpush1.msra.mxu0 %v1105_v27  ;;  %1358 = vmatprep.subr.mxu1 %v1088_v52  ;;  %v1573_v27 = vld [vmem:[%s5673_s14 + $0xf0] sm:$0xff]  ;;  %v1582_v43 = vld [vmem:[%s5673_s14 + $0x138] sm:$0xff]  ;;  %v1567_v45 = vld [vmem:[%s5673_s14 + $0xc0] sm:$0xff] }
  0x59   : > { %1145 = vmatprep.subr.mxu0 %v1102_v28  ;;  %v1587_v28 = vld [vmem:[%s5673_s14 + $0x160] sm:$0xff]  ;;  %v1566_v48 = vld [vmem:[%s5673_s14 + $0xb8] sm:$0xff] }
  0x5a   : > { %1146 = vmatpush1.msra.mxu0 %v1101_v30  ;;  %v1572_v30 = vld [vmem:[%s5673_s14 + $0xe8] sm:$0xff]  ;;  %v1550_v50 = vld [vmem:[%s5673_s14 + $0x38] sm:$0xff]  ;;  %v1579_v52 = vld [vmem:[%s5673_s14 + $0x120] sm:$0xff] }
  0x5b   : > { %1147 = vmatprep.subr.mxu0 %v1098_v33  ;;  %v1571_v33 = vld [vmem:[%s5673_s14 + $0xe0] sm:$0xff] }
  0x5c   : > { %1148 = vmatpush1.msra.mxu0 %v1097_v35  ;;  %v1555_v35 = vld [vmem:[%s5673_s14 + $0x60] sm:$0xff] }
  0x5d   : > { %1149 = vmatprep.subr.mxu0 %v1094_v38  ;;  %v1554_v38 = vld [vmem:[%s5673_s14 + $0x58] sm:$0xff] }
  0x5e   : > { %1150 = vmatpush1.msra.mxu0 %v1093_v40  ;;  %v1583_v40 = vld [vmem:[%s5673_s14 + $0x140] sm:$0xff] }
  0x5f   : > { %1151 = vmatprep.subr.mxu0 %v1090_v42  ;;  %v1568_v42 = vld [vmem:[%s5673_s14 + $0xc8] sm:$0xff] }
  0x60   : > { %1152 = vmatpush1.msra.mxu0 %v1089_v44  ;;  %v1552_v44 = vld [vmem:[%s5673_s14 + $0x48] sm:$0xff] }
  0x61   : > { %1208 = vmatprep.subr.mxu0 %v1120_v46  ;;  %4832 = vmatmul.mubr.msk.f32.vlgmr.msra.gmra.mxu0 %vm960_vm1, %v5810_v9  ;;  %v1581_v46 = vld [vmem:[%s5673_s14 + $0x130] sm:$0xff] }
  0x62   : > { %1209 = vmatpush1.msra.mxu0 %v1119_v47  ;;  %1256 = vmatprep.mubr.f32.mxu0 %v5617_v1  ;;  %v1551_v47 = vld [vmem:[%s5673_s14 + $0x40] sm:$0xff] }
  0x63   : > { %1210 = vmatprep.subr.mxu0 %v1116_v49  ;;  %v1580_v49 = vld [vmem:[%s5673_s14 + $0x128] sm:$0xff] }
  0x64   : > { %1211 = vmatpush1.msra.mxu0 %v1115_v51  ;;  %v1565_v51 = vld [vmem:[%s5673_s14 + $0xb0] sm:$0xff] }
  0x65   : > { %1212 = vmatprep.subr.mxu0 %v1112_v53  ;;  %v1549_v53 = vld [vmem:[%s5673_s14 + $0x30] sm:$0xff] }
  0x66   : > { %1213 = vmatpush1.msra.mxu0 %v1111_v54  ;;  %v1564_v54 = vld [vmem:[%s5673_s14 + $0xa8] sm:$0xff] }
  0x67   : > { %1214 = vmatprep.subr.mxu0 %v1108_v55  ;;  %v1578_v55 = vld [vmem:[%s5673_s14 + $0x118] sm:$0xff] }
  0x68   : > { %1215 = vmatpush1.msra.mxu0 %v1107_v56  ;;  %v1548_v56 = vld [vmem:[%s5673_s14 + $0x28] sm:$0xff] }
  0x69   : > { %1216 = vmatprep.subr.mxu0 %v1104_v57  ;;  %v1563_v57 = vld [vmem:[%s5673_s14 + $0xa0] sm:$0xff] }
  0x6a   : > { %1217 = vmatpush1.msra.mxu0 %v1103_v58  ;;  %v1577_v58 = vld [vmem:[%s5673_s14 + $0x110] sm:$0xff] }
  0x6b   : > { %1218 = vmatprep.subr.mxu0 %v1100_v59  ;;  %v1547_v59 = vld [vmem:[%s5673_s14 + $0x20] sm:$0xff] }
  0x6c   : > { %1219 = vmatpush1.msra.mxu0 %v1099_v60  ;;  %v1562_v60 = vld [vmem:[%s5673_s14 + $0x98] sm:$0xff] }
  0x6d   : > { %1220 = vmatprep.subr.mxu0 %v1096_v61  ;;  %v1576_v61 = vld [vmem:[%s5673_s14 + $0x108] sm:$0xff] }
  0x6e   : > { %1221 = vmatpush1.msra.mxu0 %v1095_v62  ;;  %v1546_v62 = vld [vmem:[%s5673_s14 + $0x18] sm:$0xff] }
  0x6f   : > { %1222 = vmatprep.subr.mxu0 %v1092_v63  ;;  %v1561_v63 = vld [vmem:[%s5673_s14 + $0x90] sm:$0xff] }
  0x70   : > { %1223 = vmatpush1.msra.mxu0 %v1091_v0  ;;  %v1575_v0 = vld [vmem:[%s5673_s14 + $0x100] sm:$0xff] }
  0x71   : > { %4833 = vmatmul.mubr.msk.f32.vlgmr.msra.gmra.mxu0 %vm960_vm1, %v5810_v9  ;;  %v1084_v9 = vld [vmem:[%s5658_s29 + $0x98] sm:$0xff]  ;;  %5052 = vmatprep.subr.mxu0 %v1574_v24 }
  0x72   : > { %5053 = vmatpush3.msra.mxu0 %v1558_v26 }
  0x73   : > { %5054 = vmatprep.subr.mxu0 %v1573_v27 }
  0x74   : > { %5055 = vmatpush3.msra.mxu0 %v1557_v29 }
  0x75   : > { %5056 = vmatprep.subr.mxu0 %v1572_v30 }
  0x76   : > { %5057 = vmatpush3.msra.mxu0 %v1556_v32 }
  0x77   : > { %5058 = vmatprep.subr.mxu0 %v1571_v33 }
  0x78   : > { %5059 = vmatpush3.msra.mxu0 %v1555_v35 }
  0x79   : > { %5060 = vmatprep.subr.mxu0 %v1570_v36 }
  0x7a   : > { %5061 = vmatpush3.msra.mxu0 %v1554_v38 }
  0x7b   : > { %5062 = vmatprep.subr.mxu0 %v1569_v39 }
  0x7c   : > { %5063 = vmatpush3.msra.mxu0 %v1553_v41 }
  0x7d   : > { %5064 = vmatprep.subr.mxu0 %v1568_v42 }
  0x7e   : > { %5065 = vmatpush3.msra.mxu0 %v1552_v44 }
  0x7f   : > { %5066 = vmatprep.subr.mxu0 %v1567_v45 }
  0x80   : > { %5067 = vmatpush3.msra.mxu0 %v1551_v47 }
  0x81   : > { %5068 = vmatprep.subr.mxu0 %v1566_v48 }
  0x82   : > { %5069 = vmatpush3.msra.mxu0 %v1550_v50 }
  0x83   : > { %5070 = vmatprep.subr.mxu0 %v1565_v51 }
  0x84   : > { %5071 = vmatpush3.msra.mxu0 %v1549_v53 }
  0x85   : > { %5072 = vmatprep.subr.mxu0 %v1564_v54 }
  0x86   : > { %5073 = vmatpush3.msra.mxu0 %v1548_v56 }
  0x87   : > { %5074 = vmatprep.subr.mxu0 %v1563_v57 }
  0x88   : > { %5075 = vmatpush3.msra.mxu0 %v1547_v59 }
  0x89   : > { %5076 = vmatprep.subr.mxu0 %v1562_v60 }
  0x8a   : > { %5077 = vmatpush3.msra.mxu0 %v1546_v62 }
  0x8b   : > { %5078 = vmatprep.subr.mxu0 %v1561_v63 }
 0x111   : > { %v1030_v11 = vpop.f32.mrf.mxu0 }
 0x112   : > { %v1031_v12 = vadd.f32 %v4828_v10, %v1030_v11 }
 0x113   : > { %v5219_v13 = vpop.f32.mrf.mxu0 }
 0x114   : > { %v1037_v14 = vsel %vm1036_vm2, %v1031_v12, 0.0  ;;  %v1083_v13 = vld [vmem:[%s5658_s29 + $0x90] sm:$0xff] }
 0x115   : > { %1038 = vadd.xlane.f32.xlu0 %v1037_v14  ;;  %v1080_v14 = vld [vmem:[%s5658_s29 + $0x78] sm:$0xff] }
 0x19e   : > { %v1039_v15 = vpop.xlane.xlu0 %1038 }
 0x19f   : > { %v1041_v16 = vmul.f32 0.020833334, %v1039_v15  ;;  %v1079_v15 = vld [vmem:[%s5658_s29 + $0x70] sm:$0xff] }
 0x1a1   : > { %v5818_v17 = vsub.f32 %v1031_v12, %v1041_v16  ;;  %v1087_v12 = vld [vmem:[%s5658_s29 + $0xb0] sm:$0xff]  ;;  %v1076_v16 = vld [vmem:[%s5658_s29 + $0x58] sm:$0xff] }
 0x1a3   : > { %v1043_v18 = vmul.f32 %v5818_v17, %v5818_v17 }
 0x1a5   : > { %v1044_v19 = vsel %vm1036_vm2, %v1043_v18, 0.0  ;;  %v1072_v18 = vld [vmem:[%s5658_s29 + $0x38] sm:$0xff] }
 0x1a6   : > { %1045 = vadd.xlane.f32.xlu0 %v1044_v19  ;;  %v1071_v19 = vld [vmem:[%s5658_s29 + $0x30] sm:$0xff] }
 0x22f   : > { %v1046_v2 = vpop.xlane.xlu0 %1045 }
 0x230   : > { %v1047_v3 = vmul.f32 0.020833334, %v1046_v2  ;;  %v1545_v2 = vld [vmem:[%s5673_s14 + $0x10] sm:$0xff] }
 0x231   : > { %5079 = vmatpush3.msra.mxu0 %v1545_v2 }
 0x232   : > { %v1048_v4 = vadd.f32 1e-05, %v1047_v3  ;;  %v1560_v3 = vld [vmem:[%s5673_s14 + $0x88] sm:$0xff] }
 0x233   : > { %5080 = vmatprep.subr.mxu0 %v1560_v3 }
 0x234   : > { %5511 = vrsqrt.f32 %v1048_v4  ;;  %v1598_v4 = vld [vmem:[%s5673_s14 + $0x1b8] sm:$0xff] }
 0x241   : > { %v5512_v5 = vpop.eup %5511 }
 0x242   : > { %v1050_v7 = vmul.f32 %v5512_v5, %v5818_v17  ;;  %v1075_v17 = vld [vmem:[%s5658_s29 + $0x50] sm:$0xff]  ;;  %v1544_v5 = vld [vmem:[%s5673_s14 + $0x8] sm:$0xff] }
 0x243   : > { %5081 = vmatpush3.msra.mxu0 %v1544_v5 }
 0x244   : > { %v1057_v10 = vmul.f32 %v4830_v6, %v1050_v7  ;;  %v1559_v6 = vld [vmem:[%s5673_s14 + $0x80] sm:$0xff]  ;;  %v1597_v7 = vld [vmem:[%s5673_s14 + $0x1b0] sm:$0xff] }
 0x245   : > { %5082 = vmatprep.subr.mxu0 %v1559_v6 }
 0x246   : > { %v1064_v11 = vadd.f32 %v4831_v8, %v1057_v10  ;;  %v1543_v8 = vld [vmem:[%s5673_s14] sm:$0xff]  ;;  %v1596_v10 = vld [vmem:[%s5673_s14 + $0x1a8] sm:$0xff] }
 0x247   : > { %5083 = vmatpush3.msra.mxu0 %v1543_v8 }
 0x248   : > { %4834 = vmatmul.mubr.msk.f32.vlgmr.msra.gmra.mxu1 %vm1263_vm3, %v1064_v11 }
 0x249   : > { %1359 = vmatpush1.msra.mxu1 %v1087_v12  ;;  %1402 = vmatprep.mubr.f32.mxu1 %v5617_v1  ;;  %v1594_v12 = vld [vmem:[%s5673_s14 + $0x198] sm:$0xff] }
 0x24a   : > { %1360 = vmatprep.subr.mxu1 %v1084_v9  ;;  %v1593_v9 = vld [vmem:[%s5673_s14 + $0x190] sm:$0xff] }
 0x24b   : > { %1361 = vmatpush1.msra.mxu1 %v1083_v13  ;;  %v1592_v13 = vld [vmem:[%s5673_s14 + $0x188] sm:$0xff] }
 0x24c   : > { %1362 = vmatprep.subr.mxu1 %v1080_v14  ;;  %v1591_v14 = vld [vmem:[%s5673_s14 + $0x180] sm:$0xff] }
 0x24d   : > { %1363 = vmatpush1.msra.mxu1 %v1079_v15  ;;  %v1411_v15 = vlaneseq }
 0x24e   : > { %1364 = vmatprep.subr.mxu1 %v1076_v16 }
 0x24f   : > { %1365 = vmatpush1.msra.mxu1 %v1075_v17  ;;  %v1412_v16 = vshrl.u32 %v1411_v15, 7 }
 0x250   : > { %1366 = vmatprep.subr.mxu1 %v1072_v18  ;;  %v1409_v18 = vld [vmem:[%s5668_s8] sm:$0xf] }
 0x251   : > { %1367 = vmatpush1.msra.mxu1 %v1071_v19  ;;  %v5971_v17 = vsub.s32 0, %v1412_v16  ;;  %v5974_v19 = vsub.s32 1, %v1412_v16  ;;  %v1421_v33 = vsub.s32 2, %v1412_v16  ;;  %v1425_v36 = vsub.s32 3, %v1412_v16 }
 0x252   : > { %1368 = vmatprep.subr.mxu1 %v1068_v20  ;;  %v1187_v20 = vpop.f32.mrf.mxu0 }
 0x253   : > { %1369 = vmatpush1.msra.mxu1 %v1067_v21  ;;  %v1414_v21 = vrot.slane %v1409_v18, %v5971_v17  ;;  %v1418_v24 = vrot.slane %v1409_v18, %v5974_v19  ;;  %v1422_v41 = vrot.slane %v1409_v18, %v1421_v33 }
 0x254   : > { %4835 = vmatmul.mubr.msk.f32.vlgmr.msra.gmra.mxu1 %vm1263_vm3, %v1064_v11  ;;  %1679 = vmatprep.subr.mxu1 %v5617_v1  ;;  %v1595_v11 = vld [vmem:[%s5673_s14 + $0x1a0] sm:$0xff] }
 0x255   : > { %1680 = vmatpush1.msra.mxu1 %v1590_v22 }
 0x256   : > { %1681 = vmatprep.subr.mxu1 %v5617_v1 }
 0x257   : > { %1682 = vmatpush1.msra.mxu1 %v1589_v23 }
 0x258   : > { %1683 = vmatprep.subr.mxu1 %v5617_v1 }
 0x259   : > { %1684 = vmatpush1.msra.mxu1 %v1588_v25  ;;  %v1189_v25 = vpop.f32.mrf.mxu0 }
 0x25a   : > { %1685 = vmatprep.subr.mxu1 %v5617_v1 }
 0x25b   : > { %1686 = vmatpush1.msra.mxu1 %v1587_v28 }
 0x25c   : > { %1687 = vmatprep.subr.mxu1 %v5617_v1 }
 0x25d   : > { %1688 = vmatpush1.msra.mxu1 %v1586_v31 }
 0x25e   : > { %1689 = vmatprep.subr.mxu1 %v5617_v1 }
 0x25f   : > { %1690 = vmatpush1.msra.mxu1 %v1585_v34 }
 0x260   : > { %1691 = vmatprep.subr.mxu1 %v5617_v1 }
 0x261   : > { %1692 = vmatpush1.msra.mxu1 %v1584_v37  ;;  %v1258_v37 = vpop.f32.mrf.mxu0 }
 0x262   : > { %1693 = vmatprep.subr.mxu1 %v5617_v1 }
 0x263   : > { %1694 = vmatpush1.msra.mxu1 %v1583_v40  ;;  %v1260_v44 = vpop.f32.mrf.mxu0 }
 0x264   : > { %1695 = vmatprep.subr.mxu1 %v5617_v1 }
 0x265   : > { %1696 = vmatpush1.msra.mxu1 %v1582_v43  ;;  %v1426_v43 = vrot.slane %v1409_v18, %v1425_v36 }
 0x266   : > { %1697 = vmatprep.subr.mxu1 %v5617_v1 }
 0x267   : > { %1698 = vmatpush1.msra.mxu1 %v1581_v46 }
 0x268   : > { %1699 = vmatprep.subr.mxu1 %v5617_v1 }
 0x269   : > { %1700 = vmatpush1.msra.mxu1 %v1580_v49 }
 0x26a   : > { %1701 = vmatprep.subr.mxu1 %v5617_v1 }
 0x26b   : > { %1702 = vmatpush1.msra.mxu1 %v1579_v52 }
 0x26c   : > { %1703 = vmatprep.subr.mxu1 %v5617_v1 }
 0x26d   : > { %1704 = vmatpush1.msra.mxu1 %v1578_v55 }
 0x26e   : > { %1705 = vmatprep.subr.mxu1 %v5617_v1 }
 0x26f   : > { %1706 = vmatpush1.msra.mxu1 %v1577_v58 }
 0x270   : > { %1707 = vmatprep.subr.mxu1 %v5617_v1 }
 0x271   : > { %1708 = vmatpush1.msra.mxu1 %v1576_v61 }
 0x272   : > { %1709 = vmatprep.subr.mxu1 %v5617_v1 }
 0x273   : > { %1710 = vmatpush1.msra.mxu1 %v1575_v0 }
 0x274   : > { %1727 = vmatprep.subr.mxu1 %v5617_v1 }
 0x275   : > { %1728 = vmatpush2.msra.mxu1 %v1598_v4 }
 0x276   : > { %1729 = vmatprep.subr.mxu1 %v5617_v1 }
 0x277   : > { %1730 = vmatpush2.msra.mxu1 %v1597_v7 }
 0x278   : > { %1731 = vmatprep.subr.mxu1 %v5617_v1 }
 0x279   : > { %1732 = vmatpush2.msra.mxu1 %v1596_v10 }
 0x27a   : > { %1733 = vmatprep.subr.mxu1 %v5617_v1 }
 0x27b   : > { %1734 = vmatpush2.msra.mxu1 %v1595_v11 }
 0x27c   : > { %1735 = vmatprep.subr.mxu1 %v5617_v1 }
 0x27d   : > { %1736 = vmatpush2.msra.mxu1 %v1594_v12 }
 0x27e   : > { %1737 = vmatprep.subr.mxu1 %v5617_v1 }
 0x27f   : > { %1738 = vmatpush2.msra.mxu1 %v1593_v9 }
 0x280   : > { %1739 = vmatprep.subr.mxu1 %v5617_v1 }
 0x281   : > { %1740 = vmatpush2.msra.mxu1 %v1592_v13 }
 0x282   : > { %1741 = vmatprep.subr.mxu1 %v5617_v1 }
 0x283   : > { %1742 = vmatpush2.msra.mxu1 %v1591_v14 }
 0x284   : > { %5220 = vmatprep.subr.mxu1 %v5617_v1 }
 0x308   : > { %v1333_v22 = vpop.f32.mrf.mxu1 }
 0x309   : > { %v1334_v23 = vadd.f32 %v1333_v22, %v1187_v20 }
 0x30a   : > { %v1335_v26 = vpop.f32.mrf.mxu1 }
 0x30b   : > { %v5978_v27 = vadd.f32 %v1414_v21, %v1334_v23  ;;  %v1336_v28 = vadd.f32 %v1335_v26, %v1189_v25 }
 0x30d   : > { %v5981_v29 = vmul.f32 0.70710677, %v5978_v27  ;;  %v5983_v30 = vadd.f32 %v1418_v24, %v1336_v28 }
 0x30f   : > { %v1443_v31 = vand.u32 2147483647, %v5981_v29  ;;  %v5987_v32 = vmul.f32 0.70710677, %v5983_v30  ;;  %vm1523_vm4 = vcmp.ge.f32.partialorder %v5981_v29, 0.0 }
 0x311   : > { %v1447_v34 = vmul.f32 0.3275911, %v1443_v31  ;;  %v1444_v35 = vand.u32 2147483647, %v5987_v32  ;;  %v1499_v51 = vsub.f32 0.0, %v1443_v31  ;;  %vm1524_vm5 = vcmp.ge.f32.partialorder %v5987_v32, 0.0 }
 0x313   : > { %v1451_v38 = vadd.f32 1.0, %v1447_v34  ;;  %v1448_v39 = vmul.f32 0.3275911, %v1444_v35  ;;  %v1500_v55 = vsub.f32 0.0, %v1444_v35  ;;  %v1503_v57 = vmul.f32 %v1499_v51, %v1443_v31 }
 0x314   : > { %v1404_v40 = vpop.f32.mrf.mxu1 }
 0x315   : > { %5513 = vrcp.f32 %v1451_v38  ;;  %v1452_v42 = vadd.f32 1.0, %v1448_v39  ;;  %v1405_v45 = vadd.f32 %v1404_v40, %v1258_v37  ;;  %v1504_v62 = vmul.f32 %v1500_v55, %v1444_v35 }
 0x316   : > { %v1406_v46 = vpop.f32.mrf.mxu1  ;;  %v1507_v0 = vmul.f32 1.442695, %v1503_v57 }
 0x317   : > { %v1407_v47 = vadd.f32 %v1406_v46, %v1260_v44  ;;  %5515 = vrcp.f32 %v1452_v42  ;;  %v5990_v48 = vadd.f32 %v1422_v41, %v1405_v45  ;;  %v1509_v4 = vmul.f32 1.442695, %v1504_v62 }
 0x319   : > { %v5992_v49 = vadd.f32 %v1426_v43, %v1407_v47  ;;  %v5995_v50 = vmul.f32 0.70710677, %v5990_v48 }
 0x31b   : > { %v5998_v52 = vmul.f32 0.70710677, %v5992_v49  ;;  %v1445_v53 = vand.u32 2147483647, %v5995_v50  ;;  %vm1525_vm6 = vcmp.ge.f32.partialorder %v5995_v50, 0.0  ;;  %v1760_v50 = vld [vmem:[%s5683_s24 + $0x58] sm:$0xff] }
 0x31c   : > { %1796 = vmatprep.subr.mxu0 %v1760_v50 }
 0x31d   : > { %v1446_v54 = vand.u32 2147483647, %v5998_v52  ;;  %v1449_v56 = vmul.f32 0.3275911, %v1445_v53  ;;  %v1501_v7 = vsub.f32 0.0, %v1445_v53  ;;  %vm1526_vm7 = vcmp.ge.f32.partialorder %v5998_v52, 0.0 }
 0x31e   : > { %v1759_v52 = vld [vmem:[%s5683_s24 + $0x50] sm:$0xff] }
 0x31f   : > { %v1450_v58 = vmul.f32 0.3275911, %v1446_v54  ;;  %v1453_v59 = vadd.f32 1.0, %v1449_v56  ;;  %v1502_v11 = vsub.f32 0.0, %v1446_v54  ;;  %v1505_v13 = vmul.f32 %v1501_v7, %v1445_v53 }
 0x321   : > { %v1454_v60 = vadd.f32 1.0, %v1450_v58  ;;  %5517 = vrcp.f32 %v1453_v59  ;;  %v1506_v16 = vmul.f32 %v1502_v11, %v1446_v54  ;;  %v1511_v24 = vmul.f32 1.442695, %v1505_v13 }
 0x322   : > { %v5514_v61 = vpop.eup %5513 }
 0x323   : > { %v1463_v63 = vmul.f32 1.0614054, %v5514_v61  ;;  %5519 = vrcp.f32 %v1454_v60  ;;  %v1513_v31 = vmul.f32 1.442695, %v1506_v16 }
 0x324   : > { %v5516_v2 = vpop.eup %5515  ;;  %5521 = vpow2.f32 %v1507_v0 }
 0x325   : > { %v1467_v3 = vadd.f32 -1.4531521, %v1463_v63  ;;  %v1464_v5 = vmul.f32 1.0614054, %v5516_v2  ;;  %5523 = vpow2.f32 %v1509_v4 }
 0x326   : > { %5525 = vpow2.f32 %v1511_v24  ;;  %v1757_v24 = vld [vmem:[%s5683_s24 + $0x40] sm:$0xff] }
 0x327   : > { %v1471_v6 = vmul.f32 %v5514_v61, %v1467_v3  ;;  %v1468_v8 = vadd.f32 -1.4531521, %v1464_v5  ;;  %5527 = vpow2.f32 %v1513_v31  ;;  %v1435_v5 = vmul.f32 0.5, %v5978_v27  ;;  %v1752_v31 = vld [vmem:[%s5683_s24 + $0x18] sm:$0xff] }
 0x329   : > { %v1475_v10 = vadd.f32 1.4214138, %v1471_v6  ;;  %v1472_v12 = vmul.f32 %v5516_v2, %v1468_v8 }
 0x32b   : > { %v1479_v9 = vmul.f32 %v5514_v61, %v1475_v10  ;;  %v1476_v14 = vadd.f32 1.4214138, %v1472_v12 }
 0x32d   : > { %v1483_v15 = vadd.f32 -0.28449672, %v1479_v9  ;;  %v1480_v18 = vmul.f32 %v5516_v2, %v1476_v14 }
 0x32e   : > { %v5518_v20 = vpop.eup %5517 }
 0x32f   : > { %v1487_v21 = vmul.f32 %v5514_v61, %v1483_v15  ;;  %v1465_v23 = vmul.f32 1.0614054, %v5518_v20  ;;  %v1484_v25 = vadd.f32 -0.28449672, %v1480_v18  ;;  %v1438_v18 = vmul.f32 0.5, %v5992_v49  ;;  %v1758_v49 = vld [vmem:[%s5683_s24 + $0x48] sm:$0xff] }
 0x330   : > { %v5520_v22 = vpop.eup %5519 }
 0x331   : > { %v1491_v26 = vadd.f32 0.2548296, %v1487_v21  ;;  %v1466_v28 = vmul.f32 1.0614054, %v5520_v22  ;;  %v1469_v33 = vadd.f32 -1.4531521, %v1465_v23  ;;  %v1488_v34 = vmul.f32 %v5516_v2, %v1484_v25  ;;  %v5522_v37 = vpop.eup %5521 }
 0x332   : > { %v5524_v44 = vpop.eup %5523  ;;  %v1437_v21 = vmul.f32 0.5, %v5990_v48  ;;  %v1756_v48 = vld [vmem:[%s5683_s24 + $0x38] sm:$0xff]  ;;  %v1755_v25 = vld [vmem:[%s5683_s24 + $0x30] sm:$0xff] }
 0x333   : > { %v1495_v35 = vmul.f32 %v5514_v61, %v1491_v26  ;;  %v1470_v36 = vadd.f32 -1.4531521, %v1466_v28  ;;  %v1473_v38 = vmul.f32 %v5518_v20, %v1469_v33  ;;  %v1492_v39 = vadd.f32 0.2548296, %v1488_v34  ;;  %v5526_v29 = vpop.eup %5525  ;;  %v1754_v26 = vld [vmem:[%s5683_s24 + $0x28] sm:$0xff]  ;;  %v1753_v28 = vld [vmem:[%s5683_s24 + $0x20] sm:$0xff] }
 0x334   : > { %v5528_v10 = vpop.eup %5527  ;;  %v1751_v33 = vld [vmem:[%s5683_s24 + $0x10] sm:$0xff]  ;;  %v1750_v34 = vld [vmem:[%s5683_s24 + $0x8] sm:$0xff] }
 0x335   : > { %v1515_v40 = vmul.f32 %v5522_v37, %v1495_v35  ;;  %v1474_v41 = vmul.f32 %v5520_v22, %v1470_v36  ;;  %v1477_v42 = vadd.f32 1.4214138, %v1473_v38  ;;  %v1496_v43 = vmul.f32 %v5516_v2, %v1492_v39  ;;  %v1749_v35 = vld [vmem:[%s5683_s24] sm:$0xff] }
 0x336   : > { %v1436_v2 = vmul.f32 0.5, %v5983_v30  ;;  %v4836_v39 = vld [vmem:[%s5678_s19] ss:$0 sm:$0xff] }
 0x337   : > { %v1519_v45 = vsub.f32 1.0, %v1515_v40  ;;  %v1478_v46 = vadd.f32 1.4214138, %v1474_v41  ;;  %v1481_v47 = vmul.f32 %v5518_v20, %v1477_v42  ;;  %v1516_v51 = vmul.f32 %v5524_v44, %v1496_v43  ;;  %v1916_v44 = vld [vmem:[%s5693_s6 + $0x78] sm:$0xff] }
 0x339   : > { %v1527_v53 = vsub.f32 0.0, %v1519_v45  ;;  %v1482_v54 = vmul.f32 %v5520_v22, %v1478_v46  ;;  %v1485_v55 = vadd.f32 -0.28449672, %v1481_v47  ;;  %v1520_v56 = vsub.f32 1.0, %v1516_v51  ;;  %v1914_v46 = vld [vmem:[%s5693_s6 + $0x68] sm:$0xff]  ;;  %v1913_v47 = vld [vmem:[%s5693_s6 + $0x60] sm:$0xff] }
 0x33a   : > { %v1912_v51 = vld [vmem:[%s5693_s6 + $0x58] sm:$0xff] }
 0x33b   : > { %v1531_v57 = vsel %vm1523_vm4, %v1519_v45, %v1527_v53  ;;  %v1486_v58 = vadd.f32 -0.28449672, %v1482_v54  ;;  %v1489_v59 = vmul.f32 %v5518_v20, %v1485_v55  ;;  %v1528_v60 = vsub.f32 0.0, %v1520_v56  ;;  %v1915_v45 = vld [vmem:[%s5693_s6 + $0x70] sm:$0xff]  ;;  %v1910_v54 = vld [vmem:[%s5693_s6 + $0x48] sm:$0xff]  ;;  %v1909_v55 = vld [vmem:[%s5693_s6 + $0x40] sm:$0xff] }
 0x33c   : > { %v1535_v62 = vadd.f32 1.0, %v1531_v57  ;;  %v1911_v53 = vld [vmem:[%s5693_s6 + $0x50] sm:$0xff] }
 0x33d   : > { %v1490_v61 = vmul.f32 %v5520_v22, %v1486_v58  ;;  %v1493_v63 = vadd.f32 0.2548296, %v1489_v59  ;;  %v1532_v0 = vsel %vm1524_vm5, %v1520_v56, %v1528_v60  ;;  %v1908_v56 = vld [vmem:[%s5693_s6 + $0x38] sm:$0xff]  ;;  %v1907_v57 = vld [vmem:[%s5693_s6 + $0x30] sm:$0xff]  ;;  %v1906_v58 = vld [vmem:[%s5693_s6 + $0x28] sm:$0xff] }
 0x33e   : > { %v1536_v4 = vadd.f32 1.0, %v1532_v0  ;;  %v1539_v11 = vmul.f32 %v1535_v62, %v1435_v5  ;;  %v1905_v59 = vld [vmem:[%s5693_s6 + $0x20] sm:$0xff]  ;;  %v1904_v60 = vld [vmem:[%s5693_s6 + $0x18] sm:$0xff]  ;;  %v1902_v62 = vld [vmem:[%s5693_s6 + $0x8] sm:$0xff] }
 0x33f   : > { %v1494_v3 = vadd.f32 0.2548296, %v1490_v61  ;;  %v1497_v6 = vmul.f32 %v5518_v20, %v1493_v63  ;;  %v1903_v61 = vld [vmem:[%s5693_s6 + $0x10] sm:$0xff]  ;;  %v1901_v63 = vld [vmem:[%s5693_s6] sm:$0xff]  ;;  %v1924_v0 = vld [vmem:[%s5693_s6 + $0xb8] sm:$0xff] }
 0x340   : > { %v1540_v8 = vmul.f32 %v1536_v4, %v1436_v2  ;;  %v1923_v2 = vld [vmem:[%s5693_s6 + $0xb0] sm:$0xff]  ;;  %v1921_v4 = vld [vmem:[%s5693_s6 + $0xa0] sm:$0xff]  ;;  %v1920_v5 = vld [vmem:[%s5693_s6 + $0x98] sm:$0xff] }
 0x341   : > { %v1498_v7 = vmul.f32 %v5520_v22, %v1494_v3  ;;  %v1517_v12 = vmul.f32 %v5526_v29, %v1497_v6  ;;  %v1922_v3 = vld [vmem:[%s5693_s6 + $0xa8] sm:$0xff]  ;;  %v1919_v6 = vld [vmem:[%s5693_s6 + $0x90] sm:$0xff] }
 0x342   : > { %1673 = vmatprep.mubr.f32.mxu0 %v1540_v8  ;;  %v1918_v29 = vld [vmem:[%s5693_s6 + $0x88] sm:$0xff]  ;;  %v1761_v8 = vld [vmem:[%s5688_s30] sm:$0x3] }
 0x343   : > { %v1518_v9 = vmul.f32 %v5528_v10, %v1498_v7  ;;  %v1521_v32 = vsub.f32 1.0, %v1517_v12  ;;  %1674 = vmatmul.mubr.f32.vlgmr.msra.gmra.mxu0 %v1539_v11  ;;  %v1917_v7 = vld [vmem:[%s5693_s6 + $0x80] sm:$0xff]  ;;  %v1766_v10 = vrot.slane %v1761_v8, %v5971_v17  ;;  %v1770_v11 = vrot.slane %v1761_v8, %v5974_v19 }
 0x344   : > { %1840 = vmatprep.mubr.f32.mxu0 %v5617_v1  ;;  %1797 = vmatpush1.msra.mxu0 %v1759_v52 }
 0x345   : > { %v1522_v13 = vsub.f32 1.0, %v1518_v9  ;;  %v1529_v30 = vsub.f32 0.0, %v1521_v32  ;;  %1798 = vmatprep.subr.mxu0 %v1758_v49 }
 0x346   : > { %1799 = vmatpush1.msra.mxu0 %v1757_v24 }
 0x347   : > { %v1530_v27 = vsub.f32 0.0, %v1522_v13  ;;  %v1533_v14 = vsel %vm1525_vm6, %v1521_v32, %v1529_v30  ;;  %1800 = vmatprep.subr.mxu0 %v1756_v48 }
 0x348   : > { %v1537_v15 = vadd.f32 1.0, %v1533_v14  ;;  %1801 = vmatpush1.msra.mxu0 %v1755_v25 }
 0x349   : > { %v1534_v16 = vsel %vm1526_vm7, %v1522_v13, %v1530_v27  ;;  %1802 = vmatprep.subr.mxu0 %v1754_v26 }
 0x34a   : > { %v1538_v20 = vadd.f32 1.0, %v1534_v16  ;;  %v1541_v23 = vmul.f32 %v1537_v15, %v1437_v21  ;;  %1803 = vmatpush1.msra.mxu0 %v1753_v28 }
 0x34b   : > { %1804 = vmatprep.subr.mxu0 %v1752_v31 }
 0x34c   : > { %v1542_v22 = vmul.f32 %v1538_v20, %v1438_v18  ;;  %1805 = vmatpush1.msra.mxu0 %v1751_v33 }
 0x34d   : > { %1806 = vmatprep.subr.mxu0 %v1750_v34 }
 0x34e   : > { %4837 = vmatprep.mubr.msk.f32.mxu1 %vm960_vm1, %v1542_v22  ;;  %1807 = vmatpush1.msra.mxu0 %v1749_v35 }
 0x34f   : > { %1744 = vmatmul.mubr.f32.vlgmr.msra.gmra.mxu1 %v1541_v23  ;;  %1935 = vmatprep.subr.mxu0 %v5617_v1 }
 0x350   : > { %5232 = vmatprep.mubr.msk.f32.mxu1 %vm5618_vm0, %v5617_v1 }
 0x403   : > { %v5084_v36 = vpop.f32.mrf.mxu0 }
 0x405   : > { %v5085_v37 = vpop.f32.mrf.mxu0 }
 0x406   : > { %v5086_v38 = vadd.f32 %v5085_v37, %v5084_v36 }
 0x408   : > { %v1676_v40 = vadd.f32 %v5086_v38, %v4836_v39 }
 0x40f   : > { %v1745_v41 = vpop.f32.mrf.mxu1 }
 0x410   : > { %v6028_v42 = vadd.f32 %v1745_v41, %v1676_v40 }
 0x411   : > { %v1747_v43 = vpop.f32.mrf.mxu1 }
 0x412   : > { %4838 = vmatmul.mubr.msk.f32.vlgmr.msra.gmra.mxu0 %vm1263_vm3, %v6028_v42 }
 0x413   : > { %1936 = vmatpush1.msra.mxu0 %v1916_v44 }
 0x414   : > { %1937 = vmatprep.subr.mxu0 %v5617_v1 }
 0x415   : > { %1938 = vmatpush1.msra.mxu0 %v1915_v45 }
 0x416   : > { %1939 = vmatprep.subr.mxu0 %v5617_v1 }
 0x417   : > { %1940 = vmatpush1.msra.mxu0 %v1914_v46 }
 0x418   : > { %1941 = vmatprep.subr.mxu0 %v5617_v1 }
 0x419   : > { %1942 = vmatpush1.msra.mxu0 %v1913_v47 }
 0x41a   : > { %1943 = vmatprep.subr.mxu0 %v5617_v1 }
 0x41b   : > { %1944 = vmatpush1.msra.mxu0 %v1912_v51 }
 0x41c   : > { %1945 = vmatprep.subr.mxu0 %v5617_v1 }
 0x41d   : > { %1946 = vmatpush1.msra.mxu0 %v1911_v53 }
 0x41e   : > { %1947 = vmatprep.subr.mxu0 %v5617_v1 }
 0x41f   : > { %1948 = vmatpush1.msra.mxu0 %v1910_v54 }
 0x420   : > { %1949 = vmatprep.subr.mxu0 %v5617_v1 }
 0x421   : > { %1950 = vmatpush1.msra.mxu0 %v1909_v55 }
 0x422   : > { %1951 = vmatprep.subr.mxu0 %v5617_v1 }
 0x423   : > { %1952 = vmatpush1.msra.mxu0 %v1908_v56 }
 0x424   : > { %1953 = vmatprep.subr.mxu0 %v5617_v1 }
 0x425   : > { %1954 = vmatpush1.msra.mxu0 %v1907_v57 }
 0x426   : > { %1955 = vmatprep.subr.mxu0 %v5617_v1 }
 0x427   : > { %1956 = vmatpush1.msra.mxu0 %v1906_v58 }
 0x428   : > { %1957 = vmatprep.subr.mxu0 %v5617_v1 }
 0x429   : > { %1958 = vmatpush1.msra.mxu0 %v1905_v59 }
 0x42a   : > { %1959 = vmatprep.subr.mxu0 %v5617_v1 }
 0x42b   : > { %1960 = vmatpush1.msra.mxu0 %v1904_v60 }
 0x42c   : > { %1961 = vmatprep.subr.mxu0 %v5617_v1 }
 0x42d   : > { %1962 = vmatpush1.msra.mxu0 %v1903_v61 }
 0x42e   : > { %1963 = vmatprep.subr.mxu0 %v5617_v1 }
 0x42f   : > { %1964 = vmatpush1.msra.mxu0 %v1902_v62 }
 0x430   : > { %1965 = vmatprep.subr.mxu0 %v5617_v1 }
 0x431   : > { %1966 = vmatpush1.msra.mxu0 %v1901_v63 }
 0x432   : > { %1983 = vmatprep.subr.mxu0 %v5617_v1 }
 0x433   : > { %1984 = vmatpush2.msra.mxu0 %v1924_v0 }
 0x434   : > { %1985 = vmatprep.subr.mxu0 %v5617_v1 }
 0x435   : > { %1986 = vmatpush2.msra.mxu0 %v1923_v2 }
 0x436   : > { %1987 = vmatprep.subr.mxu0 %v5617_v1 }
 0x437   : > { %1988 = vmatpush2.msra.mxu0 %v1922_v3 }
 0x438   : > { %1989 = vmatprep.subr.mxu0 %v5617_v1 }
 0x439   : > { %1990 = vmatpush2.msra.mxu0 %v1921_v4 }
 0x43a   : > { %1991 = vmatprep.subr.mxu0 %v5617_v1 }
 0x43b   : > { %1992 = vmatpush2.msra.mxu0 %v1920_v5 }
 0x43c   : > { %1993 = vmatprep.subr.mxu0 %v5617_v1 }
 0x43d   : > { %1994 = vmatpush2.msra.mxu0 %v1919_v6  ;;  %v4839_v6 = vld [vmem:[%s6618_s22] ss:$0 sm:$0xff]  ;;  %s6627_s22 = sld [smem:[#allocation11_spill]] }
 0x43e   : > { %1995 = vmatprep.subr.mxu0 %v5617_v1 }
 0x43f   : > { %1996 = vmatpush2.msra.mxu0 %v1918_v29  ;;  %v944_v29 = vld [vmem:[%s938_s26] sm:$0x3f]  ;;  %s6628_s26 = sld [smem:[#allocation12_spill]] }
 0x440   : > { %1997 = vmatprep.subr.mxu0 %v5617_v1 }
 0x441   : > { %1998 = vmatpush2.msra.mxu0 %v1917_v7 }
 0x442   : > { %5265 = vmatprep.subr.mxu0 %v5617_v1 }
 0x4d2   : > { %v1842_v12 = vpop.f32.mrf.mxu0 }
 0x4d3   : > { %v1843_v9 = vadd.f32 %v1842_v12, %v1766_v10 }
 0x4d4   : > { %v1844_v32 = vpop.f32.mrf.mxu0 }
 0x4d5   : > { %v1849_v13 = vmul.f32 0.70710677, %v1843_v9  ;;  %v1845_v30 = vadd.f32 %v1844_v32, %v1770_v11  ;;  %v1847_v3 = vmul.f32 0.5, %v1843_v9 }
 0x4d7   : > { %v1851_v27 = vand.u32 2147483647, %v1849_v13  ;;  %v1850_v14 = vmul.f32 0.70710677, %v1845_v30  ;;  %vm1891_vm8 = vcmp.ge.f32.partialorder %v1849_v13, 0.0  ;;  %v1848_v0 = vmul.f32 0.5, %v1845_v30 }
 0x4d9   : > { %v1853_v15 = vmul.f32 0.3275911, %v1851_v27  ;;  %v1852_v16 = vand.u32 2147483647, %v1850_v14  ;;  %v1879_v22 = vsub.f32 0.0, %v1851_v27  ;;  %vm1892_vm9 = vcmp.ge.f32.partialorder %v1850_v14, 0.0 }
 0x4da   : > { %v2040_v14 = vld [vmem:[%s6619_s23 + $0x28] sm:$0xff] }
 0x4db   : > { %v1855_v18 = vadd.f32 1.0, %v1853_v15  ;;  %v1854_v20 = vmul.f32 0.3275911, %v1852_v16  ;;  %v1880_v23 = vsub.f32 0.0, %v1852_v16  ;;  %v1881_v50 = vmul.f32 %v1879_v22, %v1851_v27  ;;  %5221 = vmatpush3.msra.mxu1 %v2040_v14  ;;  %v2039_v15 = vld [vmem:[%s6619_s23 + $0x20] sm:$0xff]  ;;  %v3019_v14 = vld [vmem:[%s6623_s7 + $0x18] sm:$0xff] }
 0x4dc   : > { %5222 = vmatprep.subr.mxu1 %v5617_v1 }
 0x4dd   : > { %5529 = vrcp.f32 %v1855_v18  ;;  %v1856_v21 = vadd.f32 1.0, %v1854_v20  ;;  %v1882_v49 = vmul.f32 %v1880_v23, %v1852_v16  ;;  %v1883_v48 = vmul.f32 1.442695, %v1881_v50  ;;  %5223 = vmatpush3.msra.mxu1 %v2039_v15  ;;  %v2038_v16 = vld [vmem:[%s6619_s23 + $0x18] sm:$0xff]  ;;  %v2037_v18 = vld [vmem:[%s6619_s23 + $0x10] sm:$0xff]  ;;  %v2036_v20 = vld [vmem:[%s6619_s23 + $0x8] sm:$0xff] }
 0x4de   : > { %5224 = vmatprep.subr.mxu1 %v5617_v1  ;;  %v3018_v15 = vld [vmem:[%s6623_s7 + $0x10] sm:$0xff] }
 0x4df   : > { %5531 = vrcp.f32 %v1856_v21  ;;  %v1885_v31 = vmul.f32 1.442695, %v1882_v49  ;;  %5225 = vmatpush3.msra.mxu1 %v2038_v16  ;;  %v2035_v21 = vld [vmem:[%s6619_s23] sm:$0xff]  ;;  %v3017_v16 = vld [vmem:[%s6623_s7 + $0x8] sm:$0xff] }
 0x4e0   : > { %5533 = vpow2.f32 %v1883_v48  ;;  %5226 = vmatprep.subr.mxu1 %v5617_v1  ;;  %v4841_v49 = vld [vmem:[%s6620_s28] ss:$0 sm:$0xff] }
 0x4e1   : > { %5535 = vpow2.f32 %v1885_v31  ;;  %5227 = vmatpush3.msra.mxu1 %v2037_v18  ;;  %v4842_v48 = vld [vmem:[%s6621_s1] ss:$0 sm:$0xff] }
 0x4e2   : > { %5228 = vmatprep.subr.mxu1 %v5617_v1  ;;  %v4849_v31 = vld [vmem:[%s6619_s23 + $0x80] sm:$0xff] }
 0x4e3   : > { %5229 = vmatpush3.msra.mxu1 %v2036_v20  ;;  %v3016_v18 = vld [vmem:[%s6623_s7] sm:$0xff] }
 0x4e4   : > { %5230 = vmatprep.subr.mxu1 %v5617_v1 }
 0x4e5   : > { %5231 = vmatpush3.msra.mxu1 %v2035_v21 }
 0x4e6   : > { %5235 = vmatprep.subr.mxu1 %v5617_v1 }
 0x4ea   : > { %v5530_v52 = vpop.eup %5529 }
 0x4eb   : > { %v1861_v24 = vmul.f32 1.0614054, %v5530_v52 }
 0x4ec   : > { %v5532_v25 = vpop.eup %5531 }
 0x4ed   : > { %v1863_v26 = vadd.f32 -1.4531521, %v1861_v24  ;;  %v1862_v28 = vmul.f32 1.0614054, %v5532_v25  ;;  %v5534_v47 = vpop.eup %5533 }
 0x4ee   : > { %v5536_v55 = vpop.eup %5535 }
 0x4ef   : > { %v1865_v33 = vmul.f32 %v5530_v52, %v1863_v26  ;;  %v1864_v34 = vadd.f32 -1.4531521, %v1862_v28  ;;  %v4850_v28 = vld [vmem:[%s6619_s23 + $0x88] sm:$0xff] }
 0x4f1   : > { %v1867_v35 = vadd.f32 1.4214138, %v1865_v33  ;;  %v1866_v36 = vmul.f32 %v5532_v25, %v1864_v34  ;;  %v4848_v33 = vld [vmem:[%s6619_s23 + $0x78] sm:$0xff]  ;;  %v4847_v34 = vld [vmem:[%s6619_s23 + $0x70] sm:$0xff] }
 0x4f3   : > { %v1869_v37 = vmul.f32 %v5530_v52, %v1867_v35  ;;  %v1868_v38 = vadd.f32 1.4214138, %v1866_v36  ;;  %v4846_v35 = vld [vmem:[%s6619_s23 + $0x68] sm:$0xff]  ;;  %v4845_v36 = vld [vmem:[%s6619_s23 + $0x60] sm:$0xff] }
 0x4f5   : > { %v1871_v39 = vadd.f32 -0.28449672, %v1869_v37  ;;  %v1870_v40 = vmul.f32 %v5532_v25, %v1868_v38  ;;  %v4859_v37 = vld [vmem:[%s6619_s23 + $0xe8] sm:$0xff]  ;;  %v4858_v38 = vld [vmem:[%s6619_s23 + $0xe0] sm:$0xff] }
 0x4f7   : > { %v1873_v41 = vmul.f32 %v5530_v52, %v1871_v39  ;;  %v1872_v43 = vadd.f32 -0.28449672, %v1870_v40  ;;  %v4857_v39 = vld [vmem:[%s6619_s23 + $0xd8] sm:$0xff]  ;;  %v4856_v40 = vld [vmem:[%s6619_s23 + $0xd0] sm:$0xff] }
 0x4f9   : > { %v1875_v44 = vadd.f32 0.2548296, %v1873_v41  ;;  %v1874_v45 = vmul.f32 %v5532_v25, %v1872_v43  ;;  %v4855_v41 = vld [vmem:[%s6619_s23 + $0xc8] sm:$0xff]  ;;  %v4854_v43 = vld [vmem:[%s6619_s23 + $0xc0] sm:$0xff] }
 0x4fb   : > { %v1877_v46 = vmul.f32 %v5530_v52, %v1875_v44  ;;  %v1876_v51 = vadd.f32 0.2548296, %v1874_v45 }
 0x4fd   : > { %v1887_v53 = vmul.f32 %v5534_v47, %v1877_v46  ;;  %v1878_v54 = vmul.f32 %v5532_v25, %v1876_v51  ;;  %v4852_v46 = vld [vmem:[%s6622_s2 + $0x2] ss:$0 sm:$0xff]  ;;  %v4843_v51 = vld [vmem:[%s6622_s2] ss:$0 sm:$0xff] }
 0x4ff   : > { %v1889_v56 = vsub.f32 1.0, %v1887_v53  ;;  %v1888_v57 = vmul.f32 %v5536_v55, %v1878_v54 }
 0x501   : > { %v1893_v58 = vsub.f32 0.0, %v1889_v56  ;;  %v1890_v59 = vsub.f32 1.0, %v1888_v57  ;;  %v4871_v57 = vld [vmem:[%s6619_s23 + $0x50] sm:$0xff] }
 0x503   : > { %v1895_v60 = vsel %vm1891_vm8, %v1889_v56, %v1893_v58  ;;  %v1894_v61 = vsub.f32 0.0, %v1890_v59  ;;  %v4872_v56 = vld [vmem:[%s6619_s23 + $0x58] sm:$0xff]  ;;  %v4870_v58 = vld [vmem:[%s6619_s23 + $0x48] sm:$0xff] }
 0x504   : > { %v1897_v62 = vadd.f32 1.0, %v1895_v60  ;;  %v4869_v60 = vld [vmem:[%s6619_s23 + $0x40] sm:$0xff] }
 0x505   : > { %v1896_v63 = vsel %vm1892_vm9, %v1890_v59, %v1894_v61  ;;  %v4861_v59 = vld [vmem:[%s6622_s2 + $0x4] ss:$0 sm:$0xff] }
 0x506   : > { %v1898_v2 = vadd.f32 1.0, %v1896_v63  ;;  %v1899_v5 = vmul.f32 %v1897_v62, %v1847_v3  ;;  %v4868_v62 = vld [vmem:[%s6619_s23 + $0x38] sm:$0xff] }
 0x507   : > { %v4890_v3 = vld [vmem:[%s6619_s23 + $0x118] sm:$0xff] }
 0x508   : > { %v1900_v4 = vmul.f32 %v1898_v2, %v1848_v0  ;;  %v4867_v2 = vld [vmem:[%s6619_s23 + $0x30] sm:$0xff] }
 0x50a   : > { %4840 = vmatprep.mubr.msk.f32.mxu0 %vm960_vm1, %v1900_v4  ;;  %v4889_v4 = vld [vmem:[%s6619_s23 + $0x110] sm:$0xff] }
 0x50b   : > { %2000 = vmatmul.mubr.f32.vlgmr.msra.gmra.mxu0 %v1899_v5  ;;  %v4888_v5 = vld [vmem:[%s6619_s23 + $0x108] sm:$0xff] }
 0x50c   : > { %5267 = vmatprep.mubr.msk.f32.mxu0 %vm5618_vm0, %v5617_v1 }
 0x5cb   : > { %v2001_v7 = vpop.f32.mrf.mxu0 }
 0x5cc   : > { %v2002_v8 = vadd.f32 %v4839_v6, %v2001_v7  ;;  %v4887_v6 = vld [vmem:[%s6619_s23 + $0x100] sm:$0xff]  ;;  %v4885_v7 = vld [vmem:[%s6619_s23 + $0xf0] sm:$0xff] }
 0x5cd   : > { %v2003_v10 = vpop.f32.mrf.mxu0 }
 0x5ce   : > { %v6089_v11 = vadd.f32 %v2002_v8, %v944_v29  ;;  %v4886_v29 = vld [vmem:[%s6619_s23 + $0xf8] sm:$0xff]  ;;  %v3026_v10 = vld [vmem:[%s6623_s7 + $0x50] sm:$0xff] }
 0x5cf   : > { %v3027_v8 = vld [vmem:[%s6623_s7 + $0x58] sm:$0xff] }
 0x5d0   : > { %v2008_v12 = vsel %vm1036_vm2, %v6089_v11, 0.0 }
 0x5d1   : > { %2009 = vadd.xlane.f32.xlu1 %v2008_v12  ;;  %v3025_v12 = vld [vmem:[%s6623_s7 + $0x48] sm:$0xff] }
 0x65a   : > { %v2010_v9 = vpop.xlane.xlu1 %2009 }
 0x65b   : > { %v2011_v32 = vmul.f32 0.020833334, %v2010_v9  ;;  %v3024_v9 = vld [vmem:[%s6623_s7 + $0x40] sm:$0xff] }
 0x65d   : > { %v2012_v13 = vsub.f32 %v6089_v11, %v2011_v32  ;;  %v3023_v32 = vld [vmem:[%s6623_s7 + $0x38] sm:$0xff] }
 0x65f   : > { %v2013_v30 = vmul.f32 %v2012_v13, %v2012_v13 }
 0x661   : > { %v2014_v27 = vsel %vm1036_vm2, %v2013_v30, 0.0  ;;  %v3021_v30 = vld [vmem:[%s6623_s7 + $0x28] sm:$0xff] }
 0x662   : > { %2015 = vadd.xlane.f32.xlu1 %v2014_v27  ;;  %v3020_v27 = vld [vmem:[%s6623_s7 + $0x20] sm:$0xff] }
 0x6eb   : > { %v2016_v22 = vpop.xlane.xlu1 %2015 }
 0x6ec   : > { %v2017_v23 = vmul.f32 0.020833334, %v2016_v22 }
 0x6ee   : > { %v2018_v50 = vadd.f32 1e-05, %v2017_v23 }
 0x6f0   : > { %5537 = vrsqrt.f32 %v2018_v50 }
 0x6fd   : > { %v5538_v52 = vpop.eup %5537 }
 0x6fe   : > { %v2020_v24 = vmul.f32 %v5538_v52, %v2012_v13  ;;  %v3022_v13 = vld [vmem:[%s6623_s7 + $0x30] sm:$0xff] }
 0x700   : > { %v2027_v25 = vmul.f32 %v4841_v49, %v2020_v24 }
 0x702   : > { %v6109_v26 = vadd.f32 %v4842_v48, %v2027_v25 }
 0x704   : > { %5233 = vmatmul.mubr.msk.f32.vlgmr.msra.gmra.mxu1 %vm1263_vm3, %v6109_v26 }
 0x705   : > { %5236 = vmatpush3.msra.mxu1 %v4850_v28  ;;  %5247 = vmatprep.mubr.msk.f32.mxu1 %vm5618_vm0, %v5617_v1 }
 0x706   : > { %5237 = vmatprep.subr.mxu1 %v5617_v1 }
 0x707   : > { %5238 = vmatpush3.msra.mxu1 %v4849_v31 }
 0x708   : > { %5239 = vmatprep.subr.mxu1 %v5617_v1 }
 0x709   : > { %5240 = vmatpush3.msra.mxu1 %v4848_v33 }
 0x70a   : > { %5241 = vmatprep.subr.mxu1 %v5617_v1 }
 0x70b   : > { %5242 = vmatpush3.msra.mxu1 %v4847_v34 }
 0x70c   : > { %5243 = vmatprep.subr.mxu1 %v5617_v1 }
 0x70d   : > { %5244 = vmatpush3.msra.mxu1 %v4846_v35 }
 0x70e   : > { %5245 = vmatprep.subr.mxu1 %v5617_v1 }
 0x70f   : > { %5246 = vmatpush3.msra.mxu1 %v4845_v36 }
 0x710   : > { %5248 = vmatmul.mubr.msk.f32.vlgmr.msra.gmra.mxu1 %vm1263_vm3, %v6109_v26  ;;  %5250 = vmatprep.subr.mxu1 %v5617_v1 }
 0x711   : > { %5251 = vmatpush3.msra.mxu1 %v4859_v37  ;;  %5262 = vmatprep.mubr.msk.f32.mxu1 %vm5618_vm0, %v5617_v1  ;;  %v4881_v37 = vld [vmem:[%s6619_s23 + $0xb8] sm:$0xff] }
 0x712   : > { %5252 = vmatprep.subr.mxu1 %v5617_v1 }
 0x713   : > { %5253 = vmatpush3.msra.mxu1 %v4858_v38  ;;  %v4880_v38 = vld [vmem:[%s6619_s23 + $0xb0] sm:$0xff] }
 0x714   : > { %5254 = vmatprep.subr.mxu1 %v5617_v1 }
 0x715   : > { %5255 = vmatpush3.msra.mxu1 %v4857_v39  ;;  %v4879_v39 = vld [vmem:[%s6619_s23 + $0xa8] sm:$0xff] }
 0x716   : > { %5256 = vmatprep.subr.mxu1 %v5617_v1 }
 0x717   : > { %5257 = vmatpush3.msra.mxu1 %v4856_v40  ;;  %v4878_v40 = vld [vmem:[%s6619_s23 + $0xa0] sm:$0xff] }
 0x718   : > { %5258 = vmatprep.subr.mxu1 %v5617_v1 }
 0x719   : > { %5259 = vmatpush3.msra.mxu1 %v4855_v41  ;;  %v4877_v41 = vld [vmem:[%s6619_s23 + $0x98] sm:$0xff] }
 0x71a   : > { %5260 = vmatprep.subr.mxu1 %v5617_v1 }
 0x71b   : > { %5261 = vmatpush3.msra.mxu1 %v4854_v43  ;;  %v4876_v43 = vld [vmem:[%s6619_s23 + $0x90] sm:$0xff] }
 0x71c   : > { %5263 = vmatmul.mubr.msk.f32.vlgmr.msra.gmra.mxu1 %vm1263_vm3, %v6109_v26  ;;  %5270 = vmatprep.subr.mxu1 %v5617_v1 }
 0x71d   : > { %5272 = vmatprep.mubr.msk.f32.mxu1 %vm5618_vm0, %v5617_v1 }
 0x7c4   : > { %v2117_v44 = vpop.f32.mrf.mxu1 }
 0x7c5   : > { %v2118_v55 = vadd.f32 %v4843_v51, %v2117_v44  ;;  %v4874_v51 = vld [vmem:[%s6622_s2 + $0x1] ss:$0 sm:$0xff] }
 0x7c6   : > { %v5234_v45 = vpop.f32.mrf.mxu1 }
 0x7d0   : > { %v2202_v47 = vpop.f32.mrf.mxu1 }
 0x7d1   : > { %v2203_v53 = vadd.f32 %v4852_v46, %v2202_v47  ;;  %v4883_v46 = vld [vmem:[%s6622_s2 + $0x3] ss:$0 sm:$0xff] }
 0x7d2   : > { %v5249_v54 = vpop.f32.mrf.mxu1 }
 0x7d3   : > { %5266 = vmatpush3.xpose.msk.msra.mxu0 %vm2291_vm10, %v2203_v53  ;;  %v4892_v54 = vld [vmem:[%s6622_s2 + $0x5] ss:$0 sm:$0xff] }
 0x7d4   : > { %5275 = vmatprep.subr.mxu0 %v5617_v1 }
 0x7d6   : > { %5268 = vmatmul.mubr.msk.f32.vlgmr.msra.gmra.mxu0 %vm2291_vm10, %v2118_v55 }
 0x7d7   : > { %5276 = vmatpush3.msra.mxu0 %v4872_v56  ;;  %5287 = vmatprep.mubr.msk.f32.mxu0 %vm5618_vm0, %v5617_v1 }
 0x7d8   : > { %5277 = vmatprep.subr.mxu0 %v5617_v1 }
 0x7d9   : > { %5278 = vmatpush3.msra.mxu0 %v4871_v57 }
 0x7da   : > { %5279 = vmatprep.subr.mxu0 %v5617_v1 }
 0x7db   : > { %5280 = vmatpush3.msra.mxu0 %v4870_v58 }
 0x7dc   : > { %v2287_v61 = vpop.f32.mrf.mxu1  ;;  %5281 = vmatprep.subr.mxu0 %v5617_v1 }
 0x7dd   : > { %v2288_v63 = vadd.f32 %v4861_v59, %v2287_v61  ;;  %5282 = vmatpush3.msra.mxu0 %v4869_v60 }
 0x7de   : > { %v5264_v0 = vpop.f32.mrf.mxu1  ;;  %5283 = vmatprep.subr.mxu0 %v5617_v1 }
 0x7df   : > { %5271 = vmatpush3.msk.msra.mxu1 %vm2385_vm11, %v2288_v63  ;;  %5284 = vmatpush3.msra.mxu0 %v4868_v62 }
 0x7e0   : > { %5285 = vmatprep.subr.mxu0 %v5617_v1  ;;  %5290 = vmatprep.subr.mxu1 %v5617_v1 }
 0x7e1   : > { %5286 = vmatpush3.msra.mxu0 %v4867_v2 }
 0x7e2   : > { %5288 = vmatmul.mubr.msk.f32.vlgmr.msra.gmra.mxu0 %vm1263_vm3, %v6109_v26  ;;  %5305 = vmatprep.subr.mxu0 %v5617_v1 }
 0x7e3   : > { %5306 = vmatpush3.msra.mxu0 %v4890_v3  ;;  %5317 = vmatprep.mubr.msk.f32.mxu0 %vm5618_vm0, %v5617_v1 }
 0x7e4   : > { %5307 = vmatprep.subr.mxu0 %v5617_v1 }
 0x7e5   : > { %5308 = vmatpush3.msra.mxu0 %v4889_v4 }
 0x7e6   : > { %5309 = vmatprep.subr.mxu0 %v5617_v1 }
 0x7e7   : > { %5310 = vmatpush3.msra.mxu0 %v4888_v5 }
 0x7e8   : > { %5311 = vmatprep.subr.mxu0 %v5617_v1 }
 0x7e9   : > { %5312 = vmatpush3.msra.mxu0 %v4887_v6  ;;  %v2892_v6 = vld [vmem:[%s6624_s10 + $0x28] sm:$0xff] }
 0x7ea   : > { %5313 = vmatprep.subr.mxu0 %v5617_v1 }
 0x7eb   : > { %5314 = vmatpush3.msra.mxu0 %v4886_v29  ;;  %v2891_v29 = vld [vmem:[%s6624_s10 + $0x20] sm:$0xff] }
 0x7ec   : > { %5315 = vmatprep.subr.mxu0 %v5617_v1 }
 0x7ed   : > { %5316 = vmatpush3.msra.mxu0 %v4885_v7  ;;  %v2890_v7 = vld [vmem:[%s6624_s10 + $0x18] sm:$0xff] }
 0x7ee   : > { %5318 = vmatmul.mubr.msk.f32.vlgmr.msra.gmra.mxu0 %vm1263_vm3, %v6109_v26  ;;  %3048 = vmatprep.subr.mxu0 %v3027_v8  ;;  %v2889_v8 = vld [vmem:[%s6624_s10 + $0x10] sm:$0xff] }
 0x7ef   : > { %3049 = vmatpush1.msra.mxu0 %v3026_v10  ;;  %3092 = vmatprep.mubr.f32.mxu0 %v5617_v1  ;;  %v2888_v10 = vld [vmem:[%s6624_s10 + $0x8] sm:$0xff] }
 0x7f0   : > { %3050 = vmatprep.subr.mxu0 %v3025_v12  ;;  %v2887_v12 = vld [vmem:[%s6624_s10] sm:$0xff] }
 0x7f1   : > { %3051 = vmatpush1.msra.mxu0 %v3024_v9 }
 0x7f2   : > { %3052 = vmatprep.subr.mxu0 %v3023_v32 }
 0x7f3   : > { %3053 = vmatpush1.msra.mxu0 %v3022_v13 }
 0x7f4   : > { %3054 = vmatprep.subr.mxu0 %v3021_v30 }
 0x7f5   : > { %3055 = vmatpush1.msra.mxu0 %v3020_v27 }
 0x7f6   : > { %3056 = vmatprep.subr.mxu0 %v3019_v14  ;;  %v4899_v14 = vld [vmem:[%s6625_s11] ss:$0 sm:$0xff] }
 0x7f7   : > { %3057 = vmatpush1.msra.mxu0 %v3018_v15 }
 0x7f8   : > { %3058 = vmatprep.subr.mxu0 %v3017_v16 }
 0x7f9   : > { %3059 = vmatpush1.msra.mxu0 %v3016_v18 }
 0x7fa   : > { %4902 = vmatmul.mubr.msk.f32.vlgmr.msra.gmra.mxu0 %vm1263_vm3, %v6028_v42  ;;  %3268 = vmatprep.subr.mxu0 %v5617_v1 }
 0x896   : > { %v2364_v20 = vpop.f32.mrf.mxu0 }
 0x897   : > { %v2368_v21 = vmul.f32 0.20412415, %v2364_v20 }
 0x898   : > { %v5269_v22 = vpop.f32.mrf.mxu0 }
 0x899   : > { %v2370_v23 = vsel %vm2369_vm12, %v2368_v21, -inf }
 0x89a   : > { %2371 = vmax.xlane.f32.xlu0 %v2370_v23 }
 0x8a2   : > { %v2542_v50 = vpop.f32.mrf.mxu0 }
 0x8a3   : > { %v2543_v56 = vadd.f32 %v4874_v51, %v2542_v50 }
 0x8a4   : > { %v5289_v52 = vpop.f32.mrf.mxu0 }
 0x8ae   : > { %v2712_v49 = vpop.f32.mrf.mxu0 }
 0x8b0   : > { %v5319_v24 = vpop.f32.mrf.mxu0 }
 0x8b1   : > { %v3013_v24 = vld [vmem:[%s6626_s18 + $0x48] sm:$0xff] }
 0x923   : > { %v2372_v48 = vpop.xlane.xlu0 %2371 }
 0x924   : > { %v2373_v25 = vsub.f32 %v2368_v21, %v2372_v48  ;;  %v3012_v48 = vld [vmem:[%s6626_s18 + $0x40] sm:$0xff] }
 0x926   : > { %v2374_v28 = vmul.f32 1.442695, %v2373_v25  ;;  %v3011_v25 = vld [vmem:[%s6626_s18 + $0x38] sm:$0xff] }
 0x928   : > { %5539 = vpow2.f32 %v2374_v28  ;;  %v3010_v28 = vld [vmem:[%s6626_s18 + $0x30] sm:$0xff] }
 0x935   : > { %v5540_v31 = vpop.eup %5539 }
 0x936   : > { %v2376_v33 = vsel %vm2369_vm12, %v5540_v31, 0.0 }
 0x937   : > { %2377 = vadd.xlane.f32.xlu1 %v2376_v33  ;;  %v3008_v33 = vld [vmem:[%s6626_s18 + $0x20] sm:$0xff] }
 0x9c0   : > { %v2378_v34 = vpop.xlane.xlu1 %2377 }
 0x9c1   : > { %5541 = vrcp.f32 %v2378_v34  ;;  %v3007_v34 = vld [vmem:[%s6626_s18 + $0x18] sm:$0xff] }
 0x9ce   : > { %v5542_v35 = vpop.eup %5541 }
 0x9cf   : > { %v2380_v36 = vmul.f32 %v5542_v35, %v5540_v31  ;;  %v3009_v31 = vld [vmem:[%s6626_s18 + $0x28] sm:$0xff]  ;;  %v3006_v35 = vld [vmem:[%s6626_s18 + $0x10] sm:$0xff] }
 0x9d1   : > { %5273 = vmatmul.mubr.msk.f32.vlgmr.msra.gmra.mxu1 %vm2381_vm13, %v2380_v36  ;;  %v3005_v36 = vld [vmem:[%s6626_s18 + $0x8] sm:$0xff] }
 0x9d2   : > { %5291 = vmatpush3.msra.mxu1 %v4881_v37  ;;  %5302 = vmatprep.mubr.msk.f32.mxu1 %vm5618_vm0, %v5617_v1  ;;  %v3004_v37 = vld [vmem:[%s6626_s18] sm:$0xff] }
 0x9d3   : > { %5292 = vmatprep.subr.mxu1 %v5617_v1 }
 0x9d4   : > { %5293 = vmatpush3.msra.mxu1 %v4880_v38 }
 0x9d5   : > { %5294 = vmatprep.subr.mxu1 %v5617_v1 }
 0x9d6   : > { %5295 = vmatpush3.msra.mxu1 %v4879_v39 }
 0x9d7   : > { %5296 = vmatprep.subr.mxu1 %v5617_v1 }
 0x9d8   : > { %5297 = vmatpush3.msra.mxu1 %v4878_v40 }
 0x9d9   : > { %5298 = vmatprep.subr.mxu1 %v5617_v1 }
 0x9da   : > { %5299 = vmatpush3.msra.mxu1 %v4877_v41 }
 0x9db   : > { %5300 = vmatprep.subr.mxu1 %v5617_v1 }
 0x9dc   : > { %5301 = vmatpush3.msra.mxu1 %v4876_v43  ;;  %v4900_v43 = vld [vmem:[%s6627_s22] ss:$0 sm:$0xff] }
 0x9dd   : > { %5303 = vmatmul.mubr.msk.f32.vlgmr.msra.gmra.mxu1 %vm1263_vm3, %v6109_v26  ;;  %5320 = vmatprep.subr.mxu1 %v5617_v1  ;;  %v2713_v26 = vadd.f32 %v4892_v54, %v2712_v49  ;;  %v3014_v49 = vld [vmem:[%s6626_s18 + $0x50] sm:$0xff] }
 0x9de   : > { %5322 = vmatprep.mubr.msk.f32.mxu1 %vm5618_vm0, %v5617_v1 }
 0xa91   : > { %v2455_v44 = vpop.f32.mrf.mxu1 }
 0xa92   : > { %2460 = vst.msk [vmem:[#allocation2] sm:$0x3f] %vm2459_vm14, %v2455_v44 }
 0xa93   : > { %v5274_v45 = vpop.f32.mrf.mxu1 }
 0xa94   : > { %v4901_v45 = vld [vmem:[%s6628_s26] ss:$0 sm:$0xff] }
 0xa9d   : > { %v2627_v47 = vpop.f32.mrf.mxu1 }
 0xa9e   : > { %v2628_v53 = vadd.f32 %v4883_v46, %v2627_v47 }
 0xa9f   : > { %v5304_v55 = vpop.f32.mrf.mxu1 }
 0xaa0   : > { %5321 = vmatpush3.xpose.msk.msra.mxu1 %vm2291_vm10, %v2628_v53 }
 0xaa1   : > { %5325 = vmatprep.subr.mxu1 %v5617_v1 }
 0xaa3   : > { %5323 = vmatmul.mubr.msk.f32.vlgmr.msra.gmra.mxu1 %vm2291_vm10, %v2543_v56 }
 0xaa4   : > { %5326 = vmatpush3.msk.msra.mxu1 %vm2385_vm11, %v2713_v26  ;;  %5327 = vmatprep.mubr.msk.f32.mxu1 %vm5618_vm0, %v5617_v1 }
 0xaa5   : > { %5330 = vmatprep.subr.mxu1 %v5617_v1 }
 0xb63   : > { %v2788_v57 = vpop.f32.mrf.mxu1 }
 0xb64   : > { %v2792_v58 = vmul.f32 0.20412415, %v2788_v57 }
 0xb65   : > { %v5324_v59 = vpop.f32.mrf.mxu1 }
 0xb66   : > { %v2793_v60 = vsel %vm2369_vm12, %v2792_v58, -inf }
 0xb67   : > { %2794 = vmax.xlane.f32.xlu0 %v2793_v60 }
 0xbf0   : > { %v2795_v61 = vpop.xlane.xlu0 %2794 }
 0xbf1   : > { %v2796_v62 = vsub.f32 %v2792_v58, %v2795_v61 }
 0xbf3   : > { %v2797_v63 = vmul.f32 1.442695, %v2796_v62 }
 0xbf5   : > { %5543 = vpow2.f32 %v2797_v63 }
 0xc02   : > { %v5544_v0 = vpop.eup %5543 }
 0xc03   : > { %v2799_v2 = vsel %vm2369_vm12, %v5544_v0, 0.0 }
 0xc04   : > { %2800 = vadd.xlane.f32.xlu1 %v2799_v2 }
 0xc8d   : > { %v2801_v3 = vpop.xlane.xlu1 %2800 }
 0xc8e   : > { %5545 = vrcp.f32 %v2801_v3 }
 0xc9b   : > { %v5546_v4 = vpop.eup %5545 }
 0xc9c   : > { %v2803_v5 = vmul.f32 %v5546_v4, %v5544_v0 }
 0xc9e   : > { %5328 = vmatmul.mubr.msk.f32.vlgmr.msra.gmra.mxu1 %vm2381_vm13, %v2803_v5 }
 0xc9f   : > { %5342 = vmatprep.mubr.msk.f32.mxu1 %vm5618_vm0, %v5617_v1  ;;  %5331 = vmatpush3.msra.mxu1 %v2892_v6 }
 0xca0   : > { %5332 = vmatprep.subr.mxu1 %v5617_v1 }
 0xca1   : > { %5333 = vmatpush3.msra.mxu1 %v2891_v29 }
 0xca2   : > { %5334 = vmatprep.subr.mxu1 %v5617_v1 }
 0xca3   : > { %5335 = vmatpush3.msra.mxu1 %v2890_v7 }
 0xca4   : > { %5336 = vmatprep.subr.mxu1 %v5617_v1 }
 0xca5   : > { %5337 = vmatpush3.msra.mxu1 %v2889_v8 }
 0xca6   : > { %5338 = vmatprep.subr.mxu1 %v5617_v1 }
 0xca7   : > { %5339 = vmatpush3.msra.mxu1 %v2888_v10 }
 0xca8   : > { %5340 = vmatprep.subr.mxu1 %v5617_v1 }
 0xca9   : > { %5341 = vmatpush3.msra.mxu1 %v2887_v12 }
 0xd5e   : > { %v2876_v9 = vpop.f32.mrf.mxu1 }
 0xd5f   : > { %2881 = vrot.lane.b32.xlu0 %v2876_v9, %s6600_s16  ;;  %s6629_s16 = sld [smem:[#allocation16_spill]]  ;;  %v3173_v9 = vld [vmem:[%s6630_s3] sm:$0x3] }
 0xd60   : > { %v5329_v32 = vpop.f32.mrf.mxu1 }
 0xd61   : > { %v3094_v32 = vpop.f32.mrf.mxu0 }
 0xd65   : > { %v3256_v51 = vld [vmem:[%s6629_s16 + $0x78] sm:$0xff]  ;;  %v3255_v53 = vld [vmem:[%s6629_s16 + $0x70] sm:$0xff]  ;;  %v3254_v54 = vld [vmem:[%s6629_s16 + $0x68] sm:$0xff] }
 0xd66   : > { %3269 = vmatpush1.msra.mxu0 %v3256_v51  ;;  %v3253_v55 = vld [vmem:[%s6629_s16 + $0x60] sm:$0xff]  ;;  %v3252_v56 = vld [vmem:[%s6629_s16 + $0x58] sm:$0xff]  ;;  %v3251_v26 = vld [vmem:[%s6629_s16 + $0x50] sm:$0xff] }
 0xd67   : > { %3270 = vmatprep.subr.mxu0 %v5617_v1  ;;  %v3250_v57 = vld [vmem:[%s6629_s16 + $0x48] sm:$0xff]  ;;  %v3249_v58 = vld [vmem:[%s6629_s16 + $0x40] sm:$0xff]  ;;  %v3248_v59 = vld [vmem:[%s6629_s16 + $0x38] sm:$0xff] }
 0xd68   : > { %3271 = vmatpush1.msra.mxu0 %v3255_v53  ;;  %v3247_v60 = vld [vmem:[%s6629_s16 + $0x30] sm:$0xff]  ;;  %v3246_v61 = vld [vmem:[%s6629_s16 + $0x28] sm:$0xff]  ;;  %v3245_v62 = vld [vmem:[%s6629_s16 + $0x20] sm:$0xff] }
 0xd69   : > { %3272 = vmatprep.subr.mxu0 %v5617_v1  ;;  %v3244_v63 = vld [vmem:[%s6629_s16 + $0x18] sm:$0xff]  ;;  %v3243_v0 = vld [vmem:[%s6629_s16 + $0x10] sm:$0xff]  ;;  %v3242_v2 = vld [vmem:[%s6629_s16 + $0x8] sm:$0xff] }
 0xd6a   : > { %3273 = vmatpush1.msra.mxu0 %v3254_v54  ;;  %v3241_v3 = vld [vmem:[%s6629_s16] sm:$0xff]  ;;  %v3264_v4 = vld [vmem:[%s6629_s16 + $0xb8] sm:$0xff]  ;;  %v3263_v5 = vld [vmem:[%s6629_s16 + $0xb0] sm:$0xff] }
 0xd6b   : > { %3274 = vmatprep.subr.mxu0 %v5617_v1  ;;  %v3262_v6 = vld [vmem:[%s6629_s16 + $0xa8] sm:$0xff]  ;;  %v3261_v29 = vld [vmem:[%s6629_s16 + $0xa0] sm:$0xff]  ;;  %v3260_v7 = vld [vmem:[%s6629_s16 + $0x98] sm:$0xff] }
 0xd6c   : > { %3275 = vmatpush1.msra.mxu0 %v3253_v55  ;;  %v3259_v8 = vld [vmem:[%s6629_s16 + $0x90] sm:$0xff]  ;;  %v3258_v10 = vld [vmem:[%s6629_s16 + $0x88] sm:$0xff]  ;;  %v3257_v12 = vld [vmem:[%s6629_s16 + $0x80] sm:$0xff] }
 0xd6d   : > { %3276 = vmatprep.subr.mxu0 %v5617_v1 }
 0xd6e   : > { %3277 = vmatpush1.msra.mxu0 %v3252_v56 }
 0xd6f   : > { %3278 = vmatprep.subr.mxu0 %v5617_v1 }
 0xd70   : > { %3279 = vmatpush1.msra.mxu0 %v3251_v26 }
 0xd71   : > { %3280 = vmatprep.subr.mxu0 %v5617_v1 }
 0xd72   : > { %3281 = vmatpush1.msra.mxu0 %v3250_v57 }
 0xd73   : > { %3282 = vmatprep.subr.mxu0 %v5617_v1 }
 0xd74   : > { %3283 = vmatpush1.msra.mxu0 %v3249_v58 }
 0xd75   : > { %3284 = vmatprep.subr.mxu0 %v5617_v1 }
 0xd76   : > { %3285 = vmatpush1.msra.mxu0 %v3248_v59 }
 0xd77   : > { %3286 = vmatprep.subr.mxu0 %v5617_v1 }
 0xd78   : > { %3287 = vmatpush1.msra.mxu0 %v3247_v60 }
 0xd79   : > { %3288 = vmatprep.subr.mxu0 %v5617_v1 }
 0xd7a   : > { %3289 = vmatpush1.msra.mxu0 %v3246_v61 }
 0xd7b   : > { %3290 = vmatprep.subr.mxu0 %v5617_v1 }
 0xd7c   : > { %3291 = vmatpush1.msra.mxu0 %v3245_v62 }
 0xd7d   : > { %3292 = vmatprep.subr.mxu0 %v5617_v1 }
 0xd7e   : > { %3293 = vmatpush1.msra.mxu0 %v3244_v63 }
 0xd7f   : > { %3294 = vmatprep.subr.mxu0 %v5617_v1 }
 0xd80   : > { %3295 = vmatpush1.msra.mxu0 %v3243_v0 }
 0xd81   : > { %3296 = vmatprep.subr.mxu0 %v5617_v1 }
 0xd82   : > { %3297 = vmatpush1.msra.mxu0 %v3242_v2 }
 0xd83   : > { %3298 = vmatprep.subr.mxu0 %v5617_v1 }
 0xd84   : > { %3299 = vmatpush1.msra.mxu0 %v3241_v3 }
 0xd85   : > { %3316 = vmatprep.subr.mxu0 %v5617_v1 }
 0xd86   : > { %3317 = vmatpush2.msra.mxu0 %v3264_v4 }
 0xd87   : > { %3318 = vmatprep.subr.mxu0 %v5617_v1 }
 0xd88   : > { %3319 = vmatpush2.msra.mxu0 %v3263_v5 }
 0xd89   : > { %3320 = vmatprep.subr.mxu0 %v5617_v1 }
 0xd8a   : > { %3321 = vmatpush2.msra.mxu0 %v3262_v6 }
 0xd8b   : > { %3322 = vmatprep.subr.mxu0 %v5617_v1 }
 0xd8c   : > { %3323 = vmatpush2.msra.mxu0 %v3261_v29 }
 0xd8d   : > { %3324 = vmatprep.subr.mxu0 %v5617_v1 }
 0xd8e   : > { %3325 = vmatpush2.msra.mxu0 %v3260_v7 }
 0xd8f   : > { %3326 = vmatprep.subr.mxu0 %v5617_v1 }
 0xd90   : > { %3327 = vmatpush2.msra.mxu0 %v3259_v8 }
 0xd91   : > { %3328 = vmatprep.subr.mxu0 %v5617_v1 }
 0xd92   : > { %3329 = vmatpush2.msra.mxu0 %v3258_v10 }
 0xd93   : > { %3330 = vmatprep.subr.mxu0 %v5617_v1 }
 0xd94   : > { %3331 = vmatpush2.msra.mxu0 %v3257_v12 }
 0xd95   : > { %5395 = vmatprep.subr.mxu0 %v5617_v1 }
 0xdd1   : > { %v2882_v13 = vpop.permute.xlu0 %2881 }
 0xdd2   : > { %2885 = vst.msk [vmem:[#allocation2] sm:$0x3f] %vm2884_vm15, %v2882_v13  ;;  %v3178_v13 = vrot.slane %v3173_v9, %v5971_v17 }
 0xdd9   : > { %v2886_v30 = vld [vmem:[#allocation2] sm:$0x3f] }
 0xdda   : > { %5343 = vmatmul.mubr.msk.f32.vlgmr.msra.gmra.mxu1 %vm1263_vm3, %v2886_v30 }
 0xddb   : > { %3166 = vmatprep.mubr.f32.mxu1 %v5617_v1 }
 0xe9a   : > { %v2962_v27 = vpop.f32.mrf.mxu1 }
 0xe9b   : > { %v2966_v15 = vadd.f32 %v2962_v27, %v6089_v11  ;;  %v3015_v11 = vld [vmem:[%s6626_s18 + $0x58] sm:$0xff] }
 0xe9c   : > { %v5344_v16 = vpop.f32.mrf.mxu1  ;;  %3122 = vmatprep.subr.mxu1 %v3015_v11 }
 0xe9d   : > { %v6256_v18 = vadd.f32 %v4899_v14, %v2966_v15  ;;  %3123 = vmatpush1.msra.mxu1 %v3014_v49  ;;  %v3182_v14 = vrot.slane %v3173_v9, %v5974_v19  ;;  %v3096_v15 = vpop.f32.mrf.mxu0 }
 0xe9e   : > { %3124 = vmatprep.subr.mxu1 %v3013_v24 }
 0xe9f   : > { %v2977_v20 = vsel %vm1036_vm2, %v6256_v18, 0.0  ;;  %3125 = vmatpush1.msra.mxu1 %v3012_v48 }
 0xea0   : > { %2978 = vadd.xlane.f32.xlu1 %v2977_v20  ;;  %3126 = vmatprep.subr.mxu1 %v3011_v25 }
 0xea1   : > { %3127 = vmatpush1.msra.mxu1 %v3010_v28 }
 0xea2   : > { %3128 = vmatprep.subr.mxu1 %v3009_v31 }
 0xea3   : > { %3129 = vmatpush1.msra.mxu1 %v3008_v33 }
 0xea4   : > { %3130 = vmatprep.subr.mxu1 %v3007_v34 }
 0xea5   : > { %3131 = vmatpush1.msra.mxu1 %v3006_v35 }
 0xea6   : > { %3132 = vmatprep.subr.mxu1 %v3005_v36 }
 0xea7   : > { %3133 = vmatpush1.msra.mxu1 %v3004_v37 }
 0xea8   : > { %5345 = vmatprep.subr.mxu1 %v5617_v1 }
 0xf29   : > { %v2979_v21 = vpop.xlane.xlu1 %2978 }
 0xf2a   : > { %v2980_v22 = vmul.f32 0.020833334, %v2979_v21 }
 0xf2c   : > { %v2981_v23 = vsub.f32 %v6256_v18, %v2980_v22 }
 0xf2e   : > { %v2982_v50 = vmul.f32 %v2981_v23, %v2981_v23 }
 0xf30   : > { %v2983_v52 = vsel %vm1036_vm2, %v2982_v50, 0.0 }
 0xf31   : > { %2984 = vadd.xlane.f32.xlu1 %v2983_v52 }
 0xfba   : > { %v2985_v38 = vpop.xlane.xlu1 %2984 }
 0xfbb   : > { %v2986_v39 = vmul.f32 0.020833334, %v2985_v38 }
 0xfbd   : > { %v2987_v40 = vadd.f32 1e-05, %v2986_v39 }
 0xfbf   : > { %5547 = vrsqrt.f32 %v2987_v40 }
 0xfcc   : > { %v5548_v41 = vpop.eup %5547 }
 0xfcd   : > { %v2989_v44 = vmul.f32 %v5548_v41, %v2981_v23 }
 0xfcf   : > { %v2996_v46 = vmul.f32 %v4900_v43, %v2989_v44 }
 0xfd1   : > { %v3003_v47 = vadd.f32 %v4901_v45, %v2996_v46 }
 0xfd3   : > { %4903 = vmatmul.mubr.msk.f32.vlgmr.msra.gmra.mxu1 %vm1263_vm3, %v3003_v47 }
 0xfd4   : > { %5357 = vmatprep.mubr.msk.f32.mxu1 %vm5618_vm0, %v5617_v1 }
0x1093   : > { %v3168_v30 = vpop.f32.mrf.mxu1 }
0x1094   : > { %v3169_v27 = vadd.f32 %v3168_v30, %v3094_v32  ;;  %v4905_v30 = vld [vmem:[%s5763_s20] ss:$0 sm:$0xff] }
0x1095   : > { %v3170_v16 = vpop.f32.mrf.mxu1 }
0x1096   : > { %v3185_v20 = vadd.f32 %v3178_v13, %v3169_v27  ;;  %v3171_v21 = vadd.f32 %v3170_v16, %v3096_v15 }
0x1098   : > { %v3189_v22 = vmul.f32 0.70710677, %v3185_v20  ;;  %v3186_v23 = vadd.f32 %v3182_v14, %v3171_v21  ;;  %v3187_v12 = vmul.f32 0.5, %v3185_v20 }
0x109a   : > { %v3191_v50 = vand.u32 2147483647, %v3189_v22  ;;  %v3190_v52 = vmul.f32 0.70710677, %v3186_v23  ;;  %vm3231_vm4 = vcmp.ge.f32.partialorder %v3189_v22, 0.0  ;;  %v3188_v8 = vmul.f32 0.5, %v3186_v23 }
0x109c   : > { %v3193_v11 = vmul.f32 0.3275911, %v3191_v50  ;;  %v3192_v49 = vand.u32 2147483647, %v3190_v52  ;;  %v3219_v28 = vsub.f32 0.0, %v3191_v50  ;;  %vm3232_vm5 = vcmp.ge.f32.partialorder %v3190_v52, 0.0 }
0x109d   : > { %v4914_v52 = vld [vmem:[%s6619_s23 + $0x140] sm:$0xff] }
0x109e   : > { %v3195_v24 = vadd.f32 1.0, %v3193_v11  ;;  %v3194_v48 = vmul.f32 0.3275911, %v3192_v49  ;;  %v3220_v31 = vsub.f32 0.0, %v3192_v49  ;;  %v3221_v33 = vmul.f32 %v3219_v28, %v3191_v50  ;;  %v4913_v11 = vld [vmem:[%s6619_s23 + $0x138] sm:$0xff] }
0x10a0   : > { %5549 = vrcp.f32 %v3195_v24  ;;  %v3196_v25 = vadd.f32 1.0, %v3194_v48  ;;  %v3222_v35 = vmul.f32 %v3220_v31, %v3192_v49  ;;  %v3223_v37 = vmul.f32 1.442695, %v3221_v33  ;;  %v4912_v49 = vld [vmem:[%s6619_s23 + $0x130] sm:$0xff]  ;;  %v4911_v24 = vld [vmem:[%s6619_s23 + $0x128] sm:$0xff]  ;;  %v4910_v48 = vld [vmem:[%s6619_s23 + $0x120] sm:$0xff] }
0x10a2   : > { %5551 = vrcp.f32 %v3196_v25  ;;  %v3225_v41 = vmul.f32 1.442695, %v3222_v35 }
0x10a3   : > { %5553 = vpow2.f32 %v3223_v37 }
0x10a4   : > { %5555 = vpow2.f32 %v3225_v41  ;;  %v4922_v41 = vld [vmem:[%s6619_s23 + $0x198] sm:$0xff] }
0x10ad   : > { %v5550_v34 = vpop.eup %5549 }
0x10ae   : > { %v3201_v36 = vmul.f32 1.0614054, %v5550_v34 }
0x10af   : > { %v5552_v38 = vpop.eup %5551 }
0x10b0   : > { %v3203_v39 = vadd.f32 -1.4531521, %v3201_v36  ;;  %v3202_v40 = vmul.f32 1.0614054, %v5552_v38  ;;  %v5554_v59 = vpop.eup %5553  ;;  %v4909_v36 = vld [vmem:[%s6621_s1 + $0x1] ss:$0 sm:$0xff] }
0x10b1   : > { %v5556_v63 = vpop.eup %5555  ;;  %s6631_s1 = smov 24  }
0x10b2   : > { %v3205_v43 = vmul.f32 %v5550_v34, %v3203_v39  ;;  %v3204_v44 = vadd.f32 -1.4531521, %v3202_v40  ;;  %v4924_v39 = vld [vmem:[%s6619_s23 + $0x1a8] sm:$0xff]  ;;  %v4923_v40 = vld [vmem:[%s6619_s23 + $0x1a0] sm:$0xff] }
0x10b4   : > { %v3207_v45 = vadd.f32 1.4214138, %v3205_v43  ;;  %v3206_v46 = vmul.f32 %v5552_v38, %v3204_v44  ;;  %v4921_v43 = vld [vmem:[%s6619_s23 + $0x190] sm:$0xff]  ;;  %v4920_v44 = vld [vmem:[%s6619_s23 + $0x188] sm:$0xff] }
0x10b6   : > { %v3209_v47 = vmul.f32 %v5550_v34, %v3207_v45  ;;  %v3208_v51 = vadd.f32 1.4214138, %v3206_v46  ;;  %v4919_v45 = vld [vmem:[%s6619_s23 + $0x180] sm:$0xff]  ;;  %v4933_v46 = vld [vmem:[%s6619_s23 + $0x208] sm:$0xff] }
0x10b8   : > { %v3211_v53 = vadd.f32 -0.28449672, %v3209_v47  ;;  %v3210_v54 = vmul.f32 %v5552_v38, %v3208_v51  ;;  %v4932_v47 = vld [vmem:[%s6619_s23 + $0x200] sm:$0xff]  ;;  %v4931_v51 = vld [vmem:[%s6619_s23 + $0x1f8] sm:$0xff] }
0x10ba   : > { %v3213_v55 = vmul.f32 %v5550_v34, %v3211_v53  ;;  %v3212_v56 = vadd.f32 -0.28449672, %v3210_v54  ;;  %v4930_v53 = vld [vmem:[%s6619_s23 + $0x1f0] sm:$0xff]  ;;  %v4929_v54 = vld [vmem:[%s6619_s23 + $0x1e8] sm:$0xff] }
0x10bc   : > { %v3215_v26 = vadd.f32 0.2548296, %v3213_v55  ;;  %v3214_v57 = vmul.f32 %v5552_v38, %v3212_v56  ;;  %v4928_v55 = vld [vmem:[%s6619_s23 + $0x1e0] sm:$0xff] }
0x10be   : > { %v3217_v58 = vmul.f32 %v5550_v34, %v3215_v26  ;;  %v3216_v60 = vadd.f32 0.2548296, %v3214_v57  ;;  %v4908_v34 = vld [vmem:[%s6620_s28 + $0x1] ss:$0 sm:$0xff]  ;;  %v4926_v57 = vld [vmem:[%s6622_s2 + $0x8] ss:$0 sm:$0xff] }
0x10c0   : > { %v3227_v61 = vmul.f32 %v5554_v59, %v3217_v58  ;;  %v3218_v62 = vmul.f32 %v5552_v38, %v3216_v60  ;;  %v4917_v59 = vld [vmem:[%s6622_s2 + $0x6] ss:$0 sm:$0xff] }
0x10c2   : > { %v3229_v0 = vsub.f32 1.0, %v3227_v61  ;;  %v3228_v2 = vmul.f32 %v5556_v63, %v3218_v62  ;;  %v4946_v63 = vld [vmem:[%s6619_s23 + $0x178] sm:$0xff] }
0x10c4   : > { %v3233_v3 = vsub.f32 0.0, %v3229_v0  ;;  %v3230_v4 = vsub.f32 1.0, %v3228_v2  ;;  %v4944_v2 = vld [vmem:[%s6619_s23 + $0x168] sm:$0xff] }
0x10c6   : > { %v3235_v5 = vsel %vm3231_vm4, %v3229_v0, %v3233_v3  ;;  %v3234_v6 = vsub.f32 0.0, %v3230_v4  ;;  %v4945_v0 = vld [vmem:[%s6619_s23 + $0x170] sm:$0xff]  ;;  %v4935_v3 = vld [vmem:[%s6622_s2 + $0xa] ss:$0 sm:$0xff] }
0x10c7   : > { %v3237_v29 = vadd.f32 1.0, %v3235_v5 }
0x10c8   : > { %v3236_v7 = vsel %vm3232_vm5, %v3230_v4, %v3234_v6  ;;  %v4943_v4 = vld [vmem:[%s6619_s23 + $0x160] sm:$0xff]  ;;  %v4942_v6 = vld [vmem:[%s6619_s23 + $0x158] sm:$0xff] }
0x10c9   : > { %v3238_v10 = vadd.f32 1.0, %v3236_v7  ;;  %v3239_v32 = vmul.f32 %v3237_v29, %v3187_v12  ;;  %v4963_v12 = vld [vmem:[%s6619_s23 + $0x230] sm:$0xff] }
0x10cb   : > { %v3240_v9 = vmul.f32 %v3238_v10, %v3188_v8  ;;  %v4941_v8 = vld [vmem:[%s6619_s23 + $0x150] sm:$0xff]  ;;  %v4964_v10 = vld [vmem:[%s6619_s23 + $0x238] sm:$0xff] }
0x10cd   : > { %4904 = vmatprep.mubr.msk.f32.mxu0 %vm960_vm1, %v3240_v9  ;;  %v4962_v9 = vld [vmem:[%s6619_s23 + $0x228] sm:$0xff] }
0x10ce   : > { %3333 = vmatmul.mubr.f32.vlgmr.msra.gmra.mxu0 %v3239_v32  ;;  %v4961_v32 = vld [vmem:[%s6619_s23 + $0x220] sm:$0xff] }
0x10cf   : > { %5397 = vmatprep.mubr.msk.f32.mxu0 %vm5618_vm0, %v5617_v1 }
0x118e   : > { %v3334_v13 = vpop.f32.mrf.mxu0 }
0x118f   : > { %v3338_v27 = vadd.f32 %v3334_v13, %v6256_v18  ;;  %v4915_v18 = vld [vmem:[%s6619_s23 + $0x148] sm:$0xff]  ;;  %v4960_v13 = vld [vmem:[%s6619_s23 + $0x218] sm:$0xff] }
0x1190   : > { %v3336_v14 = vpop.f32.mrf.mxu0  ;;  %5346 = vmatpush3.msra.mxu1 %v4915_v18  ;;  %v5000_v18 = vld [vmem:[%s6623_s7 + $0x78] sm:$0xff] }
0x1191   : > { %v6336_v15 = vadd.f32 %v4905_v30, %v3338_v27  ;;  %5347 = vmatprep.subr.mxu1 %v5617_v1  ;;  %v4959_v30 = vld [vmem:[%s6619_s23 + $0x210] sm:$0xff]  ;;  %v5008_v27 = vld [vmem:[%s6623_s7 + $0xb8] sm:$0xff] }
0x1192   : > { %5348 = vmatpush3.msra.mxu1 %v4914_v52  ;;  %v5007_v14 = vld [vmem:[%s6623_s7 + $0xb0] sm:$0xff] }
0x1193   : > { %v3351_v16 = vsel %vm1036_vm2, %v6336_v15, 0.0  ;;  %5349 = vmatprep.subr.mxu1 %v5617_v1  ;;  %v4999_v52 = vld [vmem:[%s6623_s7 + $0x70] sm:$0xff] }
0x1194   : > { %3352 = vadd.xlane.f32.xlu1 %v3351_v16  ;;  %5350 = vmatpush3.msra.mxu1 %v4913_v11  ;;  %v5006_v16 = vld [vmem:[%s6623_s7 + $0xa8] sm:$0xff] }
0x1195   : > { %5351 = vmatprep.subr.mxu1 %v5617_v1  ;;  %v4998_v11 = vld [vmem:[%s6623_s7 + $0x68] sm:$0xff] }
0x1196   : > { %5352 = vmatpush3.msra.mxu1 %v4912_v49  ;;  %v4997_v49 = vld [vmem:[%s6623_s7 + $0x60] sm:$0xff] }
0x1197   : > { %5353 = vmatprep.subr.mxu1 %v5617_v1 }
0x1198   : > { %5354 = vmatpush3.msra.mxu1 %v4911_v24 }
0x1199   : > { %5355 = vmatprep.subr.mxu1 %v5617_v1 }
0x119a   : > { %5356 = vmatpush3.msra.mxu1 %v4910_v48 }
0x119b   : > { %5360 = vmatprep.subr.mxu1 %v5617_v1 }
0x121d   : > { %v3353_v20 = vpop.xlane.xlu1 %3352 }
0x121e   : > { %v3354_v21 = vmul.f32 0.020833334, %v3353_v20  ;;  %v5005_v20 = vld [vmem:[%s6623_s7 + $0xa0] sm:$0xff] }
0x1220   : > { %v3355_v22 = vsub.f32 %v6336_v15, %v3354_v21  ;;  %v5004_v21 = vld [vmem:[%s6623_s7 + $0x98] sm:$0xff] }
0x1222   : > { %v3356_v23 = vmul.f32 %v3355_v22, %v3355_v22 }
0x1224   : > { %v3357_v50 = vsel %vm1036_vm2, %v3356_v23, 0.0  ;;  %v5002_v23 = vld [vmem:[%s6623_s7 + $0x88] sm:$0xff] }
0x1225   : > { %3358 = vadd.xlane.f32.xlu1 %v3357_v50  ;;  %v5001_v50 = vld [vmem:[%s6623_s7 + $0x80] sm:$0xff] }
0x12ae   : > { %v3359_v25 = vpop.xlane.xlu1 %3358 }
0x12af   : > { %v3360_v28 = vmul.f32 0.020833334, %v3359_v25 }
0x12b1   : > { %v3361_v31 = vadd.f32 1e-05, %v3360_v28 }
0x12b3   : > { %5557 = vrsqrt.f32 %v3361_v31 }
0x12c0   : > { %v5558_v33 = vpop.eup %5557 }
0x12c1   : > { %v3363_v35 = vmul.f32 %v5558_v33, %v3355_v22  ;;  %v5003_v22 = vld [vmem:[%s6623_s7 + $0x90] sm:$0xff] }
0x12c3   : > { %v3370_v37 = vmul.f32 %v4908_v34, %v3363_v35 }
0x12c5   : > { %v6356_v38 = vadd.f32 %v4909_v36, %v3370_v37 }
0x12c7   : > { %5358 = vmatmul.mubr.msk.f32.vlgmr.msra.gmra.mxu1 %vm1263_vm3, %v6356_v38 }
0x12c8   : > { %5361 = vmatpush3.msra.mxu1 %v4924_v39  ;;  %5372 = vmatprep.mubr.msk.f32.mxu1 %vm5618_vm0, %v5617_v1 }
0x12c9   : > { %5362 = vmatprep.subr.mxu1 %v5617_v1 }
0x12ca   : > { %5363 = vmatpush3.msra.mxu1 %v4923_v40 }
0x12cb   : > { %5364 = vmatprep.subr.mxu1 %v5617_v1 }
0x12cc   : > { %5365 = vmatpush3.msra.mxu1 %v4922_v41 }
0x12cd   : > { %5366 = vmatprep.subr.mxu1 %v5617_v1 }
0x12ce   : > { %5367 = vmatpush3.msra.mxu1 %v4921_v43 }
0x12cf   : > { %5368 = vmatprep.subr.mxu1 %v5617_v1 }
0x12d0   : > { %5369 = vmatpush3.msra.mxu1 %v4920_v44 }
0x12d1   : > { %5370 = vmatprep.subr.mxu1 %v5617_v1 }
0x12d2   : > { %5371 = vmatpush3.msra.mxu1 %v4919_v45  ;;  %v4955_v45 = vld [vmem:[%s6619_s23 + $0x1d8] sm:$0xff] }
0x12d3   : > { %5373 = vmatmul.mubr.msk.f32.vlgmr.msra.gmra.mxu1 %vm1263_vm3, %v6356_v38  ;;  %5375 = vmatprep.subr.mxu1 %v5617_v1 }
0x12d4   : > { %5376 = vmatpush3.msra.mxu1 %v4933_v46  ;;  %5387 = vmatprep.mubr.msk.f32.mxu1 %vm5618_vm0, %v5617_v1  ;;  %v4954_v46 = vld [vmem:[%s6619_s23 + $0x1d0] sm:$0xff] }
0x12d5   : > { %5377 = vmatprep.subr.mxu1 %v5617_v1 }
0x12d6   : > { %5378 = vmatpush3.msra.mxu1 %v4932_v47  ;;  %v4953_v47 = vld [vmem:[%s6619_s23 + $0x1c8] sm:$0xff] }
0x12d7   : > { %5379 = vmatprep.subr.mxu1 %v5617_v1 }
0x12d8   : > { %5380 = vmatpush3.msra.mxu1 %v4931_v51  ;;  %v4952_v51 = vld [vmem:[%s6619_s23 + $0x1c0] sm:$0xff] }
0x12d9   : > { %5381 = vmatprep.subr.mxu1 %v5617_v1 }
0x12da   : > { %5382 = vmatpush3.msra.mxu1 %v4930_v53  ;;  %v4951_v53 = vld [vmem:[%s6619_s23 + $0x1b8] sm:$0xff] }
0x12db   : > { %5383 = vmatprep.subr.mxu1 %v5617_v1 }
0x12dc   : > { %5384 = vmatpush3.msra.mxu1 %v4929_v54  ;;  %v4950_v54 = vld [vmem:[%s6619_s23 + $0x1b0] sm:$0xff] }
0x12dd   : > { %5385 = vmatprep.subr.mxu1 %v5617_v1 }
0x12de   : > { %5386 = vmatpush3.msra.mxu1 %v4928_v55 }
0x12df   : > { %5388 = vmatmul.mubr.msk.f32.vlgmr.msra.gmra.mxu1 %vm1263_vm3, %v6356_v38  ;;  %5390 = vmatprep.subr.mxu1 %v5617_v1 }
0x12e0   : > { %5392 = vmatprep.mubr.msk.f32.mxu1 %vm5618_vm0, %v5617_v1 }
0x1387   : > { %v3462_v56 = vpop.f32.mrf.mxu1 }
0x1388   : > { %v3463_v62 = vadd.f32 %v4917_v59, %v3462_v56 }
0x1389   : > { %v5359_v26 = vpop.f32.mrf.mxu1 }
0x138a   : > { %v4957_v26 = vld [vmem:[%s6622_s2 + $0x9] ss:$0 sm:$0xff] }
0x1393   : > { %v3547_v58 = vpop.f32.mrf.mxu1 }
0x1394   : > { %v3548_v60 = vadd.f32 %v4926_v57, %v3547_v58  ;;  %v4948_v58 = vld [vmem:[%s6622_s2 + $0x7] ss:$0 sm:$0xff] }
0x1395   : > { %v5374_v61 = vpop.f32.mrf.mxu1 }
0x1396   : > { %5391 = vmatpush3.xpose.msk.msra.mxu1 %vm2291_vm10, %v3548_v60  ;;  %v4966_v60 = vld [vmem:[%s6622_s2 + $0xb] ss:$0 sm:$0xff] }
0x1397   : > { %5400 = vmatprep.subr.mxu1 %v5617_v1 }
0x1399   : > { %5393 = vmatmul.mubr.msk.f32.vlgmr.msra.gmra.mxu1 %vm2291_vm10, %v3463_v62 }
0x139a   : > { %5401 = vmatpush3.msra.mxu1 %v4946_v63  ;;  %5412 = vmatprep.mubr.msk.f32.mxu1 %vm5618_vm0, %v5617_v1 }
0x139b   : > { %5402 = vmatprep.subr.mxu1 %v5617_v1 }
0x139c   : > { %5403 = vmatpush3.msra.mxu1 %v4945_v0 }
0x139d   : > { %5404 = vmatprep.subr.mxu1 %v5617_v1 }
0x139e   : > { %5405 = vmatpush3.msra.mxu1 %v4944_v2 }
0x139f   : > { %v3632_v5 = vpop.f32.mrf.mxu1  ;;  %5406 = vmatprep.subr.mxu1 %v5617_v1 }
0x13a0   : > { %v3633_v29 = vadd.f32 %v4935_v3, %v3632_v5  ;;  %5407 = vmatpush3.msra.mxu1 %v4943_v4 }
0x13a1   : > { %v5389_v7 = vpop.f32.mrf.mxu1  ;;  %5408 = vmatprep.subr.mxu1 %v5617_v1 }
0x13a2   : > { %5396 = vmatpush3.msk.msra.mxu0 %vm2385_vm11, %v3633_v29  ;;  %5409 = vmatpush3.msra.mxu1 %v4942_v6 }
0x13a3   : > { %5410 = vmatprep.subr.mxu1 %v5617_v1  ;;  %5415 = vmatprep.subr.mxu0 %v5617_v1 }
0x13a4   : > { %5411 = vmatpush3.msra.mxu1 %v4941_v8 }
0x13a5   : > { %5413 = vmatmul.mubr.msk.f32.vlgmr.msra.gmra.mxu1 %vm1263_vm3, %v6356_v38  ;;  %5430 = vmatprep.subr.mxu1 %v5617_v1 }
0x13a6   : > { %5431 = vmatpush3.msra.mxu1 %v4964_v10  ;;  %5442 = vmatprep.mubr.msk.f32.mxu1 %vm5618_vm0, %v5617_v1 }
0x13a7   : > { %5432 = vmatprep.subr.mxu1 %v5617_v1 }
0x13a8   : > { %5433 = vmatpush3.msra.mxu1 %v4963_v12 }
0x13a9   : > { %5434 = vmatprep.subr.mxu1 %v5617_v1 }
0x13aa   : > { %5435 = vmatpush3.msra.mxu1 %v4962_v9  ;;  %v4977_v9 = vld [vmem:[%s6624_s10 + $0x58] sm:$0xff] }
0x13ab   : > { %5436 = vmatprep.subr.mxu1 %v5617_v1 }
0x13ac   : > { %5437 = vmatpush3.msra.mxu1 %v4961_v32  ;;  %v4976_v32 = vld [vmem:[%s6624_s10 + $0x50] sm:$0xff] }
0x13ad   : > { %5438 = vmatprep.subr.mxu1 %v5617_v1 }
0x13ae   : > { %5439 = vmatpush3.msra.mxu1 %v4960_v13  ;;  %v4975_v13 = vld [vmem:[%s6624_s10 + $0x48] sm:$0xff] }
0x13af   : > { %5440 = vmatprep.subr.mxu1 %v5617_v1 }
0x13b0   : > { %5441 = vmatpush3.msra.mxu1 %v4959_v30  ;;  %v4974_v30 = vld [vmem:[%s6624_s10 + $0x40] sm:$0xff] }
0x13b1   : > { %5443 = vmatmul.mubr.msk.f32.vlgmr.msra.gmra.mxu1 %vm1263_vm3, %v6356_v38  ;;  %4393 = vmatprep.subr.mxu1 %v5008_v27  ;;  %v4973_v27 = vld [vmem:[%s6624_s10 + $0x38] sm:$0xff] }
0x13b2   : > { %4394 = vmatpush1.msra.mxu1 %v5007_v14  ;;  %4437 = vmatprep.mubr.f32.mxu1 %v5617_v1  ;;  %v4972_v14 = vld [vmem:[%s6624_s10 + $0x30] sm:$0xff] }
0x13b3   : > { %4395 = vmatprep.subr.mxu1 %v5006_v16 }
0x13b4   : > { %4396 = vmatpush1.msra.mxu1 %v5005_v20 }
0x13b5   : > { %4397 = vmatprep.subr.mxu1 %v5004_v21 }
0x13b6   : > { %4398 = vmatpush1.msra.mxu1 %v5003_v22 }
0x13b7   : > { %4399 = vmatprep.subr.mxu1 %v5002_v23 }
0x13b8   : > { %4400 = vmatpush1.msra.mxu1 %v5001_v50  ;;  %v4980_v50 = vld [vmem:[%s6625_s11 + $0x1] ss:$0 sm:$0xff] }
0x13b9   : > { %4401 = vmatprep.subr.mxu1 %v5000_v18 }
0x13ba   : > { %4402 = vmatpush1.msra.mxu1 %v4999_v52 }
0x13bb   : > { %4403 = vmatprep.subr.mxu1 %v4998_v11 }
0x13bc   : > { %4404 = vmatpush1.msra.mxu1 %v4997_v49 }
0x13bd   : > { %5009 = vmatmul.mubr.msk.f32.vlgmr.msra.gmra.mxu1 %vm1263_vm3, %v6028_v42  ;;  %4615 = vmatprep.subr.mxu1 %v5617_v1 }
0x1459   : > { %v3708_v24 = vpop.f32.mrf.mxu1 }
0x145a   : > { %v3712_v48 = vmul.f32 0.20412415, %v3708_v24 }
0x145b   : > { %v5394_v25 = vpop.f32.mrf.mxu1 }
0x145c   : > { %v3713_v28 = vsel %vm2369_vm12, %v3712_v48, -inf }
0x145d   : > { %3714 = vmax.xlane.f32.xlu1 %v3713_v28 }
0x1465   : > { %v3882_v31 = vpop.f32.mrf.mxu1 }
0x1466   : > { %v3883_v62 = vadd.f32 %v4948_v58, %v3882_v31  ;;  %v5026_v58 = vld [vmem:[%s6629_s16 + $0x130] sm:$0xff] }
0x1467   : > { %v5414_v33 = vpop.f32.mrf.mxu1 }
0x1468   : > { %v4995_v33 = vld [vmem:[%s6626_s18 + $0xb0] sm:$0xff] }
0x1471   : > { %v4052_v34 = vpop.f32.mrf.mxu1 }
0x1473   : > { %v5444_v35 = vpop.f32.mrf.mxu1 }
0x1474   : > { %v4993_v35 = vld [vmem:[%s6626_s18 + $0xa0] sm:$0xff] }
0x14e6   : > { %v3715_v36 = vpop.xlane.xlu1 %3714 }
0x14e7   : > { %v3716_v37 = vsub.f32 %v3712_v48, %v3715_v36  ;;  %v4992_v36 = vld [vmem:[%s6626_s18 + $0x98] sm:$0xff] }
0x14e9   : > { %v3717_v39 = vmul.f32 1.442695, %v3716_v37  ;;  %v4991_v37 = vld [vmem:[%s6626_s18 + $0x90] sm:$0xff] }
0x14eb   : > { %5559 = vpow2.f32 %v3717_v39  ;;  %v4990_v39 = vld [vmem:[%s6626_s18 + $0x88] sm:$0xff] }
0x14f8   : > { %v5560_v42 = vpop.eup %5559 }
0x14f9   : > { %v3719_v40 = vsel %vm2369_vm12, %v5560_v42, 0.0 }
0x14fa   : > { %3720 = vadd.xlane.f32.xlu1 %v3719_v40  ;;  %v4988_v40 = vld [vmem:[%s6626_s18 + $0x78] sm:$0xff] }
0x1583   : > { %v3721_v41 = vpop.xlane.xlu1 %3720 }
0x1584   : > { %5561 = vrcp.f32 %v3721_v41  ;;  %v4987_v41 = vld [vmem:[%s6626_s18 + $0x70] sm:$0xff] }
0x1591   : > { %v5562_v43 = vpop.eup %5561 }
0x1592   : > { %v3723_v44 = vmul.f32 %v5562_v43, %v5560_v42  ;;  %v4989_v42 = vld [vmem:[%s6626_s18 + $0x80] sm:$0xff]  ;;  %v4986_v43 = vld [vmem:[%s6626_s18 + $0x68] sm:$0xff] }
0x1594   : > { %5398 = vmatmul.mubr.msk.f32.vlgmr.msra.gmra.mxu0 %vm2381_vm13, %v3723_v44  ;;  %v4985_v44 = vld [vmem:[%s6626_s18 + $0x60] sm:$0xff] }
0x1595   : > { %5416 = vmatpush3.msra.mxu0 %v4955_v45  ;;  %5427 = vmatprep.mubr.msk.f32.mxu0 %vm5618_vm0, %v5617_v1 }
0x1596   : > { %5417 = vmatprep.subr.mxu0 %v5617_v1 }
0x1597   : > { %5418 = vmatpush3.msra.mxu0 %v4954_v46 }
0x1598   : > { %5419 = vmatprep.subr.mxu0 %v5617_v1 }
0x1599   : > { %5420 = vmatpush3.msra.mxu0 %v4953_v47 }
0x159a   : > { %5421 = vmatprep.subr.mxu0 %v5617_v1 }
0x159b   : > { %5422 = vmatpush3.msra.mxu0 %v4952_v51 }
0x159c   : > { %5423 = vmatprep.subr.mxu0 %v5617_v1 }
0x159d   : > { %5424 = vmatpush3.msra.mxu0 %v4951_v53  ;;  %v4983_v53 = vld [vmem:[%s6627_s22 + $0x1] ss:$0 sm:$0xff] }
0x159e   : > { %5425 = vmatprep.subr.mxu0 %v5617_v1 }
0x159f   : > { %5426 = vmatpush3.msra.mxu0 %v4950_v54 }
0x15a0   : > { %5428 = vmatmul.mubr.msk.f32.vlgmr.msra.gmra.mxu0 %vm1263_vm3, %v6356_v38  ;;  %5445 = vmatprep.subr.mxu0 %v5617_v1  ;;  %v4053_v38 = vadd.f32 %v4966_v60, %v4052_v34  ;;  %v4994_v34 = vld [vmem:[%s6626_s18 + $0xa8] sm:$0xff]  ;;  %v5024_v60 = vld [vmem:[%s6629_s16 + $0x120] sm:$0xff] }
0x15a1   : > { %5447 = vmatprep.mubr.msk.f32.mxu0 %vm5618_vm0, %v5617_v1 }
0x1654   : > { %v3796_v55 = vpop.f32.mrf.mxu0 }
0x1655   : > { %3800 = vst.msk [vmem:[#allocation2] sm:$0x3f] %vm2459_vm14, %v3796_v55  ;;  %v4984_v55 = vld [vmem:[%s6628_s26 + $0x1] ss:$0 sm:$0xff] }
0x1656   : > { %v5399_v56 = vpop.f32.mrf.mxu0 }
0x1660   : > { %v3967_v57 = vpop.f32.mrf.mxu0 }
0x1661   : > { %v3968_v59 = vadd.f32 %v4957_v26, %v3967_v57  ;;  %v5027_v57 = vld [vmem:[%s6629_s16 + $0x138] sm:$0xff] }
0x1662   : > { %v5429_v61 = vpop.f32.mrf.mxu0  ;;  %4616 = vmatpush1.msra.mxu1 %v5027_v57 }
0x1663   : > { %5446 = vmatpush3.xpose.msk.msra.mxu0 %vm2291_vm10, %v3968_v59  ;;  %4617 = vmatprep.subr.mxu1 %v5617_v1  ;;  %v5025_v59 = vld [vmem:[%s6629_s16 + $0x128] sm:$0xff]  ;;  %v5023_v61 = vld [vmem:[%s6629_s16 + $0x118] sm:$0xff] }
0x1664   : > { %5450 = vmatprep.subr.mxu0 %v5617_v1  ;;  %4618 = vmatpush1.msra.mxu1 %v5026_v58 }
0x1665   : > { %4619 = vmatprep.subr.mxu1 %v5617_v1 }
0x1666   : > { %5448 = vmatmul.mubr.msk.f32.vlgmr.msra.gmra.mxu0 %vm2291_vm10, %v3883_v62  ;;  %4620 = vmatpush1.msra.mxu1 %v5025_v59  ;;  %v5022_v62 = vld [vmem:[%s6629_s16 + $0x110] sm:$0xff] }
0x1667   : > { %5451 = vmatpush3.msk.msra.mxu0 %vm2385_vm11, %v4053_v38  ;;  %5452 = vmatprep.mubr.msk.f32.mxu0 %vm5618_vm0, %v5617_v1  ;;  %v5021_v38 = vld [vmem:[%s6629_s16 + $0x108] sm:$0xff] }
0x1668   : > { %5455 = vmatprep.subr.mxu0 %v5617_v1  ;;  %4621 = vmatprep.subr.mxu1 %v5617_v1 }
0x1669   : > { %4622 = vmatpush1.msra.mxu1 %v5024_v60 }
0x166a   : > { %4623 = vmatprep.subr.mxu1 %v5617_v1 }
0x166b   : > { %4624 = vmatpush1.msra.mxu1 %v5023_v61 }
0x166c   : > { %4625 = vmatprep.subr.mxu1 %v5617_v1 }
0x166d   : > { %4626 = vmatpush1.msra.mxu1 %v5022_v62 }
0x166e   : > { %4627 = vmatprep.subr.mxu1 %v5617_v1 }
0x166f   : > { %4628 = vmatpush1.msra.mxu1 %v5021_v38 }
0x1670   : > { %4629 = vmatprep.subr.mxu1 %v5617_v1 }
0x1726   : > { %v4128_v63 = vpop.f32.mrf.mxu0 }
0x1727   : > { %v4132_v0 = vmul.f32 0.20412415, %v4128_v63  ;;  %v5020_v63 = vld [vmem:[%s6629_s16 + $0x100] sm:$0xff] }
0x1728   : > { %v5449_v2 = vpop.f32.mrf.mxu0  ;;  %4630 = vmatpush1.msra.mxu1 %v5020_v63 }
0x1729   : > { %v4133_v3 = vsel %vm2369_vm12, %v4132_v0, -inf  ;;  %4631 = vmatprep.subr.mxu1 %v5617_v1  ;;  %v5018_v2 = vld [vmem:[%s6629_s16 + $0xf0] sm:$0xff] }
0x172a   : > { %4134 = vmax.xlane.f32.xlu0 %v4133_v3  ;;  %v5017_v3 = vld [vmem:[%s6629_s16 + $0xe8] sm:$0xff] }
0x17b3   : > { %v4135_v4 = vpop.xlane.xlu0 %4134 }
0x17b4   : > { %v4136_v5 = vsub.f32 %v4132_v0, %v4135_v4  ;;  %v5019_v0 = vld [vmem:[%s6629_s16 + $0xf8] sm:$0xff]  ;;  %v5016_v4 = vld [vmem:[%s6629_s16 + $0xe0] sm:$0xff] }
0x17b5   : > { %4632 = vmatpush1.msra.mxu1 %v5019_v0 }
0x17b6   : > { %v4137_v6 = vmul.f32 1.442695, %v4136_v5  ;;  %4633 = vmatprep.subr.mxu1 %v5617_v1  ;;  %v5015_v5 = vld [vmem:[%s6629_s16 + $0xd8] sm:$0xff] }
0x17b7   : > { %4634 = vmatpush1.msra.mxu1 %v5018_v2 }
0x17b8   : > { %5563 = vpow2.f32 %v4137_v6  ;;  %4635 = vmatprep.subr.mxu1 %v5617_v1  ;;  %v5014_v6 = vld [vmem:[%s6629_s16 + $0xd0] sm:$0xff] }
0x17b9   : > { %4636 = vmatpush1.msra.mxu1 %v5017_v3 }
0x17ba   : > { %4637 = vmatprep.subr.mxu1 %v5617_v1 }
0x17bb   : > { %4638 = vmatpush1.msra.mxu1 %v5016_v4 }
0x17bc   : > { %4639 = vmatprep.subr.mxu1 %v5617_v1 }
0x17bd   : > { %4640 = vmatpush1.msra.mxu1 %v5015_v5 }
0x17be   : > { %4641 = vmatprep.subr.mxu1 %v5617_v1 }
0x17bf   : > { %4642 = vmatpush1.msra.mxu1 %v5014_v6 }
0x17c0   : > { %4643 = vmatprep.subr.mxu1 %v5617_v1 }
0x17c5   : > { %v5564_v29 = vpop.eup %5563 }
0x17c6   : > { %v4139_v7 = vsel %vm2369_vm12, %v5564_v29, 0.0 }
0x17c7   : > { %4140 = vadd.xlane.f32.xlu1 %v4139_v7  ;;  %v5012_v7 = vld [vmem:[%s6629_s16 + $0xc0] sm:$0xff] }
0x1850   : > { %v4141_v8 = vpop.xlane.xlu1 %4140 }
0x1851   : > { %5565 = vrcp.f32 %v4141_v8  ;;  %v5035_v8 = vld [vmem:[%s6629_s16 + $0x178] sm:$0xff] }
0x185e   : > { %v5566_v10 = vpop.eup %5565 }
0x185f   : > { %v4143_v12 = vmul.f32 %v5566_v10, %v5564_v29  ;;  %v5013_v29 = vld [vmem:[%s6629_s16 + $0xc8] sm:$0xff]  ;;  %v5034_v10 = vld [vmem:[%s6629_s16 + $0x170] sm:$0xff] }
0x1860   : > { %4644 = vmatpush1.msra.mxu1 %v5013_v29 }
0x1861   : > { %5453 = vmatmul.mubr.msk.f32.vlgmr.msra.gmra.mxu0 %vm2381_vm13, %v4143_v12  ;;  %4645 = vmatprep.subr.mxu1 %v5617_v1  ;;  %v5033_v12 = vld [vmem:[%s6629_s16 + $0x168] sm:$0xff] }
0x1862   : > { %5467 = vmatprep.mubr.msk.f32.mxu0 %vm5618_vm0, %v5617_v1  ;;  %5456 = vmatpush3.msra.mxu0 %v4977_v9  ;;  %v5032_v9 = vld [vmem:[%s6629_s16 + $0x160] sm:$0xff] }
0x1863   : > { %5457 = vmatprep.subr.mxu0 %v5617_v1  ;;  %4646 = vmatpush1.msra.mxu1 %v5012_v7 }
0x1864   : > { %5458 = vmatpush3.msra.mxu0 %v4976_v32  ;;  %4663 = vmatprep.subr.mxu1 %v5617_v1  ;;  %v5031_v32 = vld [vmem:[%s6629_s16 + $0x158] sm:$0xff] }
0x1865   : > { %5459 = vmatprep.subr.mxu0 %v5617_v1  ;;  %4664 = vmatpush2.msra.mxu1 %v5035_v8 }
0x1866   : > { %5460 = vmatpush3.msra.mxu0 %v4975_v13  ;;  %4665 = vmatprep.subr.mxu1 %v5617_v1  ;;  %v5030_v13 = vld [vmem:[%s6629_s16 + $0x150] sm:$0xff] }
0x1867   : > { %5461 = vmatprep.subr.mxu0 %v5617_v1  ;;  %4666 = vmatpush2.msra.mxu1 %v5034_v10 }
0x1868   : > { %5462 = vmatpush3.msra.mxu0 %v4974_v30  ;;  %4667 = vmatprep.subr.mxu1 %v5617_v1  ;;  %v5029_v30 = vld [vmem:[%s6629_s16 + $0x148] sm:$0xff] }
0x1869   : > { %5463 = vmatprep.subr.mxu0 %v5617_v1  ;;  %4668 = vmatpush2.msra.mxu1 %v5033_v12 }
0x186a   : > { %5464 = vmatpush3.msra.mxu0 %v4973_v27  ;;  %4669 = vmatprep.subr.mxu1 %v5617_v1  ;;  %v5028_v27 = vld [vmem:[%s6629_s16 + $0x140] sm:$0xff] }
0x186b   : > { %5465 = vmatprep.subr.mxu0 %v5617_v1  ;;  %4670 = vmatpush2.msra.mxu1 %v5032_v9 }
0x186c   : > { %5466 = vmatpush3.msra.mxu0 %v4972_v14  ;;  %4671 = vmatprep.subr.mxu1 %v5617_v1  ;;  %v5011_v14 = vld [vmem:[%s6630_s3 + $0x2] sm:$0x3] }
0x186d   : > { %4672 = vmatpush2.msra.mxu1 %v5031_v32 }
0x186e   : > { %4673 = vmatprep.subr.mxu1 %v5617_v1 }
0x186f   : > { %4674 = vmatpush2.msra.mxu1 %v5030_v13 }
0x1870   : > { %4675 = vmatprep.subr.mxu1 %v5617_v1 }
0x1871   : > { %4676 = vmatpush2.msra.mxu1 %v5029_v30 }
0x1872   : > { %4677 = vmatprep.subr.mxu1 %v5617_v1 }
0x1873   : > { %4678 = vmatpush2.msra.mxu1 %v5028_v27  ;;  %v5038_v27 = vld [vmem:[%s5763_s20 + $0x1] ss:$0 sm:$0xff] }
0x1921   : > { %v4216_v16 = vpop.f32.mrf.mxu0 }
0x1922   : > { %4221 = vrot.lane.b32.xlu1 %v4216_v16, %s6631_s1  ;;  %v4439_v16 = vpop.f32.mrf.mxu1  ;;  %s942_s1 = scalar_lea.vmem %s5778_s12, %s5800_s0 }
0x1923   : > { %v5454_v20 = vpop.f32.mrf.mxu0 }
0x1924   : > { %v4524_v20 = vrot.slane %v5011_v14, %v5971_v17 }
0x1994   : > { %v4222_v21 = vpop.permute.xlu1 %4221 }
0x1995   : > { %4224 = vst.msk [vmem:[#allocation2] sm:$0x3f] %vm2884_vm15, %v4222_v21 }
0x199c   : > { %v4225_v22 = vld [vmem:[#allocation2] sm:$0x3f] }
0x199d   : > { %5468 = vmatmul.mubr.msk.f32.vlgmr.msra.gmra.mxu0 %vm1263_vm3, %v4225_v22 }
0x199e   : > { %4511 = vmatprep.mubr.f32.mxu0 %v5617_v1 }
0x1a5d   : > { %v4302_v23 = vpop.f32.mrf.mxu0 }
0x1a5e   : > { %v4306_v18 = vadd.f32 %v4302_v23, %v6336_v15  ;;  %v4996_v15 = vld [vmem:[%s6626_s18 + $0xb8] sm:$0xff]  ;;  %v4528_v23 = vrot.slane %v5011_v14, %v5974_v19 }
0x1a5f   : > { %v5469_v52 = vpop.f32.mrf.mxu0  ;;  %4467 = vmatprep.subr.mxu0 %v4996_v15 }
0x1a60   : > { %v6503_v11 = vadd.f32 %v4980_v50, %v4306_v18  ;;  %4468 = vmatpush1.msra.mxu0 %v4995_v33  ;;  %v4441_v50 = vpop.f32.mrf.mxu1 }
0x1a61   : > { %4469 = vmatprep.subr.mxu0 %v4994_v34 }
0x1a62   : > { %v4320_v49 = vsel %vm1036_vm2, %v6503_v11, 0.0  ;;  %4470 = vmatpush1.msra.mxu0 %v4993_v35 }
0x1a63   : > { %4321 = vadd.xlane.f32.xlu1 %v4320_v49  ;;  %4471 = vmatprep.subr.mxu0 %v4992_v36 }
0x1a64   : > { %4472 = vmatpush1.msra.mxu0 %v4991_v37 }
0x1a65   : > { %4473 = vmatprep.subr.mxu0 %v4990_v39 }
0x1a66   : > { %4474 = vmatpush1.msra.mxu0 %v4989_v42 }
0x1a67   : > { %4475 = vmatprep.subr.mxu0 %v4988_v40 }
0x1a68   : > { %4476 = vmatpush1.msra.mxu0 %v4987_v41 }
0x1a69   : > { %4477 = vmatprep.subr.mxu0 %v4986_v43 }
0x1a6a   : > { %4478 = vmatpush1.msra.mxu0 %v4985_v44 }
0x1aec   : > { %v4322_v24 = vpop.xlane.xlu1 %4321 }
0x1aed   : > { %v4323_v48 = vmul.f32 0.020833334, %v4322_v24 }
0x1aef   : > { %v4324_v25 = vsub.f32 %v6503_v11, %v4323_v48 }
0x1af1   : > { %v4325_v28 = vmul.f32 %v4324_v25, %v4324_v25 }
0x1af3   : > { %v4326_v31 = vsel %vm1036_vm2, %v4325_v28, 0.0 }
0x1af4   : > { %4327 = vadd.xlane.f32.xlu0 %v4326_v31 }
0x1b7d   : > { %v4328_v45 = vpop.xlane.xlu0 %4327 }
0x1b7e   : > { %v4329_v46 = vmul.f32 0.020833334, %v4328_v45 }
0x1b80   : > { %v4330_v47 = vadd.f32 1e-05, %v4329_v46 }
0x1b82   : > { %5567 = vrsqrt.f32 %v4330_v47 }
0x1b8f   : > { %v5568_v51 = vpop.eup %5567 }
0x1b90   : > { %v4332_v54 = vmul.f32 %v5568_v51, %v4324_v25 }
0x1b92   : > { %v4339_v56 = vmul.f32 %v4983_v53, %v4332_v54 }
0x1b94   : > { %v4346_v26 = vadd.f32 %v4984_v55, %v4339_v56 }
0x1b96   : > { %5010 = vmatmul.mubr.msk.f32.vlgmr.msra.gmra.mxu0 %vm1263_vm3, %v4346_v26 }
0x1c56   : > { %v4513_v21 = vpop.f32.mrf.mxu0 }
0x1c57   : > { %v4514_v22 = vadd.f32 %v4513_v21, %v4439_v16 }
0x1c58   : > { %v4515_v18 = vpop.f32.mrf.mxu0 }
0x1c59   : > { %v4531_v52 = vadd.f32 %v4524_v20, %v4514_v22  ;;  %v4516_v49 = vadd.f32 %v4515_v18, %v4441_v50 }
0x1c5b   : > { %v4535_v24 = vmul.f32 0.70710677, %v4531_v52  ;;  %v4532_v48 = vadd.f32 %v4528_v23, %v4516_v49  ;;  %v4533_v9 = vmul.f32 0.5, %v4531_v52 }
0x1c5d   : > { %v4537_v25 = vand.u32 2147483647, %v4535_v24  ;;  %v4536_v28 = vmul.f32 0.70710677, %v4532_v48  ;;  %vm4577_vm0 = vcmp.ge.f32.partialorder %v4535_v24, 0.0  ;;  %v4534_v10 = vmul.f32 0.5, %v4532_v48 }
0x1c5f   : > { %v4539_v31 = vmul.f32 0.3275911, %v4537_v25  ;;  %v4538_v15 = vand.u32 2147483647, %v4536_v28  ;;  %v4565_v17 = vsub.f32 0.0, %v4537_v25  ;;  %vm4578_vm3 = vcmp.ge.f32.partialorder %v4536_v28, 0.0 }
0x1c61   : > { %v4541_v1 = vadd.f32 1.0, %v4539_v31  ;;  %v4540_v33 = vmul.f32 0.3275911, %v4538_v15  ;;  %v4566_v35 = vsub.f32 0.0, %v4538_v15  ;;  %v4567_v36 = vmul.f32 %v4565_v17, %v4537_v25  ;;  %v5039_v25 = vld [vmem:[%s5768_s27] ss:$0 sm:$0xff] }
0x1c62   : > { %v5040_v31 = vld [vmem:[%s5773_s4] ss:$0 sm:$0xff] }
0x1c63   : > { %5569 = vrcp.f32 %v4541_v1  ;;  %v4542_v34 = vadd.f32 1.0, %v4540_v33  ;;  %v4568_v19 = vmul.f32 %v4566_v35, %v4538_v15  ;;  %v4569_v42 = vmul.f32 1.442695, %v4567_v36 }
0x1c65   : > { %5571 = vrcp.f32 %v4542_v34  ;;  %v4571_v44 = vmul.f32 1.442695, %v4568_v19 }
0x1c66   : > { %5573 = vpow2.f32 %v4569_v42 }
0x1c67   : > { %5575 = vpow2.f32 %v4571_v44 }
0x1c70   : > { %v5570_v37 = vpop.eup %5569 }
0x1c71   : > { %v4547_v39 = vmul.f32 1.0614054, %v5570_v37 }
0x1c72   : > { %v5572_v40 = vpop.eup %5571 }
0x1c73   : > { %v4549_v41 = vadd.f32 -1.4531521, %v4547_v39  ;;  %v4548_v43 = vmul.f32 1.0614054, %v5572_v40  ;;  %v5574_v61 = vpop.eup %5573 }
0x1c74   : > { %v5576_v0 = vpop.eup %5575 }
0x1c75   : > { %v4551_v45 = vmul.f32 %v5570_v37, %v4549_v41  ;;  %v4550_v46 = vadd.f32 -1.4531521, %v4548_v43 }
0x1c77   : > { %v4553_v47 = vadd.f32 1.4214138, %v4551_v45  ;;  %v4552_v51 = vmul.f32 %v5572_v40, %v4550_v46 }
0x1c79   : > { %v4555_v53 = vmul.f32 %v5570_v37, %v4553_v47  ;;  %v4554_v54 = vadd.f32 1.4214138, %v4552_v51 }
0x1c7b   : > { %v4557_v55 = vadd.f32 -0.28449672, %v4555_v53  ;;  %v4556_v56 = vmul.f32 %v5572_v40, %v4554_v54 }
0x1c7d   : > { %v4559_v26 = vmul.f32 %v5570_v37, %v4557_v55  ;;  %v4558_v57 = vadd.f32 -0.28449672, %v4556_v56 }
0x1c7f   : > { %v4561_v58 = vadd.f32 0.2548296, %v4559_v26  ;;  %v4560_v59 = vmul.f32 %v5572_v40, %v4558_v57 }
0x1c81   : > { %v4563_v60 = vmul.f32 %v5570_v37, %v4561_v58  ;;  %v4562_v62 = vadd.f32 0.2548296, %v4560_v59 }
0x1c83   : > { %v4573_v38 = vmul.f32 %v5574_v61, %v4563_v60  ;;  %v4564_v63 = vmul.f32 %v5572_v40, %v4562_v62 }
0x1c85   : > { %v4575_v2 = vsub.f32 1.0, %v4573_v38  ;;  %v4574_v3 = vmul.f32 %v5576_v0, %v4564_v63 }
0x1c87   : > { %v4579_v4 = vsub.f32 0.0, %v4575_v2  ;;  %v4576_v5 = vsub.f32 1.0, %v4574_v3 }
0x1c89   : > { %v4581_v6 = vsel %vm4577_vm0, %v4575_v2, %v4579_v4  ;;  %v4580_v29 = vsub.f32 0.0, %v4576_v5 }
0x1c8a   : > { %v4583_v7 = vadd.f32 1.0, %v4581_v6 }
0x1c8b   : > { %v4582_v8 = vsel %vm4578_vm3, %v4576_v5, %v4580_v29 }
0x1c8c   : > { %v4584_v12 = vadd.f32 1.0, %v4582_v8  ;;  %v4585_v13 = vmul.f32 %v4583_v7, %v4533_v9 }
0x1c8e   : > { %v4586_v32 = vmul.f32 %v4584_v12, %v4534_v10 }
0x1c90   : > { %5036 = vmatprep.mubr.msk.f32.mxu1 %vm960_vm1, %v4586_v32 }
0x1c91   : > { %4680 = vmatmul.mubr.f32.vlgmr.msra.gmra.mxu1 %v4585_v13 }
0x1d51   : > { %v4681_v30 = vpop.f32.mrf.mxu1 }
0x1d52   : > { %v4685_v14 = vadd.f32 %v4681_v30, %v6503_v11 }
0x1d53   : > { %v4683_v16 = vpop.f32.mrf.mxu1 }
0x1d54   : > { %v4694_v20 = vadd.f32 %v5038_v27, %v4685_v14 }
0x1d56   : > { %v4697_v21 = vsel %vm1036_vm2, %v4694_v20, 0.0 }
0x1d57   : > { %4698 = vadd.xlane.f32.xlu0 %v4697_v21 }
0x1de0   : > { %v4699_v22 = vpop.xlane.xlu0 %4698 }
0x1de1   : > { %v4700_v23 = vmul.f32 0.020833334, %v4699_v22 }
0x1de3   : > { %v4701_v50 = vsub.f32 %v4694_v20, %v4700_v23 }
0x1de5   : > { %v4702_v18 = vmul.f32 %v4701_v50, %v4701_v50 }
0x1de7   : > { %v4703_v52 = vsel %vm1036_vm2, %v4702_v18, 0.0 }
0x1de8   : > { %4704 = vadd.xlane.f32.xlu0 %v4703_v52 }
0x1e71   : > { %v4705_v49 = vpop.xlane.xlu0 %4704 }
0x1e72   : > { %v4706_v24 = vmul.f32 0.020833334, %v4705_v49 }
0x1e74   : > { %v4707_v48 = vadd.f32 1e-05, %v4706_v24 }
0x1e76   : > { %5577 = vrsqrt.f32 %v4707_v48 }
0x1e83   : > { %v5578_v11 = vpop.eup %5577 }
0x1e84   : > { %v4709_v28 = vmul.f32 %v5578_v11, %v4701_v50 }
0x1e86   : > { %v4716_v15 = vmul.f32 %v5039_v25, %v4709_v28 }
0x1e88   : > { %v4723_v1 = vadd.f32 %v5040_v31, %v4716_v15 }
0x1e8a   : > { %4724 = vst.msk [vmem:[%s942_s1] sm:$0x3f] %vm1036_vm2, %v4723_v1 }
0x1e8b PF: > { %s71_s15 = sadd.s32 1, %s5585_s15  }
0x1e8c   : > { %p68_p4 = scmp.ge.s32.totalorder %s71_s15, 4  }
0x1e8e   :  { %70 = sbr.rel (!%p68_p4) target bundleno = 54 (0x36), region = 236 }

// kernel: mae_guided_forward.3
= control target key start
LH: loop header
LB: loop body
LE: loop exit
PB: predicated region body
PF: predicated region fallthrough
CT: control target
= control target key end

     0   :  { %s8994_s0 = inlined_call_operand.vmem [shape: f32[2,6,48], index: 0, kind: input, shape index: {}]   ;;  %s8995_s1 = inlined_call_operand.vmem [shape: f32[2,6,64], index: 1, kind: input, shape index: {}]   ;;  %s8996_s2 = inlined_call_operand.vmem [shape: f32[2,4,48], index: 2, kind: input, shape index: {}]   ;;  %s8997_s3 = inlined_call_operand.vmem [shape: f32[2,10,64], index: 3, kind: input, shape index: {}]   ;;  %s8998_s4 = inlined_call_operand.vmem [shape: f32[48,48], index: 4, kind: input, shape index: {}]   ;;  %s8999_s5 = inlined_call_operand.vmem [shape: f32[64,48], index: 5, kind: input, shape index: {}]   ;;  %s9000_s6 = inlined_call_operand.vmem [shape: f32[1,48], index: 6, kind: input, shape index: {}]   ;;  %s9001_s7 = inlined_call_operand.vmem [shape: f32[3,1,48], index: 7, kind: input, shape index: {}]   ;;  %s9002_s8 = inlined_call_operand.vmem [shape: f32[3,1,48], index: 8, kind: input, shape index: {}]   ;;  %s9003_s9 = inlined_call_operand.vmem [shape: f32[3,3,2,48,24], index: 9, kind: input, shape index: {}]   ;;  %s9004_s10 = inlined_call_operand.vmem [shape: f32[3,3,2,1,24], index: 10, kind: input, shape index: {}]   ;;  %s9005_s11 = inlined_call_operand.vmem [shape: f32[3,48,48], index: 11, kind: input, shape index: {}]   ;;  %s9006_s12 = inlined_call_operand.vmem [shape: f32[3,1,48], index: 12, kind: input, shape index: {}]   ;;  %s9007_s13 = inlined_call_operand.vmem [shape: f32[3,1,48], index: 13, kind: input, shape index: {}]   ;;  %s9008_s14 = inlined_call_operand.vmem [shape: f32[3,1,48], index: 14, kind: input, shape index: {}]   ;;  %s9009_s15 = inlined_call_operand.vmem [shape: f32[3,48,192], index: 15, kind: input, shape index: {}]   ;;  %s9010_s16 = inlined_call_operand.vmem [shape: f32[3,64,192], index: 16, kind: input, shape index: {}]   ;;  %s9011_s17 = inlined_call_operand.vmem [shape: f32[3,1,192], index: 17, kind: input, shape index: {}]   ;;  %s9012_s18 = inlined_call_operand.vmem [shape: f32[3,192,48], index: 18, kind: input, shape index: {}]   ;;  %s9013_s19 = inlined_call_operand.vmem [shape: f32[3,1,48], index: 19, kind: input, shape index: {}]   ;;  %s9014_s20 = inlined_call_operand.vmem [shape: f32[48,64], index: 20, kind: input, shape index: {}]   ;;  %s9015_s21 = inlined_call_operand.vmem [shape: f32[1,64], index: 21, kind: input, shape index: {}]   ;;  %s9016_s22 = inlined_call_operand.hbm [shape: f32[2,4,64], index: 22, kind: output, shape index: {}]  }
   0x1   :  { %9030 = sst [smem:[#allocation13_spill]] %s8994_s0 }
   0x2   :  { %9031 = sst [smem:[#allocation14_spill]] %s8995_s1 }
   0x3   :  { %9032 = sst [smem:[#allocation15_spill]] %s8996_s2 }
   0x4   :  { %9033 = sst [smem:[#allocation16_spill]] %s8997_s3 }
   0x5   :  { %9034 = sst [smem:[#allocation17_spill]] %s8998_s4 }
   0x6   :  { %9035 = sst [smem:[#allocation18_spill]] %s8999_s5 }
   0x7   :  { %9036 = sst [smem:[#allocation19_spill]] %s9000_s6 }
   0x8   :  { %9037 = sst [smem:[#allocation20_spill]] %s9001_s7 }
   0x9   :  { %9038 = sst [smem:[#allocation21_spill]] %s9016_s22 }
   0xa   :  { %27 = vsyncpa [#allocation5], 0 }
   0xb   :  { %29 = vsyncpa [#allocation5 + $0x1], 0  ;;  %s7283_s3 = smov 0   ;;  %s7285_s28 = smov 0  }
   0xc   :  { %s7287_s29 = smov 0   ;;  %s7289_s30 = smov 0  }
   0xd LB: > { %9039 = sst [smem:[#allocation7_spill]] %s7150_s3  ;;  %s7304_s4 = sadd.s32 4294967295, %s7162_s30   ;;  %s7162_s30 = sphi %s7289_s30, %s9062_s30   ;;  %s7158_s29 = sphi %s7287_s29, %s9064_s29   ;;  %s7154_s28 = sphi %s7285_s28, %s9066_s28   ;;  %s7150_s3 = sphi %s7283_s3, %s9065_s3  }
   0xe   : > { %9040 = sst [smem:[#allocation8_spill]] %s7158_s29  ;;  %s5842_s0 = sadd.s32 4294967294, %s7162_s30  }
   0xf   : > { %9041 = sst [smem:[#allocation9_spill]] %s7162_s30  ;;  %s7308_s23 = sadd.s32 1, %s7162_s30  }
  0x10   : > { %9042 = sst [smem:[#allocation10_spill]] %s7308_s23  ;;  %s524_s1 = sadd.s32 1, %s7158_s29 }
  0x11   : > { %s521_s5 = ssub.s32 %s7162_s30, %s7308_s23  ;;  %p534_p0 = scmp.ne.s32.totalorder %s7158_s29, %s7154_s28 }
  0x12   : > { %p522_p1 = scmp.eq.s32.totalorder %s521_s5, 0  ;;  %p535_p2 = scmp.eq.s32.totalorder %s7304_s4, 1 }
  0x13   : > { %p540_p3 = scmp.ne.s32.totalorder %s7154_s28, %s7150_s3  ;;  %p541_p4 = scmp.eq.s32.totalorder %s5842_s0, 1 }
  0x14   : > { %s7319_s24 = scalar_select %p522_p1, %s7158_s29, %s524_s1  }
  0x15   : > { %p7321_p5 = por %p535_p2, %p534_p0  ;;  %p7325_p6 = por %p541_p4, %p540_p3 }
  0x16   : > { %9043 = sst [smem:[#allocation11_spill]] %s7319_s24  ;;  %p5845_p7 = scmp.ge.s32.totalorder %s7162_s30, 1 }
  0x17   : > { %s9045_s25 = scalar_select %p7325_p6, 1, 0 }
  0x18   : > { %p642_p8 = scmp.lt.s32.totalorder %s7162_s30, 3 }
  0x19   : > { %9046 = sst [smem:[#allocation12_spill]] %s9045_s25 }
  0x1a   : > { %p643_p9 = pnand %p5845_p7, %p642_p8 }
  0x1b   : > { %s9047_s27 = sld [smem:[#allocation18_spill]] (!%p643_p9)  ;;  %p716_p10 = scmp.lt.s32.totalorder (!%p643_p9), %s7304_s4, 1 }
  0x1c   : > { %646 = sbr.rel (%p643_p9) target bundleno = 9583 (0x256f), region = 108  ;;  %s9048_s25 = sld [smem:[#allocation15_spill]] (!%p643_p9) }
  0x1d   : > { %s9049_s30 = sld [smem:[#allocation14_spill]] (!%p643_p9)  ;;  %s9027_s2 = smov (!%p643_p9), 24  }
  0x1e   : > { %s9050_s29 = sld [smem:[#allocation17_spill]] (!%p643_p9) }
  0x1f   : > { %s9054_s7 = sld [smem:[#allocation20_spill]] (!%p643_p9) }
  0x21   : > { %v751_v0 = vld [vmem:[%s9047_s27 + $0x38] sm:$0xff]  ;;  %v7164_v1 = vmov 0.0   ;;  %v750_v2 = vld [vmem:[%s9047_s27 + $0x30] sm:$0xff]  ;;  %vm7165_vm0 = vmmov 0   ;;  %s7342_s5 = scalar_select %p716_p10, %s7304_s4, 1  ;;  %v749_v3 = vld [vmem:[%s9047_s27 + $0x28] sm:$0xff] }
  0x22   : > { %6488 = vmatprep.subr.mxu1 %v7164_v1  ;;  %6504 = vmatprep.mubr.msk.f32.mxu1 %vm7165_vm0, %v7164_v1  ;;  %v748_v4 = vld [vmem:[%s9047_s27 + $0x20] sm:$0xff]  ;;  %vm910_vm1 = vcmask 388096   ;;  %v747_v5 = vld [vmem:[%s9047_s27 + $0x18] sm:$0xff]  ;;  %v746_v7 = vld [vmem:[%s9047_s27 + $0x10] sm:$0xff]  ;;  %vm752_vm2 = vcmask 523264   ;;  %vm826_vm3 = vcmask 392192  }
  0x23   : > { %6489 = vmatpush3.msra.mxu1 %v751_v0  ;;  %s5849_s24 = sshll.u32 %s7342_s5, 2  ;;  %s5847_s26 = sshll.u32 %s7342_s5, 3  ;;  %v745_v8 = vld [vmem:[%s9047_s27 + $0x8] sm:$0xff]  ;;  %v744_v9 = vld [vmem:[%s9047_s27] sm:$0xff]  ;;  %vm908_vm4 = vcmask 390144   ;;  %vm919_vm5 = vcmask 386048  }
  0x24   : > { %6490 = vmatprep.subr.mxu1 %v7164_v1  ;;  %s727_s3 = scalar_lea.vmem %s9048_s25, %s5849_s24  ;;  %s9051_s23 = smov %s9050_s29  ;;  %v743_v11 = vld [vmem:[%s9050_s29 + $0x28] sm:$0xff]  ;;  %v964_v41 = vld [vmem:[%s9003_s9 + $0x20] sm:$0xff]  ;;  %v963_v43 = vld [vmem:[%s9003_s9 + $0x18] sm:$0xff]  ;;  %vm1234_vm6 = vcmask 195584   ;;  %vm1354_vm7 = vcmask 1041408   ;;  %vm1328_vm8 = vcmask 74752  }
  0x25   : > { %6491 = vmatpush3.msra.mxu1 %v750_v2  ;;  %v735_v6 = vld [vmem:[%s727_s3] sm:$0xf]  ;;  %s723_s3 = scalar_lea.vmem %s9049_s30, %s5847_s26  ;;  %v741_v13 = vld [vmem:[%s9051_s23 + $0x18] sm:$0xff]  ;;  %v740_v14 = vld [vmem:[%s9051_s23 + $0x10] sm:$0xff]  ;;  %s9052_s29 = sld [smem:[#allocation13_spill]]  ;;  %vm1324_vm9 = vcmask 80896  }
  0x26   : > { %6492 = vmatprep.subr.mxu1 %v7164_v1  ;;  %911 = vst.msk [vmem:[#allocation2 + $0x6] sm:$0xf] %vm910_vm1, %v735_v6  ;;  %v734_v10 = vld [vmem:[%s723_s3] sm:$0x3f]  ;;  %v739_v15 = vld [vmem:[%s9051_s23 + $0x8] sm:$0xff]  ;;  %s9053_s25 = sld [smem:[#allocation19_spill]] }
  0x27   : > { %6493 = vmatpush3.msra.mxu1 %v749_v3  ;;  %v742_v12 = vld [vmem:[%s9051_s23 + $0x20] sm:$0xff]  ;;  %v965_v39 = vld [vmem:[%s9003_s9 + $0x28] sm:$0xff]  ;;  %v5863_v44 = vld [vmem:[%s9003_s9 + $0x78] sm:$0xff]  ;;  %vm1434_vm10 = vcmask 189440   ;;  %vm1911_vm11 = vcmask 386240   ;;  %vm1909_vm12 = vcmask 392384  }
  0x28   : > { %6494 = vmatprep.subr.mxu1 %v7164_v1  ;;  %v738_v16 = vld [vmem:[%s9051_s23] sm:$0xff]  ;;  %v5865_v40 = vld [vmem:[%s9003_s9 + $0x88] sm:$0xff]  ;;  %v962_v45 = vld [vmem:[%s9003_s9 + $0x10] sm:$0xff]  ;;  %s9055_s23 = sld [smem:[#allocation16_spill]]  ;;  %s713_s30 = sand.u32 1, %s7154_s28  }
  0x29   : > { %6495 = vmatpush3.msra.mxu1 %v748_v4  ;;  %6537 = vmatprep.subr.mxu0 %v5865_v40  ;;  %v5864_v42 = vld [vmem:[%s9003_s9 + $0x80] sm:$0xff]  ;;  %v5862_v46 = vld [vmem:[%s9003_s9 + $0x70] sm:$0xff]  ;;  %v961_v47 = vld [vmem:[%s9003_s9 + $0x8] sm:$0xff]  ;;  %s5846_s3 = sshll.u32 %s713_s30, 2 }
  0x2a   : > { %6496 = vmatprep.subr.mxu1 %v7164_v1  ;;  %6538 = vmatpush3.msra.mxu0 %v5865_v40  ;;  %v5861_v48 = vld [vmem:[%s9003_s9 + $0x68] sm:$0xff]  ;;  %v960_v49 = vld [vmem:[%s9003_s9] sm:$0xff]  ;;  %v5873_v6 = vld [vmem:[%s9003_s9 + $0xd8] sm:$0xff] }
  0x2b   : > { %6497 = vmatpush3.msra.mxu1 %v747_v5  ;;  %s719_s24 = scalar_lea.vmem %s9052_s29, %s5847_s26  ;;  %6539 = vmatprep.subr.mxu0 %v5864_v42  ;;  %v5860_v50 = vld [vmem:[%s9003_s9 + $0x60] sm:$0xff]  ;;  %v5875_v51 = vld [vmem:[%s9003_s9 + $0xe8] sm:$0xff]  ;;  %s6245_s26 = sshll.u32 %s7304_s4, 6 }
  0x2c   : > { %6498 = vmatprep.subr.mxu1 %v7164_v1  ;;  %v733_v17 = vld [vmem:[%s719_s24] sm:$0x3f]  ;;  %6540 = vmatpush3.msra.mxu0 %v5864_v42  ;;  %s9057_s29 = sld [smem:[#allocation21_spill]]  ;;  %s7167_s4 = smov [#allocation4]  }
  0x2d   : > { %6499 = vmatpush3.msra.mxu1 %v746_v7  ;;  %v5854_v21 = vld [vmem:[%s9053_s25] ss:$0 sm:$0xff]  ;;  %v7413_v26 = vld [vmem:[#allocation2 + $0x8] sm:$0x3]  ;;  %6541 = vmatprep.subr.mxu0 %v5863_v44  ;;  %v5872_v7 = vld [vmem:[%s9003_s9 + $0xd0] sm:$0xff]  ;;  %s6248_s25 = sshll.u32 %s7342_s5, 4 }
  0x2e   : > { %6500 = vmatprep.subr.mxu1 %v7164_v1  ;;  %v920_v28 = vsel %vm919_vm5, %v7413_v26, 0.0  ;;  %6542 = vmatpush3.msra.mxu0 %v5863_v44  ;;  %v5855_v59 = vld [vmem:[%s9054_s7] ss:$0 sm:$0xff]  ;;  %s7749_s27 = scalar_lea.vmem %s9055_s23, %s6248_s25  ;;  %s9056_s23 = smov 24  }
  0x2f   : > { %6501 = vmatpush3.msra.mxu1 %v745_v8  ;;  %6543 = vmatprep.subr.mxu0 %v5862_v46  ;;  %v5856_v61 = vld [vmem:[%s9002_s8] ss:$0 sm:$0xff]  ;;  %v5871_v8 = vld [vmem:[%s9003_s9 + $0xc8] sm:$0xff] }
  0x30   : > { %6502 = vmatprep.subr.mxu1 %v7164_v1  ;;  %6544 = vmatpush3.msra.mxu0 %v5862_v46  ;;  %v5874_v5 = vld [vmem:[%s9003_s9 + $0xe0] sm:$0xff] }
  0x31   : > { %6503 = vmatpush3.msra.mxu1 %v744_v9  ;;  %6545 = vmatprep.subr.mxu0 %v5861_v48  ;;  %v5870_v9 = vld [vmem:[%s9003_s9 + $0xc0] sm:$0xff] }
  0x32   : > { %6505 = vmatmul.mubr.msk.f32.vlgmr.msra.gmra.mxu1 %vm752_vm2, %v734_v10  ;;  %6507 = vmatprep.subr.mxu1 %v7164_v1  ;;  %v5892_v10 = vld [vmem:[%s9003_s9 + $0x58] sm:$0xff]  ;;  %s9058_s24 = smov %s9057_s29  ;;  %s8959_s22 = scalar_lea.hbm %s9057_s29, %s6245_s26 }
  0x33   : > { %6508 = vmatpush3.msra.mxu1 %v743_v11  ;;  %6519 = vmatprep.mubr.msk.f32.mxu1 %vm7165_vm0, %v7164_v1  ;;  %v5891_v11 = vld [vmem:[%s9003_s9 + $0x50] sm:$0xff] }
  0x34   : > { %6509 = vmatprep.subr.mxu1 %v7164_v1  ;;  %6546 = vmatpush3.msra.mxu0 %v5861_v48 }
  0x35   : > { %6510 = vmatpush3.msra.mxu1 %v742_v12  ;;  %6547 = vmatprep.subr.mxu0 %v5860_v50  ;;  %v5890_v12 = vld [vmem:[%s9003_s9 + $0x48] sm:$0xff] }
  0x36   : > { %6511 = vmatprep.subr.mxu1 %v7164_v1  ;;  %6548 = vmatpush3.msra.mxu0 %v5860_v50 }
  0x37   : > { %6512 = vmatpush3.msra.mxu1 %v741_v13  ;;  %v5889_v13 = vld [vmem:[%s9003_s9 + $0x40] sm:$0xff] }
  0x38   : > { %6513 = vmatprep.subr.mxu1 %v7164_v1 }
  0x39   : > { %6514 = vmatpush3.msra.mxu1 %v740_v14  ;;  %v5888_v14 = vld [vmem:[%s9003_s9 + $0x38] sm:$0xff] }
  0x3a   : > { %6515 = vmatprep.subr.mxu1 %v7164_v1 }
  0x3b   : > { %6516 = vmatpush3.msra.mxu1 %v739_v15  ;;  %v5887_v15 = vld [vmem:[%s9003_s9 + $0x30] sm:$0xff] }
  0x3c   : > { %6517 = vmatprep.subr.mxu1 %v7164_v1 }
  0x3d   : > { %6518 = vmatpush3.msra.mxu1 %v738_v16  ;;  %v5912_v16 = vld [vmem:[%s9003_s9 + $0x118] sm:$0xff] }
  0x3e   : > { %6520 = vmatmul.mubr.msk.f32.vlgmr.msra.gmra.mxu1 %vm826_vm3, %v733_v17  ;;  %6522 = vmatprep.subr.mxu1 %v965_v39  ;;  %v5911_v17 = vld [vmem:[%s9003_s9 + $0x110] sm:$0xff] }
  0x3f   : > { %6523 = vmatpush3.msra.mxu1 %v965_v39  ;;  %v5894_v39 = vld [vmem:[%s9004_s10 + $0x1] ss:$0 sm:$0xff] }
  0x40   : > { %6524 = vmatprep.subr.mxu1 %v964_v41 }
  0x41   : > { %6525 = vmatpush3.msra.mxu1 %v964_v41 }
  0x42   : > { %6526 = vmatprep.subr.mxu1 %v963_v43 }
  0x43   : > { %6527 = vmatpush3.msra.mxu1 %v963_v43 }
  0x44   : > { %6528 = vmatprep.subr.mxu1 %v962_v45 }
  0x45   : > { %6529 = vmatpush3.msra.mxu1 %v962_v45 }
  0x46   : > { %6530 = vmatprep.subr.mxu1 %v961_v47 }
  0x47   : > { %6531 = vmatpush3.msra.mxu1 %v961_v47 }
  0x48   : > { %6532 = vmatprep.subr.mxu1 %v960_v49 }
  0x49   : > { %6533 = vmatpush3.msra.mxu1 %v960_v49 }
  0x4a   : > { %6552 = vmatprep.subr.mxu1 %v5875_v51 }
  0xf2   : > { %v822_v18 = vpop.f32.mrf.mxu1 }
  0xf4   : > { %v6506_v19 = vpop.f32.mrf.mxu1 }
  0xf5   : > { %v5909_v19 = vld [vmem:[%s9003_s9 + $0x100] sm:$0xff] }
  0xfe   : > { %v896_v20 = vpop.f32.mrf.mxu1 }
  0xff   : > { %v897_v22 = vadd.f32 %v896_v20, %v822_v18  ;;  %v5910_v18 = vld [vmem:[%s9003_s9 + $0x108] sm:$0xff]  ;;  %v5908_v20 = vld [vmem:[%s9003_s9 + $0xf8] sm:$0xff] }
 0x100   : > { %v6521_v23 = vpop.f32.mrf.mxu1 }
 0x101   : > { %v907_v24 = vadd.f32 %v5854_v21, %v897_v22  ;;  %v5907_v21 = vld [vmem:[%s9003_s9 + $0xf0] sm:$0xff]  ;;  %v5867_v22 = vld [vmem:[%s9004_s10 + $0x2] ss:$0 sm:$0xff] }
 0x103   : > { %909 = vst.msk [vmem:[#allocation2] sm:$0x3f] %vm908_vm4, %v907_v24 }
 0x10a   : > { %v7411_v25 = vld [vmem:[#allocation2] sm:$0xff] }
 0x10b   : > { %v916_v27 = vsel %vm826_vm3, %v7411_v25, 0.0 }
 0x10c   : > { %917 = vadd.xlane.f32.xlu0 %v916_v27 }
 0x110   : > { %921 = vadd.xlane.f32.xlu0 %v920_v28  ;;  %v5857_v28 = vld [vmem:[%s9004_s10] ss:$0 sm:$0xff] }
 0x195   : > { %v918_v29 = vpop.xlane.xlu0 %917 }
 0x196   : > { %v924_v30 = vmul.f32 0.020833334, %v918_v29 }
 0x198   : > { %v926_v31 = vsub.f32 %v7411_v25, %v924_v30 }
 0x199   : > { %v922_v32 = vpop.xlane.xlu0 %921 }
 0x19a   : > { %v925_v33 = vmul.f32 0.020833334, %v922_v32  ;;  %v928_v34 = vmul.f32 %v926_v31, %v926_v31 }
 0x19c   : > { %v927_v35 = vsub.f32 %v7413_v26, %v925_v33  ;;  %v930_v36 = vsel %vm826_vm3, %v928_v34, 0.0  ;;  %v5877_v34 = vld [vmem:[%s9004_s10 + $0x4] ss:$0 sm:$0xff] }
 0x19d   : > { %931 = vadd.xlane.f32.xlu1 %v930_v36 }
 0x19e   : > { %v929_v37 = vmul.f32 %v927_v35, %v927_v35 }
 0x1a0   : > { %v933_v38 = vsel %vm919_vm5, %v929_v37, 0.0 }
 0x1a1   : > { %934 = vadd.xlane.f32.xlu1 %v933_v38 }
 0x226   : > { %v932_v52 = vpop.xlane.xlu1 %931 }
 0x227   : > { %v936_v53 = vmul.f32 0.020833334, %v932_v52 }
 0x229   : > { %v938_v54 = vadd.f32 1e-05, %v936_v53 }
 0x22a   : > { %v935_v55 = vpop.xlane.xlu1 %934 }
 0x22b   : > { %6978 = vrsqrt.f32 %v938_v54  ;;  %v937_v56 = vmul.f32 0.020833334, %v935_v55 }
 0x22d   : > { %v939_v57 = vadd.f32 1e-05, %v937_v56 }
 0x22f   : > { %6980 = vrsqrt.f32 %v939_v57 }
 0x238   : > { %v6979_v58 = vpop.eup %6978 }
 0x239   : > { %v942_v60 = vmul.f32 %v6979_v58, %v926_v31  ;;  %v5902_v58 = vld [vmem:[%s9003_s9 + $0xb8] sm:$0xff] }
 0x23b   : > { %v950_v62 = vmul.f32 %v5855_v59, %v942_v60 }
 0x23c   : > { %v6981_v63 = vpop.eup %6980 }
 0x23d   : > { %v943_v0 = vmul.f32 %v6981_v63, %v927_v35  ;;  %v7468_v2 = vadd.f32 %v5856_v61, %v950_v62 }
 0x23f   : > { %v951_v3 = vmul.f32 %v5855_v59, %v943_v0  ;;  %6534 = vmatprep.mubr.msk.f32.mxu1 %vm826_vm3, %v7468_v2  ;;  %6549 = vmatprep.mubr.msk.f32.mxu0 %vm826_vm3, %v7468_v2 }
 0x241   : > { %v7474_v4 = vadd.f32 %v5856_v61, %v951_v3  ;;  %v5901_v3 = vld [vmem:[%s9003_s9 + $0xb0] sm:$0xff] }
 0x243   : > { %6535 = vmatmul.mubr.msk.f32.vlgmr.msra.gmra.mxu1 %vm826_vm3, %v7474_v4  ;;  %6550 = vmatmul.mubr.msk.f32.vlgmr.msra.gmra.mxu0 %vm826_vm3, %v7474_v4 }
 0x244   : > { %6553 = vmatpush3.msra.mxu1 %v5875_v51  ;;  %6564 = vmatprep.mubr.msk.f32.mxu1 %vm826_vm3, %v7468_v2 }
 0x245   : > { %6554 = vmatprep.subr.mxu1 %v5874_v5 }
 0x246   : > { %6555 = vmatpush3.msra.mxu1 %v5874_v5  ;;  %v5900_v5 = vld [vmem:[%s9003_s9 + $0xa8] sm:$0xff] }
 0x247   : > { %6556 = vmatprep.subr.mxu1 %v5873_v6 }
 0x248   : > { %6557 = vmatpush3.msra.mxu1 %v5873_v6  ;;  %v5899_v6 = vld [vmem:[%s9003_s9 + $0xa0] sm:$0xff] }
 0x249   : > { %6558 = vmatprep.subr.mxu1 %v5872_v7 }
 0x24a   : > { %6559 = vmatpush3.msra.mxu1 %v5872_v7  ;;  %v5898_v7 = vld [vmem:[%s9003_s9 + $0x98] sm:$0xff] }
 0x24b   : > { %6560 = vmatprep.subr.mxu1 %v5871_v8 }
 0x24c   : > { %6561 = vmatpush3.msra.mxu1 %v5871_v8 }
 0x24d   : > { %6562 = vmatprep.subr.mxu1 %v5870_v9 }
 0x24e   : > { %6563 = vmatpush3.msra.mxu1 %v5870_v9 }
 0x24f   : > { %6565 = vmatmul.mubr.msk.f32.vlgmr.msra.gmra.mxu1 %vm826_vm3, %v7474_v4  ;;  %6581 = vmatprep.subr.mxu1 %v5892_v10 }
 0x250   : > { %6582 = vmatpush3.msra.mxu1 %v5892_v10  ;;  %6593 = vmatprep.mubr.msk.f32.mxu1 %vm826_vm3, %v7468_v2 }
 0x251   : > { %6583 = vmatprep.subr.mxu1 %v5891_v11 }
 0x252   : > { %6584 = vmatpush3.msra.mxu1 %v5891_v11 }
 0x253   : > { %6585 = vmatprep.subr.mxu1 %v5890_v12 }
 0x254   : > { %6586 = vmatpush3.msra.mxu1 %v5890_v12  ;;  %v5904_v12 = vld [vmem:[%s9004_s10 + $0x3] ss:$0 sm:$0xff] }
 0x255   : > { %6587 = vmatprep.subr.mxu1 %v5889_v13 }
 0x256   : > { %6588 = vmatpush3.msra.mxu1 %v5889_v13 }
 0x257   : > { %6589 = vmatprep.subr.mxu1 %v5888_v14 }
 0x258   : > { %6590 = vmatpush3.msra.mxu1 %v5888_v14 }
 0x259   : > { %6591 = vmatprep.subr.mxu1 %v5887_v15 }
 0x25a   : > { %6592 = vmatpush3.msra.mxu1 %v5887_v15 }
 0x25b   : > { %6594 = vmatmul.mubr.msk.f32.vlgmr.msra.gmra.mxu1 %vm826_vm3, %v7474_v4  ;;  %6611 = vmatprep.subr.mxu1 %v5912_v16 }
 0x25c   : > { %6612 = vmatpush3.msra.mxu1 %v5912_v16  ;;  %6623 = vmatprep.mubr.msk.f32.mxu1 %vm826_vm3, %v7468_v2 }
 0x25d   : > { %6613 = vmatprep.subr.mxu1 %v5911_v17 }
 0x25e   : > { %6614 = vmatpush3.msra.mxu1 %v5911_v17  ;;  %v5914_v17 = vld [vmem:[%s9004_s10 + $0x5] ss:$0 sm:$0xff] }
 0x25f   : > { %6615 = vmatprep.subr.mxu1 %v5910_v18 }
 0x260   : > { %6616 = vmatpush3.msra.mxu1 %v5910_v18 }
 0x261   : > { %6617 = vmatprep.subr.mxu1 %v5909_v19 }
 0x262   : > { %6618 = vmatpush3.msra.mxu1 %v5909_v19 }
 0x263   : > { %6619 = vmatprep.subr.mxu1 %v5908_v20 }
 0x264   : > { %6620 = vmatpush3.msra.mxu1 %v5908_v20 }
 0x265   : > { %6621 = vmatprep.subr.mxu1 %v5907_v21 }
 0x266   : > { %6622 = vmatpush3.msra.mxu1 %v5907_v21 }
 0x267   : > { %6624 = vmatmul.mubr.msk.f32.vlgmr.msra.gmra.mxu1 %vm826_vm3, %v7474_v4 }
 0x303   : > { %v6536_v23 = vpop.f32.mrf.mxu1  ;;  %v6551_v24 = vpop.f32.mrf.mxu0 }
 0x304   : > { %v1141_v27 = vadd.f32 %v6551_v24, %v5867_v22  ;;  %v1051_v33 = vadd.f32 %v6536_v23, %v5857_v28 }
 0x305   : > { %v1045_v29 = vpop.f32.mrf.mxu1  ;;  %v1135_v30 = vpop.f32.mrf.mxu0 }
 0x306   : > { %v1046_v31 = vadd.f32 %v5857_v28, %v1045_v29  ;;  %v1136_v32 = vadd.f32 %v5867_v22, %v1135_v30  ;;  %6567 = vmatprep.subr.msk.mxu0 %vm1234_vm6, %v1141_v27 }
 0x307   : > { %6568 = vmatpush3.xpose.msk.msra.mxu0 %vm1234_vm6, %v1141_v27 }
 0x308   : > { %6569 = vmatprep.subr.msk.mxu0 %vm1234_vm6, %v1136_v32  ;;  %6571 = vmatprep.mubr.msk.f32.mxu0 %vm1234_vm6, %v1046_v31 }
 0x30b   : > { %6570 = vmatpush3.xpose.msk.msra.mxu0 %vm1234_vm6, %v1136_v32 }
 0x30e   : > { %6572 = vmatmul.mubr.msk.f32.vlgmr.msra.gmra.mxu0 %vm1234_vm6, %v1051_v33 }
 0x30f   : > { %v6566_v35 = vpop.f32.mrf.mxu1 }
 0x310   : > { %v1231_v36 = vadd.f32 %v6566_v35, %v5877_v34 }
 0x311   : > { %v1225_v37 = vpop.f32.mrf.mxu1 }
 0x312   : > { %v1226_v38 = vadd.f32 %v5877_v34, %v1225_v37  ;;  %6574 = vmatprep.subr.msk.mxu0 %vm1354_vm7, %v1231_v36 }
 0x313   : > { %6575 = vmatpush3.msk.msra.mxu0 %vm1354_vm7, %v1231_v36 }
 0x314   : > { %6576 = vmatprep.subr.mxu0 %v1226_v38 }
 0x315   : > { %6577 = vmatpush3.msra.mxu0 %v1226_v38 }
 0x316   : > { %6596 = vmatprep.subr.mxu0 %v5902_v58 }
 0x31b   : > { %v6595_v40 = vpop.f32.mrf.mxu1 }
 0x31c   : > { %v7563_v41 = vadd.f32 %v6595_v40, %v5894_v39 }
 0x31d   : > { %v1517_v8 = vpop.f32.mrf.mxu1 }
 0x31e   : > { %v1518_v9 = vadd.f32 %v5894_v39, %v1517_v8 }
 0x3ce   : > { %v6573_v42 = vpop.f32.mrf.mxu0 }
 0x3cf   : > { %v1323_v43 = vmul.f32 0.20412415, %v6573_v42 }
 0x3d0   : > { %v1313_v44 = vpop.f32.mrf.mxu0 }
 0x3d1   : > { %v1322_v45 = vmul.f32 0.20412415, %v1313_v44  ;;  %v1329_v46 = vsel %vm1328_vm8, %v1323_v43, -inf }
 0x3d2   : > { %1330 = vmax.xlane.f32.xlu1 %v1329_v46  ;;  %v1919_v46 = vld [vmem:[%s9005_s11 + $0x20] sm:$0xff] }
 0x3d3   : > { %v1325_v47 = vsel %vm1324_vm9, %v1322_v45, -inf }
 0x3d4   : > { %1326 = vmax.xlane.f32.xlu0 %v1325_v47  ;;  %v1918_v47 = vld [vmem:[%s9005_s11 + $0x18] sm:$0xff] }
 0x45b   : > { %v1331_v48 = vpop.xlane.xlu1 %1330 }
 0x45c   : > { %v1333_v49 = vsub.f32 %v1323_v43, %v1331_v48  ;;  %v1917_v48 = vld [vmem:[%s9005_s11 + $0x10] sm:$0xff] }
 0x45d   : > { %v1327_v50 = vpop.xlane.xlu0 %1326 }
 0x45e   : > { %v1336_v51 = vmul.f32 1.442695, %v1333_v49  ;;  %v1332_v52 = vsub.f32 %v1322_v45, %v1327_v50  ;;  %v1920_v45 = vld [vmem:[%s9005_s11 + $0x28] sm:$0xff]  ;;  %v1915_v50 = vld [vmem:[%s9005_s11] sm:$0xff] }
 0x45f   : > { %6640 = vmatprep.subr.mxu1 %v1920_v45  ;;  %v1916_v49 = vld [vmem:[%s9005_s11 + $0x8] sm:$0xff] }
 0x460   : > { %6982 = vpow2.f32 %v1336_v51  ;;  %v1334_v53 = vmul.f32 1.442695, %v1332_v52  ;;  %6641 = vmatpush3.msra.mxu1 %v1920_v45 }
 0x461   : > { %6642 = vmatprep.subr.mxu1 %v1919_v46 }
 0x462   : > { %6984 = vpow2.f32 %v1334_v53  ;;  %6643 = vmatpush3.msra.mxu1 %v1919_v46 }
 0x463   : > { %6644 = vmatprep.subr.mxu1 %v1918_v47 }
 0x464   : > { %6645 = vmatpush3.msra.mxu1 %v1918_v47 }
 0x465   : > { %6646 = vmatprep.subr.mxu1 %v1917_v48 }
 0x466   : > { %6647 = vmatpush3.msra.mxu1 %v1917_v48 }
 0x467   : > { %6648 = vmatprep.subr.mxu1 %v1916_v49 }
 0x468   : > { %6649 = vmatpush3.msra.mxu1 %v1916_v49 }
 0x469   : > { %6650 = vmatprep.subr.mxu1 %v1915_v50 }
 0x46a   : > { %6651 = vmatpush3.msra.mxu1 %v1915_v50 }
 0x46d   : > { %v6983_v54 = vpop.eup %6982 }
 0x46e   : > { %v1341_v55 = vsel %vm1328_vm8, %v6983_v54, 0.0 }
 0x46f   : > { %v6985_v56 = vpop.eup %6984  ;;  %1342 = vadd.xlane.f32.xlu1 %v1341_v55 }
 0x470   : > { %v1338_v57 = vsel %vm1324_vm9, %v6985_v56, 0.0 }
 0x471   : > { %1339 = vadd.xlane.f32.xlu0 %v1338_v57 }
 0x4f8   : > { %v1343_v59 = vpop.xlane.xlu1 %1342 }
 0x4f9   : > { %6986 = vrcp.f32 %v1343_v59 }
 0x4fa   : > { %v1340_v60 = vpop.xlane.xlu0 %1339 }
 0x4fb   : > { %6988 = vrcp.f32 %v1340_v60 }
 0x506   : > { %v6987_v61 = vpop.eup %6986 }
 0x507   : > { %v1347_v0 = vmul.f32 %v6987_v61, %v6983_v54 }
 0x508   : > { %v6989_v62 = vpop.eup %6988 }
 0x509   : > { %v1346_v63 = vmul.f32 %v6989_v62, %v6985_v56 }
 0x50b   : > { %6578 = vmatprep.mubr.msk.f32.mxu0 %vm1324_vm9, %v1346_v63 }
 0x50c   : > { %6579 = vmatmul.mubr.msk.f32.vlgmr.msra.gmra.mxu0 %vm1324_vm9, %v1347_v0 }
 0x50d   : > { %6597 = vmatpush3.msra.mxu0 %v5902_v58  ;;  %6608 = vmatprep.mubr.msk.f32.mxu0 %vm826_vm3, %v7468_v2  ;;  %v5897_v2 = vld [vmem:[%s9003_s9 + $0x90] sm:$0xff]  ;;  %v5926_v58 = vld [vmem:[%s9006_s12] ss:$0 sm:$0xff] }
 0x50e   : > { %6598 = vmatprep.subr.mxu0 %v5901_v3 }
 0x50f   : > { %6599 = vmatpush3.msra.mxu0 %v5901_v3 }
 0x510   : > { %6600 = vmatprep.subr.mxu0 %v5900_v5 }
 0x511   : > { %6601 = vmatpush3.msra.mxu0 %v5900_v5 }
 0x512   : > { %6602 = vmatprep.subr.mxu0 %v5899_v6 }
 0x513   : > { %6603 = vmatpush3.msra.mxu0 %v5899_v6 }
 0x514   : > { %6604 = vmatprep.subr.mxu0 %v5898_v7 }
 0x515   : > { %6605 = vmatpush3.msra.mxu0 %v5898_v7 }
 0x516   : > { %6606 = vmatprep.subr.mxu0 %v5897_v2 }
 0x517   : > { %6607 = vmatpush3.msra.mxu0 %v5897_v2 }
 0x518   : > { %6609 = vmatmul.mubr.msk.f32.vlgmr.msra.gmra.mxu0 %vm826_vm3, %v7474_v4  ;;  %v6625_v4 = vpop.f32.mrf.mxu1 }
 0x519   : > { %6630 = vmatprep.mubr.msk.f32.mxu0 %vm1234_vm6, %v1518_v9  ;;  %v1703_v18 = vadd.f32 %v6625_v4, %v5914_v17  ;;  %v2079_v4 = vld [vmem:[%s9010_s16 + $0x50] sm:$0xff] }
 0x51a   : > { %v1697_v19 = vpop.f32.mrf.mxu1 }
 0x51b   : > { %v1698_v20 = vadd.f32 %v5914_v17, %v1697_v19  ;;  %v2078_v17 = vld [vmem:[%s9010_s16 + $0x48] sm:$0xff]  ;;  %v2077_v19 = vld [vmem:[%s9010_s16 + $0x40] sm:$0xff] }
 0x5cc   : > { %v6580_v10 = vpop.f32.mrf.mxu0 }
 0x5cd   : > { %1435 = vst.msk [vmem:[#allocation3 + $0x8] sm:$0x3] %vm1434_vm10, %v6580_v10 }
 0x5ce   : > { %v1424_v11 = vpop.f32.mrf.mxu0 }
 0x5cf   : > { %1433 = vst.msk [vmem:[#allocation3] sm:$0xff] %vm1234_vm6, %v1424_v11 }
 0x5d8   : > { %v6610_v13 = vpop.f32.mrf.mxu0 }
 0x5d9   : > { %v1613_v14 = vadd.f32 %v6610_v13, %v5904_v12  ;;  %v2083_v13 = vld [vmem:[%s9010_s16 + $0x70] sm:$0xff] }
 0x5da   : > { %v1607_v15 = vpop.f32.mrf.mxu0 }
 0x5db   : > { %v1608_v16 = vadd.f32 %v5904_v12, %v1607_v15  ;;  %6626 = vmatprep.subr.msk.mxu0 %vm1234_vm6, %v1613_v14  ;;  %v2084_v12 = vld [vmem:[%s9010_s16 + $0x78] sm:$0xff]  ;;  %v2081_v15 = vld [vmem:[%s9010_s16 + $0x60] sm:$0xff] }
 0x5dc   : > { %6627 = vmatpush3.xpose.msk.msra.mxu0 %vm1234_vm6, %v1613_v14  ;;  %v2082_v14 = vld [vmem:[%s9010_s16 + $0x68] sm:$0xff] }
 0x5dd   : > { %6628 = vmatprep.subr.msk.mxu0 %vm1234_vm6, %v1608_v16 }
 0x5e0   : > { %6629 = vmatpush3.xpose.msk.msra.mxu0 %vm1234_vm6, %v1608_v16  ;;  %v2080_v16 = vld [vmem:[%s9010_s16 + $0x58] sm:$0xff] }
 0x5e1   : > { %6633 = vmatprep.subr.msk.mxu0 %vm1354_vm7, %v1703_v18 }
 0x5e3   : > { %6631 = vmatmul.mubr.msk.f32.vlgmr.msra.gmra.mxu0 %vm1234_vm6, %v7563_v41 }
 0x5e4   : > { %6634 = vmatpush3.msk.msra.mxu0 %vm1354_vm7, %v1703_v18  ;;  %v2068_v18 = vld [vmem:[%s9009_s15 + $0x58] sm:$0xff] }
 0x5e5   : > { %6635 = vmatprep.subr.mxu0 %v1698_v20  ;;  %2194 = vmatprep.subr.mxu1 %v2068_v18  ;;  %v2392_v18 = vld [vmem:[%s9012_s18 + $0x88] sm:$0xff] }
 0x5e6   : > { %6636 = vmatpush3.msra.mxu0 %v1698_v20  ;;  %v2067_v20 = vld [vmem:[%s9009_s15 + $0x50] sm:$0xff] }
 0x5e7   : > { %2107 = vmatprep.subr.mxu0 %v2084_v12  ;;  %v2375_v12 = vld [vmem:[%s9012_s18] sm:$0xff] }
 0x6a3   : > { %v6632_v21 = vpop.f32.mrf.mxu0 }
 0x6a4   : > { %v1794_v22 = vmul.f32 0.20412415, %v6632_v21  ;;  %v2076_v21 = vld [vmem:[%s9010_s16 + $0x38] sm:$0xff] }
 0x6a5   : > { %v1784_v23 = vpop.f32.mrf.mxu0 }
 0x6a6   : > { %v1793_v24 = vmul.f32 0.20412415, %v1784_v23  ;;  %v1798_v27 = vsel %vm1328_vm8, %v1794_v22, -inf  ;;  %v2075_v23 = vld [vmem:[%s9010_s16 + $0x30] sm:$0xff] }
 0x6a7   : > { %1799 = vmax.xlane.f32.xlu1 %v1798_v27  ;;  %v2074_v27 = vld [vmem:[%s9010_s16 + $0x28] sm:$0xff] }
 0x6a8   : > { %v1795_v28 = vsel %vm1324_vm9, %v1793_v24, -inf }
 0x6a9   : > { %1796 = vmax.xlane.f32.xlu0 %v1795_v28  ;;  %v2064_v28 = vld [vmem:[%s9009_s15 + $0x38] sm:$0xff] }
 0x730   : > { %v1800_v29 = vpop.xlane.xlu1 %1799 }
 0x731   : > { %v1802_v30 = vsub.f32 %v1794_v22, %v1800_v29  ;;  %v2066_v22 = vld [vmem:[%s9009_s15 + $0x48] sm:$0xff]  ;;  %v2073_v29 = vld [vmem:[%s9010_s16 + $0x20] sm:$0xff] }
 0x732   : > { %v1797_v31 = vpop.xlane.xlu0 %1796 }
 0x733   : > { %v1805_v32 = vmul.f32 1.442695, %v1802_v30  ;;  %v1801_v33 = vsub.f32 %v1793_v24, %v1797_v31  ;;  %v2065_v24 = vld [vmem:[%s9009_s15 + $0x40] sm:$0xff]  ;;  %v2063_v30 = vld [vmem:[%s9009_s15 + $0x30] sm:$0xff]  ;;  %v2072_v31 = vld [vmem:[%s9010_s16 + $0x18] sm:$0xff] }
 0x735   : > { %6990 = vpow2.f32 %v1805_v32  ;;  %v1803_v34 = vmul.f32 1.442695, %v1801_v33  ;;  %v2062_v32 = vld [vmem:[%s9009_s15 + $0x28] sm:$0xff]  ;;  %v2071_v33 = vld [vmem:[%s9010_s16 + $0x10] sm:$0xff] }
 0x737   : > { %6992 = vpow2.f32 %v1803_v34  ;;  %v2061_v34 = vld [vmem:[%s9009_s15 + $0x20] sm:$0xff] }
 0x742   : > { %v6991_v35 = vpop.eup %6990 }
 0x743   : > { %v1810_v36 = vsel %vm1328_vm8, %v6991_v35, 0.0 }
 0x744   : > { %v6993_v37 = vpop.eup %6992  ;;  %1811 = vadd.xlane.f32.xlu1 %v1810_v36  ;;  %v2060_v36 = vld [vmem:[%s9009_s15 + $0x18] sm:$0xff] }
 0x745   : > { %v1807_v38 = vsel %vm1324_vm9, %v6993_v37, 0.0 }
 0x746   : > { %1808 = vadd.xlane.f32.xlu0 %v1807_v38  ;;  %v2059_v38 = vld [vmem:[%s9009_s15 + $0x10] sm:$0xff] }
 0x7cd   : > { %v1812_v39 = vpop.xlane.xlu1 %1811 }
 0x7ce   : > { %6994 = vrcp.f32 %v1812_v39  ;;  %v736_v39 = vld [vmem:[%s7749_s27] sm:$0xff] }
 0x7cf   : > { %v1809_v40 = vpop.xlane.xlu0 %1808 }
 0x7d0   : > { %6996 = vrcp.f32 %v1809_v40  ;;  %v2058_v40 = vld [vmem:[%s9009_s15 + $0x8] sm:$0xff] }
 0x7db   : > { %v6995_v41 = vpop.eup %6994 }
 0x7dc   : > { %v1816_v44 = vmul.f32 %v6995_v41, %v6991_v35  ;;  %v2070_v35 = vld [vmem:[%s9010_s16 + $0x8] sm:$0xff]  ;;  %v2057_v41 = vld [vmem:[%s9009_s15] sm:$0xff] }
 0x7dd   : > { %v6997_v42 = vpop.eup %6996 }
 0x7de   : > { %v1815_v43 = vmul.f32 %v6997_v42, %v6993_v37  ;;  %v2069_v37 = vld [vmem:[%s9010_s16] sm:$0xff]  ;;  %v737_v42 = vld [vmem:[%s7749_s27 + $0x8] sm:$0x3] }
 0x7e0   : > { %6637 = vmatprep.mubr.msk.f32.mxu0 %vm1324_vm9, %v1815_v43 }
 0x7e1   : > { %6638 = vmatmul.mubr.msk.f32.vlgmr.msra.gmra.mxu0 %vm1324_vm9, %v1816_v44 }
 0x7e2   : > { %2155 = vmatprep.mubr.f32.mxu0 %v7164_v1  ;;  %2108 = vmatpush1.msra.mxu0 %v2083_v13  ;;  %v2398_v13 = vld [vmem:[%s9012_s18 + $0xb8] sm:$0xff] }
 0x7e3   : > { %2109 = vmatprep.subr.mxu0 %v2082_v14  ;;  %v2397_v14 = vld [vmem:[%s9012_s18 + $0xb0] sm:$0xff] }
 0x7e4   : > { %2110 = vmatpush1.msra.mxu0 %v2081_v15  ;;  %v2396_v15 = vld [vmem:[%s9012_s18 + $0xa8] sm:$0xff] }
 0x7e5   : > { %2111 = vmatprep.subr.mxu0 %v2080_v16  ;;  %v2395_v16 = vld [vmem:[%s9012_s18 + $0xa0] sm:$0xff] }
 0x7e6   : > { %2112 = vmatpush1.msra.mxu0 %v2079_v4  ;;  %v2394_v4 = vld [vmem:[%s9012_s18 + $0x98] sm:$0xff] }
 0x7e7   : > { %2113 = vmatprep.subr.mxu0 %v2078_v17  ;;  %v2393_v17 = vld [vmem:[%s9012_s18 + $0x90] sm:$0xff] }
 0x7e8   : > { %2114 = vmatpush1.msra.mxu0 %v2077_v19  ;;  %v2391_v19 = vld [vmem:[%s9012_s18 + $0x80] sm:$0xff] }
 0x7e9   : > { %2115 = vmatprep.subr.mxu0 %v2076_v21 }
 0x7ea   : > { %2116 = vmatpush1.msra.mxu0 %v2075_v23 }
 0x7eb   : > { %2117 = vmatprep.subr.mxu0 %v2074_v27 }
 0x7ec   : > { %2118 = vmatpush1.msra.mxu0 %v2073_v29 }
 0x7ed   : > { %2119 = vmatprep.subr.mxu0 %v2072_v31 }
 0x7ee   : > { %2120 = vmatpush1.msra.mxu0 %v2071_v33 }
 0x7ef   : > { %2121 = vmatprep.subr.mxu0 %v2070_v35 }
 0x7f0   : > { %2122 = vmatpush1.msra.mxu0 %v2069_v37 }
 0x7f1   : > { %5929 = vmatmul.mubr.msk.f32.vlgmr.msra.gmra.mxu0 %vm752_vm2, %v736_v39  ;;  %2405 = vmatprep.subr.mxu0 %v7164_v1 }
 0x7f2   : > { %2161 = vmatprep.mubr.f32.mxu0 %v7164_v1 }
 0x7f5   : > { %5930 = vmatmul.mubr.msk.f32.gmra.mxu0 %vm752_vm2, %v737_v42 }
 0x8a1   : > { %v6639_v51 = vpop.f32.mrf.mxu0 }
 0x8a2   : > { %1905 = vrot.lane.b32.xlu1 %v6639_v51, %s9027_s2 }
 0x8a3   : > { %v1892_v52 = vpop.f32.mrf.mxu0 }
 0x8a4   : > { %1903 = vrot.lane.b32.xlu0 %v1892_v52, %s9027_s2  ;;  %s715_s2 = scalar_lea.vmem [#allocation4], %s5846_s3  ;;  %s7106_s3 = sshll.u32 %s7167_s4, 4  ;;  %s7107_s3 = int_to_ptr.vmem [resolvable:$false] %s7106_s3 }
 0x8a5   : > { %s5747_s1 = sshll.u32 %s715_s2, 4  ;;  %s5748_s1 = int_to_ptr.vmem [resolvable:$true] %s5747_s1 }
 0x8a6   : > { %p7109_p0 = scmp.lt.s32.totalorder %s5748_s1, %s7107_s3 }
 0x914   : > { %v1906_v53 = vpop.permute.xlu1 %1905 }
 0x915   : > { %1912 = vst.msk [vmem:[#allocation3 + $0x8] sm:$0x3] %vm1911_vm11, %v1906_v53  ;;  %v5927_v53 = vld [vmem:[%s9007_s13] ss:$0 sm:$0xff] }
 0x916   : > { %v1904_v54 = vpop.permute.xlu0 %1903 }
 0x917   : > { %1910 = vst.msk [vmem:[#allocation3] sm:$0xff] %vm1909_vm12, %v1904_v54 }
 0x91c   : > { %v1914_v56 = vld [vmem:[#allocation3 + $0x8] sm:$0x3] }
 0x91e   : > { %v1913_v55 = vld [vmem:[#allocation3] sm:$0xff] }
 0x91f   : > { %6652 = vmatprep.mubr.msk.f32.mxu1 %vm826_vm3, %v1913_v55  ;;  %v5928_v55 = vld [vmem:[%s9008_s14] ss:$0 sm:$0xff] }
 0x920   : > { %6653 = vmatmul.mubr.msk.f32.vlgmr.msra.gmra.mxu1 %vm826_vm3, %v1914_v56 }
 0x921   : > { %2238 = vmatprep.mubr.f32.mxu1 %v7164_v1  ;;  %2195 = vmatpush1.msra.mxu1 %v2067_v20  ;;  %v2253_v20 = vlaneseq }
 0x922   : > { %2196 = vmatprep.subr.mxu1 %v2066_v22  ;;  %v2157_v22 = vpop.f32.mrf.mxu0 }
 0x923   : > { %2197 = vmatpush1.msra.mxu1 %v2065_v24  ;;  %v2254_v21 = vshrl.u32 %v2253_v20, 7  ;;  %v2251_v24 = vld [vmem:[%s9011_s17] sm:$0x3] }
 0x924   : > { %2198 = vmatprep.subr.mxu1 %v2064_v28  ;;  %v2159_v28 = vpop.f32.mrf.mxu0 }
 0x925   : > { %2199 = vmatpush1.msra.mxu1 %v2063_v30  ;;  %v7869_v23 = vsub.s32 0, %v2254_v21  ;;  %v7874_v27 = vsub.s32 1, %v2254_v21 }
 0x926   : > { %2200 = vmatprep.subr.mxu1 %v2062_v32  ;;  %v2163_v35 = vpop.f32.mrf.mxu0 }
 0x927   : > { %2201 = vmatpush1.msra.mxu1 %v2061_v34  ;;  %v2256_v29 = vrot.slane %v2251_v24, %v7869_v23  ;;  %v2260_v32 = vrot.slane %v2251_v24, %v7874_v27 }
 0x928   : > { %2202 = vmatprep.subr.mxu1 %v2060_v36 }
 0x929   : > { %2203 = vmatpush1.msra.mxu1 %v2059_v38 }
 0x92a   : > { %2204 = vmatprep.subr.mxu1 %v2058_v40 }
 0x92b   : > { %2205 = vmatpush1.msra.mxu1 %v2057_v41 }
 0x9e0   : > { %v6654_v57 = vpop.f32.mrf.mxu1 }
 0x9e1   : > { %v2003_v59 = vadd.f32 %v6654_v57, %v7413_v26 }
 0x9e2   : > { %v1993_v60 = vpop.f32.mrf.mxu1 }
 0x9e3   : > { %v7646_v61 = vadd.f32 %v5926_v58, %v2003_v59  ;;  %v2002_v62 = vadd.f32 %v1993_v60, %v7411_v25  ;;  %v2390_v59 = vld [vmem:[%s9012_s18 + $0x78] sm:$0xff]  ;;  %v2389_v60 = vld [vmem:[%s9012_s18 + $0x70] sm:$0xff] }
 0x9e4   : > { %2406 = vmatpush1.msra.mxu0 %v2390_v59 }
 0x9e5   : > { %v7649_v63 = vadd.f32 %v5926_v58, %v2002_v62  ;;  %v2018_v0 = vsel %vm919_vm5, %v7646_v61, 0.0  ;;  %2407 = vmatprep.subr.mxu0 %v7164_v1  ;;  %v2388_v62 = vld [vmem:[%s9012_s18 + $0x68] sm:$0xff] }
 0x9e6   : > { %2019 = vadd.xlane.f32.xlu0 %v2018_v0  ;;  %2408 = vmatpush1.msra.mxu0 %v2389_v60  ;;  %v2387_v0 = vld [vmem:[%s9012_s18 + $0x60] sm:$0xff] }
 0x9e7   : > { %v2015_v3 = vsel %vm826_vm3, %v7649_v63, 0.0  ;;  %2409 = vmatprep.subr.mxu0 %v7164_v1 }
 0x9e8   : > { %2016 = vadd.xlane.f32.xlu1 %v2015_v3  ;;  %2410 = vmatpush1.msra.mxu0 %v2388_v62  ;;  %v2386_v3 = vld [vmem:[%s9012_s18 + $0x58] sm:$0xff] }
 0x9e9   : > { %2411 = vmatprep.subr.mxu0 %v7164_v1 }
 0x9ea   : > { %2412 = vmatpush1.msra.mxu0 %v2387_v0 }
 0x9eb   : > { %2413 = vmatprep.subr.mxu0 %v7164_v1 }
 0x9ec   : > { %2414 = vmatpush1.msra.mxu0 %v2386_v3 }
 0x9ed   : > { %2415 = vmatprep.subr.mxu0 %v7164_v1 }
 0xa6f   : > { %v2020_v5 = vpop.xlane.xlu0 %2019 }
 0xa70   : > { %v2022_v6 = vmul.f32 0.020833334, %v2020_v5  ;;  %v2385_v5 = vld [vmem:[%s9012_s18 + $0x50] sm:$0xff] }
 0xa71   : > { %v2017_v7 = vpop.xlane.xlu1 %2016  ;;  %2416 = vmatpush1.msra.mxu0 %v2385_v5 }
 0xa72   : > { %v7656_v26 = vsub.f32 %v7646_v61, %v2022_v6  ;;  %v2021_v2 = vmul.f32 0.020833334, %v2017_v7  ;;  %2417 = vmatprep.subr.mxu0 %v7164_v1  ;;  %v2384_v6 = vld [vmem:[%s9012_s18 + $0x48] sm:$0xff]  ;;  %v2383_v7 = vld [vmem:[%s9012_s18 + $0x40] sm:$0xff] }
 0xa73   : > { %2418 = vmatpush1.msra.mxu0 %v2384_v6 }
 0xa74   : > { %v7659_v8 = vsub.f32 %v7649_v63, %v2021_v2  ;;  %v2026_v25 = vmul.f32 %v7656_v26, %v7656_v26  ;;  %2419 = vmatprep.subr.mxu0 %v7164_v1  ;;  %v2381_v2 = vld [vmem:[%s9012_s18 + $0x30] sm:$0xff] }
 0xa75   : > { %2420 = vmatpush1.msra.mxu0 %v2383_v7 }
 0xa76   : > { %v2030_v9 = vsel %vm919_vm5, %v2026_v25, 0.0  ;;  %v2025_v10 = vmul.f32 %v7659_v8, %v7659_v8  ;;  %2421 = vmatprep.subr.mxu0 %v7164_v1  ;;  %v2379_v25 = vld [vmem:[%s9012_s18 + $0x20] sm:$0xff] }
 0xa77   : > { %2031 = vadd.xlane.f32.xlu1 %v2030_v9  ;;  %v2378_v9 = vld [vmem:[%s9012_s18 + $0x18] sm:$0xff] }
 0xa78   : > { %v2027_v11 = vsel %vm826_vm3, %v2025_v10, 0.0  ;;  %v2377_v10 = vld [vmem:[%s9012_s18 + $0x10] sm:$0xff] }
 0xa79   : > { %2028 = vadd.xlane.f32.xlu0 %v2027_v11  ;;  %v2376_v11 = vld [vmem:[%s9012_s18 + $0x8] sm:$0xff] }
 0xb00   : > { %v2032_v43 = vpop.xlane.xlu1 %2031 }
 0xb01   : > { %v2034_v44 = vmul.f32 0.020833334, %v2032_v43 }
 0xb02   : > { %v2029_v45 = vpop.xlane.xlu0 %2028 }
 0xb03   : > { %v2036_v46 = vadd.f32 1e-05, %v2034_v44  ;;  %v2033_v47 = vmul.f32 0.020833334, %v2029_v45  ;;  %v2165_v44 = vpop.f32.mrf.mxu0 }
 0xb05   : > { %6998 = vrsqrt.f32 %v2036_v46  ;;  %v2035_v48 = vadd.f32 1e-05, %v2033_v47 }
 0xb07   : > { %7000 = vrsqrt.f32 %v2035_v48 }
 0xb12   : > { %v6999_v49 = vpop.eup %6998 }
 0xb13   : > { %v2040_v52 = vmul.f32 %v6999_v49, %v7656_v26  ;;  %v2382_v26 = vld [vmem:[%s9012_s18 + $0x38] sm:$0xff] }
 0xb14   : > { %v7001_v50 = vpop.eup %7000  ;;  %2422 = vmatpush1.msra.mxu0 %v2382_v26 }
 0xb15   : > { %v2039_v51 = vmul.f32 %v7001_v50, %v7659_v8  ;;  %v2048_v57 = vmul.f32 %v5927_v53, %v2040_v52  ;;  %2423 = vmatprep.subr.mxu0 %v7164_v1  ;;  %v2380_v8 = vld [vmem:[%s9012_s18 + $0x28] sm:$0xff] }
 0xb16   : > { %2424 = vmatpush1.msra.mxu0 %v2381_v2 }
 0xb17   : > { %v2047_v54 = vmul.f32 %v5927_v53, %v2039_v51  ;;  %v2056_v58 = vadd.f32 %v5928_v55, %v2048_v57  ;;  %2425 = vmatprep.subr.mxu0 %v7164_v1 }
 0xb18   : > { %2426 = vmatpush1.msra.mxu0 %v2380_v8 }
 0xb19   : > { %v2055_v56 = vadd.f32 %v5928_v55, %v2047_v54  ;;  %2427 = vmatprep.subr.mxu0 %v7164_v1 }
 0xb1a   : > { %2428 = vmatpush1.msra.mxu0 %v2379_v25 }
 0xb1b   : > { %5931 = vmatmul.mubr.msk.f32.vlgmr.msra.gmra.mxu1 %vm826_vm3, %v2055_v56  ;;  %2429 = vmatprep.subr.mxu0 %v7164_v1 }
 0xb1c   : > { %2244 = vmatprep.mubr.f32.mxu1 %v7164_v1  ;;  %2430 = vmatpush1.msra.mxu0 %v2378_v9 }
 0xb1d   : > { %2431 = vmatprep.subr.mxu0 %v7164_v1 }
 0xb1e   : > { %2432 = vmatpush1.msra.mxu0 %v2377_v10 }
 0xb1f   : > { %5932 = vmatmul.mubr.msk.f32.gmra.mxu1 %vm826_vm3, %v2056_v58  ;;  %2433 = vmatprep.subr.mxu0 %v7164_v1 }
 0xb20   : > { %2434 = vmatpush1.msra.mxu0 %v2376_v11 }
 0xb21   : > { %2435 = vmatprep.subr.mxu0 %v7164_v1 }
 0xb22   : > { %2436 = vmatpush1.msra.mxu0 %v2375_v12 }
 0xb23   : > { %2453 = vmatprep.subr.mxu0 %v7164_v1 }
 0xb24   : > { %2454 = vmatpush2.msra.mxu0 %v2398_v13 }
 0xb25   : > { %2455 = vmatprep.subr.mxu0 %v7164_v1 }
 0xb26   : > { %2456 = vmatpush2.msra.mxu0 %v2397_v14 }
 0xb27   : > { %2457 = vmatprep.subr.mxu0 %v7164_v1 }
 0xb28   : > { %2458 = vmatpush2.msra.mxu0 %v2396_v15 }
 0xb29   : > { %2459 = vmatprep.subr.mxu0 %v7164_v1 }
 0xb2a   : > { %2460 = vmatpush2.msra.mxu0 %v2395_v16 }
 0xb2b   : > { %2461 = vmatprep.subr.mxu0 %v7164_v1 }
 0xb2c   : > { %2462 = vmatpush2.msra.mxu0 %v2394_v4 }
 0xb2d   : > { %2463 = vmatprep.subr.mxu0 %v7164_v1 }
 0xb2e   : > { %2464 = vmatpush2.msra.mxu0 %v2393_v17 }
 0xb2f   : > { %2465 = vmatprep.subr.mxu0 %v7164_v1 }
 0xb30   : > { %2466 = vmatpush2.msra.mxu0 %v2392_v18 }
 0xb31   : > { %2467 = vmatprep.subr.mxu0 %v7164_v1 }
 0xb32   : > { %2468 = vmatpush2.msra.mxu0 %v2391_v19 }
 0xbdb   : > { %v2240_v30 = vpop.f32.mrf.mxu1 }
 0xbdc   : > { %v2241_v31 = vadd.f32 %v2240_v30, %v2157_v22 }
 0xbdd   : > { %v2242_v33 = vpop.f32.mrf.mxu1 }
 0xbde   : > { %v7878_v34 = vadd.f32 %v2256_v29, %v2241_v31  ;;  %v2243_v36 = vadd.f32 %v2242_v33, %v2159_v28 }
 0xbdf   : > { %v2246_v37 = vpop.f32.mrf.mxu1 }
 0xbe0   : > { %v7881_v38 = vmul.f32 0.70710677, %v7878_v34  ;;  %v7883_v39 = vadd.f32 %v2260_v32, %v2243_v36  ;;  %v2247_v40 = vadd.f32 %v2246_v37, %v2163_v35 }
 0xbe1   : > { %v2248_v41 = vpop.f32.mrf.mxu1 }
 0xbe2   : > { %v2275_v42 = vand.u32 2147483647, %v7881_v38  ;;  %v7887_v43 = vmul.f32 0.70710677, %v7883_v39  ;;  %v7889_v45 = vadd.f32 %v2256_v29, %v2247_v40  ;;  %v2249_v46 = vadd.f32 %v2248_v41, %v2165_v44 }
 0xbe3   : > { %vm2355_vm13 = vcmp.ge.f32.partialorder %v7881_v38, 0.0  ;;  %v2267_v38 = vmul.f32 0.5, %v7878_v34 }
 0xbe4   : > { %v2279_v47 = vmul.f32 0.3275911, %v2275_v42  ;;  %v2276_v48 = vand.u32 2147483647, %v7887_v43  ;;  %v7893_v49 = vmul.f32 0.70710677, %v7889_v45  ;;  %v7895_v50 = vadd.f32 %v2260_v32, %v2249_v46 }
 0xbe5   : > { %v2331_v62 = vsub.f32 0.0, %v2275_v42  ;;  %vm2356_vm14 = vcmp.ge.f32.partialorder %v7887_v43, 0.0 }
 0xbe6   : > { %v2283_v51 = vadd.f32 1.0, %v2279_v47  ;;  %v2280_v52 = vmul.f32 0.3275911, %v2276_v48  ;;  %v2277_v53 = vand.u32 2147483647, %v7893_v49  ;;  %v2332_v0 = vsub.f32 0.0, %v2276_v48 }
 0xbe7   : > { %v7899_v54 = vmul.f32 0.70710677, %v7895_v50  ;;  %v2335_v3 = vmul.f32 %v2331_v62, %v2275_v42  ;;  %vm2357_vm15 = vcmp.ge.f32.partialorder %v7893_v49, 0.0 }
 0xbe8   : > { %7002 = vrcp.f32 %v2283_v51  ;;  %v2284_v55 = vadd.f32 1.0, %v2280_v52  ;;  %v2281_v56 = vmul.f32 0.3275911, %v2277_v53  ;;  %v2333_v5 = vsub.f32 0.0, %v2277_v53 }
 0xbe9   : > { %v2278_v57 = vand.u32 2147483647, %v7899_v54  ;;  %v2336_v7 = vmul.f32 %v2332_v0, %v2276_v48  ;;  %v2339_v2 = vmul.f32 1.442695, %v2335_v3  ;;  %vm2358_vm1 = vcmp.ge.f32.partialorder %v7899_v54, 0.0 }
 0xbea   : > { %7004 = vrcp.f32 %v2284_v55  ;;  %v2285_v58 = vadd.f32 1.0, %v2281_v56  ;;  %v2337_v25 = vmul.f32 %v2333_v5, %v2277_v53  ;;  %v5935_v54 = vld [vmem:[%s9013_s19] ss:$0 sm:$0xff] }
 0xbeb   : > { %v2282_v59 = vmul.f32 0.3275911, %v2278_v57  ;;  %v2334_v8 = vsub.f32 0.0, %v2278_v57  ;;  %v2341_v12 = vmul.f32 1.442695, %v2336_v7 }
 0xbec   : > { %7006 = vrcp.f32 %v2285_v58  ;;  %v2343_v4 = vmul.f32 1.442695, %v2337_v25 }
 0xbed   : > { %v2286_v60 = vadd.f32 1.0, %v2282_v59  ;;  %v2338_v15 = vmul.f32 %v2334_v8, %v2278_v57 }
 0xbef   : > { %7008 = vrcp.f32 %v2286_v60  ;;  %v2345_v28 = vmul.f32 1.442695, %v2338_v15 }
 0xbf0   : > { %7010 = vpow2.f32 %v2339_v2 }
 0xbf1   : > { %7012 = vpow2.f32 %v2341_v12 }
 0xbf2   : > { %7014 = vpow2.f32 %v2343_v4 }
 0xbf3   : > { %7016 = vpow2.f32 %v2345_v28  ;;  %v2270_v28 = vmul.f32 0.5, %v7895_v50 }
 0xbf5   : > { %v7003_v6 = vpop.eup %7002 }
 0xbf6   : > { %v2295_v26 = vmul.f32 1.0614054, %v7003_v6 }
 0xbf7   : > { %v7005_v9 = vpop.eup %7004 }
 0xbf8   : > { %v2299_v10 = vadd.f32 -1.4531521, %v2295_v26  ;;  %v2296_v11 = vmul.f32 1.0614054, %v7005_v9 }
 0xbf9   : > { %v7007_v13 = vpop.eup %7006 }
 0xbfa   : > { %v2303_v14 = vmul.f32 %v7003_v6, %v2299_v10  ;;  %v2300_v16 = vadd.f32 -1.4531521, %v2296_v11  ;;  %v2297_v17 = vmul.f32 1.0614054, %v7007_v13 }
 0xbfc   : > { %v2307_v18 = vadd.f32 1.4214138, %v2303_v14  ;;  %v7009_v19 = vpop.eup %7008  ;;  %v2304_v20 = vmul.f32 %v7005_v9, %v2300_v16  ;;  %v2301_v21 = vadd.f32 -1.4531521, %v2297_v17 }
 0xbfd   : > { %v2298_v24 = vmul.f32 1.0614054, %v7009_v19  ;;  %v7011_v52 = vpop.eup %7010 }
 0xbfe   : > { %v2311_v22 = vmul.f32 %v7003_v6, %v2307_v18  ;;  %v2308_v29 = vadd.f32 1.4214138, %v2304_v20  ;;  %v2305_v30 = vmul.f32 %v7007_v13, %v2301_v21  ;;  %v7013_v60 = vpop.eup %7012 }
 0xbff   : > { %v2302_v32 = vadd.f32 -1.4531521, %v2298_v24  ;;  %v7015_v7 = vpop.eup %7014 }
 0xc00   : > { %v2315_v31 = vadd.f32 -0.28449672, %v2311_v22  ;;  %v2312_v33 = vmul.f32 %v7005_v9, %v2308_v29  ;;  %v2309_v35 = vadd.f32 1.4214138, %v2305_v30  ;;  %v7017_v11 = vpop.eup %7016 }
 0xc01   : > { %v2306_v37 = vmul.f32 %v7009_v19, %v2302_v32 }
 0xc02   : > { %v2319_v36 = vmul.f32 %v7003_v6, %v2315_v31  ;;  %v2316_v40 = vadd.f32 -0.28449672, %v2312_v33  ;;  %v2313_v41 = vmul.f32 %v7007_v13, %v2309_v35 }
 0xc03   : > { %v2310_v44 = vadd.f32 1.4214138, %v2306_v37 }
 0xc04   : > { %v2323_v42 = vadd.f32 0.2548296, %v2319_v36  ;;  %v2320_v46 = vmul.f32 %v7005_v9, %v2316_v40  ;;  %v2317_v47 = vadd.f32 -0.28449672, %v2313_v41 }
 0xc05   : > { %v2314_v51 = vmul.f32 %v7009_v19, %v2310_v44 }
 0xc06   : > { %v2327_v48 = vmul.f32 %v7003_v6, %v2323_v42  ;;  %v2324_v53 = vadd.f32 0.2548296, %v2320_v46  ;;  %v2321_v55 = vmul.f32 %v7007_v13, %v2317_v47 }
 0xc07   : > { %v2318_v57 = vadd.f32 -0.28449672, %v2314_v51 }
 0xc08   : > { %v2347_v56 = vmul.f32 %v7011_v52, %v2327_v48  ;;  %v2328_v58 = vmul.f32 %v7005_v9, %v2324_v53  ;;  %v2325_v59 = vadd.f32 0.2548296, %v2321_v55  ;;  %v5945_v53 = vld [vmem:[%s9003_s9 + $0x148] sm:$0xff]  ;;  %v5982_v55 = vld [vmem:[%s9003_s9 + $0x178] sm:$0xff] }
 0xc09   : > { %v2322_v0 = vmul.f32 %v7009_v19, %v2318_v57  ;;  %6655 = vmatprep.subr.mxu1 %v5945_v53  ;;  %6714 = vmatprep.subr.mxu0 %v5982_v55  ;;  %v5981_v57 = vld [vmem:[%s9003_s9 + $0x170] sm:$0xff] }
 0xc0a   : > { %v2351_v62 = vsub.f32 1.0, %v2347_v56  ;;  %v2348_v3 = vmul.f32 %v7013_v60, %v2328_v58  ;;  %v2329_v5 = vmul.f32 %v7007_v13, %v2325_v59  ;;  %v2268_v13 = vmul.f32 0.5, %v7883_v39  ;;  %6656 = vmatpush3.msra.mxu1 %v5945_v53  ;;  %v5944_v56 = vld [vmem:[%s9003_s9 + $0x140] sm:$0xff]  ;;  %v5943_v58 = vld [vmem:[%s9003_s9 + $0x138] sm:$0xff]  ;;  %v5980_v59 = vld [vmem:[%s9003_s9 + $0x168] sm:$0xff] }
 0xc0b   : > { %v2326_v2 = vadd.f32 0.2548296, %v2322_v0  ;;  %v2269_v39 = vmul.f32 0.5, %v7889_v45  ;;  %6657 = vmatprep.subr.mxu1 %v5944_v56  ;;  %v5942_v60 = vld [vmem:[%s9003_s9 + $0x130] sm:$0xff]  ;;  %v5941_v0 = vld [vmem:[%s9003_s9 + $0x128] sm:$0xff] }
 0xc0c   : > { %v2359_v26 = vsub.f32 0.0, %v2351_v62  ;;  %v2352_v8 = vsub.f32 1.0, %v2348_v3  ;;  %v2349_v6 = vmul.f32 %v7015_v7, %v2329_v5  ;;  %6658 = vmatpush3.msra.mxu1 %v5944_v56  ;;  %v5978_v3 = vld [vmem:[%s9003_s9 + $0x158] sm:$0xff]  ;;  %v5940_v5 = vld [vmem:[%s9003_s9 + $0x120] sm:$0xff]  ;;  %v5977_v7 = vld [vmem:[%s9003_s9 + $0x150] sm:$0xff] }
 0xc0d   : > { %v2330_v10 = vmul.f32 %v7009_v19, %v2326_v2  ;;  %6659 = vmatprep.subr.mxu1 %v5943_v58  ;;  %v6002_v2 = vld [vmem:[%s9003_s9 + $0x238] sm:$0xff] }
 0xc0e   : > { %v2363_v25 = vsel %vm2355_vm13, %v2351_v62, %v2359_v26  ;;  %v2360_v12 = vsub.f32 0.0, %v2352_v8  ;;  %v2353_v14 = vsub.f32 1.0, %v2349_v6  ;;  %6660 = vmatpush3.msra.mxu1 %v5943_v58  ;;  %v5979_v62 = vld [vmem:[%s9003_s9 + $0x160] sm:$0xff]  ;;  %v5955_v26 = vld [vmem:[%s9003_s9 + $0x1a8] sm:$0xff] }
 0xc0f   : > { %v2350_v9 = vmul.f32 %v7017_v11, %v2330_v10  ;;  %v2367_v15 = vadd.f32 1.0, %v2363_v25  ;;  %6661 = vmatprep.subr.mxu1 %v5942_v60 }
 0xc10   : > { %v2364_v16 = vsel %vm2356_vm14, %v2352_v8, %v2360_v12  ;;  %v2361_v4 = vsub.f32 0.0, %v2353_v14  ;;  %6662 = vmatpush3.msra.mxu1 %v5942_v60  ;;  %v5967_v60 = vld [vmem:[%s9004_s10 + $0xa] ss:$0 sm:$0xff] }
 0xc11   : > { %v2368_v17 = vadd.f32 1.0, %v2364_v16  ;;  %v2354_v18 = vsub.f32 1.0, %v2350_v9  ;;  %v2371_v22 = vmul.f32 %v2367_v15, %v2267_v38  ;;  %6663 = vmatprep.subr.mxu1 %v5941_v0  ;;  %v5938_v9 = vld [vmem:[%s9054_s7 + $0x1] ss:$0 sm:$0xff] }
 0xc12   : > { %v2365_v20 = vsel %vm2357_vm15, %v2353_v14, %v2361_v4  ;;  %6664 = vmatpush3.msra.mxu1 %v5941_v0  ;;  %v5939_v16 = vld [vmem:[%s9002_s8 + $0x1] ss:$0 sm:$0xff] }
 0xc13   : > { %v2372_v21 = vmul.f32 %v2368_v17, %v2268_v13  ;;  %v2362_v19 = vsub.f32 0.0, %v2354_v18  ;;  %v2369_v43 = vadd.f32 1.0, %v2365_v20  ;;  %6665 = vmatprep.subr.mxu1 %v5940_v5 }
 0xc14   : > { %6666 = vmatpush3.msra.mxu1 %v5940_v5 }
 0xc15   : > { %v2366_v24 = vsel %vm2358_vm1, %v2354_v18, %v2362_v19  ;;  %5933 = vmatprep.mubr.msk.f32.mxu0 %vm752_vm2, %v2372_v21  ;;  %v2373_v30 = vmul.f32 %v2369_v43, %v2269_v39  ;;  %6670 = vmatprep.subr.mxu1 %v5955_v26  ;;  %v5954_v21 = vld [vmem:[%s9003_s9 + $0x1a0] sm:$0xff]  ;;  %v6001_v19 = vld [vmem:[%s9003_s9 + $0x230] sm:$0xff]  ;;  %v5998_v39 = vld [vmem:[%s9003_s9 + $0x218] sm:$0xff] }
 0xc16   : > { %v2370_v29 = vadd.f32 1.0, %v2366_v24  ;;  %2470 = vmatmul.mubr.f32.vlgmr.msra.gmra.mxu0 %v2371_v22  ;;  %v5953_v22 = vld [vmem:[%s9003_s9 + $0x198] sm:$0xff]  ;;  %v6000_v24 = vld [vmem:[%s9003_s9 + $0x228] sm:$0xff]  ;;  %v5952_v43 = vld [vmem:[%s9003_s9 + $0x190] sm:$0xff] }
 0xc17   : > { %6715 = vmatpush3.msra.mxu0 %v5982_v55 }
 0xc18   : > { %v2374_v49 = vmul.f32 %v2370_v29, %v2270_v28  ;;  %6716 = vmatprep.subr.mxu0 %v5981_v57  ;;  %v5999_v28 = vld [vmem:[%s9003_s9 + $0x220] sm:$0xff]  ;;  %v5951_v29 = vld [vmem:[%s9003_s9 + $0x188] sm:$0xff] }
 0xc19   : > { %6717 = vmatpush3.msra.mxu0 %v5981_v57 }
 0xc1a   : > { %5934 = vmatprep.mubr.msk.f32.mxu0 %vm752_vm2, %v2374_v49  ;;  %6718 = vmatprep.subr.mxu0 %v5980_v59  ;;  %v5950_v49 = vld [vmem:[%s9003_s9 + $0x180] sm:$0xff] }
 0xc1b   : > { %2475 = vmatmul.mubr.f32.gmra.mxu0 %v2373_v30  ;;  %v5997_v30 = vld [vmem:[%s9003_s9 + $0x210] sm:$0xff] }
 0xc1c   : > { %6719 = vmatpush3.msra.mxu0 %v5980_v59 }
 0xc1d   : > { %6720 = vmatprep.subr.mxu0 %v5979_v62 }
 0xc1e   : > { %6721 = vmatpush3.msra.mxu0 %v5979_v62 }
 0xc1f   : > { %6722 = vmatprep.subr.mxu0 %v5978_v3 }
 0xc20   : > { %6723 = vmatpush3.msra.mxu0 %v5978_v3 }
 0xc21   : > { %6724 = vmatprep.subr.mxu0 %v5977_v7 }
 0xc22   : > { %6725 = vmatpush3.msra.mxu0 %v5977_v7 }
 0xc23   : > { %6744 = vmatprep.subr.mxu0 %v6002_v2 }
 0xcd6   : > { %v2471_v34 = vpop.f32.mrf.mxu0 }
 0xcd7   : > { %v2480_v31 = vadd.f32 %v2471_v34, %v7649_v63  ;;  %v5965_v34 = vld [vmem:[%s9003_s9 + $0x208] sm:$0xff] }
 0xcd8   : > { %v2473_v32 = vpop.f32.mrf.mxu0 }
 0xcd9   : > { %v7916_v33 = vadd.f32 %v5935_v54, %v2480_v31  ;;  %v5963_v31 = vld [vmem:[%s9003_s9 + $0x1f8] sm:$0xff]  ;;  %v5962_v32 = vld [vmem:[%s9003_s9 + $0x1f0] sm:$0xff] }
 0xcdb   : > { %v2476_v50 = vpop.f32.mrf.mxu0  ;;  %v2495_v35 = vsel %vm826_vm3, %v7916_v33, 0.0 }
 0xcdc   : > { %v2481_v45 = vadd.f32 %v2476_v50, %v7646_v61  ;;  %2496 = vadd.xlane.f32.xlu0 %v2495_v35  ;;  %v5961_v50 = vld [vmem:[%s9003_s9 + $0x1e8] sm:$0xff]  ;;  %v5960_v35 = vld [vmem:[%s9003_s9 + $0x1e0] sm:$0xff] }
 0xcdd   : > { %v2478_v36 = vpop.f32.mrf.mxu0 }
 0xcde   : > { %v7921_v37 = vadd.f32 %v5935_v54, %v2481_v45  ;;  %v5964_v54 = vld [vmem:[%s9003_s9 + $0x200] sm:$0xff] }
 0xcdf   : > { %v8052_v45 = vld [vmem:[%s9004_s10 + $0x7] ss:$0 sm:$0xff] }
 0xce0   : > { %v2498_v40 = vsel %vm919_vm5, %v7921_v37, 0.0 }
 0xce1   : > { %2499 = vadd.xlane.f32.xlu1 %v2498_v40 }
 0xd65   : > { %v2497_v41 = vpop.xlane.xlu0 %2496 }
 0xd66   : > { %v2501_v42 = vmul.f32 0.020833334, %v2497_v41 }
 0xd68   : > { %v2503_v63 = vsub.f32 %v7916_v33, %v2501_v42  ;;  %v5947_v42 = vld [vmem:[%s9004_s10 + $0x6] ss:$0 sm:$0xff] }
 0xd6a   : > { %v2500_v44 = vpop.xlane.xlu1 %2499  ;;  %v2505_v46 = vmul.f32 %v2503_v63, %v2503_v63 }
 0xd6b   : > { %v2502_v47 = vmul.f32 0.020833334, %v2500_v44 }
 0xd6c   : > { %v2507_v48 = vsel %vm826_vm3, %v2505_v46, 0.0  ;;  %v5957_v46 = vld [vmem:[%s9004_s10 + $0x8] ss:$0 sm:$0xff] }
 0xd6d   : > { %v2504_v51 = vsub.f32 %v7921_v37, %v2502_v47  ;;  %2508 = vadd.xlane.f32.xlu0 %v2507_v48  ;;  %v6004_v48 = vld [vmem:[%s9004_s10 + $0xb] ss:$0 sm:$0xff] }
 0xd6f   : > { %v2506_v61 = vmul.f32 %v2504_v51, %v2504_v51 }
 0xd71   : > { %v2510_v52 = vsel %vm919_vm5, %v2506_v61, 0.0 }
 0xd72   : > { %2511 = vadd.xlane.f32.xlu1 %v2510_v52 }
 0xdf6   : > { %v2509_v8 = vpop.xlane.xlu0 %2508 }
 0xdf7   : > { %v2513_v6 = vmul.f32 0.020833334, %v2509_v8 }
 0xdf9   : > { %v2515_v25 = vadd.f32 1e-05, %v2513_v6 }
 0xdfb   : > { %7018 = vrsqrt.f32 %v2515_v25  ;;  %v2512_v10 = vpop.xlane.xlu1 %2511 }
 0xdfc   : > { %v2514_v11 = vmul.f32 0.020833334, %v2512_v10 }
 0xdfe   : > { %v2516_v12 = vadd.f32 1e-05, %v2514_v11 }
 0xe00   : > { %7020 = vrsqrt.f32 %v2516_v12 }
 0xe08   : > { %v7019_v14 = vpop.eup %7018 }
 0xe09   : > { %v2519_v15 = vmul.f32 %v7019_v14, %v2503_v63 }
 0xe0b   : > { %v2527_v4 = vmul.f32 %v5938_v9, %v2519_v15 }
 0xe0d   : > { %v7021_v13 = vpop.eup %7020  ;;  %v7977_v17 = vadd.f32 %v5939_v16, %v2527_v4 }
 0xe0e   : > { %v2520_v18 = vmul.f32 %v7021_v13, %v2504_v51 }
 0xe0f   : > { %6667 = vmatprep.mubr.msk.f32.mxu1 %vm826_vm3, %v7977_v17  ;;  %6726 = vmatprep.mubr.msk.f32.mxu0 %vm826_vm3, %v7977_v17 }
 0xe10   : > { %v2528_v38 = vmul.f32 %v5938_v9, %v2520_v18 }
 0xe12   : > { %v7983_v20 = vadd.f32 %v5939_v16, %v2528_v38  ;;  %v5992_v38 = vld [vmem:[%s9003_s9 + $0x1d8] sm:$0xff] }
 0xe14   : > { %6668 = vmatmul.mubr.msk.f32.vlgmr.msra.gmra.mxu1 %vm826_vm3, %v7983_v20  ;;  %6727 = vmatmul.mubr.msk.f32.vlgmr.msra.gmra.mxu0 %vm826_vm3, %v7983_v20 }
 0xe15   : > { %6671 = vmatpush3.msra.mxu1 %v5955_v26  ;;  %6745 = vmatpush3.msra.mxu0 %v6002_v2 }
 0xe16   : > { %6672 = vmatprep.subr.mxu1 %v5954_v21  ;;  %6682 = vmatprep.mubr.msk.f32.mxu1 %vm826_vm3, %v7977_v17 }
 0xe17   : > { %6746 = vmatprep.subr.mxu0 %v6001_v19  ;;  %6756 = vmatprep.mubr.msk.f32.mxu0 %vm826_vm3, %v7977_v17 }
 0xe18   : > { %6673 = vmatpush3.msra.mxu1 %v5954_v21  ;;  %6747 = vmatpush3.msra.mxu0 %v6001_v19 }
 0xe19   : > { %6674 = vmatprep.subr.mxu1 %v5953_v22  ;;  %6748 = vmatprep.subr.mxu0 %v6000_v24 }
 0xe1a   : > { %6675 = vmatpush3.msra.mxu1 %v5953_v22  ;;  %6749 = vmatpush3.msra.mxu0 %v6000_v24 }
 0xe1b   : > { %6676 = vmatprep.subr.mxu1 %v5952_v43  ;;  %6750 = vmatprep.subr.mxu0 %v5999_v28 }
 0xe1c   : > { %6677 = vmatpush3.msra.mxu1 %v5952_v43  ;;  %6751 = vmatpush3.msra.mxu0 %v5999_v28 }
 0xe1d   : > { %6678 = vmatprep.subr.mxu1 %v5951_v29  ;;  %6752 = vmatprep.subr.mxu0 %v5998_v39 }
 0xe1e   : > { %6679 = vmatpush3.msra.mxu1 %v5951_v29  ;;  %6753 = vmatpush3.msra.mxu0 %v5998_v39  ;;  %v5991_v29 = vld [vmem:[%s9003_s9 + $0x1d0] sm:$0xff]  ;;  %v5990_v39 = vld [vmem:[%s9003_s9 + $0x1c8] sm:$0xff] }
 0xe1f   : > { %6680 = vmatprep.subr.mxu1 %v5950_v49  ;;  %6754 = vmatprep.subr.mxu0 %v5997_v30 }
 0xe20   : > { %6681 = vmatpush3.msra.mxu1 %v5950_v49  ;;  %6755 = vmatpush3.msra.mxu0 %v5997_v30  ;;  %v5989_v49 = vld [vmem:[%s9003_s9 + $0x1c0] sm:$0xff]  ;;  %v5988_v30 = vld [vmem:[%s9003_s9 + $0x1b8] sm:$0xff] }
 0xe21   : > { %6683 = vmatmul.mubr.msk.f32.vlgmr.msra.gmra.mxu1 %vm826_vm3, %v7983_v20  ;;  %6685 = vmatprep.subr.mxu1 %v5965_v34 }
 0xe22   : > { %6757 = vmatmul.mubr.msk.f32.vlgmr.msra.gmra.mxu0 %vm826_vm3, %v7983_v20  ;;  %6686 = vmatpush3.msra.mxu1 %v5965_v34 }
 0xe23   : > { %6697 = vmatprep.mubr.msk.f32.mxu1 %vm826_vm3, %v7977_v17  ;;  %6687 = vmatprep.subr.mxu1 %v5964_v54 }
 0xe24   : > { %6688 = vmatpush3.msra.mxu1 %v5964_v54 }
 0xe25   : > { %6689 = vmatprep.subr.mxu1 %v5963_v31 }
 0xe26   : > { %6690 = vmatpush3.msra.mxu1 %v5963_v31 }
 0xe27   : > { %6691 = vmatprep.subr.mxu1 %v5962_v32 }
 0xe28   : > { %6692 = vmatpush3.msra.mxu1 %v5962_v32  ;;  %v5994_v32 = vld [vmem:[%s9004_s10 + $0x9] ss:$0 sm:$0xff] }
 0xe29   : > { %6693 = vmatprep.subr.mxu1 %v5961_v50 }
 0xe2a   : > { %6694 = vmatpush3.msra.mxu1 %v5961_v50 }
 0xe2b   : > { %6695 = vmatprep.subr.mxu1 %v5960_v35 }
 0xe2c   : > { %6696 = vmatpush3.msra.mxu1 %v5960_v35 }
 0xe2d   : > { %6698 = vmatmul.mubr.msk.f32.vlgmr.msra.gmra.mxu1 %vm826_vm3, %v7983_v20 }
 0xed4   : > { %v6669_v36 = vpop.f32.mrf.mxu1  ;;  %v6728_v40 = vpop.f32.mrf.mxu0 }
 0xed5   : > { %v8055_v41 = vadd.f32 %v6728_v40, %v8052_v45  ;;  %v2630_v59 = vadd.f32 %v6669_v36, %v5947_v42 }
 0xed6   : > { %v2624_v63 = vpop.f32.mrf.mxu1  ;;  %v8064_v47 = vpop.f32.mrf.mxu0 }
 0xed7   : > { %v2625_v44 = vadd.f32 %v5947_v42, %v2624_v63  ;;  %v3092_v34 = vadd.f32 %v8052_v45, %v8064_v47 }
 0xed9   : > { %6704 = vmatprep.mubr.msk.f32.mxu1 %vm1234_vm6, %v2625_v44 }
 0xee1   : > { %v6684_v51 = vpop.f32.mrf.mxu1 }
 0xee2   : > { %v2720_v61 = vadd.f32 %v6684_v51, %v5957_v46  ;;  %v6758_v52 = vpop.f32.mrf.mxu0 }
 0xee3   : > { %v3277_v53 = vadd.f32 %v6758_v52, %v6004_v48  ;;  %v2714_v55 = vpop.f32.mrf.mxu1 }
 0xee4   : > { %v2715_v56 = vadd.f32 %v5957_v46, %v2714_v55  ;;  %v3271_v57 = vpop.f32.mrf.mxu0  ;;  %6700 = vmatprep.subr.msk.mxu1 %vm1234_vm6, %v2720_v61 }
 0xee5   : > { %v3272_v58 = vadd.f32 %v6004_v48, %v3271_v57  ;;  %6766 = vmatprep.subr.msk.mxu0 %vm1354_vm7, %v3277_v53  ;;  %6701 = vmatpush3.xpose.msk.msra.mxu1 %vm1234_vm6, %v2720_v61 }
 0xee6   : > { %6767 = vmatpush3.msk.msra.mxu0 %vm1354_vm7, %v3277_v53  ;;  %6702 = vmatprep.subr.msk.mxu1 %vm1234_vm6, %v2715_v56 }
 0xee7   : > { %6768 = vmatprep.subr.mxu0 %v3272_v58 }
 0xee8   : > { %6769 = vmatpush3.msra.mxu0 %v3272_v58 }
 0xee9   : > { %6703 = vmatpush3.xpose.msk.msra.mxu1 %vm1234_vm6, %v2715_v56 }
 0xeec   : > { %6705 = vmatmul.mubr.msk.f32.vlgmr.msra.gmra.mxu1 %vm1234_vm6, %v2630_v59 }
 0xeed   : > { %v6699_v62 = vpop.f32.mrf.mxu1 }
 0xeee   : > { %v2810_v0 = vadd.f32 %v6699_v62, %v5967_v60 }
 0xeef   : > { %v2804_v3 = vpop.f32.mrf.mxu1 }
 0xef0   : > { %v2805_v5 = vadd.f32 %v5967_v60, %v2804_v3  ;;  %6707 = vmatprep.subr.msk.mxu1 %vm1354_vm7, %v2810_v0 }
 0xef1   : > { %6708 = vmatpush3.msk.msra.mxu1 %vm1354_vm7, %v2810_v0 }
 0xef2   : > { %6709 = vmatprep.subr.mxu1 %v2805_v5 }
 0xef3   : > { %6710 = vmatpush3.msra.mxu1 %v2805_v5  ;;  %v6019_v5 = vld [vmem:[%s9005_s11 + $0x58] sm:$0xff] }
 0xef4   : > { %6729 = vmatprep.subr.mxu1 %v5992_v38 }
 0xfac   : > { %v6706_v7 = vpop.f32.mrf.mxu1 }
 0xfad   : > { %v2901_v26 = vmul.f32 0.20412415, %v6706_v7  ;;  %v6018_v7 = vld [vmem:[%s9005_s11 + $0x50] sm:$0xff] }
 0xfae   : > { %v2891_v2 = vpop.f32.mrf.mxu1 }
 0xfaf   : > { %v2900_v8 = vmul.f32 0.20412415, %v2891_v2  ;;  %v2905_v6 = vsel %vm1328_vm8, %v2901_v26, -inf  ;;  %v6016_v2 = vld [vmem:[%s9005_s11 + $0x40] sm:$0xff] }
 0xfb0   : > { %2906 = vmax.xlane.f32.xlu1 %v2905_v6  ;;  %v6014_v6 = vld [vmem:[%s9005_s11 + $0x30] sm:$0xff] }
 0xfb1   : > { %v2902_v25 = vsel %vm1324_vm9, %v2900_v8, -inf }
 0xfb2   : > { %2903 = vmax.xlane.f32.xlu0 %v2902_v25 }
0x1039   : > { %v2907_v10 = vpop.xlane.xlu1 %2906 }
0x103a   : > { %v2909_v11 = vsub.f32 %v2901_v26, %v2907_v10  ;;  %v6017_v26 = vld [vmem:[%s9005_s11 + $0x48] sm:$0xff] }
0x103b   : > { %v2904_v12 = vpop.xlane.xlu0 %2903 }
0x103c   : > { %v2912_v14 = vmul.f32 1.442695, %v2909_v11  ;;  %v2908_v9 = vsub.f32 %v2900_v8, %v2904_v12  ;;  %v6015_v8 = vld [vmem:[%s9005_s11 + $0x38] sm:$0xff] }
0x103e   : > { %7022 = vpow2.f32 %v2912_v14  ;;  %v2910_v15 = vmul.f32 1.442695, %v2908_v9 }
0x1040   : > { %7024 = vpow2.f32 %v2910_v15 }
0x104b   : > { %v7023_v16 = vpop.eup %7022 }
0x104c   : > { %v2917_v4 = vsel %vm1328_vm8, %v7023_v16, 0.0 }
0x104d   : > { %v7025_v13 = vpop.eup %7024  ;;  %2918 = vadd.xlane.f32.xlu1 %v2917_v4 }
0x104e   : > { %v2914_v18 = vsel %vm1324_vm9, %v7025_v13, 0.0 }
0x104f   : > { %2915 = vadd.xlane.f32.xlu0 %v2914_v18 }
0x10d6   : > { %v2919_v21 = vpop.xlane.xlu1 %2918 }
0x10d7   : > { %7026 = vrcp.f32 %v2919_v21 }
0x10d8   : > { %v2916_v19 = vpop.xlane.xlu0 %2915 }
0x10d9   : > { %7028 = vrcp.f32 %v2916_v19 }
0x10e4   : > { %v7027_v22 = vpop.eup %7026 }
0x10e5   : > { %v2923_v28 = vmul.f32 %v7027_v22, %v7023_v16  ;;  %v6023_v16 = vld [vmem:[%s9006_s12 + $0x1] ss:$0 sm:$0xff] }
0x10e6   : > { %v7029_v24 = vpop.eup %7028 }
0x10e7   : > { %v2922_v43 = vmul.f32 %v7029_v24, %v7025_v13 }
0x10e9   : > { %6711 = vmatprep.mubr.msk.f32.mxu1 %vm1324_vm9, %v2922_v43 }
0x10ea   : > { %6712 = vmatmul.mubr.msk.f32.vlgmr.msra.gmra.mxu1 %vm1324_vm9, %v2923_v28 }
0x10eb   : > { %6730 = vmatpush3.msra.mxu1 %v5992_v38  ;;  %6741 = vmatprep.mubr.msk.f32.mxu1 %vm826_vm3, %v7977_v17  ;;  %v5987_v17 = vld [vmem:[%s9003_s9 + $0x1b0] sm:$0xff] }
0x10ec   : > { %6731 = vmatprep.subr.mxu1 %v5991_v29 }
0x10ed   : > { %6732 = vmatpush3.msra.mxu1 %v5991_v29 }
0x10ee   : > { %6733 = vmatprep.subr.mxu1 %v5990_v39 }
0x10ef   : > { %6734 = vmatpush3.msra.mxu1 %v5990_v39 }
0x10f0   : > { %6735 = vmatprep.subr.mxu1 %v5989_v49 }
0x10f1   : > { %6736 = vmatpush3.msra.mxu1 %v5989_v49 }
0x10f2   : > { %6737 = vmatprep.subr.mxu1 %v5988_v30 }
0x10f3   : > { %6738 = vmatpush3.msra.mxu1 %v5988_v30 }
0x10f4   : > { %6739 = vmatprep.subr.mxu1 %v5987_v17 }
0x10f5   : > { %6740 = vmatpush3.msra.mxu1 %v5987_v17 }
0x10f6   : > { %6742 = vmatmul.mubr.msk.f32.vlgmr.msra.gmra.mxu1 %vm826_vm3, %v7983_v20 }
0x10f7   : > { %6763 = vmatprep.mubr.msk.f32.mxu1 %vm1234_vm6, %v3092_v34  ;;  %v6055_v34 = vld [vmem:[%s9010_s16 + $0xf8] sm:$0xff] }
0x10f8   : > { %3679 = vmatprep.subr.mxu0 %v6055_v34  ;;  %v6063_v34 = vld [vmem:[%s9012_s18 + $0xd0] sm:$0xff] }
0x11aa   : > { %v6713_v54 = vpop.f32.mrf.mxu1 }
0x11ab   : > { %3009 = vst.msk [vmem:[#allocation3 + $0x8] sm:$0x3] %vm1434_vm10, %v6713_v54  ;;  %v6054_v54 = vld [vmem:[%s9010_s16 + $0xf0] sm:$0xff] }
0x11ac   : > { %v2999_v31 = vpop.f32.mrf.mxu1 }
0x11ad   : > { %3008 = vst.msk [vmem:[#allocation3] sm:$0xff] %vm1234_vm6, %v2999_v31  ;;  %v6053_v31 = vld [vmem:[%s9010_s16 + $0xe8] sm:$0xff] }
0x11b6   : > { %v6743_v50 = vpop.f32.mrf.mxu1 }
0x11b7   : > { %v3187_v35 = vadd.f32 %v6743_v50, %v5994_v32  ;;  %v6051_v50 = vld [vmem:[%s9010_s16 + $0xd8] sm:$0xff] }
0x11b8   : > { %v3181_v36 = vpop.f32.mrf.mxu1 }
0x11b9   : > { %v3182_v45 = vadd.f32 %v5994_v32, %v3181_v36  ;;  %6759 = vmatprep.subr.msk.mxu1 %vm1234_vm6, %v3187_v35  ;;  %v6052_v32 = vld [vmem:[%s9010_s16 + $0xe0] sm:$0xff]  ;;  %v6049_v36 = vld [vmem:[%s9010_s16 + $0xc8] sm:$0xff] }
0x11ba   : > { %6760 = vmatpush3.xpose.msk.msra.mxu1 %vm1234_vm6, %v3187_v35  ;;  %v6050_v35 = vld [vmem:[%s9010_s16 + $0xd0] sm:$0xff] }
0x11bb   : > { %6761 = vmatprep.subr.msk.mxu1 %vm1234_vm6, %v3182_v45 }
0x11be   : > { %6762 = vmatpush3.xpose.msk.msra.mxu1 %vm1234_vm6, %v3182_v45  ;;  %v6039_v45 = vld [vmem:[%s9009_s15 + $0xb8] sm:$0xff] }
0x11bf   : > { %6773 = vmatprep.subr.mxu1 %v6019_v5 }
0x11c1   : > { %6764 = vmatmul.mubr.msk.f32.vlgmr.msra.gmra.mxu1 %vm1234_vm6, %v8055_v41 }
0x11c2   : > { %6774 = vmatpush3.msra.mxu1 %v6019_v5 }
0x11c3   : > { %6775 = vmatprep.subr.mxu1 %v6018_v7 }
0x11c4   : > { %6776 = vmatpush3.msra.mxu1 %v6018_v7 }
0x11c5   : > { %6777 = vmatprep.subr.mxu1 %v6017_v26 }
0x11c6   : > { %6778 = vmatpush3.msra.mxu1 %v6017_v26 }
0x11c7   : > { %6779 = vmatprep.subr.mxu1 %v6016_v2 }
0x11c8   : > { %6780 = vmatpush3.msra.mxu1 %v6016_v2 }
0x11c9   : > { %6781 = vmatprep.subr.mxu1 %v6015_v8 }
0x11ca   : > { %6782 = vmatpush3.msra.mxu1 %v6015_v8 }
0x11cb   : > { %6783 = vmatprep.subr.mxu1 %v6014_v6 }
0x11cc   : > { %6784 = vmatpush3.msra.mxu1 %v6014_v6 }
0x11cd   : > { %3766 = vmatprep.subr.mxu1 %v6039_v45  ;;  %v6080_v45 = vld [vmem:[%s9012_s18 + $0x158] sm:$0xff] }
0x1281   : > { %v6765_v20 = vpop.f32.mrf.mxu1 }
0x1282   : > { %v3368_v40 = vmul.f32 0.20412415, %v6765_v20  ;;  %v6048_v20 = vld [vmem:[%s9010_s16 + $0xc0] sm:$0xff] }
0x1283   : > { %v3358_v42 = vpop.f32.mrf.mxu1 }
0x1284   : > { %v3367_v63 = vmul.f32 0.20412415, %v3358_v42  ;;  %v3372_v44 = vsel %vm1328_vm8, %v3368_v40, -inf  ;;  %v6047_v42 = vld [vmem:[%s9010_s16 + $0xb8] sm:$0xff] }
0x1285   : > { %3373 = vmax.xlane.f32.xlu1 %v3372_v44  ;;  %v6046_v44 = vld [vmem:[%s9010_s16 + $0xb0] sm:$0xff] }
0x1286   : > { %v3369_v46 = vsel %vm1324_vm9, %v3367_v63, -inf }
0x1287   : > { %3370 = vmax.xlane.f32.xlu0 %v3369_v46  ;;  %v6036_v46 = vld [vmem:[%s9009_s15 + $0xa0] sm:$0xff] }
0x130e   : > { %v3374_v47 = vpop.xlane.xlu1 %3373 }
0x130f   : > { %v3376_v48 = vsub.f32 %v3368_v40, %v3374_v47  ;;  %v6038_v40 = vld [vmem:[%s9009_s15 + $0xb0] sm:$0xff]  ;;  %v6045_v47 = vld [vmem:[%s9010_s16 + $0xa8] sm:$0xff] }
0x1310   : > { %v3371_v51 = vpop.xlane.xlu0 %3370 }
0x1311   : > { %v3379_v61 = vmul.f32 1.442695, %v3376_v48  ;;  %v3375_v52 = vsub.f32 %v3367_v63, %v3371_v51  ;;  %v6037_v63 = vld [vmem:[%s9009_s15 + $0xa8] sm:$0xff]  ;;  %v6035_v48 = vld [vmem:[%s9009_s15 + $0x98] sm:$0xff]  ;;  %v6044_v51 = vld [vmem:[%s9010_s16 + $0xa0] sm:$0xff] }
0x1313   : > { %7030 = vpow2.f32 %v3379_v61  ;;  %v3377_v53 = vmul.f32 1.442695, %v3375_v52  ;;  %v6034_v61 = vld [vmem:[%s9009_s15 + $0x90] sm:$0xff]  ;;  %v6043_v52 = vld [vmem:[%s9010_s16 + $0x98] sm:$0xff] }
0x1315   : > { %7032 = vpow2.f32 %v3377_v53  ;;  %v6033_v53 = vld [vmem:[%s9009_s15 + $0x88] sm:$0xff] }
0x1320   : > { %v7031_v55 = vpop.eup %7030 }
0x1321   : > { %v3384_v41 = vsel %vm1328_vm8, %v7031_v55, 0.0 }
0x1322   : > { %v7033_v56 = vpop.eup %7032  ;;  %3385 = vadd.xlane.f32.xlu1 %v3384_v41  ;;  %v6032_v41 = vld [vmem:[%s9009_s15 + $0x80] sm:$0xff] }
0x1323   : > { %v3381_v57 = vsel %vm1324_vm9, %v7033_v56, 0.0 }
0x1324   : > { %3382 = vadd.xlane.f32.xlu0 %v3381_v57  ;;  %v6031_v57 = vld [vmem:[%s9009_s15 + $0x78] sm:$0xff] }
0x13ab   : > { %v3386_v58 = vpop.xlane.xlu1 %3385 }
0x13ac   : > { %7034 = vrcp.f32 %v3386_v58  ;;  %v6040_v58 = vld [vmem:[%s9010_s16 + $0x80] sm:$0xff] }
0x13ad   : > { %v3383_v59 = vpop.xlane.xlu0 %3382 }
0x13ae   : > { %7036 = vrcp.f32 %v3383_v59  ;;  %v6030_v59 = vld [vmem:[%s9009_s15 + $0x70] sm:$0xff] }
0x13b9   : > { %v7035_v60 = vpop.eup %7034 }
0x13ba   : > { %v3390_v3 = vmul.f32 %v7035_v60, %v7031_v55  ;;  %v6042_v55 = vld [vmem:[%s9010_s16 + $0x90] sm:$0xff]  ;;  %v6029_v60 = vld [vmem:[%s9009_s15 + $0x68] sm:$0xff] }
0x13bb   : > { %v7037_v62 = vpop.eup %7036 }
0x13bc   : > { %v3389_v0 = vmul.f32 %v7037_v62, %v7033_v56  ;;  %v6041_v56 = vld [vmem:[%s9010_s16 + $0x88] sm:$0xff]  ;;  %v6028_v62 = vld [vmem:[%s9009_s15 + $0x60] sm:$0xff] }
0x13be   : > { %6770 = vmatprep.mubr.msk.f32.mxu0 %vm1324_vm9, %v3389_v0  ;;  %v7098_v0 = vld [vmem:[%s7749_s27] sm:$0xff] }
0x13bf   : > { %6771 = vmatmul.mubr.msk.f32.vlgmr.msra.gmra.mxu0 %vm1324_vm9, %v3390_v3  ;;  %v7099_v3 = vld [vmem:[%s7749_s27 + $0x8] sm:$0x3] }
0x13c0   : > { %3727 = vmatprep.mubr.f32.mxu0 %v7164_v1  ;;  %3680 = vmatpush1.msra.mxu0 %v6054_v54  ;;  %v6062_v54 = vld [vmem:[%s9012_s18 + $0xc8] sm:$0xff] }
0x13c1   : > { %3681 = vmatprep.subr.mxu0 %v6053_v31  ;;  %v6061_v31 = vld [vmem:[%s9012_s18 + $0xc0] sm:$0xff] }
0x13c2   : > { %3682 = vmatpush1.msra.mxu0 %v6052_v32  ;;  %v6084_v32 = vld [vmem:[%s9012_s18 + $0x178] sm:$0xff] }
0x13c3   : > { %3683 = vmatprep.subr.mxu0 %v6051_v50  ;;  %v6083_v50 = vld [vmem:[%s9012_s18 + $0x170] sm:$0xff] }
0x13c4   : > { %3684 = vmatpush1.msra.mxu0 %v6050_v35  ;;  %v6082_v35 = vld [vmem:[%s9012_s18 + $0x168] sm:$0xff] }
0x13c5   : > { %3685 = vmatprep.subr.mxu0 %v6049_v36  ;;  %v6081_v36 = vld [vmem:[%s9012_s18 + $0x160] sm:$0xff] }
0x13c6   : > { %3686 = vmatpush1.msra.mxu0 %v6048_v20  ;;  %v6079_v20 = vld [vmem:[%s9012_s18 + $0x150] sm:$0xff] }
0x13c7   : > { %3687 = vmatprep.subr.mxu0 %v6047_v42  ;;  %v6077_v42 = vld [vmem:[%s9012_s18 + $0x140] sm:$0xff] }
0x13c8   : > { %3688 = vmatpush1.msra.mxu0 %v6046_v44  ;;  %v6060_v44 = vld [vmem:[%s9011_s17 + $0x2] sm:$0x3] }
0x13c9   : > { %3689 = vmatprep.subr.mxu0 %v6045_v47  ;;  %v3829_v47 = vrot.slane %v6060_v44, %v7869_v23 }
0x13ca   : > { %3690 = vmatpush1.msra.mxu0 %v6044_v51 }
0x13cb   : > { %3691 = vmatprep.subr.mxu0 %v6043_v52 }
0x13cc   : > { %3692 = vmatpush1.msra.mxu0 %v6042_v55 }
0x13cd   : > { %3693 = vmatprep.subr.mxu0 %v6041_v56 }
0x13ce   : > { %3694 = vmatpush1.msra.mxu0 %v6040_v58 }
0x13cf   : > { %6056 = vmatmul.mubr.msk.f32.vlgmr.msra.gmra.mxu0 %vm752_vm2, %v7098_v0  ;;  %3979 = vmatprep.subr.mxu0 %v7164_v1 }
0x13d0   : > { %3733 = vmatprep.mubr.f32.mxu0 %v7164_v1 }
0x13d3   : > { %6057 = vmatmul.mubr.msk.f32.gmra.mxu0 %vm752_vm2, %v7099_v3 }
0x147f   : > { %v6772_v25 = vpop.f32.mrf.mxu0 }
0x1480   : > { %3479 = vrot.lane.b32.xlu1 %v6772_v25, %s9056_s23 }
0x1481   : > { %v3466_v10 = vpop.f32.mrf.mxu0 }
0x1482   : > { %3477 = vrot.lane.b32.xlu0 %v3466_v10, %s9056_s23 }
0x14f2   : > { %v3480_v11 = vpop.permute.xlu1 %3479 }
0x14f3   : > { %3484 = vst.msk [vmem:[#allocation3 + $0x8] sm:$0x3] %vm1911_vm11, %v3480_v11 }
0x14f4   : > { %v3478_v12 = vpop.permute.xlu0 %3477 }
0x14f5   : > { %3483 = vst.msk [vmem:[#allocation3] sm:$0xff] %vm1909_vm12, %v3478_v12 }
0x14fa   : > { %v3486_v9 = vld [vmem:[#allocation3 + $0x8] sm:$0x3] }
0x14fc   : > { %v3485_v14 = vld [vmem:[#allocation3] sm:$0xff] }
0x14fd   : > { %6785 = vmatprep.mubr.msk.f32.mxu1 %vm826_vm3, %v3485_v14  ;;  %v6026_v14 = vld [vmem:[%s9007_s13 + $0x1] ss:$0 sm:$0xff] }
0x14fe   : > { %6786 = vmatmul.mubr.msk.f32.vlgmr.msra.gmra.mxu1 %vm826_vm3, %v3486_v9 }
0x14ff   : > { %3810 = vmatprep.mubr.f32.mxu1 %v7164_v1  ;;  %3767 = vmatpush1.msra.mxu1 %v6038_v40  ;;  %v6078_v40 = vld [vmem:[%s9012_s18 + $0x148] sm:$0xff] }
0x1500   : > { %3768 = vmatprep.subr.mxu1 %v6037_v63  ;;  %v3729_v63 = vpop.f32.mrf.mxu0 }
0x1501   : > { %3769 = vmatpush1.msra.mxu1 %v6036_v46 }
0x1502   : > { %3770 = vmatprep.subr.mxu1 %v6035_v48  ;;  %v3731_v46 = vpop.f32.mrf.mxu0 }
0x1503   : > { %3771 = vmatpush1.msra.mxu1 %v6034_v61  ;;  %v3833_v61 = vrot.slane %v6060_v44, %v7874_v27 }
0x1504   : > { %3772 = vmatprep.subr.mxu1 %v6033_v53  ;;  %v3735_v55 = vpop.f32.mrf.mxu0 }
0x1505   : > { %3773 = vmatpush1.msra.mxu1 %v6032_v41 }
0x1506   : > { %3774 = vmatprep.subr.mxu1 %v6031_v57  ;;  %v3737_v3 = vpop.f32.mrf.mxu0 }
0x1507   : > { %3775 = vmatpush1.msra.mxu1 %v6030_v59 }
0x1508   : > { %3776 = vmatprep.subr.mxu1 %v6029_v60 }
0x1509   : > { %3777 = vmatpush1.msra.mxu1 %v6028_v62 }
0x15be   : > { %v6787_v15 = vpop.f32.mrf.mxu1 }
0x15bf   : > { %v3576_v4 = vadd.f32 %v6787_v15, %v7921_v37  ;;  %v6027_v15 = vld [vmem:[%s9008_s14 + $0x1] ss:$0 sm:$0xff] }
0x15c0   : > { %v3566_v13 = vpop.f32.mrf.mxu1 }
0x15c1   : > { %v8159_v18 = vadd.f32 %v6023_v16, %v3576_v4  ;;  %v3575_v38 = vadd.f32 %v3566_v13, %v7916_v33 }
0x15c3   : > { %v8162_v21 = vadd.f32 %v6023_v16, %v3575_v38  ;;  %v3594_v19 = vsel %vm919_vm5, %v8159_v18, 0.0  ;;  %v6076_v38 = vld [vmem:[%s9012_s18 + $0x138] sm:$0xff] }
0x15c4   : > { %3595 = vadd.xlane.f32.xlu0 %v3594_v19  ;;  %3980 = vmatpush1.msra.mxu0 %v6076_v38  ;;  %v6075_v19 = vld [vmem:[%s9012_s18 + $0x130] sm:$0xff] }
0x15c5   : > { %v3591_v22 = vsel %vm826_vm3, %v8162_v21, 0.0  ;;  %3981 = vmatprep.subr.mxu0 %v7164_v1 }
0x15c6   : > { %3592 = vadd.xlane.f32.xlu1 %v3591_v22  ;;  %3982 = vmatpush1.msra.mxu0 %v6075_v19  ;;  %v6074_v22 = vld [vmem:[%s9012_s18 + $0x128] sm:$0xff] }
0x15c7   : > { %3983 = vmatprep.subr.mxu0 %v7164_v1 }
0x15c8   : > { %3984 = vmatpush1.msra.mxu0 %v6074_v22 }
0x15c9   : > { %3985 = vmatprep.subr.mxu0 %v7164_v1 }
0x164d   : > { %v3596_v24 = vpop.xlane.xlu0 %3595 }
0x164e   : > { %v3598_v43 = vmul.f32 0.020833334, %v3596_v24  ;;  %v6073_v24 = vld [vmem:[%s9012_s18 + $0x120] sm:$0xff] }
0x164f   : > { %v3593_v28 = vpop.xlane.xlu1 %3592  ;;  %3986 = vmatpush1.msra.mxu0 %v6073_v24 }
0x1650   : > { %v8169_v37 = vsub.f32 %v8159_v18, %v3598_v43  ;;  %v3597_v29 = vmul.f32 0.020833334, %v3593_v28  ;;  %3987 = vmatprep.subr.mxu0 %v7164_v1  ;;  %v6072_v43 = vld [vmem:[%s9012_s18 + $0x118] sm:$0xff]  ;;  %v6071_v28 = vld [vmem:[%s9012_s18 + $0x110] sm:$0xff] }
0x1651   : > { %3988 = vmatpush1.msra.mxu0 %v6072_v43 }
0x1652   : > { %v8172_v39 = vsub.f32 %v8162_v21, %v3597_v29  ;;  %v3602_v33 = vmul.f32 %v8169_v37, %v8169_v37  ;;  %3989 = vmatprep.subr.mxu0 %v7164_v1  ;;  %v6069_v29 = vld [vmem:[%s9012_s18 + $0x100] sm:$0xff] }
0x1653   : > { %3990 = vmatpush1.msra.mxu0 %v6071_v28 }
0x1654   : > { %v3606_v49 = vsel %vm919_vm5, %v3602_v33, 0.0  ;;  %v3601_v30 = vmul.f32 %v8172_v39, %v8172_v39  ;;  %3991 = vmatprep.subr.mxu0 %v7164_v1  ;;  %v6067_v33 = vld [vmem:[%s9012_s18 + $0xf0] sm:$0xff] }
0x1655   : > { %3607 = vadd.xlane.f32.xlu1 %v3606_v49  ;;  %v6066_v49 = vld [vmem:[%s9012_s18 + $0xe8] sm:$0xff] }
0x1656   : > { %v3603_v17 = vsel %vm826_vm3, %v3601_v30, 0.0  ;;  %v6065_v30 = vld [vmem:[%s9012_s18 + $0xe0] sm:$0xff] }
0x1657   : > { %3604 = vadd.xlane.f32.xlu0 %v3603_v17  ;;  %v6064_v17 = vld [vmem:[%s9012_s18 + $0xd8] sm:$0xff] }
0x16de   : > { %v3608_v5 = vpop.xlane.xlu1 %3607 }
0x16df   : > { %v3610_v7 = vmul.f32 0.020833334, %v3608_v5 }
0x16e0   : > { %v3605_v26 = vpop.xlane.xlu0 %3604 }
0x16e1   : > { %v3612_v2 = vadd.f32 1e-05, %v3610_v7  ;;  %v3609_v8 = vmul.f32 0.020833334, %v3605_v26 }
0x16e3   : > { %7038 = vrsqrt.f32 %v3612_v2  ;;  %v3611_v6 = vadd.f32 1e-05, %v3609_v8 }
0x16e5   : > { %7040 = vrsqrt.f32 %v3611_v6 }
0x16f0   : > { %v7039_v25 = vpop.eup %7038 }
0x16f1   : > { %v3616_v12 = vmul.f32 %v7039_v25, %v8169_v37  ;;  %v6070_v37 = vld [vmem:[%s9012_s18 + $0x108] sm:$0xff] }
0x16f2   : > { %v7041_v10 = vpop.eup %7040  ;;  %3992 = vmatpush1.msra.mxu0 %v6070_v37 }
0x16f3   : > { %v3615_v11 = vmul.f32 %v7041_v10, %v8172_v39  ;;  %v3624_v4 = vmul.f32 %v6026_v14, %v3616_v12  ;;  %3993 = vmatprep.subr.mxu0 %v7164_v1  ;;  %v6068_v39 = vld [vmem:[%s9012_s18 + $0xf8] sm:$0xff] }
0x16f4   : > { %3994 = vmatpush1.msra.mxu0 %v6069_v29 }
0x16f5   : > { %v3623_v9 = vmul.f32 %v6026_v14, %v3615_v11  ;;  %v3632_v13 = vadd.f32 %v6027_v15, %v3624_v4  ;;  %3995 = vmatprep.subr.mxu0 %v7164_v1 }
0x16f6   : > { %3996 = vmatpush1.msra.mxu0 %v6068_v39 }
0x16f7   : > { %v3631_v16 = vadd.f32 %v6027_v15, %v3623_v9  ;;  %3997 = vmatprep.subr.mxu0 %v7164_v1 }
0x16f8   : > { %3998 = vmatpush1.msra.mxu0 %v6067_v33 }
0x16f9   : > { %6058 = vmatmul.mubr.msk.f32.vlgmr.msra.gmra.mxu1 %vm826_vm3, %v3631_v16  ;;  %3999 = vmatprep.subr.mxu0 %v7164_v1 }
0x16fa   : > { %3816 = vmatprep.mubr.f32.mxu1 %v7164_v1  ;;  %4000 = vmatpush1.msra.mxu0 %v6066_v49 }
0x16fb   : > { %4001 = vmatprep.subr.mxu0 %v7164_v1 }
0x16fc   : > { %4002 = vmatpush1.msra.mxu0 %v6065_v30 }
0x16fd   : > { %6059 = vmatmul.mubr.msk.f32.gmra.mxu1 %vm826_vm3, %v3632_v13  ;;  %4003 = vmatprep.subr.mxu0 %v7164_v1 }
0x16fe   : > { %4004 = vmatpush1.msra.mxu0 %v6064_v17 }
0x16ff   : > { %4005 = vmatprep.subr.mxu0 %v7164_v1 }
0x1700   : > { %4006 = vmatpush1.msra.mxu0 %v6063_v34 }
0x1701   : > { %4007 = vmatprep.subr.mxu0 %v7164_v1 }
0x1702   : > { %4008 = vmatpush1.msra.mxu0 %v6062_v54 }
0x1703   : > { %4009 = vmatprep.subr.mxu0 %v7164_v1 }
0x1704   : > { %4010 = vmatpush1.msra.mxu0 %v6061_v31 }
0x1705   : > { %4027 = vmatprep.subr.mxu0 %v7164_v1 }
0x1706   : > { %4028 = vmatpush2.msra.mxu0 %v6084_v32 }
0x1707   : > { %4029 = vmatprep.subr.mxu0 %v7164_v1 }
0x1708   : > { %4030 = vmatpush2.msra.mxu0 %v6083_v50 }
0x1709   : > { %4031 = vmatprep.subr.mxu0 %v7164_v1 }
0x170a   : > { %4032 = vmatpush2.msra.mxu0 %v6082_v35 }
0x170b   : > { %4033 = vmatprep.subr.mxu0 %v7164_v1 }
0x170c   : > { %4034 = vmatpush2.msra.mxu0 %v6081_v36 }
0x170d   : > { %4035 = vmatprep.subr.mxu0 %v7164_v1 }
0x170e   : > { %4036 = vmatpush2.msra.mxu0 %v6080_v45 }
0x170f   : > { %4037 = vmatprep.subr.mxu0 %v7164_v1 }
0x1710   : > { %4038 = vmatpush2.msra.mxu0 %v6079_v20 }
0x1711   : > { %4039 = vmatprep.subr.mxu0 %v7164_v1 }
0x1712   : > { %4040 = vmatpush2.msra.mxu0 %v6078_v40 }
0x1713   : > { %4041 = vmatprep.subr.mxu0 %v7164_v1 }
0x1714   : > { %4042 = vmatpush2.msra.mxu0 %v6077_v42 }
0x17b9   : > { %v3812_v48 = vpop.f32.mrf.mxu1 }
0x17ba   : > { %v3813_v51 = vadd.f32 %v3812_v48, %v3729_v63 }
0x17bb   : > { %v3814_v52 = vpop.f32.mrf.mxu1 }
0x17bc   : > { %v8381_v53 = vadd.f32 %v3829_v47, %v3813_v51  ;;  %v3815_v41 = vadd.f32 %v3814_v52, %v3731_v46 }
0x17bd   : > { %v3818_v56 = vpop.f32.mrf.mxu1 }
0x17be   : > { %v8384_v57 = vmul.f32 0.70710677, %v8381_v53  ;;  %v8386_v58 = vadd.f32 %v3833_v61, %v3815_v41  ;;  %v3819_v59 = vadd.f32 %v3818_v56, %v3735_v55 }
0x17bf   : > { %v3820_v60 = vpop.f32.mrf.mxu1 }
0x17c0   : > { %v3848_v62 = vand.u32 2147483647, %v8384_v57  ;;  %v8390_v0 = vmul.f32 0.70710677, %v8386_v58  ;;  %v8392_v5 = vadd.f32 %v3829_v47, %v3819_v59  ;;  %v3821_v7 = vadd.f32 %v3820_v60, %v3737_v3 }
0x17c1   : > { %vm3928_vm4 = vcmp.ge.f32.partialorder %v8384_v57, 0.0  ;;  %v3840_v57 = vmul.f32 0.5, %v8381_v53 }
0x17c2   : > { %v3852_v26 = vmul.f32 0.3275911, %v3848_v62  ;;  %v3849_v2 = vand.u32 2147483647, %v8390_v0  ;;  %v8396_v8 = vmul.f32 0.70710677, %v8392_v5  ;;  %v8398_v6 = vadd.f32 %v3833_v61, %v3821_v7 }
0x17c3   : > { %v3904_v38 = vsub.f32 0.0, %v3848_v62  ;;  %vm3929_vm13 = vcmp.ge.f32.partialorder %v8390_v0, 0.0 }
0x17c4   : > { %v3856_v25 = vadd.f32 1.0, %v3852_v26  ;;  %v3853_v10 = vmul.f32 0.3275911, %v3849_v2  ;;  %v3850_v11 = vand.u32 2147483647, %v8396_v8  ;;  %v3905_v19 = vsub.f32 0.0, %v3849_v2 }
0x17c5   : > { %v8402_v12 = vmul.f32 0.70710677, %v8398_v6  ;;  %v3908_v22 = vmul.f32 %v3904_v38, %v3848_v62  ;;  %vm3930_vm14 = vcmp.ge.f32.partialorder %v8396_v8, 0.0 }
0x17c6   : > { %7042 = vrcp.f32 %v3856_v25  ;;  %v3857_v14 = vadd.f32 1.0, %v3853_v10  ;;  %v3854_v9 = vmul.f32 0.3275911, %v3850_v11  ;;  %v3906_v24 = vsub.f32 0.0, %v3850_v11 }
0x17c7   : > { %v3851_v15 = vand.u32 2147483647, %v8402_v12  ;;  %v3909_v28 = vmul.f32 %v3905_v19, %v3849_v2  ;;  %v3912_v29 = vmul.f32 1.442695, %v3908_v22  ;;  %vm3931_vm15 = vcmp.ge.f32.partialorder %v8402_v12, 0.0 }
0x17c8   : > { %7044 = vrcp.f32 %v3857_v14  ;;  %v3858_v16 = vadd.f32 1.0, %v3854_v9  ;;  %v3910_v33 = vmul.f32 %v3906_v24, %v3850_v11  ;;  %v6088_v12 = vld [vmem:[%s9013_s19 + $0x1] ss:$0 sm:$0xff] }
0x17c9   : > { %v3855_v4 = vmul.f32 0.3275911, %v3851_v15  ;;  %v3907_v39 = vsub.f32 0.0, %v3851_v15  ;;  %v3914_v34 = vmul.f32 1.442695, %v3909_v28 }
0x17ca   : > { %7046 = vrcp.f32 %v3858_v16  ;;  %v3916_v35 = vmul.f32 1.442695, %v3910_v33 }
0x17cb   : > { %v3859_v13 = vadd.f32 1.0, %v3855_v4  ;;  %v3911_v32 = vmul.f32 %v3907_v39, %v3851_v15 }
0x17cd   : > { %7048 = vrcp.f32 %v3859_v13  ;;  %v3918_v46 = vmul.f32 1.442695, %v3911_v32 }
0x17ce   : > { %7050 = vpow2.f32 %v3912_v29 }
0x17cf   : > { %7052 = vpow2.f32 %v3914_v34 }
0x17d0   : > { %7054 = vpow2.f32 %v3916_v35 }
0x17d1   : > { %7056 = vpow2.f32 %v3918_v46  ;;  %v3843_v46 = vmul.f32 0.5, %v8398_v6 }
0x17d3   : > { %v7043_v43 = vpop.eup %7042 }
0x17d4   : > { %v3868_v37 = vmul.f32 1.0614054, %v7043_v43 }
0x17d5   : > { %v7045_v49 = vpop.eup %7044 }
0x17d6   : > { %v3872_v30 = vadd.f32 -1.4531521, %v3868_v37  ;;  %v3869_v17 = vmul.f32 1.0614054, %v7045_v49 }
0x17d7   : > { %v7047_v54 = vpop.eup %7046 }
0x17d8   : > { %v3876_v31 = vmul.f32 %v7043_v43, %v3872_v30  ;;  %v3873_v50 = vadd.f32 -1.4531521, %v3869_v17  ;;  %v3870_v36 = vmul.f32 1.0614054, %v7047_v54 }
0x17da   : > { %v3880_v45 = vadd.f32 1.4214138, %v3876_v31  ;;  %v7049_v20 = vpop.eup %7048  ;;  %v3877_v40 = vmul.f32 %v7045_v49, %v3873_v50  ;;  %v3874_v42 = vadd.f32 -1.4531521, %v3870_v36 }
0x17db   : > { %v3871_v44 = vmul.f32 1.0614054, %v7049_v20  ;;  %v7051_v10 = vpop.eup %7050 }
0x17dc   : > { %v3884_v63 = vmul.f32 %v7043_v43, %v3880_v45  ;;  %v3881_v47 = vadd.f32 1.4214138, %v3877_v40  ;;  %v3878_v48 = vmul.f32 %v7047_v54, %v3874_v42  ;;  %v7053_v13 = vpop.eup %7052 }
0x17dd   : > { %v3875_v61 = vadd.f32 -1.4531521, %v3871_v44  ;;  %v7055_v28 = vpop.eup %7054 }
0x17de   : > { %v3888_v51 = vadd.f32 -0.28449672, %v3884_v63  ;;  %v3885_v52 = vmul.f32 %v7045_v49, %v3881_v47  ;;  %v3882_v55 = vadd.f32 1.4214138, %v3878_v48  ;;  %v7057_v17 = vpop.eup %7056 }
0x17df   : > { %v3879_v56 = vmul.f32 %v7049_v20, %v3875_v61 }
0x17e0   : > { %v3892_v41 = vmul.f32 %v7043_v43, %v3888_v51  ;;  %v3889_v59 = vadd.f32 -0.28449672, %v3885_v52  ;;  %v3886_v60 = vmul.f32 %v7047_v54, %v3882_v55 }
0x17e1   : > { %v3883_v3 = vadd.f32 1.4214138, %v3879_v56 }
0x17e2   : > { %v3896_v62 = vadd.f32 0.2548296, %v3892_v41  ;;  %v3893_v7 = vmul.f32 %v7045_v49, %v3889_v59  ;;  %v3890_v26 = vadd.f32 -0.28449672, %v3886_v60 }
0x17e3   : > { %v3887_v25 = vmul.f32 %v7049_v20, %v3883_v3 }
0x17e4   : > { %v3900_v2 = vmul.f32 %v7043_v43, %v3896_v62  ;;  %v3897_v11 = vadd.f32 0.2548296, %v3893_v7  ;;  %v3894_v14 = vmul.f32 %v7047_v54, %v3890_v26 }
0x17e5   : > { %v3891_v15 = vadd.f32 -0.28449672, %v3887_v25 }
0x17e6   : > { %v3920_v9 = vmul.f32 %v7051_v10, %v3900_v2  ;;  %v3901_v16 = vmul.f32 %v7045_v49, %v3897_v11  ;;  %v3898_v4 = vadd.f32 0.2548296, %v3894_v14  ;;  %v6098_v11 = vld [vmem:[%s9003_s9 + $0x268] sm:$0xff]  ;;  %v6135_v14 = vld [vmem:[%s9003_s9 + $0x298] sm:$0xff] }
0x17e7   : > { %v3895_v19 = vmul.f32 %v7049_v20, %v3891_v15  ;;  %6788 = vmatprep.subr.mxu1 %v6098_v11  ;;  %6847 = vmatprep.subr.mxu0 %v6135_v14  ;;  %v6134_v15 = vld [vmem:[%s9003_s9 + $0x290] sm:$0xff] }
0x17e8   : > { %v3924_v38 = vsub.f32 1.0, %v3920_v9  ;;  %v3921_v22 = vmul.f32 %v7053_v13, %v3901_v16  ;;  %v3902_v24 = vmul.f32 %v7047_v54, %v3898_v4  ;;  %v3841_v54 = vmul.f32 0.5, %v8386_v58  ;;  %6789 = vmatpush3.msra.mxu1 %v6098_v11  ;;  %v6097_v9 = vld [vmem:[%s9003_s9 + $0x260] sm:$0xff]  ;;  %v6096_v16 = vld [vmem:[%s9003_s9 + $0x258] sm:$0xff]  ;;  %v6133_v4 = vld [vmem:[%s9003_s9 + $0x288] sm:$0xff] }
0x17e9   : > { %v3899_v29 = vadd.f32 0.2548296, %v3895_v19  ;;  %v3842_v58 = vmul.f32 0.5, %v8392_v5  ;;  %6790 = vmatprep.subr.mxu1 %v6097_v9  ;;  %v6095_v13 = vld [vmem:[%s9003_s9 + $0x250] sm:$0xff]  ;;  %v6094_v19 = vld [vmem:[%s9003_s9 + $0x248] sm:$0xff] }
0x17ea   : > { %v3932_v37 = vsub.f32 0.0, %v3924_v38  ;;  %v3925_v39 = vsub.f32 1.0, %v3921_v22  ;;  %v3922_v43 = vmul.f32 %v7055_v28, %v3902_v24  ;;  %6791 = vmatpush3.msra.mxu1 %v6097_v9  ;;  %v6131_v22 = vld [vmem:[%s9003_s9 + $0x278] sm:$0xff]  ;;  %v6093_v24 = vld [vmem:[%s9003_s9 + $0x240] sm:$0xff]  ;;  %v6130_v28 = vld [vmem:[%s9003_s9 + $0x270] sm:$0xff] }
0x17eb   : > { %v3903_v30 = vmul.f32 %v7049_v20, %v3899_v29  ;;  %6792 = vmatprep.subr.mxu1 %v6096_v16  ;;  %v6155_v29 = vld [vmem:[%s9003_s9 + $0x358] sm:$0xff] }
0x17ec   : > { %v3936_v33 = vsel %vm3928_vm4, %v3924_v38, %v3932_v37  ;;  %v3933_v34 = vsub.f32 0.0, %v3925_v39  ;;  %v3926_v31 = vsub.f32 1.0, %v3922_v43  ;;  %6793 = vmatpush3.msra.mxu1 %v6096_v16  ;;  %v6132_v38 = vld [vmem:[%s9003_s9 + $0x280] sm:$0xff]  ;;  %v6108_v37 = vld [vmem:[%s9003_s9 + $0x2c8] sm:$0xff] }
0x17ed   : > { %v3923_v49 = vmul.f32 %v7057_v17, %v3903_v30  ;;  %v3940_v32 = vadd.f32 1.0, %v3936_v33  ;;  %6794 = vmatprep.subr.mxu1 %v6095_v13 }
0x17ee   : > { %v3937_v50 = vsel %vm3929_vm13, %v3925_v39, %v3933_v34  ;;  %v3934_v35 = vsub.f32 0.0, %v3926_v31  ;;  %6795 = vmatpush3.msra.mxu1 %v6095_v13  ;;  %v6120_v13 = vld [vmem:[%s9004_s10 + $0x10] ss:$0 sm:$0xff] }
0x17ef   : > { %v3941_v36 = vadd.f32 1.0, %v3937_v50  ;;  %v3927_v45 = vsub.f32 1.0, %v3923_v49  ;;  %v3944_v63 = vmul.f32 %v3940_v32, %v3840_v57  ;;  %6796 = vmatprep.subr.mxu1 %v6094_v19  ;;  %v6091_v49 = vld [vmem:[%s9054_s7 + $0x2] ss:$0 sm:$0xff]  ;;  %s7102_s7 = scalar_lea.vmem %s5748_s1, 64 }
0x17f0   : > { %v3938_v40 = vsel %vm3930_vm14, %v3926_v31, %v3934_v35  ;;  %6797 = vmatpush3.msra.mxu1 %v6094_v19  ;;  %v6092_v50 = vld [vmem:[%s9002_s8 + $0x2] ss:$0 sm:$0xff]  ;;  %p7103_p11 = scmp.ne.s32.totalorder %s5748_s1, %s7102_s7 }
0x17f1   : > { %v3945_v42 = vmul.f32 %v3941_v36, %v3841_v54  ;;  %v3935_v20 = vsub.f32 0.0, %v3927_v45  ;;  %v3942_v0 = vadd.f32 1.0, %v3938_v40  ;;  %6798 = vmatprep.subr.mxu1 %v6093_v24 }
0x17f2   : > { %6799 = vmatpush3.msra.mxu1 %v6093_v24  ;;  %p7104_p12 = pnand %p7103_p11, %p7321_p5 }
0x17f3   : > { %v3939_v44 = vsel %vm3931_vm15, %v3927_v45, %v3935_v20  ;;  %6085 = vmatprep.mubr.msk.f32.mxu0 %vm752_vm2, %v3945_v42  ;;  %v3946_v48 = vmul.f32 %v3942_v0, %v3842_v58  ;;  %6803 = vmatprep.subr.mxu1 %v6108_v37  ;;  %v6107_v42 = vld [vmem:[%s9003_s9 + $0x2c0] sm:$0xff]  ;;  %v6154_v20 = vld [vmem:[%s9003_s9 + $0x350] sm:$0xff]  ;;  %v6151_v58 = vld [vmem:[%s9003_s9 + $0x338] sm:$0xff] }
0x17f4   : > { %v3943_v47 = vadd.f32 1.0, %v3939_v44  ;;  %4044 = vmatmul.mubr.f32.vlgmr.msra.gmra.mxu0 %v3944_v63  ;;  %v6106_v63 = vld [vmem:[%s9003_s9 + $0x2b8] sm:$0xff]  ;;  %v6153_v44 = vld [vmem:[%s9003_s9 + $0x348] sm:$0xff]  ;;  %v6105_v0 = vld [vmem:[%s9003_s9 + $0x2b0] sm:$0xff]  ;;  %p7105_p13 = pneg %p7104_p12 }
0x17f5   : > { %6848 = vmatpush3.msra.mxu0 %v6135_v14 }
0x17f6   : > { %v3947_v8 = vmul.f32 %v3943_v47, %v3843_v46  ;;  %6849 = vmatprep.subr.mxu0 %v6134_v15  ;;  %v6152_v46 = vld [vmem:[%s9003_s9 + $0x340] sm:$0xff]  ;;  %v6104_v47 = vld [vmem:[%s9003_s9 + $0x2a8] sm:$0xff] }
0x17f7   : > { %6850 = vmatpush3.msra.mxu0 %v6134_v15 }
0x17f8   : > { %6086 = vmatprep.mubr.msk.f32.mxu0 %vm752_vm2, %v3947_v8  ;;  %6851 = vmatprep.subr.mxu0 %v6133_v4  ;;  %v6103_v8 = vld [vmem:[%s9003_s9 + $0x2a0] sm:$0xff] }
0x17f9   : > { %4049 = vmatmul.mubr.f32.gmra.mxu0 %v3946_v48  ;;  %v6150_v48 = vld [vmem:[%s9003_s9 + $0x330] sm:$0xff] }
0x17fa   : > { %6852 = vmatpush3.msra.mxu0 %v6133_v4 }
0x17fb   : > { %6853 = vmatprep.subr.mxu0 %v6132_v38 }
0x17fc   : > { %6854 = vmatpush3.msra.mxu0 %v6132_v38 }
0x17fd   : > { %6855 = vmatprep.subr.mxu0 %v6131_v22 }
0x17fe   : > { %6856 = vmatpush3.msra.mxu0 %v6131_v22 }
0x17ff   : > { %6857 = vmatprep.subr.mxu0 %v6130_v28 }
0x1800   : > { %6858 = vmatpush3.msra.mxu0 %v6130_v28 }
0x1801   : > { %6877 = vmatprep.subr.mxu0 %v6155_v29 }
0x18b4   : > { %v4045_v53 = vpop.f32.mrf.mxu0 }
0x18b5   : > { %v4054_v51 = vadd.f32 %v4045_v53, %v8162_v21  ;;  %v6118_v53 = vld [vmem:[%s9003_s9 + $0x328] sm:$0xff] }
0x18b6   : > { %v4047_v61 = vpop.f32.mrf.mxu0 }
0x18b7   : > { %v8419_v52 = vadd.f32 %v6088_v12, %v4054_v51  ;;  %v6116_v51 = vld [vmem:[%s9003_s9 + $0x318] sm:$0xff]  ;;  %v6115_v61 = vld [vmem:[%s9003_s9 + $0x310] sm:$0xff] }
0x18b9   : > { %v4050_v6 = vpop.f32.mrf.mxu0  ;;  %v4070_v55 = vsel %vm826_vm3, %v8419_v52, 0.0 }
0x18ba   : > { %v4055_v5 = vadd.f32 %v4050_v6, %v8159_v18  ;;  %4071 = vadd.xlane.f32.xlu0 %v4070_v55  ;;  %v6114_v6 = vld [vmem:[%s9003_s9 + $0x308] sm:$0xff]  ;;  %v6113_v55 = vld [vmem:[%s9003_s9 + $0x300] sm:$0xff] }
0x18bb   : > { %v4052_v41 = vpop.f32.mrf.mxu0 }
0x18bc   : > { %v8424_v56 = vadd.f32 %v6088_v12, %v4055_v5  ;;  %v6117_v12 = vld [vmem:[%s9003_s9 + $0x320] sm:$0xff]  ;;  %v8555_v5 = vld [vmem:[%s9004_s10 + $0xd] ss:$0 sm:$0xff] }
0x18be   : > { %v4073_v59 = vsel %vm919_vm5, %v8424_v56, 0.0 }
0x18bf   : > { %4074 = vadd.xlane.f32.xlu1 %v4073_v59 }
0x1943   : > { %v4072_v60 = vpop.xlane.xlu0 %4071 }
0x1944   : > { %v4076_v62 = vmul.f32 0.020833334, %v4072_v60 }
0x1946   : > { %v4078_v21 = vsub.f32 %v8419_v52, %v4076_v62  ;;  %v6100_v62 = vld [vmem:[%s9004_s10 + $0xc] ss:$0 sm:$0xff] }
0x1948   : > { %v4075_v3 = vpop.xlane.xlu1 %4074  ;;  %v4080_v7 = vmul.f32 %v4078_v21, %v4078_v21 }
0x1949   : > { %v4077_v26 = vmul.f32 0.020833334, %v4075_v3 }
0x194a   : > { %v4082_v2 = vsel %vm826_vm3, %v4080_v7, 0.0  ;;  %v6110_v7 = vld [vmem:[%s9004_s10 + $0xe] ss:$0 sm:$0xff] }
0x194b   : > { %v4079_v25 = vsub.f32 %v8424_v56, %v4077_v26  ;;  %4083 = vadd.xlane.f32.xlu0 %v4082_v2  ;;  %v6157_v2 = vld [vmem:[%s9004_s10 + $0x11] ss:$0 sm:$0xff] }
0x194d   : > { %v4081_v18 = vmul.f32 %v4079_v25, %v4079_v25 }
0x194f   : > { %v4085_v10 = vsel %vm919_vm5, %v4081_v18, 0.0 }
0x1950   : > { %4086 = vadd.xlane.f32.xlu1 %v4085_v10 }
0x19d4   : > { %v4084_v39 = vpop.xlane.xlu0 %4083 }
0x19d5   : > { %v4088_v43 = vmul.f32 0.020833334, %v4084_v39 }
0x19d7   : > { %v4090_v33 = vadd.f32 1e-05, %v4088_v43 }
0x19d9   : > { %7058 = vrsqrt.f32 %v4090_v33  ;;  %v4087_v30 = vpop.xlane.xlu1 %4086 }
0x19da   : > { %v4089_v17 = vmul.f32 0.020833334, %v4087_v30 }
0x19dc   : > { %v4091_v34 = vadd.f32 1e-05, %v4089_v17 }
0x19de   : > { %7060 = vrsqrt.f32 %v4091_v34 }
0x19e6   : > { %v7059_v31 = vpop.eup %7058 }
0x19e7   : > { %v4094_v32 = vmul.f32 %v7059_v31, %v4078_v21 }
0x19e9   : > { %v4102_v35 = vmul.f32 %v6091_v49, %v4094_v32 }
0x19eb   : > { %v7061_v54 = vpop.eup %7060  ;;  %v8480_v36 = vadd.f32 %v6092_v50, %v4102_v35 }
0x19ec   : > { %v4095_v45 = vmul.f32 %v7061_v54, %v4079_v25 }
0x19ed   : > { %6800 = vmatprep.mubr.msk.f32.mxu1 %vm826_vm3, %v8480_v36  ;;  %6859 = vmatprep.mubr.msk.f32.mxu0 %vm826_vm3, %v8480_v36 }
0x19ee   : > { %v4103_v57 = vmul.f32 %v6091_v49, %v4095_v45 }
0x19f0   : > { %v8486_v40 = vadd.f32 %v6092_v50, %v4103_v57  ;;  %v6145_v57 = vld [vmem:[%s9003_s9 + $0x2f8] sm:$0xff] }
0x19f2   : > { %6801 = vmatmul.mubr.msk.f32.vlgmr.msra.gmra.mxu1 %vm826_vm3, %v8486_v40  ;;  %6860 = vmatmul.mubr.msk.f32.vlgmr.msra.gmra.mxu0 %vm826_vm3, %v8486_v40 }
0x19f3   : > { %6804 = vmatpush3.msra.mxu1 %v6108_v37  ;;  %6878 = vmatpush3.msra.mxu0 %v6155_v29 }
0x19f4   : > { %6805 = vmatprep.subr.mxu1 %v6107_v42  ;;  %6815 = vmatprep.mubr.msk.f32.mxu1 %vm826_vm3, %v8480_v36 }
0x19f5   : > { %6879 = vmatprep.subr.mxu0 %v6154_v20  ;;  %6889 = vmatprep.mubr.msk.f32.mxu0 %vm826_vm3, %v8480_v36 }
0x19f6   : > { %6806 = vmatpush3.msra.mxu1 %v6107_v42  ;;  %6880 = vmatpush3.msra.mxu0 %v6154_v20 }
0x19f7   : > { %6807 = vmatprep.subr.mxu1 %v6106_v63  ;;  %6881 = vmatprep.subr.mxu0 %v6153_v44 }
0x19f8   : > { %6808 = vmatpush3.msra.mxu1 %v6106_v63  ;;  %6882 = vmatpush3.msra.mxu0 %v6153_v44 }
0x19f9   : > { %6809 = vmatprep.subr.mxu1 %v6105_v0  ;;  %6883 = vmatprep.subr.mxu0 %v6152_v46 }
0x19fa   : > { %6810 = vmatpush3.msra.mxu1 %v6105_v0  ;;  %6884 = vmatpush3.msra.mxu0 %v6152_v46 }
0x19fb   : > { %6811 = vmatprep.subr.mxu1 %v6104_v47  ;;  %6885 = vmatprep.subr.mxu0 %v6151_v58 }
0x19fc   : > { %6812 = vmatpush3.msra.mxu1 %v6104_v47  ;;  %6886 = vmatpush3.msra.mxu0 %v6151_v58  ;;  %v6144_v47 = vld [vmem:[%s9003_s9 + $0x2f0] sm:$0xff]  ;;  %v6143_v58 = vld [vmem:[%s9003_s9 + $0x2e8] sm:$0xff] }
0x19fd   : > { %6813 = vmatprep.subr.mxu1 %v6103_v8  ;;  %6887 = vmatprep.subr.mxu0 %v6150_v48 }
0x19fe   : > { %6814 = vmatpush3.msra.mxu1 %v6103_v8  ;;  %6888 = vmatpush3.msra.mxu0 %v6150_v48  ;;  %v6142_v8 = vld [vmem:[%s9003_s9 + $0x2e0] sm:$0xff]  ;;  %v6141_v48 = vld [vmem:[%s9003_s9 + $0x2d8] sm:$0xff] }
0x19ff   : > { %6816 = vmatmul.mubr.msk.f32.vlgmr.msra.gmra.mxu1 %vm826_vm3, %v8486_v40  ;;  %6818 = vmatprep.subr.mxu1 %v6118_v53 }
0x1a00   : > { %6890 = vmatmul.mubr.msk.f32.vlgmr.msra.gmra.mxu0 %vm826_vm3, %v8486_v40  ;;  %6819 = vmatpush3.msra.mxu1 %v6118_v53 }
0x1a01   : > { %6830 = vmatprep.mubr.msk.f32.mxu1 %vm826_vm3, %v8480_v36  ;;  %6820 = vmatprep.subr.mxu1 %v6117_v12 }
0x1a02   : > { %6821 = vmatpush3.msra.mxu1 %v6117_v12 }
0x1a03   : > { %6822 = vmatprep.subr.mxu1 %v6116_v51 }
0x1a04   : > { %6823 = vmatpush3.msra.mxu1 %v6116_v51 }
0x1a05   : > { %6824 = vmatprep.subr.mxu1 %v6115_v61 }
0x1a06   : > { %6825 = vmatpush3.msra.mxu1 %v6115_v61  ;;  %v6147_v61 = vld [vmem:[%s9004_s10 + $0xf] ss:$0 sm:$0xff] }
0x1a07   : > { %6826 = vmatprep.subr.mxu1 %v6114_v6 }
0x1a08   : > { %6827 = vmatpush3.msra.mxu1 %v6114_v6 }
0x1a09   : > { %6828 = vmatprep.subr.mxu1 %v6113_v55 }
0x1a0a   : > { %6829 = vmatpush3.msra.mxu1 %v6113_v55 }
0x1a0b   : > { %6831 = vmatmul.mubr.msk.f32.vlgmr.msra.gmra.mxu1 %vm826_vm3, %v8486_v40 }
0x1ab2   : > { %v6802_v41 = vpop.f32.mrf.mxu1  ;;  %v6861_v59 = vpop.f32.mrf.mxu0 }
0x1ab3   : > { %v8558_v60 = vadd.f32 %v6861_v59, %v8555_v5  ;;  %v4205_v4 = vadd.f32 %v6802_v41, %v6100_v62 }
0x1ab4   : > { %v4199_v21 = vpop.f32.mrf.mxu1  ;;  %v8567_v26 = vpop.f32.mrf.mxu0 }
0x1ab5   : > { %v4200_v3 = vadd.f32 %v6100_v62, %v4199_v21  ;;  %v4667_v53 = vadd.f32 %v8555_v5, %v8567_v26 }
0x1ab7   : > { %6837 = vmatprep.mubr.msk.f32.mxu1 %vm1234_vm6, %v4200_v3 }
0x1abf   : > { %v6817_v25 = vpop.f32.mrf.mxu1 }
0x1ac0   : > { %v4295_v18 = vadd.f32 %v6817_v25, %v6110_v7  ;;  %v6891_v10 = vpop.f32.mrf.mxu0 }
0x1ac1   : > { %v4852_v11 = vadd.f32 %v6891_v10, %v6157_v2  ;;  %v4289_v14 = vpop.f32.mrf.mxu1 }
0x1ac2   : > { %v4290_v9 = vadd.f32 %v6110_v7, %v4289_v14  ;;  %v4846_v15 = vpop.f32.mrf.mxu0  ;;  %6833 = vmatprep.subr.msk.mxu1 %vm1234_vm6, %v4295_v18 }
0x1ac3   : > { %v4847_v16 = vadd.f32 %v6157_v2, %v4846_v15  ;;  %6899 = vmatprep.subr.msk.mxu0 %vm1354_vm7, %v4852_v11  ;;  %6834 = vmatpush3.xpose.msk.msra.mxu1 %vm1234_vm6, %v4295_v18 }
0x1ac4   : > { %6900 = vmatpush3.msk.msra.mxu0 %vm1354_vm7, %v4852_v11  ;;  %6835 = vmatprep.subr.msk.mxu1 %vm1234_vm6, %v4290_v9 }
0x1ac5   : > { %6901 = vmatprep.subr.mxu0 %v4847_v16 }
0x1ac6   : > { %6902 = vmatpush3.msra.mxu0 %v4847_v16 }
0x1ac7   : > { %6836 = vmatpush3.xpose.msk.msra.mxu1 %vm1234_vm6, %v4290_v9 }
0x1aca   : > { %6838 = vmatmul.mubr.msk.f32.vlgmr.msra.gmra.mxu1 %vm1234_vm6, %v4205_v4 }
0x1acb   : > { %v6832_v38 = vpop.f32.mrf.mxu1 }
0x1acc   : > { %v4385_v19 = vadd.f32 %v6832_v38, %v6120_v13 }
0x1acd   : > { %v4379_v22 = vpop.f32.mrf.mxu1 }
0x1ace   : > { %v4380_v24 = vadd.f32 %v6120_v13, %v4379_v22  ;;  %6840 = vmatprep.subr.msk.mxu1 %vm1354_vm7, %v4385_v19 }
0x1acf   : > { %6841 = vmatpush3.msk.msra.mxu1 %vm1354_vm7, %v4385_v19 }
0x1ad0   : > { %6842 = vmatprep.subr.mxu1 %v4380_v24 }
0x1ad1   : > { %6843 = vmatpush3.msra.mxu1 %v4380_v24  ;;  %v6172_v24 = vld [vmem:[%s9005_s11 + $0x88] sm:$0xff] }
0x1ad2   : > { %6862 = vmatprep.subr.mxu1 %v6145_v57 }
0x1b8a   : > { %v6839_v28 = vpop.f32.mrf.mxu1 }
0x1b8b   : > { %v4476_v37 = vmul.f32 0.20412415, %v6839_v28  ;;  %v6171_v28 = vld [vmem:[%s9005_s11 + $0x80] sm:$0xff] }
0x1b8c   : > { %v4466_v29 = vpop.f32.mrf.mxu1 }
0x1b8d   : > { %v4475_v39 = vmul.f32 0.20412415, %v4466_v29  ;;  %v4480_v43 = vsel %vm1328_vm8, %v4476_v37, -inf  ;;  %v6169_v29 = vld [vmem:[%s9005_s11 + $0x70] sm:$0xff] }
0x1b8e   : > { %4481 = vmax.xlane.f32.xlu1 %v4480_v43  ;;  %v6167_v43 = vld [vmem:[%s9005_s11 + $0x60] sm:$0xff] }
0x1b8f   : > { %v4477_v33 = vsel %vm1324_vm9, %v4475_v39, -inf }
0x1b90   : > { %4478 = vmax.xlane.f32.xlu0 %v4477_v33 }
0x1c17   : > { %v4482_v30 = vpop.xlane.xlu1 %4481 }
0x1c18   : > { %v4484_v17 = vsub.f32 %v4476_v37, %v4482_v30  ;;  %v6170_v37 = vld [vmem:[%s9005_s11 + $0x78] sm:$0xff] }
0x1c19   : > { %v4479_v34 = vpop.xlane.xlu0 %4478 }
0x1c1a   : > { %v4487_v31 = vmul.f32 1.442695, %v4484_v17  ;;  %v4483_v49 = vsub.f32 %v4475_v39, %v4479_v34  ;;  %v6168_v39 = vld [vmem:[%s9005_s11 + $0x68] sm:$0xff] }
0x1c1c   : > { %7062 = vpow2.f32 %v4487_v31  ;;  %v4485_v32 = vmul.f32 1.442695, %v4483_v49 }
0x1c1e   : > { %7064 = vpow2.f32 %v4485_v32 }
0x1c29   : > { %v7063_v50 = vpop.eup %7062 }
0x1c2a   : > { %v4492_v35 = vsel %vm1328_vm8, %v7063_v50, 0.0 }
0x1c2b   : > { %v7065_v54 = vpop.eup %7064  ;;  %4493 = vadd.xlane.f32.xlu1 %v4492_v35 }
0x1c2c   : > { %v4489_v45 = vsel %vm1324_vm9, %v7065_v54, 0.0 }
0x1c2d   : > { %4490 = vadd.xlane.f32.xlu0 %v4489_v45 }
0x1cb4   : > { %v4494_v42 = vpop.xlane.xlu1 %4493 }
0x1cb5   : > { %7066 = vrcp.f32 %v4494_v42 }
0x1cb6   : > { %v4491_v20 = vpop.xlane.xlu0 %4490 }
0x1cb7   : > { %7068 = vrcp.f32 %v4491_v20 }
0x1cc2   : > { %v7067_v63 = vpop.eup %7066 }
0x1cc3   : > { %v4498_v46 = vmul.f32 %v7067_v63, %v7063_v50  ;;  %v6176_v50 = vld [vmem:[%s9006_s12 + $0x2] ss:$0 sm:$0xff] }
0x1cc4   : > { %v7069_v44 = vpop.eup %7068 }
0x1cc5   : > { %v4497_v0 = vmul.f32 %v7069_v44, %v7065_v54 }
0x1cc7   : > { %6844 = vmatprep.mubr.msk.f32.mxu1 %vm1324_vm9, %v4497_v0 }
0x1cc8   : > { %6845 = vmatmul.mubr.msk.f32.vlgmr.msra.gmra.mxu1 %vm1324_vm9, %v4498_v46 }
0x1cc9   : > { %6863 = vmatpush3.msra.mxu1 %v6145_v57  ;;  %6874 = vmatprep.mubr.msk.f32.mxu1 %vm826_vm3, %v8480_v36  ;;  %v6140_v36 = vld [vmem:[%s9003_s9 + $0x2d0] sm:$0xff] }
0x1cca   : > { %6864 = vmatprep.subr.mxu1 %v6144_v47 }
0x1ccb   : > { %6865 = vmatpush3.msra.mxu1 %v6144_v47 }
0x1ccc   : > { %6866 = vmatprep.subr.mxu1 %v6143_v58 }
0x1ccd   : > { %6867 = vmatpush3.msra.mxu1 %v6143_v58 }
0x1cce   : > { %6868 = vmatprep.subr.mxu1 %v6142_v8 }
0x1ccf   : > { %6869 = vmatpush3.msra.mxu1 %v6142_v8 }
0x1cd0   : > { %6870 = vmatprep.subr.mxu1 %v6141_v48 }
0x1cd1   : > { %6871 = vmatpush3.msra.mxu1 %v6141_v48 }
0x1cd2   : > { %6872 = vmatprep.subr.mxu1 %v6140_v36 }
0x1cd3   : > { %6873 = vmatpush3.msra.mxu1 %v6140_v36 }
0x1cd4   : > { %6875 = vmatmul.mubr.msk.f32.vlgmr.msra.gmra.mxu1 %vm826_vm3, %v8486_v40 }
0x1cd5   : > { %6896 = vmatprep.mubr.msk.f32.mxu1 %vm1234_vm6, %v4667_v53  ;;  %v6208_v53 = vld [vmem:[%s9010_s16 + $0x178] sm:$0xff] }
0x1cd6   : > { %5254 = vmatprep.subr.mxu0 %v6208_v53  ;;  %v6216_v53 = vld [vmem:[%s9012_s18 + $0x190] sm:$0xff] }
0x1d88   : > { %v6846_v12 = vpop.f32.mrf.mxu1 }
0x1d89   : > { %4584 = vst.msk [vmem:[#allocation3 + $0x8] sm:$0x3] %vm1434_vm10, %v6846_v12  ;;  %v6207_v12 = vld [vmem:[%s9010_s16 + $0x170] sm:$0xff] }
0x1d8a   : > { %v4574_v51 = vpop.f32.mrf.mxu1 }
0x1d8b   : > { %4583 = vst.msk [vmem:[#allocation3] sm:$0xff] %vm1234_vm6, %v4574_v51  ;;  %v6206_v51 = vld [vmem:[%s9010_s16 + $0x168] sm:$0xff] }
0x1d94   : > { %v6876_v6 = vpop.f32.mrf.mxu1 }
0x1d95   : > { %v4762_v55 = vadd.f32 %v6876_v6, %v6147_v61  ;;  %v6204_v6 = vld [vmem:[%s9010_s16 + $0x158] sm:$0xff] }
0x1d96   : > { %v4756_v41 = vpop.f32.mrf.mxu1 }
0x1d97   : > { %v4757_v5 = vadd.f32 %v6147_v61, %v4756_v41  ;;  %6892 = vmatprep.subr.msk.mxu1 %vm1234_vm6, %v4762_v55  ;;  %v6205_v61 = vld [vmem:[%s9010_s16 + $0x160] sm:$0xff]  ;;  %v6202_v41 = vld [vmem:[%s9010_s16 + $0x148] sm:$0xff] }
0x1d98   : > { %6893 = vmatpush3.xpose.msk.msra.mxu1 %vm1234_vm6, %v4762_v55  ;;  %v6203_v55 = vld [vmem:[%s9010_s16 + $0x150] sm:$0xff] }
0x1d99   : > { %6894 = vmatprep.subr.msk.mxu1 %vm1234_vm6, %v4757_v5 }
0x1d9c   : > { %6895 = vmatpush3.xpose.msk.msra.mxu1 %vm1234_vm6, %v4757_v5  ;;  %v6192_v5 = vld [vmem:[%s9009_s15 + $0x118] sm:$0xff] }
0x1d9d   : > { %6906 = vmatprep.subr.mxu1 %v6172_v24 }
0x1d9f   : > { %6897 = vmatmul.mubr.msk.f32.vlgmr.msra.gmra.mxu1 %vm1234_vm6, %v8558_v60 }
0x1da0   : > { %6907 = vmatpush3.msra.mxu1 %v6172_v24 }
0x1da1   : > { %6908 = vmatprep.subr.mxu1 %v6171_v28 }
0x1da2   : > { %6909 = vmatpush3.msra.mxu1 %v6171_v28 }
0x1da3   : > { %6910 = vmatprep.subr.mxu1 %v6170_v37 }
0x1da4   : > { %6911 = vmatpush3.msra.mxu1 %v6170_v37 }
0x1da5   : > { %6912 = vmatprep.subr.mxu1 %v6169_v29 }
0x1da6   : > { %6913 = vmatpush3.msra.mxu1 %v6169_v29 }
0x1da7   : > { %6914 = vmatprep.subr.mxu1 %v6168_v39 }
0x1da8   : > { %6915 = vmatpush3.msra.mxu1 %v6168_v39 }
0x1da9   : > { %6916 = vmatprep.subr.mxu1 %v6167_v43 }
0x1daa   : > { %6917 = vmatpush3.msra.mxu1 %v6167_v43 }
0x1dab   : > { %5341 = vmatprep.subr.mxu1 %v6192_v5  ;;  %v6233_v5 = vld [vmem:[%s9012_s18 + $0x218] sm:$0xff] }
0x1e5f   : > { %v6898_v40 = vpop.f32.mrf.mxu1 }
0x1e60   : > { %v4943_v59 = vmul.f32 0.20412415, %v6898_v40  ;;  %v6201_v40 = vld [vmem:[%s9010_s16 + $0x140] sm:$0xff] }
0x1e61   : > { %v4933_v62 = vpop.f32.mrf.mxu1 }
0x1e62   : > { %v4942_v21 = vmul.f32 0.20412415, %v4933_v62  ;;  %v4947_v3 = vsel %vm1328_vm8, %v4943_v59, -inf  ;;  %v6200_v62 = vld [vmem:[%s9010_s16 + $0x138] sm:$0xff] }
0x1e63   : > { %4948 = vmax.xlane.f32.xlu1 %v4947_v3  ;;  %v6199_v3 = vld [vmem:[%s9010_s16 + $0x130] sm:$0xff] }
0x1e64   : > { %v4944_v7 = vsel %vm1324_vm9, %v4942_v21, -inf }
0x1e65   : > { %4945 = vmax.xlane.f32.xlu0 %v4944_v7  ;;  %v6189_v7 = vld [vmem:[%s9009_s15 + $0x100] sm:$0xff] }
0x1eec   : > { %v4949_v26 = vpop.xlane.xlu1 %4948 }
0x1eed   : > { %v4951_v2 = vsub.f32 %v4943_v59, %v4949_v26  ;;  %v6191_v59 = vld [vmem:[%s9009_s15 + $0x110] sm:$0xff]  ;;  %v6198_v26 = vld [vmem:[%s9010_s16 + $0x128] sm:$0xff] }
0x1eee   : > { %v4946_v25 = vpop.xlane.xlu0 %4945 }
0x1eef   : > { %v4954_v18 = vmul.f32 1.442695, %v4951_v2  ;;  %v4950_v10 = vsub.f32 %v4942_v21, %v4946_v25  ;;  %v6190_v21 = vld [vmem:[%s9009_s15 + $0x108] sm:$0xff]  ;;  %v6188_v2 = vld [vmem:[%s9009_s15 + $0xf8] sm:$0xff]  ;;  %v6197_v25 = vld [vmem:[%s9010_s16 + $0x120] sm:$0xff] }
0x1ef1   : > { %7070 = vpow2.f32 %v4954_v18  ;;  %v4952_v11 = vmul.f32 1.442695, %v4950_v10  ;;  %v6187_v18 = vld [vmem:[%s9009_s15 + $0xf0] sm:$0xff]  ;;  %v6196_v10 = vld [vmem:[%s9010_s16 + $0x118] sm:$0xff] }
0x1ef3   : > { %7072 = vpow2.f32 %v4952_v11  ;;  %v6186_v11 = vld [vmem:[%s9009_s15 + $0xe8] sm:$0xff] }
0x1efe   : > { %v7071_v14 = vpop.eup %7070 }
0x1eff   : > { %v4959_v60 = vsel %vm1328_vm8, %v7071_v14, 0.0 }
0x1f00   : > { %v7073_v9 = vpop.eup %7072  ;;  %4960 = vadd.xlane.f32.xlu1 %v4959_v60  ;;  %v6185_v60 = vld [vmem:[%s9009_s15 + $0xe0] sm:$0xff] }
0x1f01   : > { %v4956_v15 = vsel %vm1324_vm9, %v7073_v9, 0.0 }
0x1f02   : > { %4957 = vadd.xlane.f32.xlu0 %v4956_v15  ;;  %v6184_v15 = vld [vmem:[%s9009_s15 + $0xd8] sm:$0xff] }
0x1f89   : > { %v4961_v16 = vpop.xlane.xlu1 %4960 }
0x1f8a   : > { %7074 = vrcp.f32 %v4961_v16  ;;  %v6193_v16 = vld [vmem:[%s9010_s16 + $0x100] sm:$0xff] }
0x1f8b   : > { %v4958_v4 = vpop.xlane.xlu0 %4957 }
0x1f8c   : > { %7076 = vrcp.f32 %v4958_v4  ;;  %v6183_v4 = vld [vmem:[%s9009_s15 + $0xd0] sm:$0xff] }
0x1f97   : > { %v7075_v13 = vpop.eup %7074 }
0x1f98   : > { %v4965_v22 = vmul.f32 %v7075_v13, %v7071_v14  ;;  %v6195_v14 = vld [vmem:[%s9010_s16 + $0x110] sm:$0xff]  ;;  %v6182_v13 = vld [vmem:[%s9009_s15 + $0xc8] sm:$0xff] }
0x1f99   : > { %v7077_v38 = vpop.eup %7076 }
0x1f9a   : > { %v4964_v19 = vmul.f32 %v7077_v38, %v7073_v9  ;;  %v6194_v9 = vld [vmem:[%s9010_s16 + $0x108] sm:$0xff]  ;;  %v6181_v38 = vld [vmem:[%s9009_s15 + $0xc0] sm:$0xff] }
0x1f9c   : > { %6903 = vmatprep.mubr.msk.f32.mxu0 %vm1324_vm9, %v4964_v19  ;;  %v7100_v19 = vld [vmem:[%s7749_s27] sm:$0xff] }
0x1f9d   : > { %6904 = vmatmul.mubr.msk.f32.vlgmr.msra.gmra.mxu0 %vm1324_vm9, %v4965_v22  ;;  %v7101_v22 = vld [vmem:[%s7749_s27 + $0x8] sm:$0x3]  ;;  %s5734_s27 = scalar_lea.sflag [#allocation5], %s713_s30 }
0x1f9e   : > { %5302 = vmatprep.mubr.f32.mxu0 %v7164_v1  ;;  %5255 = vmatpush1.msra.mxu0 %v6207_v12  ;;  %v6215_v12 = vld [vmem:[%s9012_s18 + $0x188] sm:$0xff] }
0x1f9f   : > { %5256 = vmatprep.subr.mxu0 %v6206_v51  ;;  %v6214_v51 = vld [vmem:[%s9012_s18 + $0x180] sm:$0xff] }
0x1fa0   : > { %5257 = vmatpush1.msra.mxu0 %v6205_v61  ;;  %v6237_v61 = vld [vmem:[%s9012_s18 + $0x238] sm:$0xff] }
0x1fa1   : > { %5258 = vmatprep.subr.mxu0 %v6204_v6  ;;  %v6236_v6 = vld [vmem:[%s9012_s18 + $0x230] sm:$0xff] }
0x1fa2   : > { %5259 = vmatpush1.msra.mxu0 %v6203_v55  ;;  %v6235_v55 = vld [vmem:[%s9012_s18 + $0x228] sm:$0xff] }
0x1fa3   : > { %5260 = vmatprep.subr.mxu0 %v6202_v41  ;;  %v6234_v41 = vld [vmem:[%s9012_s18 + $0x220] sm:$0xff] }
0x1fa4   : > { %5261 = vmatpush1.msra.mxu0 %v6201_v40  ;;  %v6232_v40 = vld [vmem:[%s9012_s18 + $0x210] sm:$0xff] }
0x1fa5   : > { %5262 = vmatprep.subr.mxu0 %v6200_v62  ;;  %v6230_v62 = vld [vmem:[%s9012_s18 + $0x200] sm:$0xff] }
0x1fa6   : > { %5263 = vmatpush1.msra.mxu0 %v6199_v3  ;;  %v6213_v3 = vld [vmem:[%s9011_s17 + $0x4] sm:$0x3] }
0x1fa7   : > { %5264 = vmatprep.subr.mxu0 %v6198_v26  ;;  %v5404_v26 = vrot.slane %v6213_v3, %v7869_v23 }
0x1fa8   : > { %5265 = vmatpush1.msra.mxu0 %v6197_v25 }
0x1fa9   : > { %5266 = vmatprep.subr.mxu0 %v6196_v10 }
0x1faa   : > { %5267 = vmatpush1.msra.mxu0 %v6195_v14 }
0x1fab   : > { %5268 = vmatprep.subr.mxu0 %v6194_v9 }
0x1fac   : > { %5269 = vmatpush1.msra.mxu0 %v6193_v16 }
0x1fad   : > { %6209 = vmatmul.mubr.msk.f32.vlgmr.msra.gmra.mxu0 %vm752_vm2, %v7100_v19  ;;  %5554 = vmatprep.subr.mxu0 %v7164_v1 }
0x1fae   : > { %5308 = vmatprep.mubr.f32.mxu0 %v7164_v1 }
0x1fb1   : > { %6210 = vmatmul.mubr.msk.f32.gmra.mxu0 %vm752_vm2, %v7101_v22 }
0x205d   : > { %v6905_v33 = vpop.f32.mrf.mxu0 }
0x205e   : > { %5054 = vrot.lane.b32.xlu1 %v6905_v33, %s9056_s23 }
0x205f   : > { %v5041_v30 = vpop.f32.mrf.mxu0 }
0x2060   : > { %5052 = vrot.lane.b32.xlu0 %v5041_v30, %s9056_s23  ;;  %s7108_s23 = scalar_lea.vmem %s7107_s3, 128 }
0x2061   : > { %p7110_p1 = scmp.lt.s32.totalorder %s7108_s23, %s7102_s7 }
0x2063   : > { %p7111_p2 = por %p7110_p1, %p7109_p0 }
0x2065   : > { %p7112_p3 = pnand %p7111_p2, %p7105_p13 }
0x20d0   : > { %v5055_v17 = vpop.permute.xlu1 %5054 }
0x20d1   : > { %5059 = vst.msk [vmem:[#allocation3 + $0x8] sm:$0x3] %vm1911_vm11, %v5055_v17 }
0x20d2   : > { %v5053_v34 = vpop.permute.xlu0 %5052 }
0x20d3   : > { %5058 = vst.msk [vmem:[#allocation3] sm:$0xff] %vm1909_vm12, %v5053_v34 }
0x20d8   : > { %v5061_v49 = vld [vmem:[#allocation3 + $0x8] sm:$0x3] }
0x20da   : > { %v5060_v31 = vld [vmem:[#allocation3] sm:$0xff] }
0x20db   : > { %6918 = vmatprep.mubr.msk.f32.mxu1 %vm826_vm3, %v5060_v31  ;;  %v6179_v31 = vld [vmem:[%s9007_s13 + $0x2] ss:$0 sm:$0xff] }
0x20dc   : > { %6919 = vmatmul.mubr.msk.f32.vlgmr.msra.gmra.mxu1 %vm826_vm3, %v5061_v49 }
0x20dd   : > { %5385 = vmatprep.mubr.f32.mxu1 %v7164_v1  ;;  %5342 = vmatpush1.msra.mxu1 %v6191_v59  ;;  %v6231_v59 = vld [vmem:[%s9012_s18 + $0x208] sm:$0xff] }
0x20de   : > { %5343 = vmatprep.subr.mxu1 %v6190_v21  ;;  %v5304_v21 = vpop.f32.mrf.mxu0 }
0x20df   : > { %5344 = vmatpush1.msra.mxu1 %v6189_v7 }
0x20e0   : > { %5345 = vmatprep.subr.mxu1 %v6188_v2  ;;  %v5306_v7 = vpop.f32.mrf.mxu0 }
0x20e1   : > { %5346 = vmatpush1.msra.mxu1 %v6187_v18  ;;  %v5408_v18 = vrot.slane %v6213_v3, %v7874_v27 }
0x20e2   : > { %5347 = vmatprep.subr.mxu1 %v6186_v11  ;;  %v5310_v14 = vpop.f32.mrf.mxu0 }
0x20e3   : > { %5348 = vmatpush1.msra.mxu1 %v6185_v60 }
0x20e4   : > { %5349 = vmatprep.subr.mxu1 %v6184_v15  ;;  %v5312_v19 = vpop.f32.mrf.mxu0 }
0x20e5   : > { %5350 = vmatpush1.msra.mxu1 %v6183_v4 }
0x20e6   : > { %5351 = vmatprep.subr.mxu1 %v6182_v13 }
0x20e7   : > { %5352 = vmatpush1.msra.mxu1 %v6181_v38 }
0x20e8   : > { %6921 = vmatprep.subr.mxu1 %v7164_v1 }
0x219c   : > { %v6920_v32 = vpop.f32.mrf.mxu1 }
0x219d   : > { %v5151_v35 = vadd.f32 %v6920_v32, %v8424_v56  ;;  %v6180_v32 = vld [vmem:[%s9008_s14 + $0x2] ss:$0 sm:$0xff] }
0x219e   : > { %v5141_v54 = vpop.f32.mrf.mxu1 }
0x219f   : > { %v8662_v45 = vadd.f32 %v6176_v50, %v5151_v35  ;;  %v5150_v57 = vadd.f32 %v5141_v54, %v8419_v52 }
0x21a1   : > { %v8665_v42 = vadd.f32 %v6176_v50, %v5150_v57  ;;  %v5169_v20 = vsel %vm919_vm5, %v8662_v45, 0.0  ;;  %v6229_v57 = vld [vmem:[%s9012_s18 + $0x1f8] sm:$0xff] }
0x21a2   : > { %5170 = vadd.xlane.f32.xlu0 %v5169_v20  ;;  %5555 = vmatpush1.msra.mxu0 %v6229_v57  ;;  %v6228_v20 = vld [vmem:[%s9012_s18 + $0x1f0] sm:$0xff] }
0x21a3   : > { %v5166_v63 = vsel %vm826_vm3, %v8665_v42, 0.0  ;;  %5556 = vmatprep.subr.mxu0 %v7164_v1 }
0x21a4   : > { %5167 = vadd.xlane.f32.xlu1 %v5166_v63  ;;  %5557 = vmatpush1.msra.mxu0 %v6228_v20  ;;  %v6227_v63 = vld [vmem:[%s9012_s18 + $0x1e8] sm:$0xff] }
0x21a5   : > { %5558 = vmatprep.subr.mxu0 %v7164_v1 }
0x21a6   : > { %5559 = vmatpush1.msra.mxu0 %v6227_v63 }
0x21a7   : > { %5560 = vmatprep.subr.mxu0 %v7164_v1 }
0x222b   : > { %v5171_v44 = vpop.xlane.xlu0 %5170 }
0x222c   : > { %v5173_v0 = vmul.f32 0.020833334, %v5171_v44  ;;  %v6226_v44 = vld [vmem:[%s9012_s18 + $0x1e0] sm:$0xff] }
0x222d   : > { %v5168_v46 = vpop.xlane.xlu1 %5167  ;;  %5561 = vmatpush1.msra.mxu0 %v6226_v44 }
0x222e   : > { %v8672_v56 = vsub.f32 %v8662_v45, %v5173_v0  ;;  %v5172_v47 = vmul.f32 0.020833334, %v5168_v46  ;;  %5562 = vmatprep.subr.mxu0 %v7164_v1  ;;  %v6225_v0 = vld [vmem:[%s9012_s18 + $0x1d8] sm:$0xff]  ;;  %v6224_v46 = vld [vmem:[%s9012_s18 + $0x1d0] sm:$0xff] }
0x222f   : > { %5563 = vmatpush1.msra.mxu0 %v6225_v0 }
0x2230   : > { %v8675_v58 = vsub.f32 %v8665_v42, %v5172_v47  ;;  %v5177_v52 = vmul.f32 %v8672_v56, %v8672_v56  ;;  %5564 = vmatprep.subr.mxu0 %v7164_v1  ;;  %v6222_v47 = vld [vmem:[%s9012_s18 + $0x1c0] sm:$0xff] }
0x2231   : > { %5565 = vmatpush1.msra.mxu0 %v6224_v46 }
0x2232   : > { %v5181_v8 = vsel %vm919_vm5, %v5177_v52, 0.0  ;;  %v5176_v48 = vmul.f32 %v8675_v58, %v8675_v58  ;;  %5566 = vmatprep.subr.mxu0 %v7164_v1  ;;  %v6220_v52 = vld [vmem:[%s9012_s18 + $0x1b0] sm:$0xff] }
0x2233   : > { %5182 = vadd.xlane.f32.xlu1 %v5181_v8  ;;  %v6219_v8 = vld [vmem:[%s9012_s18 + $0x1a8] sm:$0xff] }
0x2234   : > { %v5178_v36 = vsel %vm826_vm3, %v5176_v48, 0.0  ;;  %v6218_v48 = vld [vmem:[%s9012_s18 + $0x1a0] sm:$0xff] }
0x2235   : > { %5179 = vadd.xlane.f32.xlu0 %v5178_v36  ;;  %v6217_v36 = vld [vmem:[%s9012_s18 + $0x198] sm:$0xff] }
0x22bc   : > { %v5183_v24 = vpop.xlane.xlu1 %5182 }
0x22bd   : > { %v5185_v28 = vmul.f32 0.020833334, %v5183_v24 }
0x22be   : > { %v5180_v37 = vpop.xlane.xlu0 %5179 }
0x22bf   : > { %v5187_v29 = vadd.f32 1e-05, %v5185_v28  ;;  %v5184_v39 = vmul.f32 0.020833334, %v5180_v37 }
0x22c1   : > { %7078 = vrsqrt.f32 %v5187_v29  ;;  %v5186_v43 = vadd.f32 1e-05, %v5184_v39 }
0x22c3   : > { %7080 = vrsqrt.f32 %v5186_v43 }
0x22ce   : > { %v7079_v33 = vpop.eup %7078 }
0x22cf   : > { %v5191_v34 = vmul.f32 %v7079_v33, %v8672_v56  ;;  %v6223_v56 = vld [vmem:[%s9012_s18 + $0x1c8] sm:$0xff] }
0x22d0   : > { %v7081_v30 = vpop.eup %7080  ;;  %5567 = vmatpush1.msra.mxu0 %v6223_v56 }
0x22d1   : > { %v5190_v17 = vmul.f32 %v7081_v30, %v8675_v58  ;;  %v5199_v35 = vmul.f32 %v6179_v31, %v5191_v34  ;;  %5568 = vmatprep.subr.mxu0 %v7164_v1  ;;  %v6221_v58 = vld [vmem:[%s9012_s18 + $0x1b8] sm:$0xff] }
0x22d2   : > { %5569 = vmatpush1.msra.mxu0 %v6222_v47 }
0x22d3   : > { %v5198_v49 = vmul.f32 %v6179_v31, %v5190_v17  ;;  %v5207_v54 = vadd.f32 %v6180_v32, %v5199_v35  ;;  %5570 = vmatprep.subr.mxu0 %v7164_v1 }
0x22d4   : > { %5571 = vmatpush1.msra.mxu0 %v6221_v58 }
0x22d5   : > { %v5206_v50 = vadd.f32 %v6180_v32, %v5198_v49  ;;  %5572 = vmatprep.subr.mxu0 %v7164_v1 }
0x22d6   : > { %5573 = vmatpush1.msra.mxu0 %v6220_v52 }
0x22d7   : > { %6211 = vmatmul.mubr.msk.f32.vlgmr.msra.gmra.mxu1 %vm826_vm3, %v5206_v50  ;;  %5574 = vmatprep.subr.mxu0 %v7164_v1 }
0x22d8   : > { %5391 = vmatprep.mubr.f32.mxu1 %v7164_v1  ;;  %5575 = vmatpush1.msra.mxu0 %v6219_v8 }
0x22d9   : > { %5576 = vmatprep.subr.mxu0 %v7164_v1 }
0x22da   : > { %5577 = vmatpush1.msra.mxu0 %v6218_v48 }
0x22db   : > { %6212 = vmatmul.mubr.msk.f32.gmra.mxu1 %vm826_vm3, %v5207_v54  ;;  %5578 = vmatprep.subr.mxu0 %v7164_v1 }
0x22dc   : > { %6933 = vmatprep.mubr.msk.f32.mxu1 %vm7165_vm0, %v7164_v1  ;;  %5579 = vmatpush1.msra.mxu0 %v6217_v36 }
0x22dd   : > { %5580 = vmatprep.subr.mxu0 %v7164_v1 }
0x22de   : > { %5581 = vmatpush1.msra.mxu0 %v6216_v53 }
0x22df   : > { %5582 = vmatprep.subr.mxu0 %v7164_v1 }
0x22e0   : > { %5583 = vmatpush1.msra.mxu0 %v6215_v12 }
0x22e1   : > { %5584 = vmatprep.subr.mxu0 %v7164_v1 }
0x22e2   : > { %5585 = vmatpush1.msra.mxu0 %v6214_v51 }
0x22e3   : > { %5602 = vmatprep.subr.mxu0 %v7164_v1 }
0x22e4   : > { %5603 = vmatpush2.msra.mxu0 %v6237_v61 }
0x22e5   : > { %5604 = vmatprep.subr.mxu0 %v7164_v1 }
0x22e6   : > { %5605 = vmatpush2.msra.mxu0 %v6236_v6 }
0x22e7   : > { %5606 = vmatprep.subr.mxu0 %v7164_v1 }
0x22e8   : > { %5607 = vmatpush2.msra.mxu0 %v6235_v55 }
0x22e9   : > { %5608 = vmatprep.subr.mxu0 %v7164_v1 }
0x22ea   : > { %5609 = vmatpush2.msra.mxu0 %v6234_v41 }
0x22eb   : > { %5610 = vmatprep.subr.mxu0 %v7164_v1 }
0x22ec   : > { %5611 = vmatpush2.msra.mxu0 %v6233_v5 }
0x22ed   : > { %5612 = vmatprep.subr.mxu0 %v7164_v1 }
0x22ee   : > { %5613 = vmatpush2.msra.mxu0 %v6232_v40 }
0x22ef   : > { %5614 = vmatprep.subr.mxu0 %v7164_v1 }
0x22f0   : > { %5615 = vmatpush2.msra.mxu0 %v6231_v59 }
0x22f1   : > { %5616 = vmatprep.subr.mxu0 %v7164_v1 }
0x22f2   : > { %5617 = vmatpush2.msra.mxu0 %v6230_v62 }
0x2397   : > { %v5387_v2 = vpop.f32.mrf.mxu1 }
0x2398   : > { %v5388_v25 = vadd.f32 %v5387_v2, %v5304_v21 }
0x2399   : > { %v5389_v10 = vpop.f32.mrf.mxu1 }
0x239a   : > { %v8887_v11 = vadd.f32 %v5404_v26, %v5388_v25  ;;  %v5390_v60 = vadd.f32 %v5389_v10, %v5306_v7 }
0x239b   : > { %v5393_v9 = vpop.f32.mrf.mxu1 }
0x239c   : > { %v8890_v15 = vmul.f32 0.70710677, %v8887_v11  ;;  %v8892_v16 = vadd.f32 %v5408_v18, %v5390_v60  ;;  %v5394_v4 = vadd.f32 %v5393_v9, %v5310_v14 }
0x239d   : > { %v5395_v13 = vpop.f32.mrf.mxu1 }
0x239e   : > { %v5423_v38 = vand.u32 2147483647, %v8890_v15  ;;  %v8896_v23 = vmul.f32 0.70710677, %v8892_v16  ;;  %v8898_v27 = vadd.f32 %v5404_v26, %v5394_v4  ;;  %v5396_v22 = vadd.f32 %v5395_v13, %v5312_v19 }
0x239f   : > { %vm5503_vm0 = vcmp.ge.f32.partialorder %v8890_v15, 0.0  ;;  %v5415_v15 = vmul.f32 0.5, %v8887_v11  ;;  %v5646_v11 = vld [vmem:[%s9014_s20 + $0x28] sm:$0xff] }
0x23a0   : > { %v5427_v24 = vmul.f32 0.3275911, %v5423_v38  ;;  %v5424_v28 = vand.u32 2147483647, %v8896_v23  ;;  %v8902_v37 = vmul.f32 0.70710677, %v8898_v27  ;;  %v8904_v29 = vadd.f32 %v5408_v18, %v5396_v22  ;;  %6922 = vmatpush3.msra.mxu1 %v5646_v11 }
0x23a1   : > { %v5479_v35 = vsub.f32 0.0, %v5423_v38  ;;  %vm5504_vm5 = vcmp.ge.f32.partialorder %v8896_v23, 0.0  ;;  %6923 = vmatprep.subr.mxu1 %v7164_v1 }
0x23a2   : > { %v5431_v39 = vadd.f32 1.0, %v5427_v24  ;;  %v5428_v43 = vmul.f32 0.3275911, %v5424_v28  ;;  %v5425_v33 = vand.u32 2147483647, %v8902_v37  ;;  %v5480_v54 = vsub.f32 0.0, %v5424_v28 }
0x23a3   : > { %v8908_v30 = vmul.f32 0.70710677, %v8904_v29  ;;  %v5483_v57 = vmul.f32 %v5479_v35, %v5423_v38  ;;  %vm5505_vm6 = vcmp.ge.f32.partialorder %v8902_v37, 0.0 }
0x23a4   : > { %7082 = vrcp.f32 %v5431_v39  ;;  %v5432_v17 = vadd.f32 1.0, %v5428_v43  ;;  %v5429_v34 = vmul.f32 0.3275911, %v5425_v33  ;;  %v5481_v20 = vsub.f32 0.0, %v5425_v33 }
0x23a5   : > { %v5426_v31 = vand.u32 2147483647, %v8908_v30  ;;  %v5484_v44 = vmul.f32 %v5480_v54, %v5424_v28  ;;  %v5487_v46 = vmul.f32 1.442695, %v5483_v57  ;;  %vm5506_vm8 = vcmp.ge.f32.partialorder %v8908_v30, 0.0  ;;  %v5643_v30 = vld [vmem:[%s9014_s20 + $0x10] sm:$0xff] }
0x23a6   : > { %7084 = vrcp.f32 %v5432_v17  ;;  %v5433_v49 = vadd.f32 1.0, %v5429_v34  ;;  %v5485_v47 = vmul.f32 %v5481_v20, %v5425_v33 }
0x23a7   : > { %v5430_v32 = vmul.f32 0.3275911, %v5426_v31  ;;  %v5482_v56 = vsub.f32 0.0, %v5426_v31  ;;  %v5489_v48 = vmul.f32 1.442695, %v5484_v44 }
0x23a8   : > { %7086 = vrcp.f32 %v5433_v49  ;;  %v5491_v61 = vmul.f32 1.442695, %v5485_v47 }
0x23a9   : > { %v5434_v50 = vadd.f32 1.0, %v5430_v32  ;;  %v5486_v12 = vmul.f32 %v5482_v56, %v5426_v31 }
0x23ab   : > { %7088 = vrcp.f32 %v5434_v50  ;;  %v5493_v21 = vmul.f32 1.442695, %v5486_v12 }
0x23ac   : > { %7090 = vpow2.f32 %v5487_v46 }
0x23ad   : > { %7092 = vpow2.f32 %v5489_v48 }
0x23ae   : > { %7094 = vpow2.f32 %v5491_v61 }
0x23af   : > { %7096 = vpow2.f32 %v5493_v21 }
0x23b1   : > { %v7083_v63 = vpop.eup %7082 }
0x23b2   : > { %v5443_v0 = vmul.f32 1.0614054, %v7083_v63 }
0x23b3   : > { %v7085_v58 = vpop.eup %7084 }
0x23b4   : > { %v5447_v52 = vadd.f32 -1.4531521, %v5443_v0  ;;  %v5444_v8 = vmul.f32 1.0614054, %v7085_v58 }
0x23b5   : > { %v7087_v36 = vpop.eup %7086 }
0x23b6   : > { %v5451_v53 = vmul.f32 %v7083_v63, %v5447_v52  ;;  %v5448_v51 = vadd.f32 -1.4531521, %v5444_v8  ;;  %v5445_v6 = vmul.f32 1.0614054, %v7087_v36 }
0x23b8   : > { %v5455_v55 = vadd.f32 1.4214138, %v5451_v53  ;;  %v7089_v41 = vpop.eup %7088  ;;  %v5452_v5 = vmul.f32 %v7085_v58, %v5448_v51  ;;  %v5449_v40 = vadd.f32 -1.4531521, %v5445_v6 }
0x23b9   : > { %v5446_v62 = vmul.f32 1.0614054, %v7089_v41  ;;  %v7091_v28 = vpop.eup %7090 }
0x23ba   : > { %v5459_v59 = vmul.f32 %v7083_v63, %v5455_v55  ;;  %v5456_v3 = vadd.f32 1.4214138, %v5452_v5  ;;  %v5453_v7 = vmul.f32 %v7087_v36, %v5449_v40  ;;  %v7093_v49 = vpop.eup %7092 }
0x23bb   : > { %v5450_v2 = vadd.f32 -1.4531521, %v5446_v62  ;;  %v7095_v57 = vpop.eup %7094 }
0x23bc   : > { %v5463_v26 = vadd.f32 -0.28449672, %v5459_v59  ;;  %v5460_v25 = vmul.f32 %v7085_v58, %v5456_v3  ;;  %v5457_v18 = vadd.f32 1.4214138, %v5453_v7  ;;  %v7097_v47 = vpop.eup %7096  ;;  %v5418_v59 = vmul.f32 0.5, %v8904_v29  ;;  %v5645_v29 = vld [vmem:[%s9014_s20 + $0x20] sm:$0xff] }
0x23bd   : > { %v5454_v14 = vmul.f32 %v7089_v41, %v5450_v2  ;;  %6924 = vmatpush3.msra.mxu1 %v5645_v29  ;;  %v5642_v3 = vld [vmem:[%s9014_s20 + $0x8] sm:$0xff]  ;;  %v5641_v7 = vld [vmem:[%s9014_s20] sm:$0xff] }
0x23be   : > { %v5467_v10 = vmul.f32 %v7083_v63, %v5463_v26  ;;  %v5464_v60 = vadd.f32 -0.28449672, %v5460_v25  ;;  %v5461_v9 = vmul.f32 %v7087_v36, %v5457_v18  ;;  %6925 = vmatprep.subr.mxu1 %v7164_v1  ;;  %v6241_v18 = vld [vmem:[%s9013_s19 + $0x2] ss:$0 sm:$0xff] }
0x23bf   : > { %v5458_v13 = vadd.f32 1.4214138, %v5454_v14 }
0x23c0   : > { %v5471_v4 = vadd.f32 0.2548296, %v5467_v10  ;;  %v5468_v38 = vmul.f32 %v7085_v58, %v5464_v60  ;;  %v5465_v19 = vadd.f32 -0.28449672, %v5461_v9 }
0x23c1   : > { %v5462_v24 = vmul.f32 %v7089_v41, %v5458_v13 }
0x23c2   : > { %v5475_v22 = vmul.f32 %v7083_v63, %v5471_v4  ;;  %v5472_v39 = vadd.f32 0.2548296, %v5468_v38  ;;  %v5469_v43 = vmul.f32 %v7087_v36, %v5465_v19 }
0x23c3   : > { %v5466_v17 = vadd.f32 -0.28449672, %v5462_v24 }
0x23c4   : > { %v5495_v33 = vmul.f32 %v7091_v28, %v5475_v22  ;;  %v5476_v34 = vmul.f32 %v7085_v58, %v5472_v39  ;;  %v5473_v31 = vadd.f32 0.2548296, %v5469_v43 }
0x23c5   : > { %v5470_v50 = vmul.f32 %v7089_v41, %v5466_v17 }
0x23c6   : > { %v5499_v32 = vsub.f32 1.0, %v5495_v33  ;;  %v5496_v35 = vmul.f32 %v7093_v49, %v5476_v34  ;;  %v5477_v54 = vmul.f32 %v7087_v36, %v5473_v31  ;;  %v5416_v36 = vmul.f32 0.5, %v8892_v16 }
0x23c7   : > { %v5474_v44 = vadd.f32 0.2548296, %v5470_v50  ;;  %v5417_v16 = vmul.f32 0.5, %v8898_v27  ;;  %v5644_v27 = vld [vmem:[%s9014_s20 + $0x18] sm:$0xff] }
0x23c8   : > { %v5507_v20 = vsub.f32 0.0, %v5499_v32  ;;  %v5500_v0 = vsub.f32 1.0, %v5496_v35  ;;  %v5497_v63 = vmul.f32 %v7095_v57, %v5477_v54  ;;  %6926 = vmatpush3.msra.mxu1 %v5644_v27 }
0x23c9   : > { %v5478_v56 = vmul.f32 %v7089_v41, %v5474_v44  ;;  %6927 = vmatprep.subr.mxu1 %v7164_v1 }
0x23ca   : > { %v5511_v46 = vsel %vm5503_vm0, %v5499_v32, %v5507_v20  ;;  %v5508_v52 = vsub.f32 0.0, %v5500_v0  ;;  %v5501_v8 = vsub.f32 1.0, %v5497_v63  ;;  %6928 = vmatpush3.msra.mxu1 %v5643_v30 }
0x23cb   : > { %v5498_v58 = vmul.f32 %v7097_v47, %v5478_v56  ;;  %v5515_v48 = vadd.f32 1.0, %v5511_v46  ;;  %6929 = vmatprep.subr.mxu1 %v7164_v1 }
0x23cc   : > { %v5512_v53 = vsel %vm5504_vm5, %v5500_v0, %v5508_v52  ;;  %v5509_v12 = vsub.f32 0.0, %v5501_v8  ;;  %6930 = vmatpush3.msra.mxu1 %v5642_v3 }
0x23cd   : > { %v5516_v51 = vadd.f32 1.0, %v5512_v53  ;;  %v5502_v61 = vsub.f32 1.0, %v5498_v58  ;;  %v5519_v5 = vmul.f32 %v5515_v48, %v5415_v15  ;;  %6931 = vmatprep.subr.mxu1 %v7164_v1 }
0x23ce   : > { %v5513_v6 = vsel %vm5505_vm6, %v5501_v8, %v5509_v12  ;;  %6932 = vmatpush3.msra.mxu1 %v5641_v7 }
0x23cf   : > { %v5520_v55 = vmul.f32 %v5516_v51, %v5416_v36  ;;  %v5510_v41 = vsub.f32 0.0, %v5502_v61  ;;  %v5517_v23 = vadd.f32 1.0, %v5513_v6 }
0x23d1   : > { %v5514_v40 = vsel %vm5506_vm8, %v5502_v61, %v5510_v41  ;;  %6238 = vmatprep.mubr.msk.f32.mxu0 %vm752_vm2, %v5520_v55  ;;  %v5521_v21 = vmul.f32 %v5517_v23, %v5417_v16 }
0x23d2   : > { %v5518_v62 = vadd.f32 1.0, %v5514_v40  ;;  %5619 = vmatmul.mubr.f32.vlgmr.msra.gmra.mxu0 %v5519_v5 }
0x23d4   : > { %v5522_v37 = vmul.f32 %v5518_v62, %v5418_v59 }
0x23d6   : > { %6239 = vmatprep.mubr.msk.f32.mxu0 %vm752_vm2, %v5522_v37  ;;  %vm5731_vm2 = vcmask 519168  }
0x23d7   : > { %5624 = vmatmul.mubr.f32.gmra.mxu0 %v5521_v21 }
0x2492   : > { %v5620_v26 = vpop.f32.mrf.mxu0 }
0x2493   : > { %v5629_v2 = vadd.f32 %v5620_v26, %v8665_v42  ;;  %v6242_v42 = vld [vmem:[%s9015_s21] ss:$0 sm:$0xff] }
0x2494   : > { %v5622_v25 = vpop.f32.mrf.mxu0 }
0x2495   : > { %v5639_v14 = vadd.f32 %v6241_v18, %v5629_v2 }
0x2497   : > { %v5625_v10 = vpop.f32.mrf.mxu0  ;;  %v5656_v4 = vrot.slane %v5639_v14, 6 }
0x2498   : > { %v5630_v60 = vadd.f32 %v5625_v10, %v8662_v45 }
0x2499   : > { %v5627_v1 = vpop.f32.mrf.mxu0 }
0x249a   : > { %v5640_v9 = vadd.f32 %v6241_v18, %v5630_v60 }
0x249c   : > { %v5657_v13 = vrot.slane %v5640_v9, 6 }
0x249e   : > { %v5658_v38 = vsel %vm1354_vm7, %v5656_v4, %v5657_v13 }
0x249f   : > { %6934 = vmatmul.mubr.msk.f32.vlgmr.msra.gmra.mxu1 %vm826_vm3, %v5658_v38 }
0x255f   : > { %v5727_v19 = vpop.f32.mrf.mxu1 }
0x2560   : > { %v5728_v45 = vadd.f32 %v6242_v42, %v5727_v19 }
0x2561   : > { %v6935_v22 = vpop.f32.mrf.mxu1 }
0x2562   : > { %5732 = vst.msk [vmem:[%s715_s2] sm:$0xf] %vm5731_vm2, %v5728_v45 }
0x2563   : > { %7115 = shalt.err (!%p7112_p3)
}
0x2564   : > { %s7116_s5 = scalar_lea.hbm %s8959_s22, 64  ;;  %s7120_s2 = scalar_lea.hbm %s9058_s24, 128 }
0x2565   : > { %p7117_p4 = scmp.ne.s32.totalorder %s8959_s22, %s7116_s5  ;;  %p7121_p9 = scmp.lt.s32.totalorder %s8959_s22, %s9058_s24 }
0x2566   : > { %p7122_p10 = scmp.lt.s32.totalorder %s7120_s2, %s7116_s5 }
0x2567   : > { %p7118_p7 = pnand %p7117_p4, %p7321_p5 }
0x2568   : > { %p7123_p11 = por %p7122_p10, %p7121_p9 }
0x2569   : > { %p7119_p8 = pneg %p7118_p7 }
0x256b   : > { %p7124_p12 = pnand %p7123_p11, %p7119_p8 }
0x256d   : > { %7127 = shalt.err (!%p7124_p12)
}
0x256e   : > { %6936 = dma.vmem_to_hbm [thread:$0]  (%p7321_p5), %s5748_s1, 64, %s8959_s22, %s5734_s27  }
0x256f PF: > { %s9059_s7 = sld [smem:[#allocation9_spill]] }
0x2570   : > { %s9060_s29 = sld [smem:[#allocation7_spill]] }
0x2575   : > { %p6942_p13 = scmp.ge.s32.totalorder %s9059_s7, 2 }
0x2576   : > { %s5759_s3 = sand.u32 1, %s9060_s29  }
0x2577   : > { %p6939_p0 = pnand %p6942_p13, %p7325_p6  ;;  %s5760_s23 = scalar_lea.sflag [#allocation5], %s5759_s3 }
0x2579   : > { %p6940_p1 = pneg %p6939_p0 }
0x257b   : > { %7145 = dma.done.wait (%p6940_p1), %s5760_s23, 64  }
0x257c   : > { %7147 = vsyncadd (%p6940_p1), %s5760_s23, 4294967232  ;;  %s9062_s30 = sld [smem:[#allocation10_spill]]  ;;  %s9065_s3 = smov %s7154_s28 }
0x257d   : > { %s9063_s5 = sld [smem:[#allocation8_spill]] }
0x257e   : > { %s9064_s29 = sld [smem:[#allocation11_spill]] }
0x2582   : > { %p32_p2 = scmp.ge.s32.totalorder %s9062_s30, 4  }
0x2583   : > { %s9066_s28 = smov %s9063_s5 }
0x2584   :  { %34 = sbr.rel (!%p32_p2) target bundleno = 13 (0xd), region = 208 }
0x2589   :  { %5765 = vsyncpa [#allocation5], 1 }
0x258a   :  { %5767 = vsyncpa [#allocation5 + $0x1], 1 }

</bundles_post_ra>
